<compile_context>
chip_gen: v7x
topology: tpu7x:2x2x1
jax: 0.10.0
libtpu: 0.0.40
codegen_flags: <defaults>
</compile_context>

<pallas_src>
import functools

import jax
import jax.numpy as jnp
import numpy as np
from jax import lax
from jax.experimental import pallas as pl
from jax.experimental.pallas import tpu as pltpu

_VMEM_CAP = 48 * 1024 * 1024          # stay well under v7x's 64 MiB / TensorCore


# ----------------------------------------------------------------------------
# small helpers
# ----------------------------------------------------------------------------
def _cparams(workset_bytes):
    """Compiler params with a VMEM limit tied to the per-tile working set."""
    limit = int(min(max(2 * int(workset_bytes), 32 * 1024 * 1024), _VMEM_CAP))
    return pltpu.CompilerParams(dimension_semantics=("parallel",),
                                vmem_limit_bytes=limit)


def _nbytes(arrays):
    return sum(int(np.prod(a.shape)) * a.dtype.itemsize for a in arrays)


def _full_spec(shape):
    """BlockSpec covering a whole (small) array, constant across the grid."""
    nd = len(shape)
    return pl.BlockSpec(tuple(shape), lambda i, _nd=nd: (0,) * _nd)


def _pick_tile(m, ceiling=1024):
    """Largest M-tile (<= ceiling) that still gives >=2 grid steps (megacore)."""
    for t in (1024, 512, 256, 128, 64, 32, 16, 8):
        if t <= ceiling and m % t == 0 and m // t >= 2:
            return t
    return m


# ----------------------------------------------------------------------------
# in-kernel building blocks
# ----------------------------------------------------------------------------
def _row_shift(x, s):
    """y[r] = x[(r + s) % M] via the XLU sublane rotate; wrapped rows that are
    not valid neighbours are zeroed by the caller's mask."""
    m = x.shape[0]
    k = (-s) % m
    if k == 0:
        return x
    return pltpu.roll(x, k, 0)


def _edge_masks(m, h, w):
    """Elementary boundary masks for one image's (h*w) row-flattened tile,
    built in-kernel from iota (no HBM/VMEM mask tensor)."""
    r = lax.broadcasted_iota(jnp.int32, (m, 1), 0)        # flat row index (i*w + j)
    if w & (w - 1) == 0:                                  # demo widths are powers of two
        col = jnp.bitwise_and(r, w - 1)
    else:
        col = r % w

    def as_f32(c):
        return jnp.where(c, jnp.float32(1.0), jnp.float32(0.0))

    return {"row_lo": as_f32(r >= w),                     # i >= 1
            "row_hi": as_f32(r < (h - 1) * w),            # i <= h-2
            "col_lo": as_f32(col >= 1),                   # j >= 1
            "col_hi": as_f32(col < (w - 1))}              # j <= w-2


def _combine(parts):
    msk = None
    for p in parts:
        msk = p if msk is None else msk * p
    return msk


def _s1_tap_masks(edge):
    masks = []
    for di in range(3):
        for dj in range(3):
            parts = []
            if di == 0:
                parts.append(edge["row_lo"])
            if di == 2:
                parts.append(edge["row_hi"])
            if dj == 0:
                parts.append(edge["col_lo"])
            if dj == 2:
                parts.append(edge["col_hi"])
            masks.append(_combine(parts))
    return masks


def _s2_tap_masks(edge):
    # stride-2 with even H, W: only the "minus"-side taps can fall off the image.
    masks = []
    for di in range(3):
        for dj in range(3):
            parts = []
            if di == 0:
                parts.append(edge["row_lo"])
            if dj == 0:
                parts.append(edge["col_lo"])
            masks.append(_combine(parts))
    return masks


def _conv3x3_s1(x_f32, w_ref, b_ref, tap_masks, *, width):
    """Implicit-GEMM 3x3 / stride-1 / 'same' conv on one image's flattened tile.

    x_f32 : (M, Cin) f32, rows (i, j) row-major, M = H*W (exactly one image).
    w_ref : (9, Cin, Cout) bf16 ref (BN scale folded in).
    b_ref : (1, Cout) f32 ref (folded BN shift).
    The 9 taps are row-shifted views (pltpu.roll), boundary rows masked, then
    bf16 MXU matmuls accumulating in f32 — no im2col ever exists in HBM.
    """
    m = x_f32.shape[0]
    cout = w_ref.shape[-1]
    acc = jnp.zeros((m, cout), jnp.float32)
    for di in range(3):
        for dj in range(3):
            t = di * 3 + dj
            xs = _row_shift(x_f32, (di - 1) * width + (dj - 1))
            if tap_masks[t] is not None:
                xs = xs * tap_masks[t]
            acc = acc + jnp.dot(xs.astype(jnp.bfloat16), w_ref[t],
                                preferred_element_type=jnp.float32)
    return acc + b_ref[...]


def _conv3x3_s2(parity_f32, w_ref, b_ref, tap_masks, *, width_out):
    """3x3 / stride-2 / 'same' conv from four parity-subsampled grids
    (x_pq[io, jo] = x[2*io + p, 2*jo + q]); requires even input H and W.
    Avoids the 2.25x HBM im2col tensor and any redundant full-res compute."""
    xee, xeo, xoe, xoo = parity_f32
    grid_of = {("e", "e"): xee, ("e", "o"): xeo, ("o", "e"): xoe, ("o", "o"): xoo}
    m = xee.shape[0]
    cout = w_ref.shape[-1]
    acc = jnp.zeros((m, cout), jnp.float32)
    for di in range(3):
        for dj in range(3):
            t = di * 3 + dj
            pr = "e" if di == 1 else "o"       # input row 2*io+di-1 parity
            pc = "e" if dj == 1 else "o"
            ai = -1 if di == 0 else 0          # index offset in the parity grid
            aj = -1 if dj == 0 else 0
            xs = _row_shift(grid_of[(pr, pc)], ai * width_out + aj)
            if tap_masks[t] is not None:
                xs = xs * tap_masks[t]
            acc = acc + jnp.dot(xs.astype(jnp.bfloat16), w_ref[t],
                                preferred_element_type=jnp.float32)
    return acc + b_ref[...]


def _identity_block(x_f32, w1_ref, b1_ref, w2_ref, b2_ref, tap_masks, *, width):
    """relu(conv2(relu(conv1(x))) + x); intermediates stay in VMEM / vregs."""
    r = jnp.maximum(_conv3x3_s1(x_f32, w1_ref, b1_ref, tap_masks, width=width), 0.0)
    y = _conv3x3_s1(r, w2_ref, b2_ref, tap_masks, width=width)
    return jnp.maximum(y + x_f32, 0.0)


# ----------------------------------------------------------------------------
# Pallas kernels
# ----------------------------------------------------------------------------
def _stem_kernel(p_ref, w_ref, b_ref, o_ref):
    """conv1 (3x3/s1, BN folded) + ReLU as one im2col matmul tile (bf16 MXU)."""
    y = jnp.dot(p_ref[...], w_ref[...], preferred_element_type=jnp.float32)
    o_ref[...] = jnp.maximum(y + b_ref[...], 0.0).astype(o_ref.dtype)


def _identity_stage_kernel(x_ref, *refs, height, width, n_blocks):
    """n_blocks identity-shortcut BasicBlocks fused into ONE pallas_call.
    One grid step = one image; activations never leave VMEM between blocks."""
    o_ref = refs[-1]
    wr = refs[:-1]
    edge = _edge_masks(x_ref.shape[0], height, width)
    tmask = _s1_tap_masks(edge)
    y = x_ref[...].astype(jnp.float32)
    for b in range(n_blocks):
        w1, b1, w2, b2 = wr[4 * b: 4 * b + 4]
        y = _identity_block(y, w1, b1, w2, b2, tmask, width=width)
    o_ref[...] = y.astype(o_ref.dtype)


def _down_stage_kernel(xee_ref, xeo_ref, xoe_ref, xoo_ref, *refs,
                       height, width, n_id_blocks):
    """Stride-2 conv-shortcut BasicBlock + trailing identity blocks, fused
    into ONE pallas_call; one grid step = one image."""
    o_ref = refs[-1]
    w1, b1, wsc, bsc, w2, b2 = refs[:6]
    idw = refs[6:-1]
    m = xee_ref.shape[0]
    edge = _edge_masks(m, height, width)
    tmask_s1 = _s1_tap_masks(edge)
    tmask_s2 = _s2_tap_masks(edge)

    parity = (xee_ref[...].astype(jnp.float32), xeo_ref[...].astype(jnp.float32),
              xoe_ref[...].astype(jnp.float32), xoo_ref[...].astype(jnp.float32))
    r = jnp.maximum(_conv3x3_s2(parity, w1, b1, tmask_s2, width_out=width), 0.0)
    # 1x1 stride-2 shortcut: x[2*io, 2*jo] is exactly the even/even parity grid.
    sc = jnp.dot(xee_ref[...], wsc[...], preferred_element_type=jnp.float32) + bsc[...]
    y = _conv3x3_s1(r, w2, b2, tmask_s1, width=width)
    y = jnp.maximum(y + sc, 0.0)

    for b in range(n_id_blocks):
        iw1, ib1, iw2, ib2 = idw[4 * b: 4 * b + 4]
        y = _identity_block(y, iw1, ib1, iw2, ib2, tmask_s1, width=width)
    o_ref[...] = y.astype(o_ref.dtype)


# ----------------------------------------------------------------------------
# wrapper glue (pure JAX / XLA)
# ----------------------------------------------------------------------------
def _stem_patches(x_nhwc):
    """NHWC -> (N*H*W, 9*Cin) 'same' 3x3 patches (only used by the tiny stem)."""
    n, h, w, c = x_nhwc.shape
    xp = jnp.pad(x_nhwc, ((0, 0), (1, 1), (1, 1), (0, 0)))
    cols = [xp[:, di:di + h, dj:dj + w, :] for di in range(3) for dj in range(3)]
    return jnp.concatenate(cols, axis=-1).reshape(n * h * w, 9 * c)


def stem_conv(x_nhwc, sp):
    n, h, w, _ = x_nhwc.shape
    p = _stem_patches(x_nhwc).astype(jnp.bfloat16)
    m, k = p.shape
    co = sp["w"].shape[1]
    tm = _pick_tile(m)
    est = 2 * (tm * k * 2 + tm * co * 2) + _nbytes([sp["w"], sp["b"]]) + 2 * tm * co * 4
    out = pl.pallas_call(
        _stem_kernel,
        out_shape=jax.ShapeDtypeStruct((m, co), jnp.bfloat16),
        grid=(m // tm,),
        in_specs=[pl.BlockSpec((tm, k), lambda i: (i, 0)),
                  _full_spec(sp["w"].shape),
                  _full_spec(sp["b"].shape)],
        out_specs=pl.BlockSpec((tm, co), lambda i: (i, 0)),
        compiler_params=_cparams(est),
    )(p, sp["w"], sp["b"])
    return out.reshape(n, h, w, co)


def maxpool_3x3_s2_p1(x_nhwc):
    """nn.MaxPool2d(3, 2, 1) as an XLA maximum-tree over shifted windows."""
    n, h, w, c = x_nhwc.shape
    ho = (h - 1) // 2 + 1
    wo = (w - 1) // 2 + 1
    xp = jnp.pad(x_nhwc, ((0, 0), (1, 1), (1, 1), (0, 0)),
                 constant_values=-jnp.inf)
    out = None
    for di in range(3):
        for dj in range(3):
            win = xp[:, di:di + 2 * (ho - 1) + 1:2, dj:dj + 2 * (wo - 1) + 1:2, :]
            out = win if out is None else jnp.maximum(out, win)
    return out


def _run_identity_stage(x_nhwc, blocks):
    n, h, w, c = x_nhwc.shape
    m = h * w
    flat_w = []
    for bp in blocks:
        flat_w += [bp["w1t"], bp["b1"], bp["w2t"], bp["b2"]]
    est = 4 * m * c * 2 + _nbytes(flat_w) + 8 * m * c * 4
    kern = functools.partial(_identity_stage_kernel, height=h, width=w,
                             n_blocks=len(blocks))
    out = pl.pallas_call(
        kern,
        out_shape=jax.ShapeDtypeStruct((n * m, c), jnp.bfloat16),
        grid=(n,),
        in_specs=[pl.BlockSpec((m, c), lambda i: (i, 0))]
                 + [_full_spec(a.shape) for a in flat_w],
        out_specs=pl.BlockSpec((m, c), lambda i: (i, 0)),
        compiler_params=_cparams(est),
    )(x_nhwc.reshape(n * m, c), *flat_w)
    return out.reshape(n, h, w, c)


def _run_down_stage(x_nhwc, blocks):
    n, h, w, cin = x_nhwc.shape
    assert h % 2 == 0 and w % 2 == 0, "stride-2 stage expects even spatial dims"
    ho, wo = h // 2, w // 2
    mo = ho * wo
    b0 = blocks[0]
    cout = b0["w2t"].shape[-1]
    # Four parity-subsampled grids (same total bytes as x; no 9x im2col tensor).
    parity = [x_nhwc[:, pi::2, pj::2, :].reshape(n * mo, cin)
              for pi in (0, 1) for pj in (0, 1)]                 # ee, eo, oe, oo
    flat_w = [b0["w1t"], b0["b1"], b0["wsc"], b0["bsc"], b0["w2t"], b0["b2"]]
    for bp in blocks[1:]:
        flat_w += [bp["w1t"], bp["b1"], bp["w2t"], bp["b2"]]
    est = (8 * mo * cin * 2 + 2 * mo * cout * 2
           + _nbytes(flat_w) + 10 * mo * cout * 4)
    kern = functools.partial(_down_stage_kernel, height=ho, width=wo,
                             n_id_blocks=len(blocks) - 1)
    out = pl.pallas_call(
        kern,
        out_shape=jax.ShapeDtypeStruct((n * mo, cout), jnp.bfloat16),
        grid=(n,),
        in_specs=[pl.BlockSpec((mo, cin), lambda i: (i, 0)) for _ in range(4)]
                 + [_full_spec(a.shape) for a in flat_w],
        out_specs=pl.BlockSpec((mo, cout), lambda i: (i, 0)),
        compiler_params=_cparams(est),
    )(*parity, *flat_w)
    return out.reshape(n, ho, wo, cout)


def run_stage(x_nhwc, blocks):
    """One fused, image-gridded pallas_call per ResNet stage."""
    if "wsc" in blocks[0]:
        return _run_down_stage(x_nhwc, blocks)
    return _run_identity_stage(x_nhwc, blocks)


# ----------------------------------------------------------------------------
# parameter init (raw, PyTorch-like) and prep (BN folded, bf16, tap layout)
# ----------------------------------------------------------------------------
def _conv_w(key, co, ci, k):
    fan_in = ci * k * k
    return jax.random.normal(key, (co, ci, k, k), jnp.float32) / jnp.sqrt(fan_in)


def _bn_params(key, c):
    k1, k2 = jax.random.split(key)
    return {"gamma": 1.0 + 0.05 * jax.random.normal(k1, (c,), jnp.float32),
            "beta": 0.05 * jax.random.normal(k2, (c,), jnp.float32),
            "mean": jnp.zeros((c,), jnp.float32),
            "var": jnp.ones((c,), jnp.float32)}


def init_params(key, in_chans=1, num_block=(2, 2, 2, 2), num_classes=100):
    keys = iter(jax.random.split(key, 256))
    p = {"conv1": {"w": _conv_w(next(keys), 64, in_chans, 3),
                   "bn": _bn_params(next(keys), 64)}}
    in_c, expansion = 64, 1                                # BasicBlock
    for name, out_c, stride, nb in [("conv2_x", 64, 1, num_block[0]),
                                    ("conv3_x", 128, 2, num_block[1]),
                                    ("conv4_x", 256, 2, num_block[2]),
                                    ("conv5_x", 512, 2, num_block[3])]:
        blocks = []
        for st in [stride] + [1] * (nb - 1):
            bp = {"w1": _conv_w(next(keys), out_c, in_c, 3),
                  "bn1": _bn_params(next(keys), out_c),
                  "w2": _conv_w(next(keys), out_c * expansion, out_c, 3),
                  "bn2": _bn_params(next(keys), out_c * expansion)}
            if st != 1 or in_c != out_c * expansion:
                bp["wsc"] = _conv_w(next(keys), out_c * expansion, in_c, 1)
                bp["bnsc"] = _bn_params(next(keys), out_c * expansion)
            in_c = out_c * expansion
            blocks.append(bp)
        p[name] = blocks
    p["fc_w"] = (jax.random.normal(next(keys), (num_classes, 512 * expansion),
                                   jnp.float32) / jnp.sqrt(512.0))
    p["fc_b"] = 0.05 * jax.random.normal(next(keys), (num_classes,), jnp.float32)
    return p


def _fold_bn(w_oihw, bn, eps=1e-5):
    scale = bn["gamma"] / jnp.sqrt(bn["var"] + eps)
    return w_oihw * scale[:, None, None, None], bn["beta"] - scale * bn["mean"]


def _conv3x3_taps(w_oihw, bn):
    """(Co,Ci,3,3)+BN -> (9, Ci, Co) bf16 taps + (1, Co) f32 bias (no channel padding)."""
    w, b = _fold_bn(w_oihw, bn)
    co, ci = w.shape[0], w.shape[1]
    wt = jnp.transpose(w, (2, 3, 1, 0)).reshape(9, ci, co).astype(jnp.bfloat16)
    return wt, b.reshape(1, co)


def _conv1x1_mat(w_oihw, bn):
    w, b = _fold_bn(w_oihw, bn)
    co = w.shape[0]
    return (jnp.transpose(w[:, :, 0, 0], (1, 0)).astype(jnp.bfloat16),
            b.reshape(1, co))


def _stem_weight(w_oihw, bn):
    """(Co,Ci,3,3)+BN -> (9*Ci, Co) bf16 im2col weight ((kh,kw,ci) ordering) + bias."""
    w, b = _fold_bn(w_oihw, bn)
    co, ci = w.shape[0], w.shape[1]
    wt = jnp.transpose(w, (2, 3, 1, 0)).reshape(9 * ci, co).astype(jnp.bfloat16)
    return wt, b.reshape(1, co)


def prepare_params(raw):
    """Fold BN into the conv weights and lay them out for the kernels."""
    w, b = _stem_weight(raw["conv1"]["w"], raw["conv1"]["bn"])
    prep = {"stem": {"w": w, "b": b}}
    for name in ("conv2_x", "conv3_x"):
        blocks = []
        for bp in raw[name]:
            kb = {}
            kb["w1t"], kb["b1"] = _conv3x3_taps(bp["w1"], bp["bn1"])
            kb["w2t"], kb["b2"] = _conv3x3_taps(bp["w2"], bp["bn2"])
            if "wsc" in bp:
                kb["wsc"], kb["bsc"] = _conv1x1_mat(bp["wsc"], bp["bnsc"])
            blocks.append(kb)
        prep[name] = blocks
    # TODO(synk): conv4_x / conv5_x / avg_pool / fc are computed-then-discarded by
    # the reference forward (it returns only f1, f2, f3), so they are not prepared.
    return prep


# ----------------------------------------------------------------------------
# forward pass (matches ResNet.forward's returned values -> (f1, f2, f3), NCHW)
# ----------------------------------------------------------------------------
def resnet_forward(x_nchw, prep):
    x = jnp.transpose(x_nchw, (0, 2, 3, 1))                 # NCHW -> NHWC
    f1 = stem_conv(x, prep["stem"])                         # (N, H,   W,   64) bf16
    p = maxpool_3x3_s2_p1(f1)                               # (N, H/2, W/2, 64) bf16
    f2 = run_stage(p, prep["conv2_x"])                      # (N, H/2, W/2, 64) bf16
    f3 = run_stage(f2, prep["conv3_x"])                     # (N, H/4, W/4, 128) bf16

    def to_nchw(t):
        return jnp.transpose(t, (0, 3, 1, 2)).astype(jnp.float32)

    return to_nchw(f1), to_nchw(f2), to_nchw(f3)


# ----------------------------------------------------------------------------
if __name__ == "__main__":
    key = jax.random.PRNGKey(0)
    kx, kp = jax.random.split(key)

    # small shapes consistent with the module: batch=2, in_chans=1, spatial=16
    x = jax.random.normal(kx, (2, 1, 16, 16), jnp.float32)
    raw = init_params(kp, in_chans=1, num_block=(2, 2, 2, 2), num_classes=100)
    prep = prepare_params(raw)

    fwd = jax.jit(resnet_forward)
    f1, f2, f3 = fwd(x, prep)
    jax.block_until_ready((f1, f2, f3))

    assert f1.shape == (2, 64, 16, 16)   # same size as input
    assert f2.shape == (2, 64, 8, 8)     # 1/2 size
    assert f3.shape == (2, 128, 4, 4)    # 1/4 size

    print("KERNEL_OK")
</pallas_src>

<mosaic_0001>
module attributes {stable_mosaic.version = 11 : i64} {
  func.func @_stem_kernel(%arg0: i32, %arg1: memref<256x9xbf16, #tpu.memory_space<vmem>>, %arg2: memref<9x64xbf16, #tpu.memory_space<vmem>>, %arg3: memref<1x64xf32, #tpu.memory_space<vmem>>, %arg4: memref<256x64xbf16, #tpu.memory_space<vmem>>) attributes {dimension_semantics = [#tpu.dimension_semantics<parallel>], iteration_bounds = array<i64: 2>, scalar_prefetch = 0 : i64, scratch_operands = 0 : i64, tpu.core_type = #tpu.core_type<tc>, window_params = [{transform_indices = @transform_0, window_bounds = array<i64: 256, 9>}, {pipeline_mode = #tpu.pipeline_mode<synchronous>, transform_indices = @transform_1, window_bounds = array<i64: 9, 64>}, {pipeline_mode = #tpu.pipeline_mode<synchronous>, transform_indices = @transform_2, window_bounds = array<i64: 1, 64>}, {transform_indices = @transform_3, window_bounds = array<i64: 256, 64>}]} {
    %c0 = arith.constant 0 : index
    %c0_0 = arith.constant 0 : index
    %0 = vector.load %arg1[%c0, %c0_0] : memref<256x9xbf16, #tpu.memory_space<vmem>>, vector<256x9xbf16>
    %c0_1 = arith.constant 0 : index
    %c0_2 = arith.constant 0 : index
    %1 = vector.load %arg2[%c0_1, %c0_2] : memref<9x64xbf16, #tpu.memory_space<vmem>>, vector<9x64xbf16>
    %cst = arith.constant dense<0.000000e+00> : vector<256x64xf32>
    %2 = tpu.matmul %0, %1, %cst {dimension_numbers = #tpu.dot_dimension_numbers<[1], [0], [0], [1], [0, 0, 1, 1], [], []>} : vector<256x9xbf16>, vector<9x64xbf16>, vector<256x64xf32> -> vector<256x64xf32>
    %c0_3 = arith.constant 0 : index
    %c0_4 = arith.constant 0 : index
    %3 = vector.load %arg3[%c0_3, %c0_4] : memref<1x64xf32, #tpu.memory_space<vmem>>, vector<1x64xf32>
    %4 = vector.broadcast %3 : vector<1x64xf32> to vector<256x64xf32>
    %5 = arith.addf %2, %4 : vector<256x64xf32>
    %cst_5 = arith.constant 0.000000e+00 : f32
    %6 = vector.broadcast %cst_5 : f32 to vector<256x64xf32>
    %7 = arith.maximumf %5, %6 : vector<256x64xf32>
    %8 = arith.truncf %7 : vector<256x64xf32> to vector<256x64xbf16>
    %c0_6 = arith.constant 0 : index
    %c0_7 = arith.constant 0 : index
    %9 = vector.load %arg4[%c0_6, %c0_7] : memref<256x64xbf16, #tpu.memory_space<vmem>>, vector<256x64xbf16>
    tpu.vector_store %arg4[%c0_6, %c0_7], %8 {strides = array<i32>} : memref<256x64xbf16, #tpu.memory_space<vmem>>, vector<256x64xbf16>,
    return
  }
  func.func @transform_0(%arg0: i32) -> (i32, i32) {
    %c0_i32 = arith.constant 0 : i32
    %c0_i32_0 = arith.constant 0 : i32
    return %arg0, %c0_i32 : i32, i32
  }
  func.func @transform_1(%arg0: i32) -> (i32, i32) {
    %c0_i32 = arith.constant 0 : i32
    %c0_i32_0 = arith.constant 0 : i32
    %c0_i32_1 = arith.constant 0 : i32
    return %c0_i32, %c0_i32_0 : i32, i32
  }
  func.func @transform_2(%arg0: i32) -> (i32, i32) {
    %c0_i32 = arith.constant 0 : i32
    %c0_i32_0 = arith.constant 0 : i32
    %c0_i32_1 = arith.constant 0 : i32
    return %c0_i32, %c0_i32_0 : i32, i32
  }
  func.func @transform_3(%arg0: i32) -> (i32, i32) {
    %c0_i32 = arith.constant 0 : i32
    %c0_i32_0 = arith.constant 0 : i32
    return %arg0, %c0_i32 : i32, i32
  }
}

module attributes {stable_mosaic.version = 11 : i64} {
  func.func @_identity_stage_kernel(%arg0: i32, %arg1: memref<64x64xbf16, #tpu.memory_space<vmem>>, %arg2: memref<9x64x64xbf16, #tpu.memory_space<vmem>>, %arg3: memref<1x64xf32, #tpu.memory_space<vmem>>, %arg4: memref<9x64x64xbf16, #tpu.memory_space<vmem>>, %arg5: memref<1x64xf32, #tpu.memory_space<vmem>>, %arg6: memref<9x64x64xbf16, #tpu.memory_space<vmem>>, %arg7: memref<1x64xf32, #tpu.memory_space<vmem>>, %arg8: memref<9x64x64xbf16, #tpu.memory_space<vmem>>, %arg9: memref<1x64xf32, #tpu.memory_space<vmem>>, %arg10: memref<64x64xbf16, #tpu.memory_space<vmem>>) attributes {dimension_semantics = [#tpu.dimension_semantics<parallel>], iteration_bounds = array<i64: 2>, scalar_prefetch = 0 : i64, scratch_operands = 0 : i64, tpu.core_type = #tpu.core_type<tc>, window_params = [{transform_indices = @transform_0, window_bounds = array<i64: 64, 64>}, {pipeline_mode = #tpu.pipeline_mode<synchronous>, transform_indices = @transform_1, window_bounds = array<i64: 9, 64, 64>}, {pipeline_mode = #tpu.pipeline_mode<synchronous>, transform_indices = @transform_2, window_bounds = array<i64: 1, 64>}, {pipeline_mode = #tpu.pipeline_mode<synchronous>, transform_indices = @transform_3, window_bounds = array<i64: 9, 64, 64>}, {pipeline_mode = #tpu.pipeline_mode<synchronous>, transform_indices = @transform_4, window_bounds = array<i64: 1, 64>}, {pipeline_mode = #tpu.pipeline_mode<synchronous>, transform_indices = @transform_5, window_bounds = array<i64: 9, 64, 64>}, {pipeline_mode = #tpu.pipeline_mode<synchronous>, transform_indices = @transform_6, window_bounds = array<i64: 1, 64>}, {pipeline_mode = #tpu.pipeline_mode<synchronous>, transform_indices = @transform_7, window_bounds = array<i64: 9, 64, 64>}, {pipeline_mode = #tpu.pipeline_mode<synchronous>, transform_indices = @transform_8, window_bounds = array<i64: 1, 64>}, {transform_indices = @transform_9, window_bounds = array<i64: 64, 64>}]} {
    %0 = tpu.iota {dimensions = array<i32: 0>} : vector<64x1xi32>
    %c7_i32 = arith.constant 7 : i32
    %1 = vector.broadcast %c7_i32 : i32 to vector<64x1xi32>
    %2 = arith.andi %0, %1 : vector<64x1xi32>
    %c8_i32 = arith.constant 8 : i32
    %3 = vector.broadcast %c8_i32 : i32 to vector<64x1xi32>
    %4 = arith.cmpi sge, %0, %3 : vector<64x1xi32>
    %cst = arith.constant 1.000000e+00 : f32
    %cst_0 = arith.constant 0.000000e+00 : f32
    %5 = vector.broadcast %cst : f32 to vector<64x1xf32>
    %6 = vector.broadcast %cst_0 : f32 to vector<64x1xf32>
    %7 = arith.select %4, %5, %6 : vector<64x1xi1>, vector<64x1xf32>
    %c56_i32 = arith.constant 56 : i32
    %8 = vector.broadcast %c56_i32 : i32 to vector<64x1xi32>
    %9 = arith.cmpi slt, %0, %8 : vector<64x1xi32>
    %cst_1 = arith.constant 1.000000e+00 : f32
    %cst_2 = arith.constant 0.000000e+00 : f32
    %10 = vector.broadcast %cst_1 : f32 to vector<64x1xf32>
    %11 = vector.broadcast %cst_2 : f32 to vector<64x1xf32>
    %12 = arith.select %9, %10, %11 : vector<64x1xi1>, vector<64x1xf32>
    %c1_i32 = arith.constant 1 : i32
    %13 = vector.broadcast %c1_i32 : i32 to vector<64x1xi32>
    %14 = arith.cmpi sge, %2, %13 : vector<64x1xi32>
    %cst_3 = arith.constant 1.000000e+00 : f32
    %cst_4 = arith.constant 0.000000e+00 : f32
    %15 = vector.broadcast %cst_3 : f32 to vector<64x1xf32>
    %16 = vector.broadcast %cst_4 : f32 to vector<64x1xf32>
    %17 = arith.select %14, %15, %16 : vector<64x1xi1>, vector<64x1xf32>
    %c7_i32_5 = arith.constant 7 : i32
    %18 = vector.broadcast %c7_i32_5 : i32 to vector<64x1xi32>
    %19 = arith.cmpi slt, %2, %18 : vector<64x1xi32>
    %cst_6 = arith.constant 1.000000e+00 : f32
    %cst_7 = arith.constant 0.000000e+00 : f32
    %20 = vector.broadcast %cst_6 : f32 to vector<64x1xf32>
    %21 = vector.broadcast %cst_7 : f32 to vector<64x1xf32>
    %22 = arith.select %19, %20, %21 : vector<64x1xi1>, vector<64x1xf32>
    %23 = arith.mulf %7, %17 : vector<64x1xf32>
    %24 = arith.mulf %7, %22 : vector<64x1xf32>
    %25 = arith.mulf %12, %17 : vector<64x1xf32>
    %26 = arith.mulf %12, %22 : vector<64x1xf32>
    %c0 = arith.constant 0 : index
    %c0_8 = arith.constant 0 : index
    %27 = vector.load %arg1[%c0, %c0_8] : memref<64x64xbf16, #tpu.memory_space<vmem>>, vector<64x64xbf16>
    %28 = arith.extf %27 : vector<64x64xbf16> to vector<64x64xf32>
    %cst_9 = arith.constant 0.000000e+00 : f32
    %29 = vector.broadcast %cst_9 : f32 to vector<64x64xf32>
    %c9_i32 = arith.constant 9 : i32
    %30 = tpu.dynamic_rotate %28 by %c9_i32 dim 0 : vector<64x64xf32>, i32 -> vector<64x64xf32>
    %31 = vector.broadcast %23 : vector<64x1xf32> to vector<64x64xf32>
    %32 = arith.mulf %30, %31 : vector<64x64xf32>
    %33 = arith.truncf %32 : vector<64x64xf32> to vector<64x64xbf16>
    %c0_10 = arith.constant 0 : index
    %c0_11 = arith.constant 0 : index
    %c0_12 = arith.constant 0 : index
    %34 = vector.load %arg2[%c0_10, %c0_11, %c0_12] : memref<9x64x64xbf16, #tpu.memory_space<vmem>>, vector<1x64x64xbf16>
    %35 = vector.shape_cast %34 : vector<1x64x64xbf16> to vector<64x64xbf16>
    %cst_13 = arith.constant dense<0.000000e+00> : vector<64x64xf32>
    %36 = tpu.matmul %33, %35, %cst_13 {dimension_numbers = #tpu.dot_dimension_numbers<[1], [0], [0], [1], [0, 0, 1, 1], [], []>} : vector<64x64xbf16>, vector<64x64xbf16>, vector<64x64xf32> -> vector<64x64xf32>
    %37 = arith.addf %29, %36 : vector<64x64xf32>
    %c8_i32_14 = arith.constant 8 : i32
    %38 = tpu.dynamic_rotate %28 by %c8_i32_14 dim 0 : vector<64x64xf32>, i32 -> vector<64x64xf32>
    %39 = vector.broadcast %7 : vector<64x1xf32> to vector<64x64xf32>
    %40 = arith.mulf %38, %39 : vector<64x64xf32>
    %41 = arith.truncf %40 : vector<64x64xf32> to vector<64x64xbf16>
    %c1 = arith.constant 1 : index
    %c0_15 = arith.constant 0 : index
    %c0_16 = arith.constant 0 : index
    %42 = vector.load %arg2[%c1, %c0_15, %c0_16] : memref<9x64x64xbf16, #tpu.memory_space<vmem>>, vector<1x64x64xbf16>
    %43 = vector.shape_cast %42 : vector<1x64x64xbf16> to vector<64x64xbf16>
    %cst_17 = arith.constant dense<0.000000e+00> : vector<64x64xf32>
    %44 = tpu.matmul %41, %43, %cst_17 {dimension_numbers = #tpu.dot_dimension_numbers<[1], [0], [0], [1], [0, 0, 1, 1], [], []>} : vector<64x64xbf16>, vector<64x64xbf16>, vector<64x64xf32> -> vector<64x64xf32>
    %45 = arith.addf %37, %44 : vector<64x64xf32>
    %c7_i32_18 = arith.constant 7 : i32
    %46 = tpu.dynamic_rotate %28 by %c7_i32_18 dim 0 : vector<64x64xf32>, i32 -> vector<64x64xf32>
    %47 = vector.broadcast %24 : vector<64x1xf32> to vector<64x64xf32>
    %48 = arith.mulf %46, %47 : vector<64x64xf32>
    %49 = arith.truncf %48 : vector<64x64xf32> to vector<64x64xbf16>
    %c2 = arith.constant 2 : index
    %c0_19 = arith.constant 0 : index
    %c0_20 = arith.constant 0 : index
    %50 = vector.load %arg2[%c2, %c0_19, %c0_20] : memref<9x64x64xbf16, #tpu.memory_space<vmem>>, vector<1x64x64xbf16>
    %51 = vector.shape_cast %50 : vector<1x64x64xbf16> to vector<64x64xbf16>
    %cst_21 = arith.constant dense<0.000000e+00> : vector<64x64xf32>
    %52 = tpu.matmul %49, %51, %cst_21 {dimension_numbers = #tpu.dot_dimension_numbers<[1], [0], [0], [1], [0, 0, 1, 1], [], []>} : vector<64x64xbf16>, vector<64x64xbf16>, vector<64x64xf32> -> vector<64x64xf32>
    %53 = arith.addf %45, %52 : vector<64x64xf32>
    %c1_i32_22 = arith.constant 1 : i32
    %54 = tpu.dynamic_rotate %28 by %c1_i32_22 dim 0 : vector<64x64xf32>, i32 -> vector<64x64xf32>
    %55 = vector.broadcast %17 : vector<64x1xf32> to vector<64x64xf32>
    %56 = arith.mulf %54, %55 : vector<64x64xf32>
    %57 = arith.truncf %56 : vector<64x64xf32> to vector<64x64xbf16>
    %c3 = arith.constant 3 : index
    %c0_23 = arith.constant 0 : index
    %c0_24 = arith.constant 0 : index
    %58 = vector.load %arg2[%c3, %c0_23, %c0_24] : memref<9x64x64xbf16, #tpu.memory_space<vmem>>, vector<1x64x64xbf16>
    %59 = vector.shape_cast %58 : vector<1x64x64xbf16> to vector<64x64xbf16>
    %cst_25 = arith.constant dense<0.000000e+00> : vector<64x64xf32>
    %60 = tpu.matmul %57, %59, %cst_25 {dimension_numbers = #tpu.dot_dimension_numbers<[1], [0], [0], [1], [0, 0, 1, 1], [], []>} : vector<64x64xbf16>, vector<64x64xbf16>, vector<64x64xf32> -> vector<64x64xf32>
    %61 = arith.addf %53, %60 : vector<64x64xf32>
    %62 = arith.truncf %28 : vector<64x64xf32> to vector<64x64xbf16>
    %c4 = arith.constant 4 : index
    %c0_26 = arith.constant 0 : index
    %c0_27 = arith.constant 0 : index
    %63 = vector.load %arg2[%c4, %c0_26, %c0_27] : memref<9x64x64xbf16, #tpu.memory_space<vmem>>, vector<1x64x64xbf16>
    %64 = vector.shape_cast %63 : vector<1x64x64xbf16> to vector<64x64xbf16>
    %cst_28 = arith.constant dense<0.000000e+00> : vector<64x64xf32>
    %65 = tpu.matmul %62, %64, %cst_28 {dimension_numbers = #tpu.dot_dimension_numbers<[1], [0], [0], [1], [0, 0, 1, 1], [], []>} : vector<64x64xbf16>, vector<64x64xbf16>, vector<64x64xf32> -> vector<64x64xf32>
    %66 = arith.addf %61, %65 : vector<64x64xf32>
    %c63_i32 = arith.constant 63 : i32
    %67 = tpu.dynamic_rotate %28 by %c63_i32 dim 0 : vector<64x64xf32>, i32 -> vector<64x64xf32>
    %68 = vector.broadcast %22 : vector<64x1xf32> to vector<64x64xf32>
    %69 = arith.mulf %67, %68 : vector<64x64xf32>
    %70 = arith.truncf %69 : vector<64x64xf32> to vector<64x64xbf16>
    %c5 = arith.constant 5 : index
    %c0_29 = arith.constant 0 : index
    %c0_30 = arith.constant 0 : index
    %71 = vector.load %arg2[%c5, %c0_29, %c0_30] : memref<9x64x64xbf16, #tpu.memory_space<vmem>>, vector<1x64x64xbf16>
    %72 = vector.shape_cast %71 : vector<1x64x64xbf16> to vector<64x64xbf16>
    %cst_31 = arith.constant dense<0.000000e+00> : vector<64x64xf32>
    %73 = tpu.matmul %70, %72, %cst_31 {dimension_numbers = #tpu.dot_dimension_numbers<[1], [0], [0], [1], [0, 0, 1, 1], [], []>} : vector<64x64xbf16>, vector<64x64xbf16>, vector<64x64xf32> -> vector<64x64xf32>
    %74 = arith.addf %66, %73 : vector<64x64xf32>
    %c57_i32 = arith.constant 57 : i32
    %75 = tpu.dynamic_rotate %28 by %c57_i32 dim 0 : vector<64x64xf32>, i32 -> vector<64x64xf32>
    %76 = vector.broadcast %25 : vector<64x1xf32> to vector<64x64xf32>
    %77 = arith.mulf %75, %76 : vector<64x64xf32>
    %78 = arith.truncf %77 : vector<64x64xf32> to vector<64x64xbf16>
    %c6 = arith.constant 6 : index
    %c0_32 = arith.constant 0 : index
    %c0_33 = arith.constant 0 : index
    %79 = vector.load %arg2[%c6, %c0_32, %c0_33] : memref<9x64x64xbf16, #tpu.memory_space<vmem>>, vector<1x64x64xbf16>
    %80 = vector.shape_cast %79 : vector<1x64x64xbf16> to vector<64x64xbf16>
    %cst_34 = arith.constant dense<0.000000e+00> : vector<64x64xf32>
    %81 = tpu.matmul %78, %80, %cst_34 {dimension_numbers = #tpu.dot_dimension_numbers<[1], [0], [0], [1], [0, 0, 1, 1], [], []>} : vector<64x64xbf16>, vector<64x64xbf16>, vector<64x64xf32> -> vector<64x64xf32>
    %82 = arith.addf %74, %81 : vector<64x64xf32>
    %c56_i32_35 = arith.constant 56 : i32
    %83 = tpu.dynamic_rotate %28 by %c56_i32_35 dim 0 : vector<64x64xf32>, i32 -> vector<64x64xf32>
    %84 = vector.broadcast %12 : vector<64x1xf32> to vector<64x64xf32>
    %85 = arith.mulf %83, %84 : vector<64x64xf32>
    %86 = arith.truncf %85 : vector<64x64xf32> to vector<64x64xbf16>
    %c7 = arith.constant 7 : index
    %c0_36 = arith.constant 0 : index
    %c0_37 = arith.constant 0 : index
    %87 = vector.load %arg2[%c7, %c0_36, %c0_37] : memref<9x64x64xbf16, #tpu.memory_space<vmem>>, vector<1x64x64xbf16>
    %88 = vector.shape_cast %87 : vector<1x64x64xbf16> to vector<64x64xbf16>
    %cst_38 = arith.constant dense<0.000000e+00> : vector<64x64xf32>
    %89 = tpu.matmul %86, %88, %cst_38 {dimension_numbers = #tpu.dot_dimension_numbers<[1], [0], [0], [1], [0, 0, 1, 1], [], []>} : vector<64x64xbf16>, vector<64x64xbf16>, vector<64x64xf32> -> vector<64x64xf32>
    %90 = arith.addf %82, %89 : vector<64x64xf32>
    %c55_i32 = arith.constant 55 : i32
    %91 = tpu.dynamic_rotate %28 by %c55_i32 dim 0 : vector<64x64xf32>, i32 -> vector<64x64xf32>
    %92 = vector.broadcast %26 : vector<64x1xf32> to vector<64x64xf32>
    %93 = arith.mulf %91, %92 : vector<64x64xf32>
    %94 = arith.truncf %93 : vector<64x64xf32> to vector<64x64xbf16>
    %c8 = arith.constant 8 : index
    %c0_39 = arith.constant 0 : index
    %c0_40 = arith.constant 0 : index
    %95 = vector.load %arg2[%c8, %c0_39, %c0_40] : memref<9x64x64xbf16, #tpu.memory_space<vmem>>, vector<1x64x64xbf16>
    %96 = vector.shape_cast %95 : vector<1x64x64xbf16> to vector<64x64xbf16>
    %cst_41 = arith.constant dense<0.000000e+00> : vector<64x64xf32>
    %97 = tpu.matmul %94, %96, %cst_41 {dimension_numbers = #tpu.dot_dimension_numbers<[1], [0], [0], [1], [0, 0, 1, 1], [], []>} : vector<64x64xbf16>, vector<64x64xbf16>, vector<64x64xf32> -> vector<64x64xf32>
    %98 = arith.addf %90, %97 : vector<64x64xf32>
    %c0_42 = arith.constant 0 : index
    %c0_43 = arith.constant 0 : index
    %99 = vector.load %arg3[%c0_42, %c0_43] : memref<1x64xf32, #tpu.memory_space<vmem>>, vector<1x64xf32>
    %100 = vector.broadcast %99 : vector<1x64xf32> to vector<64x64xf32>
    %101 = arith.addf %98, %100 : vector<64x64xf32>
    %cst_44 = arith.constant 0.000000e+00 : f32
    %102 = vector.broadcast %cst_44 : f32 to vector<64x64xf32>
    %103 = arith.maximumf %101, %102 : vector<64x64xf32>
    %cst_45 = arith.constant 0.000000e+00 : f32
    %104 = vector.broadcast %cst_45 : f32 to vector<64x64xf32>
    %c9_i32_46 = arith.constant 9 : i32
    %105 = tpu.dynamic_rotate %103 by %c9_i32_46 dim 0 : vector<64x64xf32>, i32 -> vector<64x64xf32>
    %106 = vector.broadcast %23 : vector<64x1xf32> to vector<64x64xf32>
    %107 = arith.mulf %105, %106 : vector<64x64xf32>
    %108 = arith.truncf %107 : vector<64x64xf32> to vector<64x64xbf16>
    %c0_47 = arith.constant 0 : index
    %c0_48 = arith.constant 0 : index
    %c0_49 = arith.constant 0 : index
    %109 = vector.load %arg4[%c0_47, %c0_48, %c0_49] : memref<9x64x64xbf16, #tpu.memory_space<vmem>>, vector<1x64x64xbf16>
    %110 = vector.shape_cast %109 : vector<1x64x64xbf16> to vector<64x64xbf16>
    %cst_50 = arith.constant dense<0.000000e+00> : vector<64x64xf32>
    %111 = tpu.matmul %108, %110, %cst_50 {dimension_numbers = #tpu.dot_dimension_numbers<[1], [0], [0], [1], [0, 0, 1, 1], [], []>} : vector<64x64xbf16>, vector<64x64xbf16>, vector<64x64xf32> -> vector<64x64xf32>
    %112 = arith.addf %104, %111 : vector<64x64xf32>
    %c8_i32_51 = arith.constant 8 : i32
    %113 = tpu.dynamic_rotate %103 by %c8_i32_51 dim 0 : vector<64x64xf32>, i32 -> vector<64x64xf32>
    %114 = vector.broadcast %7 : vector<64x1xf32> to vector<64x64xf32>
    %115 = arith.mulf %113, %114 : vector<64x64xf32>
    %116 = arith.truncf %115 : vector<64x64xf32> to vector<64x64xbf16>
    %c1_52 = arith.constant 1 : index
    %c0_53 = arith.constant 0 : index
    %c0_54 = arith.constant 0 : index
    %117 = vector.load %arg4[%c1_52, %c0_53, %c0_54] : memref<9x64x64xbf16, #tpu.memory_space<vmem>>, vector<1x64x64xbf16>
    %118 = vector.shape_cast %117 : vector<1x64x64xbf16> to vector<64x64xbf16>
    %cst_55 = arith.constant dense<0.000000e+00> : vector<64x64xf32>
    %119 = tpu.matmul %116, %118, %cst_55 {dimension_numbers = #tpu.dot_dimension_numbers<[1], [0], [0], [1], [0, 0, 1, 1], [], []>} : vector<64x64xbf16>, vector<64x64xbf16>, vector<64x64xf32> -> vector<64x64xf32>
    %120 = arith.addf %112, %119 : vector<64x64xf32>
    %c7_i32_56 = arith.constant 7 : i32
    %121 = tpu.dynamic_rotate %103 by %c7_i32_56 dim 0 : vector<64x64xf32>, i32 -> vector<64x64xf32>
    %122 = vector.broadcast %24 : vector<64x1xf32> to vector<64x64xf32>
    %123 = arith.mulf %121, %122 : vector<64x64xf32>
    %124 = arith.truncf %123 : vector<64x64xf32> to vector<64x64xbf16>
    %c2_57 = arith.constant 2 : index
    %c0_58 = arith.constant 0 : index
    %c0_59 = arith.constant 0 : index
    %125 = vector.load %arg4[%c2_57, %c0_58, %c0_59] : memref<9x64x64xbf16, #tpu.memory_space<vmem>>, vector<1x64x64xbf16>
    %126 = vector.shape_cast %125 : vector<1x64x64xbf16> to vector<64x64xbf16>
    %cst_60 = arith.constant dense<0.000000e+00> : vector<64x64xf32>
    %127 = tpu.matmul %124, %126, %cst_60 {dimension_numbers = #tpu.dot_dimension_numbers<[1], [0], [0], [1], [0, 0, 1, 1], [], []>} : vector<64x64xbf16>, vector<64x64xbf16>, vector<64x64xf32> -> vector<64x64xf32>
    %128 = arith.addf %120, %127 : vector<64x64xf32>
    %c1_i32_61 = arith.constant 1 : i32
    %129 = tpu.dynamic_rotate %103 by %c1_i32_61 dim 0 : vector<64x64xf32>, i32 -> vector<64x64xf32>
    %130 = vector.broadcast %17 : vector<64x1xf32> to vector<64x64xf32>
    %131 = arith.mulf %129, %130 : vector<64x64xf32>
    %132 = arith.truncf %131 : vector<64x64xf32> to vector<64x64xbf16>
    %c3_62 = arith.constant 3 : index
    %c0_63 = arith.constant 0 : index
    %c0_64 = arith.constant 0 : index
    %133 = vector.load %arg4[%c3_62, %c0_63, %c0_64] : memref<9x64x64xbf16, #tpu.memory_space<vmem>>, vector<1x64x64xbf16>
    %134 = vector.shape_cast %133 : vector<1x64x64xbf16> to vector<64x64xbf16>
    %cst_65 = arith.constant dense<0.000000e+00> : vector<64x64xf32>
    %135 = tpu.matmul %132, %134, %cst_65 {dimension_numbers = #tpu.dot_dimension_numbers<[1], [0], [0], [1], [0, 0, 1, 1], [], []>} : vector<64x64xbf16>, vector<64x64xbf16>, vector<64x64xf32> -> vector<64x64xf32>
    %136 = arith.addf %128, %135 : vector<64x64xf32>
    %137 = arith.truncf %103 : vector<64x64xf32> to vector<64x64xbf16>
    %c4_66 = arith.constant 4 : index
    %c0_67 = arith.constant 0 : index
    %c0_68 = arith.constant 0 : index
    %138 = vector.load %arg4[%c4_66, %c0_67, %c0_68] : memref<9x64x64xbf16, #tpu.memory_space<vmem>>, vector<1x64x64xbf16>
    %139 = vector.shape_cast %138 : vector<1x64x64xbf16> to vector<64x64xbf16>
    %cst_69 = arith.constant dense<0.000000e+00> : vector<64x64xf32>
    %140 = tpu.matmul %137, %139, %cst_69 {dimension_numbers = #tpu.dot_dimension_numbers<[1], [0], [0], [1], [0, 0, 1, 1], [], []>} : vector<64x64xbf16>, vector<64x64xbf16>, vector<64x64xf32> -> vector<64x64xf32>
    %141 = arith.addf %136, %140 : vector<64x64xf32>
    %c63_i32_70 = arith.constant 63 : i32
    %142 = tpu.dynamic_rotate %103 by %c63_i32_70 dim 0 : vector<64x64xf32>, i32 -> vector<64x64xf32>
    %143 = vector.broadcast %22 : vector<64x1xf32> to vector<64x64xf32>
    %144 = arith.mulf %142, %143 : vector<64x64xf32>
    %145 = arith.truncf %144 : vector<64x64xf32> to vector<64x64xbf16>
    %c5_71 = arith.constant 5 : index
    %c0_72 = arith.constant 0 : index
    %c0_73 = arith.constant 0 : index
    %146 = vector.load %arg4[%c5_71, %c0_72, %c0_73] : memref<9x64x64xbf16, #tpu.memory_space<vmem>>, vector<1x64x64xbf16>
    %147 = vector.shape_cast %146 : vector<1x64x64xbf16> to vector<64x64xbf16>
    %cst_74 = arith.constant dense<0.000000e+00> : vector<64x64xf32>
    %148 = tpu.matmul %145, %147, %cst_74 {dimension_numbers = #tpu.dot_dimension_numbers<[1], [0], [0], [1], [0, 0, 1, 1], [], []>} : vector<64x64xbf16>, vector<64x64xbf16>, vector<64x64xf32> -> vector<64x64xf32>
    %149 = arith.addf %141, %148 : vector<64x64xf32>
    %c57_i32_75 = arith.constant 57 : i32
    %150 = tpu.dynamic_rotate %103 by %c57_i32_75 dim 0 : vector<64x64xf32>, i32 -> vector<64x64xf32>
    %151 = vector.broadcast %25 : vector<64x1xf32> to vector<64x64xf32>
    %152 = arith.mulf %150, %151 : vector<64x64xf32>
    %153 = arith.truncf %152 : vector<64x64xf32> to vector<64x64xbf16>
    %c6_76 = arith.constant 6 : index
    %c0_77 = arith.constant 0 : index
    %c0_78 = arith.constant 0 : index
    %154 = vector.load %arg4[%c6_76, %c0_77, %c0_78] : memref<9x64x64xbf16, #tpu.memory_space<vmem>>, vector<1x64x64xbf16>
    %155 = vector.shape_cast %154 : vector<1x64x64xbf16> to vector<64x64xbf16>
    %cst_79 = arith.constant dense<0.000000e+00> : vector<64x64xf32>
    %156 = tpu.matmul %153, %155, %cst_79 {dimension_numbers = #tpu.dot_dimension_numbers<[1], [0], [0], [1], [0, 0, 1, 1], [], []>} : vector<64x64xbf16>, vector<64x64xbf16>, vector<64x64xf32> -> vector<64x64xf32>
    %157 = arith.addf %149, %156 : vector<64x64xf32>
    %c56_i32_80 = arith.constant 56 : i32
    %158 = tpu.dynamic_rotate %103 by %c56_i32_80 dim 0 : vector<64x64xf32>, i32 -> vector<64x64xf32>
    %159 = vector.broadcast %12 : vector<64x1xf32> to vector<64x64xf32>
    %160 = arith.mulf %158, %159 : vector<64x64xf32>
    %161 = arith.truncf %160 : vector<64x64xf32> to vector<64x64xbf16>
    %c7_81 = arith.constant 7 : index
    %c0_82 = arith.constant 0 : index
    %c0_83 = arith.constant 0 : index
    %162 = vector.load %arg4[%c7_81, %c0_82, %c0_83] : memref<9x64x64xbf16, #tpu.memory_space<vmem>>, vector<1x64x64xbf16>
    %163 = vector.shape_cast %162 : vector<1x64x64xbf16> to vector<64x64xbf16>
    %cst_84 = arith.constant dense<0.000000e+00> : vector<64x64xf32>
    %164 = tpu.matmul %161, %163, %cst_84 {dimension_numbers = #tpu.dot_dimension_numbers<[1], [0], [0], [1], [0, 0, 1, 1], [], []>} : vector<64x64xbf16>, vector<64x64xbf16>, vector<64x64xf32> -> vector<64x64xf32>
    %165 = arith.addf %157, %164 : vector<64x64xf32>
    %c55_i32_85 = arith.constant 55 : i32
    %166 = tpu.dynamic_rotate %103 by %c55_i32_85 dim 0 : vector<64x64xf32>, i32 -> vector<64x64xf32>
    %167 = vector.broadcast %26 : vector<64x1xf32> to vector<64x64xf32>
    %168 = arith.mulf %166, %167 : vector<64x64xf32>
    %169 = arith.truncf %168 : vector<64x64xf32> to vector<64x64xbf16>
    %c8_86 = arith.constant 8 : index
    %c0_87 = arith.constant 0 : index
    %c0_88 = arith.constant 0 : index
    %170 = vector.load %arg4[%c8_86, %c0_87, %c0_88] : memref<9x64x64xbf16, #tpu.memory_space<vmem>>, vector<1x64x64xbf16>
    %171 = vector.shape_cast %170 : vector<1x64x64xbf16> to vector<64x64xbf16>
    %cst_89 = arith.constant dense<0.000000e+00> : vector<64x64xf32>
    %172 = tpu.matmul %169, %171, %cst_89 {dimension_numbers = #tpu.dot_dimension_numbers<[1], [0], [0], [1], [0, 0, 1, 1], [], []>} : vector<64x64xbf16>, vector<64x64xbf16>, vector<64x64xf32> -> vector<64x64xf32>
    %173 = arith.addf %165, %172 : vector<64x64xf32>
    %c0_90 = arith.constant 0 : index
    %c0_91 = arith.constant 0 : index
    %174 = vector.load %arg5[%c0_90, %c0_91] : memref<1x64xf32, #tpu.memory_space<vmem>>, vector<1x64xf32>
    %175 = vector.broadcast %174 : vector<1x64xf32> to vector<64x64xf32>
    %176 = arith.addf %173, %175 : vector<64x64xf32>
    %177 = arith.addf %176, %28 : vector<64x64xf32>
    %cst_92 = arith.constant 0.000000e+00 : f32
    %178 = vector.broadcast %cst_92 : f32 to vector<64x64xf32>
    %179 = arith.maximumf %177, %178 : vector<64x64xf32>
    %cst_93 = arith.constant 0.000000e+00 : f32
    %180 = vector.broadcast %cst_93 : f32 to vector<64x64xf32>
    %c9_i32_94 = arith.constant 9 : i32
    %181 = tpu.dynamic_rotate %179 by %c9_i32_94 dim 0 : vector<64x64xf32>, i32 -> vector<64x64xf32>
    %182 = vector.broadcast %23 : vector<64x1xf32> to vector<64x64xf32>
    %183 = arith.mulf %181, %182 : vector<64x64xf32>
    %184 = arith.truncf %183 : vector<64x64xf32> to vector<64x64xbf16>
    %c0_95 = arith.constant 0 : index
    %c0_96 = arith.constant 0 : index
    %c0_97 = arith.constant 0 : index
    %185 = vector.load %arg6[%c0_95, %c0_96, %c0_97] : memref<9x64x64xbf16, #tpu.memory_space<vmem>>, vector<1x64x64xbf16>
    %186 = vector.shape_cast %185 : vector<1x64x64xbf16> to vector<64x64xbf16>
    %cst_98 = arith.constant dense<0.000000e+00> : vector<64x64xf32>
    %187 = tpu.matmul %184, %186, %cst_98 {dimension_numbers = #tpu.dot_dimension_numbers<[1], [0], [0], [1], [0, 0, 1, 1], [], []>} : vector<64x64xbf16>, vector<64x64xbf16>, vector<64x64xf32> -> vector<64x64xf32>
    %188 = arith.addf %180, %187 : vector<64x64xf32>
    %c8_i32_99 = arith.constant 8 : i32
    %189 = tpu.dynamic_rotate %179 by %c8_i32_99 dim 0 : vector<64x64xf32>, i32 -> vector<64x64xf32>
    %190 = vector.broadcast %7 : vector<64x1xf32> to vector<64x64xf32>
    %191 = arith.mulf %189, %190 : vector<64x64xf32>
    %192 = arith.truncf %191 : vector<64x64xf32> to vector<64x64xbf16>
    %c1_100 = arith.constant 1 : index
    %c0_101 = arith.constant 0 : index
    %c0_102 = arith.constant 0 : index
    %193 = vector.load %arg6[%c1_100, %c0_101, %c0_102] : memref<9x64x64xbf16, #tpu.memory_space<vmem>>, vector<1x64x64xbf16>
    %194 = vector.shape_cast %193 : vector<1x64x64xbf16> to vector<64x64xbf16>
    %cst_103 = arith.constant dense<0.000000e+00> : vector<64x64xf32>
    %195 = tpu.matmul %192, %194, %cst_103 {dimension_numbers = #tpu.dot_dimension_numbers<[1], [0], [0], [1], [0, 0, 1, 1], [], []>} : vector<64x64xbf16>, vector<64x64xbf16>, vector<64x64xf32> -> vector<64x64xf32>
    %196 = arith.addf %188, %195 : vector<64x64xf32>
    %c7_i32_104 = arith.constant 7 : i32
    %197 = tpu.dynamic_rotate %179 by %c7_i32_104 dim 0 : vector<64x64xf32>, i32 -> vector<64x64xf32>
    %198 = vector.broadcast %24 : vector<64x1xf32> to vector<64x64xf32>
    %199 = arith.mulf %197, %198 : vector<64x64xf32>
    %200 = arith.truncf %199 : vector<64x64xf32> to vector<64x64xbf16>
    %c2_105 = arith.constant 2 : index
    %c0_106 = arith.constant 0 : index
    %c0_107 = arith.constant 0 : index
    %201 = vector.load %arg6[%c2_105, %c0_106, %c0_107] : memref<9x64x64xbf16, #tpu.memory_space<vmem>>, vector<1x64x64xbf16>
    %202 = vector.shape_cast %201 : vector<1x64x64xbf16> to vector<64x64xbf16>
    %cst_108 = arith.constant dense<0.000000e+00> : vector<64x64xf32>
    %203 = tpu.matmul %200, %202, %cst_108 {dimension_numbers = #tpu.dot_dimension_numbers<[1], [0], [0], [1], [0, 0, 1, 1], [], []>} : vector<64x64xbf16>, vector<64x64xbf16>, vector<64x64xf32> -> vector<64x64xf32>
    %204 = arith.addf %196, %203 : vector<64x64xf32>
    %c1_i32_109 = arith.constant 1 : i32
    %205 = tpu.dynamic_rotate %179 by %c1_i32_109 dim 0 : vector<64x64xf32>, i32 -> vector<64x64xf32>
    %206 = vector.broadcast %17 : vector<64x1xf32> to vector<64x64xf32>
    %207 = arith.mulf %205, %206 : vector<64x64xf32>
    %208 = arith.truncf %207 : vector<64x64xf32> to vector<64x64xbf16>
    %c3_110 = arith.constant 3 : index
    %c0_111 = arith.constant 0 : index
    %c0_112 = arith.constant 0 : index
    %209 = vector.load %arg6[%c3_110, %c0_111, %c0_112] : memref<9x64x64xbf16, #tpu.memory_space<vmem>>, vector<1x64x64xbf16>
    %210 = vector.shape_cast %209 : vector<1x64x64xbf16> to vector<64x64xbf16>
    %cst_113 = arith.constant dense<0.000000e+00> : vector<64x64xf32>
    %211 = tpu.matmul %208, %210, %cst_113 {dimension_numbers = #tpu.dot_dimension_numbers<[1], [0], [0], [1], [0, 0, 1, 1], [], []>} : vector<64x64xbf16>, vector<64x64xbf16>, vector<64x64xf32> -> vector<64x64xf32>
    %212 = arith.addf %204, %211 : vector<64x64xf32>
    %213 = arith.truncf %179 : vector<64x64xf32> to vector<64x64xbf16>
    %c4_114 = arith.constant 4 : index
    %c0_115 = arith.constant 0 : index
    %c0_116 = arith.constant 0 : index
    %214 = vector.load %arg6[%c4_114, %c0_115, %c0_116] : memref<9x64x64xbf16, #tpu.memory_space<vmem>>, vector<1x64x64xbf16>
    %215 = vector.shape_cast %214 : vector<1x64x64xbf16> to vector<64x64xbf16>
    %cst_117 = arith.constant dense<0.000000e+00> : vector<64x64xf32>
    %216 = tpu.matmul %213, %215, %cst_117 {dimension_numbers = #tpu.dot_dimension_numbers<[1], [0], [0], [1], [0, 0, 1, 1], [], []>} : vector<64x64xbf16>, vector<64x64xbf16>, vector<64x64xf32> -> vector<64x64xf32>
    %217 = arith.addf %212, %216 : vector<64x64xf32>
    %c63_i32_118 = arith.constant 63 : i32
    %218 = tpu.dynamic_rotate %179 by %c63_i32_118 dim 0 : vector<64x64xf32>, i32 -> vector<64x64xf32>
    %219 = vector.broadcast %22 : vector<64x1xf32> to vector<64x64xf32>
    %220 = arith.mulf %218, %219 : vector<64x64xf32>
    %221 = arith.truncf %220 : vector<64x64xf32> to vector<64x64xbf16>
    %c5_119 = arith.constant 5 : index
    %c0_120 = arith.constant 0 : index
    %c0_121 = arith.constant 0 : index
    %222 = vector.load %arg6[%c5_119, %c0_120, %c0_121] : memref<9x64x64xbf16, #tpu.memory_space<vmem>>, vector<1x64x64xbf16>
    %223 = vector.shape_cast %222 : vector<1x64x64xbf16> to vector<64x64xbf16>
    %cst_122 = arith.constant dense<0.000000e+00> : vector<64x64xf32>
    %224 = tpu.matmul %221, %223, %cst_122 {dimension_numbers = #tpu.dot_dimension_numbers<[1], [0], [0], [1], [0, 0, 1, 1], [], []>} : vector<64x64xbf16>, vector<64x64xbf16>, vector<64x64xf32> -> vector<64x64xf32>
    %225 = arith.addf %217, %224 : vector<64x64xf32>
    %c57_i32_123 = arith.constant 57 : i32
    %226 = tpu.dynamic_rotate %179 by %c57_i32_123 dim 0 : vector<64x64xf32>, i32 -> vector<64x64xf32>
    %227 = vector.broadcast %25 : vector<64x1xf32> to vector<64x64xf32>
    %228 = arith.mulf %226, %227 : vector<64x64xf32>
    %229 = arith.truncf %228 : vector<64x64xf32> to vector<64x64xbf16>
    %c6_124 = arith.constant 6 : index
    %c0_125 = arith.constant 0 : index
    %c0_126 = arith.constant 0 : index
    %230 = vector.load %arg6[%c6_124, %c0_125, %c0_126] : memref<9x64x64xbf16, #tpu.memory_space<vmem>>, vector<1x64x64xbf16>
    %231 = vector.shape_cast %230 : vector<1x64x64xbf16> to vector<64x64xbf16>
    %cst_127 = arith.constant dense<0.000000e+00> : vector<64x64xf32>
    %232 = tpu.matmul %229, %231, %cst_127 {dimension_numbers = #tpu.dot_dimension_numbers<[1], [0], [0], [1], [0, 0, 1, 1], [], []>} : vector<64x64xbf16>, vector<64x64xbf16>, vector<64x64xf32> -> vector<64x64xf32>
    %233 = arith.addf %225, %232 : vector<64x64xf32>
    %c56_i32_128 = arith.constant 56 : i32
    %234 = tpu.dynamic_rotate %179 by %c56_i32_128 dim 0 : vector<64x64xf32>, i32 -> vector<64x64xf32>
    %235 = vector.broadcast %12 : vector<64x1xf32> to vector<64x64xf32>
    %236 = arith.mulf %234, %235 : vector<64x64xf32>
    %237 = arith.truncf %236 : vector<64x64xf32> to vector<64x64xbf16>
    %c7_129 = arith.constant 7 : index
    %c0_130 = arith.constant 0 : index
    %c0_131 = arith.constant 0 : index
    %238 = vector.load %arg6[%c7_129, %c0_130, %c0_131] : memref<9x64x64xbf16, #tpu.memory_space<vmem>>, vector<1x64x64xbf16>
    %239 = vector.shape_cast %238 : vector<1x64x64xbf16> to vector<64x64xbf16>
    %cst_132 = arith.constant dense<0.000000e+00> : vector<64x64xf32>
    %240 = tpu.matmul %237, %239, %cst_132 {dimension_numbers = #tpu.dot_dimension_numbers<[1], [0], [0], [1], [0, 0, 1, 1], [], []>} : vector<64x64xbf16>, vector<64x64xbf16>, vector<64x64xf32> -> vector<64x64xf32>
    %241 = arith.addf %233, %240 : vector<64x64xf32>
    %c55_i32_133 = arith.constant 55 : i32
    %242 = tpu.dynamic_rotate %179 by %c55_i32_133 dim 0 : vector<64x64xf32>, i32 -> vector<64x64xf32>
    %243 = vector.broadcast %26 : vector<64x1xf32> to vector<64x64xf32>
    %244 = arith.mulf %242, %243 : vector<64x64xf32>
    %245 = arith.truncf %244 : vector<64x64xf32> to vector<64x64xbf16>
    %c8_134 = arith.constant 8 : index
    %c0_135 = arith.constant 0 : index
    %c0_136 = arith.constant 0 : index
    %246 = vector.load %arg6[%c8_134, %c0_135, %c0_136] : memref<9x64x64xbf16, #tpu.memory_space<vmem>>, vector<1x64x64xbf16>
    %247 = vector.shape_cast %246 : vector<1x64x64xbf16> to vector<64x64xbf16>
    %cst_137 = arith.constant dense<0.000000e+00> : vector<64x64xf32>
    %248 = tpu.matmul %245, %247, %cst_137 {dimension_numbers = #tpu.dot_dimension_numbers<[1], [0], [0], [1], [0, 0, 1, 1], [], []>} : vector<64x64xbf16>, vector<64x64xbf16>, vector<64x64xf32> -> vector<64x64xf32>
    %249 = arith.addf %241, %248 : vector<64x64xf32>
    %c0_138 = arith.constant 0 : index
    %c0_139 = arith.constant 0 : index
    %250 = vector.load %arg7[%c0_138, %c0_139] : memref<1x64xf32, #tpu.memory_space<vmem>>, vector<1x64xf32>
    %251 = vector.broadcast %250 : vector<1x64xf32> to vector<64x64xf32>
    %252 = arith.addf %249, %251 : vector<64x64xf32>
    %cst_140 = arith.constant 0.000000e+00 : f32
    %253 = vector.broadcast %cst_140 : f32 to vector<64x64xf32>
    %254 = arith.maximumf %252, %253 : vector<64x64xf32>
    %cst_141 = arith.constant 0.000000e+00 : f32
    %255 = vector.broadcast %cst_141 : f32 to vector<64x64xf32>
    %c9_i32_142 = arith.constant 9 : i32
    %256 = tpu.dynamic_rotate %254 by %c9_i32_142 dim 0 : vector<64x64xf32>, i32 -> vector<64x64xf32>
    %257 = vector.broadcast %23 : vector<64x1xf32> to vector<64x64xf32>
    %258 = arith.mulf %256, %257 : vector<64x64xf32>
    %259 = arith.truncf %258 : vector<64x64xf32> to vector<64x64xbf16>
    %c0_143 = arith.constant 0 : index
    %c0_144 = arith.constant 0 : index
    %c0_145 = arith.constant 0 : index
    %260 = vector.load %arg8[%c0_143, %c0_144, %c0_145] : memref<9x64x64xbf16, #tpu.memory_space<vmem>>, vector<1x64x64xbf16>
    %261 = vector.shape_cast %260 : vector<1x64x64xbf16> to vector<64x64xbf16>
    %cst_146 = arith.constant dense<0.000000e+00> : vector<64x64xf32>
    %262 = tpu.matmul %259, %261, %cst_146 {dimension_numbers = #tpu.dot_dimension_numbers<[1], [0], [0], [1], [0, 0, 1, 1], [], []>} : vector<64x64xbf16>, vector<64x64xbf16>, vector<64x64xf32> -> vector<64x64xf32>
    %263 = arith.addf %255, %262 : vector<64x64xf32>
    %c8_i32_147 = arith.constant 8 : i32
    %264 = tpu.dynamic_rotate %254 by %c8_i32_147 dim 0 : vector<64x64xf32>, i32 -> vector<64x64xf32>
    %265 = vector.broadcast %7 : vector<64x1xf32> to vector<64x64xf32>
    %266 = arith.mulf %264, %265 : vector<64x64xf32>
    %267 = arith.truncf %266 : vector<64x64xf32> to vector<64x64xbf16>
    %c1_148 = arith.constant 1 : index
    %c0_149 = arith.constant 0 : index
    %c0_150 = arith.constant 0 : index
    %268 = vector.load %arg8[%c1_148, %c0_149, %c0_150] : memref<9x64x64xbf16, #tpu.memory_space<vmem>>, vector<1x64x64xbf16>
    %269 = vector.shape_cast %268 : vector<1x64x64xbf16> to vector<64x64xbf16>
    %cst_151 = arith.constant dense<0.000000e+00> : vector<64x64xf32>
    %270 = tpu.matmul %267, %269, %cst_151 {dimension_numbers = #tpu.dot_dimension_numbers<[1], [0], [0], [1], [0, 0, 1, 1], [], []>} : vector<64x64xbf16>, vector<64x64xbf16>, vector<64x64xf32> -> vector<64x64xf32>
    %271 = arith.addf %263, %270 : vector<64x64xf32>
    %c7_i32_152 = arith.constant 7 : i32
    %272 = tpu.dynamic_rotate %254 by %c7_i32_152 dim 0 : vector<64x64xf32>, i32 -> vector<64x64xf32>
    %273 = vector.broadcast %24 : vector<64x1xf32> to vector<64x64xf32>
    %274 = arith.mulf %272, %273 : vector<64x64xf32>
    %275 = arith.truncf %274 : vector<64x64xf32> to vector<64x64xbf16>
    %c2_153 = arith.constant 2 : index
    %c0_154 = arith.constant 0 : index
    %c0_155 = arith.constant 0 : index
    %276 = vector.load %arg8[%c2_153, %c0_154, %c0_155] : memref<9x64x64xbf16, #tpu.memory_space<vmem>>, vector<1x64x64xbf16>
    %277 = vector.shape_cast %276 : vector<1x64x64xbf16> to vector<64x64xbf16>
    %cst_156 = arith.constant dense<0.000000e+00> : vector<64x64xf32>
    %278 = tpu.matmul %275, %277, %cst_156 {dimension_numbers = #tpu.dot_dimension_numbers<[1], [0], [0], [1], [0, 0, 1, 1], [], []>} : vector<64x64xbf16>, vector<64x64xbf16>, vector<64x64xf32> -> vector<64x64xf32>
    %279 = arith.addf %271, %278 : vector<64x64xf32>
    %c1_i32_157 = arith.constant 1 : i32
    %280 = tpu.dynamic_rotate %254 by %c1_i32_157 dim 0 : vector<64x64xf32>, i32 -> vector<64x64xf32>
    %281 = vector.broadcast %17 : vector<64x1xf32> to vector<64x64xf32>
    %282 = arith.mulf %280, %281 : vector<64x64xf32>
    %283 = arith.truncf %282 : vector<64x64xf32> to vector<64x64xbf16>
    %c3_158 = arith.constant 3 : index
    %c0_159 = arith.constant 0 : index
    %c0_160 = arith.constant 0 : index
    %284 = vector.load %arg8[%c3_158, %c0_159, %c0_160] : memref<9x64x64xbf16, #tpu.memory_space<vmem>>, vector<1x64x64xbf16>
    %285 = vector.shape_cast %284 : vector<1x64x64xbf16> to vector<64x64xbf16>
    %cst_161 = arith.constant dense<0.000000e+00> : vector<64x64xf32>
    %286 = tpu.matmul %283, %285, %cst_161 {dimension_numbers = #tpu.dot_dimension_numbers<[1], [0], [0], [1], [0, 0, 1, 1], [], []>} : vector<64x64xbf16>, vector<64x64xbf16>, vector<64x64xf32> -> vector<64x64xf32>
    %287 = arith.addf %279, %286 : vector<64x64xf32>
    %288 = arith.truncf %254 : vector<64x64xf32> to vector<64x64xbf16>
    %c4_162 = arith.constant 4 : index
    %c0_163 = arith.constant 0 : index
    %c0_164 = arith.constant 0 : index
    %289 = vector.load %arg8[%c4_162, %c0_163, %c0_164] : memref<9x64x64xbf16, #tpu.memory_space<vmem>>, vector<1x64x64xbf16>
    %290 = vector.shape_cast %289 : vector<1x64x64xbf16> to vector<64x64xbf16>
    %cst_165 = arith.constant dense<0.000000e+00> : vector<64x64xf32>
    %291 = tpu.matmul %288, %290, %cst_165 {dimension_numbers = #tpu.dot_dimension_numbers<[1], [0], [0], [1], [0, 0, 1, 1], [], []>} : vector<64x64xbf16>, vector<64x64xbf16>, vector<64x64xf32> -> vector<64x64xf32>
    %292 = arith.addf %287, %291 : vector<64x64xf32>
    %c63_i32_166 = arith.constant 63 : i32
    %293 = tpu.dynamic_rotate %254 by %c63_i32_166 dim 0 : vector<64x64xf32>, i32 -> vector<64x64xf32>
    %294 = vector.broadcast %22 : vector<64x1xf32> to vector<64x64xf32>
    %295 = arith.mulf %293, %294 : vector<64x64xf32>
    %296 = arith.truncf %295 : vector<64x64xf32> to vector<64x64xbf16>
    %c5_167 = arith.constant 5 : index
    %c0_168 = arith.constant 0 : index
    %c0_169 = arith.constant 0 : index
    %297 = vector.load %arg8[%c5_167, %c0_168, %c0_169] : memref<9x64x64xbf16, #tpu.memory_space<vmem>>, vector<1x64x64xbf16>
    %298 = vector.shape_cast %297 : vector<1x64x64xbf16> to vector<64x64xbf16>
    %cst_170 = arith.constant dense<0.000000e+00> : vector<64x64xf32>
    %299 = tpu.matmul %296, %298, %cst_170 {dimension_numbers = #tpu.dot_dimension_numbers<[1], [0], [0], [1], [0, 0, 1, 1], [], []>} : vector<64x64xbf16>, vector<64x64xbf16>, vector<64x64xf32> -> vector<64x64xf32>
    %300 = arith.addf %292, %299 : vector<64x64xf32>
    %c57_i32_171 = arith.constant 57 : i32
    %301 = tpu.dynamic_rotate %254 by %c57_i32_171 dim 0 : vector<64x64xf32>, i32 -> vector<64x64xf32>
    %302 = vector.broadcast %25 : vector<64x1xf32> to vector<64x64xf32>
    %303 = arith.mulf %301, %302 : vector<64x64xf32>
    %304 = arith.truncf %303 : vector<64x64xf32> to vector<64x64xbf16>
    %c6_172 = arith.constant 6 : index
    %c0_173 = arith.constant 0 : index
    %c0_174 = arith.constant 0 : index
    %305 = vector.load %arg8[%c6_172, %c0_173, %c0_174] : memref<9x64x64xbf16, #tpu.memory_space<vmem>>, vector<1x64x64xbf16>
    %306 = vector.shape_cast %305 : vector<1x64x64xbf16> to vector<64x64xbf16>
    %cst_175 = arith.constant dense<0.000000e+00> : vector<64x64xf32>
    %307 = tpu.matmul %304, %306, %cst_175 {dimension_numbers = #tpu.dot_dimension_numbers<[1], [0], [0], [1], [0, 0, 1, 1], [], []>} : vector<64x64xbf16>, vector<64x64xbf16>, vector<64x64xf32> -> vector<64x64xf32>
    %308 = arith.addf %300, %307 : vector<64x64xf32>
    %c56_i32_176 = arith.constant 56 : i32
    %309 = tpu.dynamic_rotate %254 by %c56_i32_176 dim 0 : vector<64x64xf32>, i32 -> vector<64x64xf32>
    %310 = vector.broadcast %12 : vector<64x1xf32> to vector<64x64xf32>
    %311 = arith.mulf %309, %310 : vector<64x64xf32>
    %312 = arith.truncf %311 : vector<64x64xf32> to vector<64x64xbf16>
    %c7_177 = arith.constant 7 : index
    %c0_178 = arith.constant 0 : index
    %c0_179 = arith.constant 0 : index
    %313 = vector.load %arg8[%c7_177, %c0_178, %c0_179] : memref<9x64x64xbf16, #tpu.memory_space<vmem>>, vector<1x64x64xbf16>
    %314 = vector.shape_cast %313 : vector<1x64x64xbf16> to vector<64x64xbf16>
    %cst_180 = arith.constant dense<0.000000e+00> : vector<64x64xf32>
    %315 = tpu.matmul %312, %314, %cst_180 {dimension_numbers = #tpu.dot_dimension_numbers<[1], [0], [0], [1], [0, 0, 1, 1], [], []>} : vector<64x64xbf16>, vector<64x64xbf16>, vector<64x64xf32> -> vector<64x64xf32>
    %316 = arith.addf %308, %315 : vector<64x64xf32>
    %c55_i32_181 = arith.constant 55 : i32
    %317 = tpu.dynamic_rotate %254 by %c55_i32_181 dim 0 : vector<64x64xf32>, i32 -> vector<64x64xf32>
    %318 = vector.broadcast %26 : vector<64x1xf32> to vector<64x64xf32>
    %319 = arith.mulf %317, %318 : vector<64x64xf32>
    %320 = arith.truncf %319 : vector<64x64xf32> to vector<64x64xbf16>
    %c8_182 = arith.constant 8 : index
    %c0_183 = arith.constant 0 : index
    %c0_184 = arith.constant 0 : index
    %321 = vector.load %arg8[%c8_182, %c0_183, %c0_184] : memref<9x64x64xbf16, #tpu.memory_space<vmem>>, vector<1x64x64xbf16>
    %322 = vector.shape_cast %321 : vector<1x64x64xbf16> to vector<64x64xbf16>
    %cst_185 = arith.constant dense<0.000000e+00> : vector<64x64xf32>
    %323 = tpu.matmul %320, %322, %cst_185 {dimension_numbers = #tpu.dot_dimension_numbers<[1], [0], [0], [1], [0, 0, 1, 1], [], []>} : vector<64x64xbf16>, vector<64x64xbf16>, vector<64x64xf32> -> vector<64x64xf32>
    %324 = arith.addf %316, %323 : vector<64x64xf32>
    %c0_186 = arith.constant 0 : index
    %c0_187 = arith.constant 0 : index
    %325 = vector.load %arg9[%c0_186, %c0_187] : memref<1x64xf32, #tpu.memory_space<vmem>>, vector<1x64xf32>
    %326 = vector.broadcast %325 : vector<1x64xf32> to vector<64x64xf32>
    %327 = arith.addf %324, %326 : vector<64x64xf32>
    %328 = arith.addf %327, %179 : vector<64x64xf32>
    %cst_188 = arith.constant 0.000000e+00 : f32
    %329 = vector.broadcast %cst_188 : f32 to vector<64x64xf32>
    %330 = arith.maximumf %328, %329 : vector<64x64xf32>
    %331 = arith.truncf %330 : vector<64x64xf32> to vector<64x64xbf16>
    %c0_189 = arith.constant 0 : index
    %c0_190 = arith.constant 0 : index
    %332 = vector.load %arg10[%c0_189, %c0_190] : memref<64x64xbf16, #tpu.memory_space<vmem>>, vector<64x64xbf16>
    tpu.vector_store %arg10[%c0_189, %c0_190], %331 {strides = array<i32>} : memref<64x64xbf16, #tpu.memory_space<vmem>>, vector<64x64xbf16>,
    return
  }
  func.func @transform_0(%arg0: i32) -> (i32, i32) {
    %c0_i32 = arith.constant 0 : i32
    %c0_i32_0 = arith.constant 0 : i32
    return %arg0, %c0_i32 : i32, i32
  }
  func.func @transform_1(%arg0: i32) -> (i32, i32, i32) {
    %c0_i32 = arith.constant 0 : i32
    %c0_i32_0 = arith.constant 0 : i32
    %c0_i32_1 = arith.constant 0 : i32
    %c0_i32_2 = arith.constant 0 : i32
    return %c0_i32, %c0_i32_0, %c0_i32_1 : i32, i32, i32
  }
  func.func @transform_2(%arg0: i32) -> (i32, i32) {
    %c0_i32 = arith.constant 0 : i32
    %c0_i32_0 = arith.constant 0 : i32
    %c0_i32_1 = arith.constant 0 : i32
    return %c0_i32, %c0_i32_0 : i32, i32
  }
  func.func @transform_3(%arg0: i32) -> (i32, i32, i32) {
    %c0_i32 = arith.constant 0 : i32
    %c0_i32_0 = arith.constant 0 : i32
    %c0_i32_1 = arith.constant 0 : i32
    %c0_i32_2 = arith.constant 0 : i32
    return %c0_i32, %c0_i32_0, %c0_i32_1 : i32, i32, i32
  }
  func.func @transform_4(%arg0: i32) -> (i32, i32) {
    %c0_i32 = arith.constant 0 : i32
    %c0_i32_0 = arith.constant 0 : i32
    %c0_i32_1 = arith.constant 0 : i32
    return %c0_i32, %c0_i32_0 : i32, i32
  }
  func.func @transform_5(%arg0: i32) -> (i32, i32, i32) {
    %c0_i32 = arith.constant 0 : i32
    %c0_i32_0 = arith.constant 0 : i32
    %c0_i32_1 = arith.constant 0 : i32
    %c0_i32_2 = arith.constant 0 : i32
    return %c0_i32, %c0_i32_0, %c0_i32_1 : i32, i32, i32
  }
  func.func @transform_6(%arg0: i32) -> (i32, i32) {
    %c0_i32 = arith.constant 0 : i32
    %c0_i32_0 = arith.constant 0 : i32
    %c0_i32_1 = arith.constant 0 : i32
    return %c0_i32, %c0_i32_0 : i32, i32
  }
  func.func @transform_7(%arg0: i32) -> (i32, i32, i32) {
    %c0_i32 = arith.constant 0 : i32
    %c0_i32_0 = arith.constant 0 : i32
    %c0_i32_1 = arith.constant 0 : i32
    %c0_i32_2 = arith.constant 0 : i32
    return %c0_i32, %c0_i32_0, %c0_i32_1 : i32, i32, i32
  }
  func.func @transform_8(%arg0: i32) -> (i32, i32) {
    %c0_i32 = arith.constant 0 : i32
    %c0_i32_0 = arith.constant 0 : i32
    %c0_i32_1 = arith.constant 0 : i32
    return %c0_i32, %c0_i32_0 : i32, i32
  }
  func.func @transform_9(%arg0: i32) -> (i32, i32) {
    %c0_i32 = arith.constant 0 : i32
    %c0_i32_0 = arith.constant 0 : i32
    return %arg0, %c0_i32 : i32, i32
  }
}

module attributes {stable_mosaic.version = 11 : i64} {
  func.func @_down_stage_kernel(%arg0: i32, %arg1: memref<16x64xbf16, #tpu.memory_space<vmem>>, %arg2: memref<16x64xbf16, #tpu.memory_space<vmem>>, %arg3: memref<16x64xbf16, #tpu.memory_space<vmem>>, %arg4: memref<16x64xbf16, #tpu.memory_space<vmem>>, %arg5: memref<9x64x128xbf16, #tpu.memory_space<vmem>>, %arg6: memref<1x128xf32, #tpu.memory_space<vmem>>, %arg7: memref<64x128xbf16, #tpu.memory_space<vmem>>, %arg8: memref<1x128xf32, #tpu.memory_space<vmem>>, %arg9: memref<9x128x128xbf16, #tpu.memory_space<vmem>>, %arg10: memref<1x128xf32, #tpu.memory_space<vmem>>, %arg11: memref<9x128x128xbf16, #tpu.memory_space<vmem>>, %arg12: memref<1x128xf32, #tpu.memory_space<vmem>>, %arg13: memref<9x128x128xbf16, #tpu.memory_space<vmem>>, %arg14: memref<1x128xf32, #tpu.memory_space<vmem>>, %arg15: memref<16x128xbf16, #tpu.memory_space<vmem>>) attributes {dimension_semantics = [#tpu.dimension_semantics<parallel>], iteration_bounds = array<i64: 2>, scalar_prefetch = 0 : i64, scratch_operands = 0 : i64, tpu.core_type = #tpu.core_type<tc>, window_params = [{transform_indices = @transform_0, window_bounds = array<i64: 16, 64>}, {transform_indices = @transform_1, window_bounds = array<i64: 16, 64>}, {transform_indices = @transform_2, window_bounds = array<i64: 16, 64>}, {transform_indices = @transform_3, window_bounds = array<i64: 16, 64>}, {pipeline_mode = #tpu.pipeline_mode<synchronous>, transform_indices = @transform_4, window_bounds = array<i64: 9, 64, 128>}, {pipeline_mode = #tpu.pipeline_mode<synchronous>, transform_indices = @transform_5, window_bounds = array<i64: 1, 128>}, {pipeline_mode = #tpu.pipeline_mode<synchronous>, transform_indices = @transform_6, window_bounds = array<i64: 64, 128>}, {pipeline_mode = #tpu.pipeline_mode<synchronous>, transform_indices = @transform_7, window_bounds = array<i64: 1, 128>}, {pipeline_mode = #tpu.pipeline_mode<synchronous>, transform_indices = @transform_8, window_bounds = array<i64: 9, 128, 128>}, {pipeline_mode = #tpu.pipeline_mode<synchronous>, transform_indices = @transform_9, window_bounds = array<i64: 1, 128>}, {pipeline_mode = #tpu.pipeline_mode<synchronous>, transform_indices = @transform_10, window_bounds = array<i64: 9, 128, 128>}, {pipeline_mode = #tpu.pipeline_mode<synchronous>, transform_indices = @transform_11, window_bounds = array<i64: 1, 128>}, {pipeline_mode = #tpu.pipeline_mode<synchronous>, transform_indices = @transform_12, window_bounds = array<i64: 9, 128, 128>}, {pipeline_mode = #tpu.pipeline_mode<synchronous>, transform_indices = @transform_13, window_bounds = array<i64: 1, 128>}, {transform_indices = @transform_14, window_bounds = array<i64: 16, 128>}]} {
    %0 = tpu.iota {dimensions = array<i32: 0>} : vector<16x1xi32>
    %c3_i32 = arith.constant 3 : i32
    %1 = vector.broadcast %c3_i32 : i32 to vector<16x1xi32>
    %2 = arith.andi %0, %1 : vector<16x1xi32>
    %c4_i32 = arith.constant 4 : i32
    %3 = vector.broadcast %c4_i32 : i32 to vector<16x1xi32>
    %4 = arith.cmpi sge, %0, %3 : vector<16x1xi32>
    %cst = arith.constant 1.000000e+00 : f32
    %cst_0 = arith.constant 0.000000e+00 : f32
    %5 = vector.broadcast %cst : f32 to vector<16x1xf32>
    %6 = vector.broadcast %cst_0 : f32 to vector<16x1xf32>
    %7 = arith.select %4, %5, %6 : vector<16x1xi1>, vector<16x1xf32>
    %c12_i32 = arith.constant 12 : i32
    %8 = vector.broadcast %c12_i32 : i32 to vector<16x1xi32>
    %9 = arith.cmpi slt, %0, %8 : vector<16x1xi32>
    %cst_1 = arith.constant 1.000000e+00 : f32
    %cst_2 = arith.constant 0.000000e+00 : f32
    %10 = vector.broadcast %cst_1 : f32 to vector<16x1xf32>
    %11 = vector.broadcast %cst_2 : f32 to vector<16x1xf32>
    %12 = arith.select %9, %10, %11 : vector<16x1xi1>, vector<16x1xf32>
    %c1_i32 = arith.constant 1 : i32
    %13 = vector.broadcast %c1_i32 : i32 to vector<16x1xi32>
    %14 = arith.cmpi sge, %2, %13 : vector<16x1xi32>
    %cst_3 = arith.constant 1.000000e+00 : f32
    %cst_4 = arith.constant 0.000000e+00 : f32
    %15 = vector.broadcast %cst_3 : f32 to vector<16x1xf32>
    %16 = vector.broadcast %cst_4 : f32 to vector<16x1xf32>
    %17 = arith.select %14, %15, %16 : vector<16x1xi1>, vector<16x1xf32>
    %c3_i32_5 = arith.constant 3 : i32
    %18 = vector.broadcast %c3_i32_5 : i32 to vector<16x1xi32>
    %19 = arith.cmpi slt, %2, %18 : vector<16x1xi32>
    %cst_6 = arith.constant 1.000000e+00 : f32
    %cst_7 = arith.constant 0.000000e+00 : f32
    %20 = vector.broadcast %cst_6 : f32 to vector<16x1xf32>
    %21 = vector.broadcast %cst_7 : f32 to vector<16x1xf32>
    %22 = arith.select %19, %20, %21 : vector<16x1xi1>, vector<16x1xf32>
    %23 = arith.mulf %7, %17 : vector<16x1xf32>
    %24 = arith.mulf %7, %22 : vector<16x1xf32>
    %25 = arith.mulf %12, %17 : vector<16x1xf32>
    %26 = arith.mulf %12, %22 : vector<16x1xf32>
    %27 = arith.mulf %7, %17 : vector<16x1xf32>
    %c0 = arith.constant 0 : index
    %c0_8 = arith.constant 0 : index
    %28 = vector.load %arg1[%c0, %c0_8] : memref<16x64xbf16, #tpu.memory_space<vmem>>, vector<16x64xbf16>
    %29 = arith.extf %28 : vector<16x64xbf16> to vector<16x64xf32>
    %c0_9 = arith.constant 0 : index
    %c0_10 = arith.constant 0 : index
    %30 = vector.load %arg2[%c0_9, %c0_10] : memref<16x64xbf16, #tpu.memory_space<vmem>>, vector<16x64xbf16>
    %31 = arith.extf %30 : vector<16x64xbf16> to vector<16x64xf32>
    %c0_11 = arith.constant 0 : index
    %c0_12 = arith.constant 0 : index
    %32 = vector.load %arg3[%c0_11, %c0_12] : memref<16x64xbf16, #tpu.memory_space<vmem>>, vector<16x64xbf16>
    %33 = arith.extf %32 : vector<16x64xbf16> to vector<16x64xf32>
    %c0_13 = arith.constant 0 : index
    %c0_14 = arith.constant 0 : index
    %34 = vector.load %arg4[%c0_13, %c0_14] : memref<16x64xbf16, #tpu.memory_space<vmem>>, vector<16x64xbf16>
    %35 = arith.extf %34 : vector<16x64xbf16> to vector<16x64xf32>
    %cst_15 = arith.constant 0.000000e+00 : f32
    %36 = vector.broadcast %cst_15 : f32 to vector<16x128xf32>
    %c5_i32 = arith.constant 5 : i32
    %37 = tpu.dynamic_rotate %35 by %c5_i32 dim 0 : vector<16x64xf32>, i32 -> vector<16x64xf32>
    %38 = vector.broadcast %27 : vector<16x1xf32> to vector<16x64xf32>
    %39 = arith.mulf %37, %38 : vector<16x64xf32>
    %40 = arith.truncf %39 : vector<16x64xf32> to vector<16x64xbf16>
    %c0_16 = arith.constant 0 : index
    %c0_17 = arith.constant 0 : index
    %c0_18 = arith.constant 0 : index
    %41 = vector.load %arg5[%c0_16, %c0_17, %c0_18] : memref<9x64x128xbf16, #tpu.memory_space<vmem>>, vector<1x64x128xbf16>
    %42 = vector.shape_cast %41 : vector<1x64x128xbf16> to vector<64x128xbf16>
    %cst_19 = arith.constant dense<0.000000e+00> : vector<16x128xf32>
    %43 = tpu.matmul %40, %42, %cst_19 {dimension_numbers = #tpu.dot_dimension_numbers<[1], [0], [0], [1], [0, 0, 1, 1], [], []>} : vector<16x64xbf16>, vector<64x128xbf16>, vector<16x128xf32> -> vector<16x128xf32>
    %44 = arith.addf %36, %43 : vector<16x128xf32>
    %c4_i32_20 = arith.constant 4 : i32
    %45 = tpu.dynamic_rotate %33 by %c4_i32_20 dim 0 : vector<16x64xf32>, i32 -> vector<16x64xf32>
    %46 = vector.broadcast %7 : vector<16x1xf32> to vector<16x64xf32>
    %47 = arith.mulf %45, %46 : vector<16x64xf32>
    %48 = arith.truncf %47 : vector<16x64xf32> to vector<16x64xbf16>
    %c1 = arith.constant 1 : index
    %c0_21 = arith.constant 0 : index
    %c0_22 = arith.constant 0 : index
    %49 = vector.load %arg5[%c1, %c0_21, %c0_22] : memref<9x64x128xbf16, #tpu.memory_space<vmem>>, vector<1x64x128xbf16>
    %50 = vector.shape_cast %49 : vector<1x64x128xbf16> to vector<64x128xbf16>
    %cst_23 = arith.constant dense<0.000000e+00> : vector<16x128xf32>
    %51 = tpu.matmul %48, %50, %cst_23 {dimension_numbers = #tpu.dot_dimension_numbers<[1], [0], [0], [1], [0, 0, 1, 1], [], []>} : vector<16x64xbf16>, vector<64x128xbf16>, vector<16x128xf32> -> vector<16x128xf32>
    %52 = arith.addf %44, %51 : vector<16x128xf32>
    %c4_i32_24 = arith.constant 4 : i32
    %53 = tpu.dynamic_rotate %35 by %c4_i32_24 dim 0 : vector<16x64xf32>, i32 -> vector<16x64xf32>
    %54 = vector.broadcast %7 : vector<16x1xf32> to vector<16x64xf32>
    %55 = arith.mulf %53, %54 : vector<16x64xf32>
    %56 = arith.truncf %55 : vector<16x64xf32> to vector<16x64xbf16>
    %c2 = arith.constant 2 : index
    %c0_25 = arith.constant 0 : index
    %c0_26 = arith.constant 0 : index
    %57 = vector.load %arg5[%c2, %c0_25, %c0_26] : memref<9x64x128xbf16, #tpu.memory_space<vmem>>, vector<1x64x128xbf16>
    %58 = vector.shape_cast %57 : vector<1x64x128xbf16> to vector<64x128xbf16>
    %cst_27 = arith.constant dense<0.000000e+00> : vector<16x128xf32>
    %59 = tpu.matmul %56, %58, %cst_27 {dimension_numbers = #tpu.dot_dimension_numbers<[1], [0], [0], [1], [0, 0, 1, 1], [], []>} : vector<16x64xbf16>, vector<64x128xbf16>, vector<16x128xf32> -> vector<16x128xf32>
    %60 = arith.addf %52, %59 : vector<16x128xf32>
    %c1_i32_28 = arith.constant 1 : i32
    %61 = tpu.dynamic_rotate %31 by %c1_i32_28 dim 0 : vector<16x64xf32>, i32 -> vector<16x64xf32>
    %62 = vector.broadcast %17 : vector<16x1xf32> to vector<16x64xf32>
    %63 = arith.mulf %61, %62 : vector<16x64xf32>
    %64 = arith.truncf %63 : vector<16x64xf32> to vector<16x64xbf16>
    %c3 = arith.constant 3 : index
    %c0_29 = arith.constant 0 : index
    %c0_30 = arith.constant 0 : index
    %65 = vector.load %arg5[%c3, %c0_29, %c0_30] : memref<9x64x128xbf16, #tpu.memory_space<vmem>>, vector<1x64x128xbf16>
    %66 = vector.shape_cast %65 : vector<1x64x128xbf16> to vector<64x128xbf16>
    %cst_31 = arith.constant dense<0.000000e+00> : vector<16x128xf32>
    %67 = tpu.matmul %64, %66, %cst_31 {dimension_numbers = #tpu.dot_dimension_numbers<[1], [0], [0], [1], [0, 0, 1, 1], [], []>} : vector<16x64xbf16>, vector<64x128xbf16>, vector<16x128xf32> -> vector<16x128xf32>
    %68 = arith.addf %60, %67 : vector<16x128xf32>
    %69 = arith.truncf %29 : vector<16x64xf32> to vector<16x64xbf16>
    %c4 = arith.constant 4 : index
    %c0_32 = arith.constant 0 : index
    %c0_33 = arith.constant 0 : index
    %70 = vector.load %arg5[%c4, %c0_32, %c0_33] : memref<9x64x128xbf16, #tpu.memory_space<vmem>>, vector<1x64x128xbf16>
    %71 = vector.shape_cast %70 : vector<1x64x128xbf16> to vector<64x128xbf16>
    %cst_34 = arith.constant dense<0.000000e+00> : vector<16x128xf32>
    %72 = tpu.matmul %69, %71, %cst_34 {dimension_numbers = #tpu.dot_dimension_numbers<[1], [0], [0], [1], [0, 0, 1, 1], [], []>} : vector<16x64xbf16>, vector<64x128xbf16>, vector<16x128xf32> -> vector<16x128xf32>
    %73 = arith.addf %68, %72 : vector<16x128xf32>
    %74 = arith.truncf %31 : vector<16x64xf32> to vector<16x64xbf16>
    %c5 = arith.constant 5 : index
    %c0_35 = arith.constant 0 : index
    %c0_36 = arith.constant 0 : index
    %75 = vector.load %arg5[%c5, %c0_35, %c0_36] : memref<9x64x128xbf16, #tpu.memory_space<vmem>>, vector<1x64x128xbf16>
    %76 = vector.shape_cast %75 : vector<1x64x128xbf16> to vector<64x128xbf16>
    %cst_37 = arith.constant dense<0.000000e+00> : vector<16x128xf32>
    %77 = tpu.matmul %74, %76, %cst_37 {dimension_numbers = #tpu.dot_dimension_numbers<[1], [0], [0], [1], [0, 0, 1, 1], [], []>} : vector<16x64xbf16>, vector<64x128xbf16>, vector<16x128xf32> -> vector<16x128xf32>
    %78 = arith.addf %73, %77 : vector<16x128xf32>
    %c1_i32_38 = arith.constant 1 : i32
    %79 = tpu.dynamic_rotate %35 by %c1_i32_38 dim 0 : vector<16x64xf32>, i32 -> vector<16x64xf32>
    %80 = vector.broadcast %17 : vector<16x1xf32> to vector<16x64xf32>
    %81 = arith.mulf %79, %80 : vector<16x64xf32>
    %82 = arith.truncf %81 : vector<16x64xf32> to vector<16x64xbf16>
    %c6 = arith.constant 6 : index
    %c0_39 = arith.constant 0 : index
    %c0_40 = arith.constant 0 : index
    %83 = vector.load %arg5[%c6, %c0_39, %c0_40] : memref<9x64x128xbf16, #tpu.memory_space<vmem>>, vector<1x64x128xbf16>
    %84 = vector.shape_cast %83 : vector<1x64x128xbf16> to vector<64x128xbf16>
    %cst_41 = arith.constant dense<0.000000e+00> : vector<16x128xf32>
    %85 = tpu.matmul %82, %84, %cst_41 {dimension_numbers = #tpu.dot_dimension_numbers<[1], [0], [0], [1], [0, 0, 1, 1], [], []>} : vector<16x64xbf16>, vector<64x128xbf16>, vector<16x128xf32> -> vector<16x128xf32>
    %86 = arith.addf %78, %85 : vector<16x128xf32>
    %87 = arith.truncf %33 : vector<16x64xf32> to vector<16x64xbf16>
    %c7 = arith.constant 7 : index
    %c0_42 = arith.constant 0 : index
    %c0_43 = arith.constant 0 : index
    %88 = vector.load %arg5[%c7, %c0_42, %c0_43] : memref<9x64x128xbf16, #tpu.memory_space<vmem>>, vector<1x64x128xbf16>
    %89 = vector.shape_cast %88 : vector<1x64x128xbf16> to vector<64x128xbf16>
    %cst_44 = arith.constant dense<0.000000e+00> : vector<16x128xf32>
    %90 = tpu.matmul %87, %89, %cst_44 {dimension_numbers = #tpu.dot_dimension_numbers<[1], [0], [0], [1], [0, 0, 1, 1], [], []>} : vector<16x64xbf16>, vector<64x128xbf16>, vector<16x128xf32> -> vector<16x128xf32>
    %91 = arith.addf %86, %90 : vector<16x128xf32>
    %92 = arith.truncf %35 : vector<16x64xf32> to vector<16x64xbf16>
    %c8 = arith.constant 8 : index
    %c0_45 = arith.constant 0 : index
    %c0_46 = arith.constant 0 : index
    %93 = vector.load %arg5[%c8, %c0_45, %c0_46] : memref<9x64x128xbf16, #tpu.memory_space<vmem>>, vector<1x64x128xbf16>
    %94 = vector.shape_cast %93 : vector<1x64x128xbf16> to vector<64x128xbf16>
    %cst_47 = arith.constant dense<0.000000e+00> : vector<16x128xf32>
    %95 = tpu.matmul %92, %94, %cst_47 {dimension_numbers = #tpu.dot_dimension_numbers<[1], [0], [0], [1], [0, 0, 1, 1], [], []>} : vector<16x64xbf16>, vector<64x128xbf16>, vector<16x128xf32> -> vector<16x128xf32>
    %96 = arith.addf %91, %95 : vector<16x128xf32>
    %c0_48 = arith.constant 0 : index
    %c0_49 = arith.constant 0 : index
    %97 = vector.load %arg6[%c0_48, %c0_49] : memref<1x128xf32, #tpu.memory_space<vmem>>, vector<1x128xf32>
    %98 = vector.broadcast %97 : vector<1x128xf32> to vector<16x128xf32>
    %99 = arith.addf %96, %98 : vector<16x128xf32>
    %cst_50 = arith.constant 0.000000e+00 : f32
    %100 = vector.broadcast %cst_50 : f32 to vector<16x128xf32>
    %101 = arith.maximumf %99, %100 : vector<16x128xf32>
    %c0_51 = arith.constant 0 : index
    %c0_52 = arith.constant 0 : index
    %102 = vector.load %arg1[%c0_51, %c0_52] : memref<16x64xbf16, #tpu.memory_space<vmem>>, vector<16x64xbf16>
    %c0_53 = arith.constant 0 : index
    %c0_54 = arith.constant 0 : index
    %103 = vector.load %arg7[%c0_53, %c0_54] : memref<64x128xbf16, #tpu.memory_space<vmem>>, vector<64x128xbf16>
    %cst_55 = arith.constant dense<0.000000e+00> : vector<16x128xf32>
    %104 = tpu.matmul %102, %103, %cst_55 {dimension_numbers = #tpu.dot_dimension_numbers<[1], [0], [0], [1], [0, 0, 1, 1], [], []>} : vector<16x64xbf16>, vector<64x128xbf16>, vector<16x128xf32> -> vector<16x128xf32>
    %c0_56 = arith.constant 0 : index
    %c0_57 = arith.constant 0 : index
    %105 = vector.load %arg8[%c0_56, %c0_57] : memref<1x128xf32, #tpu.memory_space<vmem>>, vector<1x128xf32>
    %106 = vector.broadcast %105 : vector<1x128xf32> to vector<16x128xf32>
    %107 = arith.addf %104, %106 : vector<16x128xf32>
    %cst_58 = arith.constant 0.000000e+00 : f32
    %108 = vector.broadcast %cst_58 : f32 to vector<16x128xf32>
    %c5_i32_59 = arith.constant 5 : i32
    %109 = tpu.dynamic_rotate %101 by %c5_i32_59 dim 0 : vector<16x128xf32>, i32 -> vector<16x128xf32>
    %110 = vector.broadcast %23 : vector<16x1xf32> to vector<16x128xf32>
    %111 = arith.mulf %109, %110 : vector<16x128xf32>
    %112 = arith.truncf %111 : vector<16x128xf32> to vector<16x128xbf16>
    %c0_60 = arith.constant 0 : index
    %c0_61 = arith.constant 0 : index
    %c0_62 = arith.constant 0 : index
    %113 = vector.load %arg9[%c0_60, %c0_61, %c0_62] : memref<9x128x128xbf16, #tpu.memory_space<vmem>>, vector<1x128x128xbf16>
    %114 = vector.shape_cast %113 : vector<1x128x128xbf16> to vector<128x128xbf16>
    %cst_63 = arith.constant dense<0.000000e+00> : vector<16x128xf32>
    %115 = tpu.matmul %112, %114, %cst_63 {dimension_numbers = #tpu.dot_dimension_numbers<[1], [0], [0], [1], [0, 0, 1, 1], [], []>} : vector<16x128xbf16>, vector<128x128xbf16>, vector<16x128xf32> -> vector<16x128xf32>
    %116 = arith.addf %108, %115 : vector<16x128xf32>
    %c4_i32_64 = arith.constant 4 : i32
    %117 = tpu.dynamic_rotate %101 by %c4_i32_64 dim 0 : vector<16x128xf32>, i32 -> vector<16x128xf32>
    %118 = vector.broadcast %7 : vector<16x1xf32> to vector<16x128xf32>
    %119 = arith.mulf %117, %118 : vector<16x128xf32>
    %120 = arith.truncf %119 : vector<16x128xf32> to vector<16x128xbf16>
    %c1_65 = arith.constant 1 : index
    %c0_66 = arith.constant 0 : index
    %c0_67 = arith.constant 0 : index
    %121 = vector.load %arg9[%c1_65, %c0_66, %c0_67] : memref<9x128x128xbf16, #tpu.memory_space<vmem>>, vector<1x128x128xbf16>
    %122 = vector.shape_cast %121 : vector<1x128x128xbf16> to vector<128x128xbf16>
    %cst_68 = arith.constant dense<0.000000e+00> : vector<16x128xf32>
    %123 = tpu.matmul %120, %122, %cst_68 {dimension_numbers = #tpu.dot_dimension_numbers<[1], [0], [0], [1], [0, 0, 1, 1], [], []>} : vector<16x128xbf16>, vector<128x128xbf16>, vector<16x128xf32> -> vector<16x128xf32>
    %124 = arith.addf %116, %123 : vector<16x128xf32>
    %c3_i32_69 = arith.constant 3 : i32
    %125 = tpu.dynamic_rotate %101 by %c3_i32_69 dim 0 : vector<16x128xf32>, i32 -> vector<16x128xf32>
    %126 = vector.broadcast %24 : vector<16x1xf32> to vector<16x128xf32>
    %127 = arith.mulf %125, %126 : vector<16x128xf32>
    %128 = arith.truncf %127 : vector<16x128xf32> to vector<16x128xbf16>
    %c2_70 = arith.constant 2 : index
    %c0_71 = arith.constant 0 : index
    %c0_72 = arith.constant 0 : index
    %129 = vector.load %arg9[%c2_70, %c0_71, %c0_72] : memref<9x128x128xbf16, #tpu.memory_space<vmem>>, vector<1x128x128xbf16>
    %130 = vector.shape_cast %129 : vector<1x128x128xbf16> to vector<128x128xbf16>
    %cst_73 = arith.constant dense<0.000000e+00> : vector<16x128xf32>
    %131 = tpu.matmul %128, %130, %cst_73 {dimension_numbers = #tpu.dot_dimension_numbers<[1], [0], [0], [1], [0, 0, 1, 1], [], []>} : vector<16x128xbf16>, vector<128x128xbf16>, vector<16x128xf32> -> vector<16x128xf32>
    %132 = arith.addf %124, %131 : vector<16x128xf32>
    %c1_i32_74 = arith.constant 1 : i32
    %133 = tpu.dynamic_rotate %101 by %c1_i32_74 dim 0 : vector<16x128xf32>, i32 -> vector<16x128xf32>
    %134 = vector.broadcast %17 : vector<16x1xf32> to vector<16x128xf32>
    %135 = arith.mulf %133, %134 : vector<16x128xf32>
    %136 = arith.truncf %135 : vector<16x128xf32> to vector<16x128xbf16>
    %c3_75 = arith.constant 3 : index
    %c0_76 = arith.constant 0 : index
    %c0_77 = arith.constant 0 : index
    %137 = vector.load %arg9[%c3_75, %c0_76, %c0_77] : memref<9x128x128xbf16, #tpu.memory_space<vmem>>, vector<1x128x128xbf16>
    %138 = vector.shape_cast %137 : vector<1x128x128xbf16> to vector<128x128xbf16>
    %cst_78 = arith.constant dense<0.000000e+00> : vector<16x128xf32>
    %139 = tpu.matmul %136, %138, %cst_78 {dimension_numbers = #tpu.dot_dimension_numbers<[1], [0], [0], [1], [0, 0, 1, 1], [], []>} : vector<16x128xbf16>, vector<128x128xbf16>, vector<16x128xf32> -> vector<16x128xf32>
    %140 = arith.addf %132, %139 : vector<16x128xf32>
    %141 = arith.truncf %101 : vector<16x128xf32> to vector<16x128xbf16>
    %c4_79 = arith.constant 4 : index
    %c0_80 = arith.constant 0 : index
    %c0_81 = arith.constant 0 : index
    %142 = vector.load %arg9[%c4_79, %c0_80, %c0_81] : memref<9x128x128xbf16, #tpu.memory_space<vmem>>, vector<1x128x128xbf16>
    %143 = vector.shape_cast %142 : vector<1x128x128xbf16> to vector<128x128xbf16>
    %cst_82 = arith.constant dense<0.000000e+00> : vector<16x128xf32>
    %144 = tpu.matmul %141, %143, %cst_82 {dimension_numbers = #tpu.dot_dimension_numbers<[1], [0], [0], [1], [0, 0, 1, 1], [], []>} : vector<16x128xbf16>, vector<128x128xbf16>, vector<16x128xf32> -> vector<16x128xf32>
    %145 = arith.addf %140, %144 : vector<16x128xf32>
    %c15_i32 = arith.constant 15 : i32
    %146 = tpu.dynamic_rotate %101 by %c15_i32 dim 0 : vector<16x128xf32>, i32 -> vector<16x128xf32>
    %147 = vector.broadcast %22 : vector<16x1xf32> to vector<16x128xf32>
    %148 = arith.mulf %146, %147 : vector<16x128xf32>
    %149 = arith.truncf %148 : vector<16x128xf32> to vector<16x128xbf16>
    %c5_83 = arith.constant 5 : index
    %c0_84 = arith.constant 0 : index
    %c0_85 = arith.constant 0 : index
    %150 = vector.load %arg9[%c5_83, %c0_84, %c0_85] : memref<9x128x128xbf16, #tpu.memory_space<vmem>>, vector<1x128x128xbf16>
    %151 = vector.shape_cast %150 : vector<1x128x128xbf16> to vector<128x128xbf16>
    %cst_86 = arith.constant dense<0.000000e+00> : vector<16x128xf32>
    %152 = tpu.matmul %149, %151, %cst_86 {dimension_numbers = #tpu.dot_dimension_numbers<[1], [0], [0], [1], [0, 0, 1, 1], [], []>} : vector<16x128xbf16>, vector<128x128xbf16>, vector<16x128xf32> -> vector<16x128xf32>
    %153 = arith.addf %145, %152 : vector<16x128xf32>
    %c13_i32 = arith.constant 13 : i32
    %154 = tpu.dynamic_rotate %101 by %c13_i32 dim 0 : vector<16x128xf32>, i32 -> vector<16x128xf32>
    %155 = vector.broadcast %25 : vector<16x1xf32> to vector<16x128xf32>
    %156 = arith.mulf %154, %155 : vector<16x128xf32>
    %157 = arith.truncf %156 : vector<16x128xf32> to vector<16x128xbf16>
    %c6_87 = arith.constant 6 : index
    %c0_88 = arith.constant 0 : index
    %c0_89 = arith.constant 0 : index
    %158 = vector.load %arg9[%c6_87, %c0_88, %c0_89] : memref<9x128x128xbf16, #tpu.memory_space<vmem>>, vector<1x128x128xbf16>
    %159 = vector.shape_cast %158 : vector<1x128x128xbf16> to vector<128x128xbf16>
    %cst_90 = arith.constant dense<0.000000e+00> : vector<16x128xf32>
    %160 = tpu.matmul %157, %159, %cst_90 {dimension_numbers = #tpu.dot_dimension_numbers<[1], [0], [0], [1], [0, 0, 1, 1], [], []>} : vector<16x128xbf16>, vector<128x128xbf16>, vector<16x128xf32> -> vector<16x128xf32>
    %161 = arith.addf %153, %160 : vector<16x128xf32>
    %c12_i32_91 = arith.constant 12 : i32
    %162 = tpu.dynamic_rotate %101 by %c12_i32_91 dim 0 : vector<16x128xf32>, i32 -> vector<16x128xf32>
    %163 = vector.broadcast %12 : vector<16x1xf32> to vector<16x128xf32>
    %164 = arith.mulf %162, %163 : vector<16x128xf32>
    %165 = arith.truncf %164 : vector<16x128xf32> to vector<16x128xbf16>
    %c7_92 = arith.constant 7 : index
    %c0_93 = arith.constant 0 : index
    %c0_94 = arith.constant 0 : index
    %166 = vector.load %arg9[%c7_92, %c0_93, %c0_94] : memref<9x128x128xbf16, #tpu.memory_space<vmem>>, vector<1x128x128xbf16>
    %167 = vector.shape_cast %166 : vector<1x128x128xbf16> to vector<128x128xbf16>
    %cst_95 = arith.constant dense<0.000000e+00> : vector<16x128xf32>
    %168 = tpu.matmul %165, %167, %cst_95 {dimension_numbers = #tpu.dot_dimension_numbers<[1], [0], [0], [1], [0, 0, 1, 1], [], []>} : vector<16x128xbf16>, vector<128x128xbf16>, vector<16x128xf32> -> vector<16x128xf32>
    %169 = arith.addf %161, %168 : vector<16x128xf32>
    %c11_i32 = arith.constant 11 : i32
    %170 = tpu.dynamic_rotate %101 by %c11_i32 dim 0 : vector<16x128xf32>, i32 -> vector<16x128xf32>
    %171 = vector.broadcast %26 : vector<16x1xf32> to vector<16x128xf32>
    %172 = arith.mulf %170, %171 : vector<16x128xf32>
    %173 = arith.truncf %172 : vector<16x128xf32> to vector<16x128xbf16>
    %c8_96 = arith.constant 8 : index
    %c0_97 = arith.constant 0 : index
    %c0_98 = arith.constant 0 : index
    %174 = vector.load %arg9[%c8_96, %c0_97, %c0_98] : memref<9x128x128xbf16, #tpu.memory_space<vmem>>, vector<1x128x128xbf16>
    %175 = vector.shape_cast %174 : vector<1x128x128xbf16> to vector<128x128xbf16>
    %cst_99 = arith.constant dense<0.000000e+00> : vector<16x128xf32>
    %176 = tpu.matmul %173, %175, %cst_99 {dimension_numbers = #tpu.dot_dimension_numbers<[1], [0], [0], [1], [0, 0, 1, 1], [], []>} : vector<16x128xbf16>, vector<128x128xbf16>, vector<16x128xf32> -> vector<16x128xf32>
    %177 = arith.addf %169, %176 : vector<16x128xf32>
    %c0_100 = arith.constant 0 : index
    %c0_101 = arith.constant 0 : index
    %178 = vector.load %arg10[%c0_100, %c0_101] : memref<1x128xf32, #tpu.memory_space<vmem>>, vector<1x128xf32>
    %179 = vector.broadcast %178 : vector<1x128xf32> to vector<16x128xf32>
    %180 = arith.addf %177, %179 : vector<16x128xf32>
    %181 = arith.addf %180, %107 : vector<16x128xf32>
    %cst_102 = arith.constant 0.000000e+00 : f32
    %182 = vector.broadcast %cst_102 : f32 to vector<16x128xf32>
    %183 = arith.maximumf %181, %182 : vector<16x128xf32>
    %cst_103 = arith.constant 0.000000e+00 : f32
    %184 = vector.broadcast %cst_103 : f32 to vector<16x128xf32>
    %c5_i32_104 = arith.constant 5 : i32
    %185 = tpu.dynamic_rotate %183 by %c5_i32_104 dim 0 : vector<16x128xf32>, i32 -> vector<16x128xf32>
    %186 = vector.broadcast %23 : vector<16x1xf32> to vector<16x128xf32>
    %187 = arith.mulf %185, %186 : vector<16x128xf32>
    %188 = arith.truncf %187 : vector<16x128xf32> to vector<16x128xbf16>
    %c0_105 = arith.constant 0 : index
    %c0_106 = arith.constant 0 : index
    %c0_107 = arith.constant 0 : index
    %189 = vector.load %arg11[%c0_105, %c0_106, %c0_107] : memref<9x128x128xbf16, #tpu.memory_space<vmem>>, vector<1x128x128xbf16>
    %190 = vector.shape_cast %189 : vector<1x128x128xbf16> to vector<128x128xbf16>
    %cst_108 = arith.constant dense<0.000000e+00> : vector<16x128xf32>
    %191 = tpu.matmul %188, %190, %cst_108 {dimension_numbers = #tpu.dot_dimension_numbers<[1], [0], [0], [1], [0, 0, 1, 1], [], []>} : vector<16x128xbf16>, vector<128x128xbf16>, vector<16x128xf32> -> vector<16x128xf32>
    %192 = arith.addf %184, %191 : vector<16x128xf32>
    %c4_i32_109 = arith.constant 4 : i32
    %193 = tpu.dynamic_rotate %183 by %c4_i32_109 dim 0 : vector<16x128xf32>, i32 -> vector<16x128xf32>
    %194 = vector.broadcast %7 : vector<16x1xf32> to vector<16x128xf32>
    %195 = arith.mulf %193, %194 : vector<16x128xf32>
    %196 = arith.truncf %195 : vector<16x128xf32> to vector<16x128xbf16>
    %c1_110 = arith.constant 1 : index
    %c0_111 = arith.constant 0 : index
    %c0_112 = arith.constant 0 : index
    %197 = vector.load %arg11[%c1_110, %c0_111, %c0_112] : memref<9x128x128xbf16, #tpu.memory_space<vmem>>, vector<1x128x128xbf16>
    %198 = vector.shape_cast %197 : vector<1x128x128xbf16> to vector<128x128xbf16>
    %cst_113 = arith.constant dense<0.000000e+00> : vector<16x128xf32>
    %199 = tpu.matmul %196, %198, %cst_113 {dimension_numbers = #tpu.dot_dimension_numbers<[1], [0], [0], [1], [0, 0, 1, 1], [], []>} : vector<16x128xbf16>, vector<128x128xbf16>, vector<16x128xf32> -> vector<16x128xf32>
    %200 = arith.addf %192, %199 : vector<16x128xf32>
    %c3_i32_114 = arith.constant 3 : i32
    %201 = tpu.dynamic_rotate %183 by %c3_i32_114 dim 0 : vector<16x128xf32>, i32 -> vector<16x128xf32>
    %202 = vector.broadcast %24 : vector<16x1xf32> to vector<16x128xf32>
    %203 = arith.mulf %201, %202 : vector<16x128xf32>
    %204 = arith.truncf %203 : vector<16x128xf32> to vector<16x128xbf16>
    %c2_115 = arith.constant 2 : index
    %c0_116 = arith.constant 0 : index
    %c0_117 = arith.constant 0 : index
    %205 = vector.load %arg11[%c2_115, %c0_116, %c0_117] : memref<9x128x128xbf16, #tpu.memory_space<vmem>>, vector<1x128x128xbf16>
    %206 = vector.shape_cast %205 : vector<1x128x128xbf16> to vector<128x128xbf16>
    %cst_118 = arith.constant dense<0.000000e+00> : vector<16x128xf32>
    %207 = tpu.matmul %204, %206, %cst_118 {dimension_numbers = #tpu.dot_dimension_numbers<[1], [0], [0], [1], [0, 0, 1, 1], [], []>} : vector<16x128xbf16>, vector<128x128xbf16>, vector<16x128xf32> -> vector<16x128xf32>
    %208 = arith.addf %200, %207 : vector<16x128xf32>
    %c1_i32_119 = arith.constant 1 : i32
    %209 = tpu.dynamic_rotate %183 by %c1_i32_119 dim 0 : vector<16x128xf32>, i32 -> vector<16x128xf32>
    %210 = vector.broadcast %17 : vector<16x1xf32> to vector<16x128xf32>
    %211 = arith.mulf %209, %210 : vector<16x128xf32>
    %212 = arith.truncf %211 : vector<16x128xf32> to vector<16x128xbf16>
    %c3_120 = arith.constant 3 : index
    %c0_121 = arith.constant 0 : index
    %c0_122 = arith.constant 0 : index
    %213 = vector.load %arg11[%c3_120, %c0_121, %c0_122] : memref<9x128x128xbf16, #tpu.memory_space<vmem>>, vector<1x128x128xbf16>
    %214 = vector.shape_cast %213 : vector<1x128x128xbf16> to vector<128x128xbf16>
    %cst_123 = arith.constant dense<0.000000e+00> : vector<16x128xf32>
    %215 = tpu.matmul %212, %214, %cst_123 {dimension_numbers = #tpu.dot_dimension_numbers<[1], [0], [0], [1], [0, 0, 1, 1], [], []>} : vector<16x128xbf16>, vector<128x128xbf16>, vector<16x128xf32> -> vector<16x128xf32>
    %216 = arith.addf %208, %215 : vector<16x128xf32>
    %217 = arith.truncf %183 : vector<16x128xf32> to vector<16x128xbf16>
    %c4_124 = arith.constant 4 : index
    %c0_125 = arith.constant 0 : index
    %c0_126 = arith.constant 0 : index
    %218 = vector.load %arg11[%c4_124, %c0_125, %c0_126] : memref<9x128x128xbf16, #tpu.memory_space<vmem>>, vector<1x128x128xbf16>
    %219 = vector.shape_cast %218 : vector<1x128x128xbf16> to vector<128x128xbf16>
    %cst_127 = arith.constant dense<0.000000e+00> : vector<16x128xf32>
    %220 = tpu.matmul %217, %219, %cst_127 {dimension_numbers = #tpu.dot_dimension_numbers<[1], [0], [0], [1], [0, 0, 1, 1], [], []>} : vector<16x128xbf16>, vector<128x128xbf16>, vector<16x128xf32> -> vector<16x128xf32>
    %221 = arith.addf %216, %220 : vector<16x128xf32>
    %c15_i32_128 = arith.constant 15 : i32
    %222 = tpu.dynamic_rotate %183 by %c15_i32_128 dim 0 : vector<16x128xf32>, i32 -> vector<16x128xf32>
    %223 = vector.broadcast %22 : vector<16x1xf32> to vector<16x128xf32>
    %224 = arith.mulf %222, %223 : vector<16x128xf32>
    %225 = arith.truncf %224 : vector<16x128xf32> to vector<16x128xbf16>
    %c5_129 = arith.constant 5 : index
    %c0_130 = arith.constant 0 : index
    %c0_131 = arith.constant 0 : index
    %226 = vector.load %arg11[%c5_129, %c0_130, %c0_131] : memref<9x128x128xbf16, #tpu.memory_space<vmem>>, vector<1x128x128xbf16>
    %227 = vector.shape_cast %226 : vector<1x128x128xbf16> to vector<128x128xbf16>
    %cst_132 = arith.constant dense<0.000000e+00> : vector<16x128xf32>
    %228 = tpu.matmul %225, %227, %cst_132 {dimension_numbers = #tpu.dot_dimension_numbers<[1], [0], [0], [1], [0, 0, 1, 1], [], []>} : vector<16x128xbf16>, vector<128x128xbf16>, vector<16x128xf32> -> vector<16x128xf32>
    %229 = arith.addf %221, %228 : vector<16x128xf32>
    %c13_i32_133 = arith.constant 13 : i32
    %230 = tpu.dynamic_rotate %183 by %c13_i32_133 dim 0 : vector<16x128xf32>, i32 -> vector<16x128xf32>
    %231 = vector.broadcast %25 : vector<16x1xf32> to vector<16x128xf32>
    %232 = arith.mulf %230, %231 : vector<16x128xf32>
    %233 = arith.truncf %232 : vector<16x128xf32> to vector<16x128xbf16>
    %c6_134 = arith.constant 6 : index
    %c0_135 = arith.constant 0 : index
    %c0_136 = arith.constant 0 : index
    %234 = vector.load %arg11[%c6_134, %c0_135, %c0_136] : memref<9x128x128xbf16, #tpu.memory_space<vmem>>, vector<1x128x128xbf16>
    %235 = vector.shape_cast %234 : vector<1x128x128xbf16> to vector<128x128xbf16>
    %cst_137 = arith.constant dense<0.000000e+00> : vector<16x128xf32>
    %236 = tpu.matmul %233, %235, %cst_137 {dimension_numbers = #tpu.dot_dimension_numbers<[1], [0], [0], [1], [0, 0, 1, 1], [], []>} : vector<16x128xbf16>, vector<128x128xbf16>, vector<16x128xf32> -> vector<16x128xf32>
    %237 = arith.addf %229, %236 : vector<16x128xf32>
    %c12_i32_138 = arith.constant 12 : i32
    %238 = tpu.dynamic_rotate %183 by %c12_i32_138 dim 0 : vector<16x128xf32>, i32 -> vector<16x128xf32>
    %239 = vector.broadcast %12 : vector<16x1xf32> to vector<16x128xf32>
    %240 = arith.mulf %238, %239 : vector<16x128xf32>
    %241 = arith.truncf %240 : vector<16x128xf32> to vector<16x128xbf16>
    %c7_139 = arith.constant 7 : index
    %c0_140 = arith.constant 0 : index
    %c0_141 = arith.constant 0 : index
    %242 = vector.load %arg11[%c7_139, %c0_140, %c0_141] : memref<9x128x128xbf16, #tpu.memory_space<vmem>>, vector<1x128x128xbf16>
    %243 = vector.shape_cast %242 : vector<1x128x128xbf16> to vector<128x128xbf16>
    %cst_142 = arith.constant dense<0.000000e+00> : vector<16x128xf32>
    %244 = tpu.matmul %241, %243, %cst_142 {dimension_numbers = #tpu.dot_dimension_numbers<[1], [0], [0], [1], [0, 0, 1, 1], [], []>} : vector<16x128xbf16>, vector<128x128xbf16>, vector<16x128xf32> -> vector<16x128xf32>
    %245 = arith.addf %237, %244 : vector<16x128xf32>
    %c11_i32_143 = arith.constant 11 : i32
    %246 = tpu.dynamic_rotate %183 by %c11_i32_143 dim 0 : vector<16x128xf32>, i32 -> vector<16x128xf32>
    %247 = vector.broadcast %26 : vector<16x1xf32> to vector<16x128xf32>
    %248 = arith.mulf %246, %247 : vector<16x128xf32>
    %249 = arith.truncf %248 : vector<16x128xf32> to vector<16x128xbf16>
    %c8_144 = arith.constant 8 : index
    %c0_145 = arith.constant 0 : index
    %c0_146 = arith.constant 0 : index
    %250 = vector.load %arg11[%c8_144, %c0_145, %c0_146] : memref<9x128x128xbf16, #tpu.memory_space<vmem>>, vector<1x128x128xbf16>
    %251 = vector.shape_cast %250 : vector<1x128x128xbf16> to vector<128x128xbf16>
    %cst_147 = arith.constant dense<0.000000e+00> : vector<16x128xf32>
    %252 = tpu.matmul %249, %251, %cst_147 {dimension_numbers = #tpu.dot_dimension_numbers<[1], [0], [0], [1], [0, 0, 1, 1], [], []>} : vector<16x128xbf16>, vector<128x128xbf16>, vector<16x128xf32> -> vector<16x128xf32>
    %253 = arith.addf %245, %252 : vector<16x128xf32>
    %c0_148 = arith.constant 0 : index
    %c0_149 = arith.constant 0 : index
    %254 = vector.load %arg12[%c0_148, %c0_149] : memref<1x128xf32, #tpu.memory_space<vmem>>, vector<1x128xf32>
    %255 = vector.broadcast %254 : vector<1x128xf32> to vector<16x128xf32>
    %256 = arith.addf %253, %255 : vector<16x128xf32>
    %cst_150 = arith.constant 0.000000e+00 : f32
    %257 = vector.broadcast %cst_150 : f32 to vector<16x128xf32>
    %258 = arith.maximumf %256, %257 : vector<16x128xf32>
    %cst_151 = arith.constant 0.000000e+00 : f32
    %259 = vector.broadcast %cst_151 : f32 to vector<16x128xf32>
    %c5_i32_152 = arith.constant 5 : i32
    %260 = tpu.dynamic_rotate %258 by %c5_i32_152 dim 0 : vector<16x128xf32>, i32 -> vector<16x128xf32>
    %261 = vector.broadcast %23 : vector<16x1xf32> to vector<16x128xf32>
    %262 = arith.mulf %260, %261 : vector<16x128xf32>
    %263 = arith.truncf %262 : vector<16x128xf32> to vector<16x128xbf16>
    %c0_153 = arith.constant 0 : index
    %c0_154 = arith.constant 0 : index
    %c0_155 = arith.constant 0 : index
    %264 = vector.load %arg13[%c0_153, %c0_154, %c0_155] : memref<9x128x128xbf16, #tpu.memory_space<vmem>>, vector<1x128x128xbf16>
    %265 = vector.shape_cast %264 : vector<1x128x128xbf16> to vector<128x128xbf16>
    %cst_156 = arith.constant dense<0.000000e+00> : vector<16x128xf32>
    %266 = tpu.matmul %263, %265, %cst_156 {dimension_numbers = #tpu.dot_dimension_numbers<[1], [0], [0], [1], [0, 0, 1, 1], [], []>} : vector<16x128xbf16>, vector<128x128xbf16>, vector<16x128xf32> -> vector<16x128xf32>
    %267 = arith.addf %259, %266 : vector<16x128xf32>
    %c4_i32_157 = arith.constant 4 : i32
    %268 = tpu.dynamic_rotate %258 by %c4_i32_157 dim 0 : vector<16x128xf32>, i32 -> vector<16x128xf32>
    %269 = vector.broadcast %7 : vector<16x1xf32> to vector<16x128xf32>
    %270 = arith.mulf %268, %269 : vector<16x128xf32>
    %271 = arith.truncf %270 : vector<16x128xf32> to vector<16x128xbf16>
    %c1_158 = arith.constant 1 : index
    %c0_159 = arith.constant 0 : index
    %c0_160 = arith.constant 0 : index
    %272 = vector.load %arg13[%c1_158, %c0_159, %c0_160] : memref<9x128x128xbf16, #tpu.memory_space<vmem>>, vector<1x128x128xbf16>
    %273 = vector.shape_cast %272 : vector<1x128x128xbf16> to vector<128x128xbf16>
    %cst_161 = arith.constant dense<0.000000e+00> : vector<16x128xf32>
    %274 = tpu.matmul %271, %273, %cst_161 {dimension_numbers = #tpu.dot_dimension_numbers<[1], [0], [0], [1], [0, 0, 1, 1], [], []>} : vector<16x128xbf16>, vector<128x128xbf16>, vector<16x128xf32> -> vector<16x128xf32>
    %275 = arith.addf %267, %274 : vector<16x128xf32>
    %c3_i32_162 = arith.constant 3 : i32
    %276 = tpu.dynamic_rotate %258 by %c3_i32_162 dim 0 : vector<16x128xf32>, i32 -> vector<16x128xf32>
    %277 = vector.broadcast %24 : vector<16x1xf32> to vector<16x128xf32>
    %278 = arith.mulf %276, %277 : vector<16x128xf32>
    %279 = arith.truncf %278 : vector<16x128xf32> to vector<16x128xbf16>
    %c2_163 = arith.constant 2 : index
    %c0_164 = arith.constant 0 : index
    %c0_165 = arith.constant 0 : index
    %280 = vector.load %arg13[%c2_163, %c0_164, %c0_165] : memref<9x128x128xbf16, #tpu.memory_space<vmem>>, vector<1x128x128xbf16>
    %281 = vector.shape_cast %280 : vector<1x128x128xbf16> to vector<128x128xbf16>
    %cst_166 = arith.constant dense<0.000000e+00> : vector<16x128xf32>
    %282 = tpu.matmul %279, %281, %cst_166 {dimension_numbers = #tpu.dot_dimension_numbers<[1], [0], [0], [1], [0, 0, 1, 1], [], []>} : vector<16x128xbf16>, vector<128x128xbf16>, vector<16x128xf32> -> vector<16x128xf32>
    %283 = arith.addf %275, %282 : vector<16x128xf32>
    %c1_i32_167 = arith.constant 1 : i32
    %284 = tpu.dynamic_rotate %258 by %c1_i32_167 dim 0 : vector<16x128xf32>, i32 -> vector<16x128xf32>
    %285 = vector.broadcast %17 : vector<16x1xf32> to vector<16x128xf32>
    %286 = arith.mulf %284, %285 : vector<16x128xf32>
    %287 = arith.truncf %286 : vector<16x128xf32> to vector<16x128xbf16>
    %c3_168 = arith.constant 3 : index
    %c0_169 = arith.constant 0 : index
    %c0_170 = arith.constant 0 : index
    %288 = vector.load %arg13[%c3_168, %c0_169, %c0_170] : memref<9x128x128xbf16, #tpu.memory_space<vmem>>, vector<1x128x128xbf16>
    %289 = vector.shape_cast %288 : vector<1x128x128xbf16> to vector<128x128xbf16>
    %cst_171 = arith.constant dense<0.000000e+00> : vector<16x128xf32>
    %290 = tpu.matmul %287, %289, %cst_171 {dimension_numbers = #tpu.dot_dimension_numbers<[1], [0], [0], [1], [0, 0, 1, 1], [], []>} : vector<16x128xbf16>, vector<128x128xbf16>, vector<16x128xf32> -> vector<16x128xf32>
    %291 = arith.addf %283, %290 : vector<16x128xf32>
    %292 = arith.truncf %258 : vector<16x128xf32> to vector<16x128xbf16>
    %c4_172 = arith.constant 4 : index
    %c0_173 = arith.constant 0 : index
    %c0_174 = arith.constant 0 : index
    %293 = vector.load %arg13[%c4_172, %c0_173, %c0_174] : memref<9x128x128xbf16, #tpu.memory_space<vmem>>, vector<1x128x128xbf16>
    %294 = vector.shape_cast %293 : vector<1x128x128xbf16> to vector<128x128xbf16>
    %cst_175 = arith.constant dense<0.000000e+00> : vector<16x128xf32>
    %295 = tpu.matmul %292, %294, %cst_175 {dimension_numbers = #tpu.dot_dimension_numbers<[1], [0], [0], [1], [0, 0, 1, 1], [], []>} : vector<16x128xbf16>, vector<128x128xbf16>, vector<16x128xf32> -> vector<16x128xf32>
    %296 = arith.addf %291, %295 : vector<16x128xf32>
    %c15_i32_176 = arith.constant 15 : i32
    %297 = tpu.dynamic_rotate %258 by %c15_i32_176 dim 0 : vector<16x128xf32>, i32 -> vector<16x128xf32>
    %298 = vector.broadcast %22 : vector<16x1xf32> to vector<16x128xf32>
    %299 = arith.mulf %297, %298 : vector<16x128xf32>
    %300 = arith.truncf %299 : vector<16x128xf32> to vector<16x128xbf16>
    %c5_177 = arith.constant 5 : index
    %c0_178 = arith.constant 0 : index
    %c0_179 = arith.constant 0 : index
    %301 = vector.load %arg13[%c5_177, %c0_178, %c0_179] : memref<9x128x128xbf16, #tpu.memory_space<vmem>>, vector<1x128x128xbf16>
    %302 = vector.shape_cast %301 : vector<1x128x128xbf16> to vector<128x128xbf16>
    %cst_180 = arith.constant dense<0.000000e+00> : vector<16x128xf32>
    %303 = tpu.matmul %300, %302, %cst_180 {dimension_numbers = #tpu.dot_dimension_numbers<[1], [0], [0], [1], [0, 0, 1, 1], [], []>} : vector<16x128xbf16>, vector<128x128xbf16>, vector<16x128xf32> -> vector<16x128xf32>
    %304 = arith.addf %296, %303 : vector<16x128xf32>
    %c13_i32_181 = arith.constant 13 : i32
    %305 = tpu.dynamic_rotate %258 by %c13_i32_181 dim 0 : vector<16x128xf32>, i32 -> vector<16x128xf32>
    %306 = vector.broadcast %25 : vector<16x1xf32> to vector<16x128xf32>
    %307 = arith.mulf %305, %306 : vector<16x128xf32>
    %308 = arith.truncf %307 : vector<16x128xf32> to vector<16x128xbf16>
    %c6_182 = arith.constant 6 : index
    %c0_183 = arith.constant 0 : index
    %c0_184 = arith.constant 0 : index
    %309 = vector.load %arg13[%c6_182, %c0_183, %c0_184] : memref<9x128x128xbf16, #tpu.memory_space<vmem>>, vector<1x128x128xbf16>
    %310 = vector.shape_cast %309 : vector<1x128x128xbf16> to vector<128x128xbf16>
    %cst_185 = arith.constant dense<0.000000e+00> : vector<16x128xf32>
    %311 = tpu.matmul %308, %310, %cst_185 {dimension_numbers = #tpu.dot_dimension_numbers<[1], [0], [0], [1], [0, 0, 1, 1], [], []>} : vector<16x128xbf16>, vector<128x128xbf16>, vector<16x128xf32> -> vector<16x128xf32>
    %312 = arith.addf %304, %311 : vector<16x128xf32>
    %c12_i32_186 = arith.constant 12 : i32
    %313 = tpu.dynamic_rotate %258 by %c12_i32_186 dim 0 : vector<16x128xf32>, i32 -> vector<16x128xf32>
    %314 = vector.broadcast %12 : vector<16x1xf32> to vector<16x128xf32>
    %315 = arith.mulf %313, %314 : vector<16x128xf32>
    %316 = arith.truncf %315 : vector<16x128xf32> to vector<16x128xbf16>
    %c7_187 = arith.constant 7 : index
    %c0_188 = arith.constant 0 : index
    %c0_189 = arith.constant 0 : index
    %317 = vector.load %arg13[%c7_187, %c0_188, %c0_189] : memref<9x128x128xbf16, #tpu.memory_space<vmem>>, vector<1x128x128xbf16>
    %318 = vector.shape_cast %317 : vector<1x128x128xbf16> to vector<128x128xbf16>
    %cst_190 = arith.constant dense<0.000000e+00> : vector<16x128xf32>
    %319 = tpu.matmul %316, %318, %cst_190 {dimension_numbers = #tpu.dot_dimension_numbers<[1], [0], [0], [1], [0, 0, 1, 1], [], []>} : vector<16x128xbf16>, vector<128x128xbf16>, vector<16x128xf32> -> vector<16x128xf32>
    %320 = arith.addf %312, %319 : vector<16x128xf32>
    %c11_i32_191 = arith.constant 11 : i32
    %321 = tpu.dynamic_rotate %258 by %c11_i32_191 dim 0 : vector<16x128xf32>, i32 -> vector<16x128xf32>
    %322 = vector.broadcast %26 : vector<16x1xf32> to vector<16x128xf32>
    %323 = arith.mulf %321, %322 : vector<16x128xf32>
    %324 = arith.truncf %323 : vector<16x128xf32> to vector<16x128xbf16>
    %c8_192 = arith.constant 8 : index
    %c0_193 = arith.constant 0 : index
    %c0_194 = arith.constant 0 : index
    %325 = vector.load %arg13[%c8_192, %c0_193, %c0_194] : memref<9x128x128xbf16, #tpu.memory_space<vmem>>, vector<1x128x128xbf16>
    %326 = vector.shape_cast %325 : vector<1x128x128xbf16> to vector<128x128xbf16>
    %cst_195 = arith.constant dense<0.000000e+00> : vector<16x128xf32>
    %327 = tpu.matmul %324, %326, %cst_195 {dimension_numbers = #tpu.dot_dimension_numbers<[1], [0], [0], [1], [0, 0, 1, 1], [], []>} : vector<16x128xbf16>, vector<128x128xbf16>, vector<16x128xf32> -> vector<16x128xf32>
    %328 = arith.addf %320, %327 : vector<16x128xf32>
    %c0_196 = arith.constant 0 : index
    %c0_197 = arith.constant 0 : index
    %329 = vector.load %arg14[%c0_196, %c0_197] : memref<1x128xf32, #tpu.memory_space<vmem>>, vector<1x128xf32>
    %330 = vector.broadcast %329 : vector<1x128xf32> to vector<16x128xf32>
    %331 = arith.addf %328, %330 : vector<16x128xf32>
    %332 = arith.addf %331, %183 : vector<16x128xf32>
    %cst_198 = arith.constant 0.000000e+00 : f32
    %333 = vector.broadcast %cst_198 : f32 to vector<16x128xf32>
    %334 = arith.maximumf %332, %333 : vector<16x128xf32>
    %335 = arith.truncf %334 : vector<16x128xf32> to vector<16x128xbf16>
    %c0_199 = arith.constant 0 : index
    %c0_200 = arith.constant 0 : index
    %336 = vector.load %arg15[%c0_199, %c0_200] : memref<16x128xbf16, #tpu.memory_space<vmem>>, vector<16x128xbf16>
    tpu.vector_store %arg15[%c0_199, %c0_200], %335 {strides = array<i32>} : memref<16x128xbf16, #tpu.memory_space<vmem>>, vector<16x128xbf16>,
    return
  }
  func.func @transform_0(%arg0: i32) -> (i32, i32) {
    %c0_i32 = arith.constant 0 : i32
    %c0_i32_0 = arith.constant 0 : i32
    return %arg0, %c0_i32 : i32, i32
  }
  func.func @transform_1(%arg0: i32) -> (i32, i32) {
    %c0_i32 = arith.constant 0 : i32
    %c0_i32_0 = arith.constant 0 : i32
    return %arg0, %c0_i32 : i32, i32
  }
  func.func @transform_2(%arg0: i32) -> (i32, i32) {
    %c0_i32 = arith.constant 0 : i32
    %c0_i32_0 = arith.constant 0 : i32
    return %arg0, %c0_i32 : i32, i32
  }
  func.func @transform_3(%arg0: i32) -> (i32, i32) {
    %c0_i32 = arith.constant 0 : i32
    %c0_i32_0 = arith.constant 0 : i32
    return %arg0, %c0_i32 : i32, i32
  }
  func.func @transform_4(%arg0: i32) -> (i32, i32, i32) {
    %c0_i32 = arith.constant 0 : i32
    %c0_i32_0 = arith.constant 0 : i32
    %c0_i32_1 = arith.constant 0 : i32
    %c0_i32_2 = arith.constant 0 : i32
    return %c0_i32, %c0_i32_0, %c0_i32_1 : i32, i32, i32
  }
  func.func @transform_5(%arg0: i32) -> (i32, i32) {
    %c0_i32 = arith.constant 0 : i32
    %c0_i32_0 = arith.constant 0 : i32
    %c0_i32_1 = arith.constant 0 : i32
    return %c0_i32, %c0_i32_0 : i32, i32
  }
  func.func @transform_6(%arg0: i32) -> (i32, i32) {
    %c0_i32 = arith.constant 0 : i32
    %c0_i32_0 = arith.constant 0 : i32
    %c0_i32_1 = arith.constant 0 : i32
    return %c0_i32, %c0_i32_0 : i32, i32
  }
  func.func @transform_7(%arg0: i32) -> (i32, i32) {
    %c0_i32 = arith.constant 0 : i32
    %c0_i32_0 = arith.constant 0 : i32
    %c0_i32_1 = arith.constant 0 : i32
    return %c0_i32, %c0_i32_0 : i32, i32
  }
  func.func @transform_8(%arg0: i32) -> (i32, i32, i32) {
    %c0_i32 = arith.constant 0 : i32
    %c0_i32_0 = arith.constant 0 : i32
    %c0_i32_1 = arith.constant 0 : i32
    %c0_i32_2 = arith.constant 0 : i32
    return %c0_i32, %c0_i32_0, %c0_i32_1 : i32, i32, i32
  }
  func.func @transform_9(%arg0: i32) -> (i32, i32) {
    %c0_i32 = arith.constant 0 : i32
    %c0_i32_0 = arith.constant 0 : i32
    %c0_i32_1 = arith.constant 0 : i32
    return %c0_i32, %c0_i32_0 : i32, i32
  }
  func.func @transform_10(%arg0: i32) -> (i32, i32, i32) {
    %c0_i32 = arith.constant 0 : i32
    %c0_i32_0 = arith.constant 0 : i32
    %c0_i32_1 = arith.constant 0 : i32
    %c0_i32_2 = arith.constant 0 : i32
    return %c0_i32, %c0_i32_0, %c0_i32_1 : i32, i32, i32
  }
  func.func @transform_11(%arg0: i32) -> (i32, i32) {
    %c0_i32 = arith.constant 0 : i32
    %c0_i32_0 = arith.constant 0 : i32
    %c0_i32_1 = arith.constant 0 : i32
    return %c0_i32, %c0_i32_0 : i32, i32
  }
  func.func @transform_12(%arg0: i32) -> (i32, i32, i32) {
    %c0_i32 = arith.constant 0 : i32
    %c0_i32_0 = arith.constant 0 : i32
    %c0_i32_1 = arith.constant 0 : i32
    %c0_i32_2 = arith.constant 0 : i32
    return %c0_i32, %c0_i32_0, %c0_i32_1 : i32, i32, i32
  }
  func.func @transform_13(%arg0: i32) -> (i32, i32) {
    %c0_i32 = arith.constant 0 : i32
    %c0_i32_0 = arith.constant 0 : i32
    %c0_i32_1 = arith.constant 0 : i32
    return %c0_i32, %c0_i32_0 : i32, i32
  }
  func.func @transform_14(%arg0: i32) -> (i32, i32) {
    %c0_i32 = arith.constant 0 : i32
    %c0_i32_0 = arith.constant 0 : i32
    return %arg0, %c0_i32 : i32, i32
  }
}

</mosaic_0001>

<bundles_post_ra>
// kernel: resnet_forward.3
= control target key start
LH: loop header
LB: loop body
LE: loop exit
PB: predicated region body
PF: predicated region fallthrough
CT: control target
= control target key end

     0   :  { %s984_s12 = smov 0   ;;  %s1148_s0 = inlined_call_operand.vmem [shape: bf16[512,9], index: 0, kind: input, shape index: {}]   ;;  %s1149_s1 = inlined_call_operand.vmem [shape: bf16[9,64], index: 1, kind: input, shape index: {}]   ;;  %s1150_s2 = inlined_call_operand.vmem [shape: f32[1,64], index: 2, kind: input, shape index: {}]   ;;  %s1151_s3 = inlined_call_operand.vmem [shape: bf16[512,64], index: 3, kind: output, shape index: {}]  }
   0x1 LB: > { %s767_s13 = sadd.s32 4294967295, %s961_s12   ;;  %p771_p0 = scmp.ge.s32.totalorder %s961_s12, 1  ;;  %s961_s12 = sphi %s984_s12, %s13_s12  }
   0x2   : > { %p138_p1 = scmp.lt.s32.totalorder %s961_s12, 3 }
   0x4   : > { %p139_p2 = pnand %p771_p0, %p138_p1 }
   0x5   : > { %v938_v0 = vld [vmem:[%s1149_s1] sm:$0x1f] (!%p139_p2)   ;;  %vm350_vm0 = vcmask (!%p139_p2), 1043456   ;;  %vm351_vm1 = vcmask (!%p139_p2), 1044480   ;;  %s772_s16 = sshll.u32 (!%p139_p2), %s767_s13, 5  ;;  %v963_v1 = vmov (!%p139_p2), 65535  }
   0x6   : > { %142 = sbr.rel (%p139_p2) target bundleno = 265 (0x109), region = 32  ;;  %v352_v2 = vsel (!%p139_p2), %vm350_vm0, 4294967295, %v963_v1  ;;  %p163_p3 = scmp.lt.s32.totalorder (!%p139_p2), %s772_s16, 63  ;;  %vm301_vm2 = vcmask (!%p139_p2), 72704   ;;  %v1040_v21 = vld [vmem:[%s1150_s2] ss:$0 sm:$0xff] (!%p139_p2) }
   0x7   : > { %v353_v3 = vsel (!%p139_p2), %vm351_vm1, %v352_v2, 0  ;;  %vm678_vm3 = vcmask (!%p139_p2), 519168  }
   0x8   : > { %v355_v4 = vand.u32 (!%p139_p2), %v938_v0, %v353_v3 }
   0xa   : > { %893 = vmatprep.subr.bf16.mxu0 (!%p139_p2), %v355_v4  ;;  %927 = vmatprep.subr.bf16.mxu1 (!%p139_p2), %v355_v4 }
   0xb   : > { %894 = vmatpush3.bf16.msra.mxu0 (!%p139_p2), %v355_v4  ;;  %928 = vmatpush3.bf16.msra.mxu1 (!%p139_p2), %v355_v4 }
   0xd   : > { %s1153_s16 = smov (!%p163_p3, %s772_s16), 63 }
   0xe   : > { %s773_s17 = sshll.u32 %s1153_s16, 2 }
   0xf   : > { %s1003_s20 = scalar_lea.vmem %s1148_s0, %s773_s17  ;;  %s1052_s25 = scalar_lea.vmem %s1151_s3, %s773_s17 }
  0x10   : > { %v939_v5 = vld [vmem:[%s1003_s20] sm:$0xff]   ;;  %v941_v7 = vld [vmem:[%s1003_s20 + $0x8] sm:$0xff]   ;;  %v943_v9 = vld [vmem:[%s1003_s20 + $0x10] sm:$0xff]  }
  0x11   : > { %v940_v6 = vld [vmem:[%s1003_s20 + $0x40] sm:$0xff]   ;;  %895 = vmatprep.mubr.msk.bf16.mxu0 %vm301_vm2, %v939_v5  ;;  %v942_v8 = vld [vmem:[%s1003_s20 + $0x48] sm:$0xff]   ;;  %v944_v10 = vld [vmem:[%s1003_s20 + $0x50] sm:$0xff]  }
  0x12   : > { %911 = vmatprep.mubr.msk.bf16.mxu1 %vm301_vm2, %v940_v6  ;;  %896 = vmatmul.mubr.msk.bf16.vlgmr.msra.gmra.mrb[0].mxu0 %vm301_vm2, %v941_v7  ;;  %v945_v11 = vld [vmem:[%s1003_s20 + $0x18] sm:$0xff]   ;;  %v947_v13 = vld [vmem:[%s1003_s20 + $0x20] sm:$0xff]   ;;  %v949_v15 = vld [vmem:[%s1003_s20 + $0x28] sm:$0xff]  }
  0x13   : > { %912 = vmatmul.mubr.msk.bf16.vlgmr.msra.gmra.mrb[0].mxu1 %vm301_vm2, %v942_v8  ;;  %899 = vmatprep.mubr.msk.bf16.mxu0 %vm301_vm2, %v943_v9  ;;  %v946_v12 = vld [vmem:[%s1003_s20 + $0x58] sm:$0xff]   ;;  %v948_v14 = vld [vmem:[%s1003_s20 + $0x60] sm:$0xff]   ;;  %v950_v16 = vld [vmem:[%s1003_s20 + $0x68] sm:$0xff]  }
  0x14   : > { %915 = vmatprep.mubr.msk.bf16.mxu1 %vm301_vm2, %v944_v10  ;;  %v951_v17 = vld [vmem:[%s1003_s20 + $0x30] sm:$0xff]   ;;  %v953_v19 = vld [vmem:[%s1003_s20 + $0x38] sm:$0xff]  }
  0x15   : > { %v952_v18 = vld [vmem:[%s1003_s20 + $0x70] sm:$0xff]   ;;  %v954_v20 = vld [vmem:[%s1003_s20 + $0x78] sm:$0xff]  }
  0x1a   : > { %900 = vmatmul.mubr.msk.bf16.gmra.mrb[4].mxu0 %vm301_vm2, %v945_v11 }
  0x1b   : > { %916 = vmatmul.mubr.msk.bf16.gmra.mrb[4].mxu1 %vm301_vm2, %v946_v12  ;;  %903 = vmatprep.mubr.msk.bf16.mxu0 %vm301_vm2, %v947_v13 }
  0x1c   : > { %919 = vmatprep.mubr.msk.bf16.mxu1 %vm301_vm2, %v948_v14 }
  0x22   : > { %904 = vmatmul.mubr.msk.bf16.gmra.mrb[8].mxu0 %vm301_vm2, %v949_v15 }
  0x23   : > { %920 = vmatmul.mubr.msk.bf16.gmra.mrb[8].mxu1 %vm301_vm2, %v950_v16  ;;  %907 = vmatprep.mubr.msk.bf16.mxu0 %vm301_vm2, %v951_v17 }
  0x24   : > { %923 = vmatprep.mubr.msk.bf16.mxu1 %vm301_vm2, %v952_v18 }
  0x2a   : > { %908 = vmatmul.mubr.msk.bf16.gmra.mrb[12].mxu0 %vm301_vm2, %v953_v19 }
  0x2b   : > { %924 = vmatmul.mubr.msk.bf16.gmra.mrb[12].mxu1 %vm301_vm2, %v954_v20 }
  0xe5   : > { %v897_v22 = vpop.f32.mrb[0].mxu0 }
  0xe6   : > { %v400_v23 = vadd.f32 %v897_v22, %v1040_v21  ;;  %v913_v24 = vpop.f32.mrb[0].mxu1  ;;  %v391_v25 = vpop.f32.mrb[1].mxu0 }
  0xe7   : > { %v464_v26 = vadd.f32 %v913_v24, %v1040_v21  ;;  %v392_v27 = vadd.f32 %v1040_v21, %v391_v25  ;;  %v455_v28 = vpop.f32.mrb[1].mxu1  ;;  %v898_v29 = vpop.f32.mrb[2].mxu0 }
  0xe8   : > { %v520_v30 = vmax.f32 %v400_v23, 0.0  ;;  %v456_v31 = vadd.f32 %v1040_v21, %v455_v28  ;;  %v403_v32 = vadd.f32 %v898_v29, %v1040_v21  ;;  %v914_v33 = vpop.f32.mrb[2].mxu1  ;;  %v394_v34 = vpop.f32.mrb[3].mxu0 }
  0xe9   : > { %v536_v35 = vmax.f32 %v464_v26, 0.0  ;;  %v518_v36 = vmax.f32 %v392_v27, 0.0  ;;  %v467_v37 = vadd.f32 %v914_v33, %v1040_v21  ;;  %v395_v38 = vadd.f32 %v1040_v21, %v394_v34  ;;  %v458_v39 = vpop.f32.mrb[3].mxu1 }
  0xea   : > { %v846_v40 = vpack.c.bf16 %v520_v30, %v520_v30  ;;  %v534_v41 = vmax.f32 %v456_v31, 0.0  ;;  %v521_v42 = vmax.f32 %v403_v32, 0.0  ;;  %v459_v43 = vadd.f32 %v1040_v21, %v458_v39 }
  0xeb   : > { %v862_v44 = vpack.c.bf16 %v536_v35, %v536_v35  ;;  %v844_v45 = vpack.c.bf16 %v518_v36, %v518_v36  ;;  %v537_v46 = vmax.f32 %v467_v37, 0.0  ;;  %v519_v47 = vmax.f32 %v395_v38, 0.0 }
  0xec   : > { %681 = vst.msk [vmem:[%s1052_s25 + $0x8] sm:$0xf] %vm678_vm3, %v846_v40  ;;  %v860_v48 = vpack.c.bf16 %v534_v41, %v534_v41  ;;  %v847_v49 = vpack.c.bf16 %v521_v42, %v521_v42  ;;  %v535_v50 = vmax.f32 %v459_v43, 0.0 }
  0xed   : > { %697 = vst.msk [vmem:[%s1052_s25 + $0x48] sm:$0xf] %vm678_vm3, %v862_v44  ;;  %679 = vst.msk [vmem:[%s1052_s25] sm:$0xf] %vm678_vm3, %v844_v45  ;;  %v863_v51 = vpack.c.bf16 %v537_v46, %v537_v46  ;;  %v845_v52 = vpack.c.bf16 %v519_v47, %v519_v47  ;;  %v901_v53 = vpop.f32.mrb[4].mxu0 }
  0xee   : > { %695 = vst.msk [vmem:[%s1052_s25 + $0x40] sm:$0xf] %vm678_vm3, %v860_v48  ;;  %682 = vst.msk [vmem:[%s1052_s25 + $0xc] sm:$0xf] %vm678_vm3, %v847_v49  ;;  %v861_v54 = vpack.c.bf16 %v535_v50, %v535_v50  ;;  %v416_v55 = vadd.f32 %v901_v53, %v1040_v21  ;;  %v917_v56 = vpop.f32.mrb[4].mxu1  ;;  %v407_v57 = vpop.f32.mrb[5].mxu0 }
  0xef   : > { %698 = vst.msk [vmem:[%s1052_s25 + $0x4c] sm:$0xf] %vm678_vm3, %v863_v51  ;;  %680 = vst.msk [vmem:[%s1052_s25 + $0x4] sm:$0xf] %vm678_vm3, %v845_v52  ;;  %v480_v58 = vadd.f32 %v917_v56, %v1040_v21  ;;  %v408_v59 = vadd.f32 %v1040_v21, %v407_v57  ;;  %v471_v60 = vpop.f32.mrb[5].mxu1  ;;  %v902_v61 = vpop.f32.mrb[6].mxu0 }
  0xf0   : > { %696 = vst.msk [vmem:[%s1052_s25 + $0x44] sm:$0xf] %vm678_vm3, %v861_v54  ;;  %v524_v62 = vmax.f32 %v416_v55, 0.0  ;;  %v472_v63 = vadd.f32 %v1040_v21, %v471_v60  ;;  %v419_v0 = vadd.f32 %v902_v61, %v1040_v21  ;;  %v918_v1 = vpop.f32.mrb[6].mxu1  ;;  %v410_v2 = vpop.f32.mrb[7].mxu0 }
  0xf1   : > { %v540_v3 = vmax.f32 %v480_v58, 0.0  ;;  %v522_v4 = vmax.f32 %v408_v59, 0.0  ;;  %v483_v5 = vadd.f32 %v918_v1, %v1040_v21  ;;  %v411_v6 = vadd.f32 %v1040_v21, %v410_v2  ;;  %v474_v7 = vpop.f32.mrb[7].mxu1 }
  0xf2   : > { %v850_v8 = vpack.c.bf16 %v524_v62, %v524_v62  ;;  %v538_v9 = vmax.f32 %v472_v63, 0.0  ;;  %v525_v10 = vmax.f32 %v419_v0, 0.0  ;;  %v475_v11 = vadd.f32 %v1040_v21, %v474_v7 }
  0xf3   : > { %v866_v12 = vpack.c.bf16 %v540_v3, %v540_v3  ;;  %v848_v13 = vpack.c.bf16 %v522_v4, %v522_v4  ;;  %v541_v14 = vmax.f32 %v483_v5, 0.0  ;;  %v523_v15 = vmax.f32 %v411_v6, 0.0 }
  0xf4   : > { %685 = vst.msk [vmem:[%s1052_s25 + $0x18] sm:$0xf] %vm678_vm3, %v850_v8  ;;  %v864_v16 = vpack.c.bf16 %v538_v9, %v538_v9  ;;  %v851_v17 = vpack.c.bf16 %v525_v10, %v525_v10  ;;  %v539_v18 = vmax.f32 %v475_v11, 0.0 }
  0xf5   : > { %701 = vst.msk [vmem:[%s1052_s25 + $0x58] sm:$0xf] %vm678_vm3, %v866_v12  ;;  %683 = vst.msk [vmem:[%s1052_s25 + $0x10] sm:$0xf] %vm678_vm3, %v848_v13  ;;  %v867_v19 = vpack.c.bf16 %v541_v14, %v541_v14  ;;  %v849_v20 = vpack.c.bf16 %v523_v15, %v523_v15  ;;  %v905_v22 = vpop.f32.mrb[8].mxu0 }
  0xf6   : > { %699 = vst.msk [vmem:[%s1052_s25 + $0x50] sm:$0xf] %vm678_vm3, %v864_v16  ;;  %686 = vst.msk [vmem:[%s1052_s25 + $0x1c] sm:$0xf] %vm678_vm3, %v851_v17  ;;  %v865_v23 = vpack.c.bf16 %v539_v18, %v539_v18  ;;  %v432_v24 = vadd.f32 %v905_v22, %v1040_v21  ;;  %v921_v25 = vpop.f32.mrb[8].mxu1  ;;  %v423_v26 = vpop.f32.mrb[9].mxu0 }
  0xf7   : > { %702 = vst.msk [vmem:[%s1052_s25 + $0x5c] sm:$0xf] %vm678_vm3, %v867_v19  ;;  %684 = vst.msk [vmem:[%s1052_s25 + $0x14] sm:$0xf] %vm678_vm3, %v849_v20  ;;  %v496_v27 = vadd.f32 %v921_v25, %v1040_v21  ;;  %v424_v28 = vadd.f32 %v1040_v21, %v423_v26  ;;  %v487_v29 = vpop.f32.mrb[9].mxu1  ;;  %v906_v30 = vpop.f32.mrb[10].mxu0 }
  0xf8   : > { %700 = vst.msk [vmem:[%s1052_s25 + $0x54] sm:$0xf] %vm678_vm3, %v865_v23  ;;  %v528_v31 = vmax.f32 %v432_v24, 0.0  ;;  %v488_v32 = vadd.f32 %v1040_v21, %v487_v29  ;;  %v435_v33 = vadd.f32 %v906_v30, %v1040_v21  ;;  %v922_v34 = vpop.f32.mrb[10].mxu1  ;;  %v426_v35 = vpop.f32.mrb[11].mxu0 }
  0xf9   : > { %v544_v36 = vmax.f32 %v496_v27, 0.0  ;;  %v526_v37 = vmax.f32 %v424_v28, 0.0  ;;  %v499_v38 = vadd.f32 %v922_v34, %v1040_v21  ;;  %v427_v39 = vadd.f32 %v1040_v21, %v426_v35  ;;  %v490_v40 = vpop.f32.mrb[11].mxu1 }
  0xfa   : > { %v854_v41 = vpack.c.bf16 %v528_v31, %v528_v31  ;;  %v542_v42 = vmax.f32 %v488_v32, 0.0  ;;  %v529_v43 = vmax.f32 %v435_v33, 0.0  ;;  %v491_v44 = vadd.f32 %v1040_v21, %v490_v40 }
  0xfb   : > { %v870_v45 = vpack.c.bf16 %v544_v36, %v544_v36  ;;  %v852_v46 = vpack.c.bf16 %v526_v37, %v526_v37  ;;  %v545_v47 = vmax.f32 %v499_v38, 0.0  ;;  %v527_v48 = vmax.f32 %v427_v39, 0.0 }
  0xfc   : > { %689 = vst.msk [vmem:[%s1052_s25 + $0x28] sm:$0xf] %vm678_vm3, %v854_v41  ;;  %v868_v49 = vpack.c.bf16 %v542_v42, %v542_v42  ;;  %v855_v50 = vpack.c.bf16 %v529_v43, %v529_v43  ;;  %v543_v51 = vmax.f32 %v491_v44, 0.0 }
  0xfd   : > { %705 = vst.msk [vmem:[%s1052_s25 + $0x68] sm:$0xf] %vm678_vm3, %v870_v45  ;;  %687 = vst.msk [vmem:[%s1052_s25 + $0x20] sm:$0xf] %vm678_vm3, %v852_v46  ;;  %v871_v52 = vpack.c.bf16 %v545_v47, %v545_v47  ;;  %v853_v53 = vpack.c.bf16 %v527_v48, %v527_v48  ;;  %v909_v54 = vpop.f32.mrb[12].mxu0 }
  0xfe   : > { %703 = vst.msk [vmem:[%s1052_s25 + $0x60] sm:$0xf] %vm678_vm3, %v868_v49  ;;  %690 = vst.msk [vmem:[%s1052_s25 + $0x2c] sm:$0xf] %vm678_vm3, %v855_v50  ;;  %v869_v55 = vpack.c.bf16 %v543_v51, %v543_v51  ;;  %v448_v56 = vadd.f32 %v909_v54, %v1040_v21  ;;  %v925_v57 = vpop.f32.mrb[12].mxu1  ;;  %v439_v58 = vpop.f32.mrb[13].mxu0 }
  0xff   : > { %706 = vst.msk [vmem:[%s1052_s25 + $0x6c] sm:$0xf] %vm678_vm3, %v871_v52  ;;  %688 = vst.msk [vmem:[%s1052_s25 + $0x24] sm:$0xf] %vm678_vm3, %v853_v53  ;;  %v512_v59 = vadd.f32 %v925_v57, %v1040_v21  ;;  %v440_v60 = vadd.f32 %v1040_v21, %v439_v58  ;;  %v503_v61 = vpop.f32.mrb[13].mxu1  ;;  %v910_v62 = vpop.f32.mrb[14].mxu0 }
 0x100   : > { %704 = vst.msk [vmem:[%s1052_s25 + $0x64] sm:$0xf] %vm678_vm3, %v869_v55  ;;  %v532_v63 = vmax.f32 %v448_v56, 0.0  ;;  %v504_v0 = vadd.f32 %v1040_v21, %v503_v61  ;;  %v451_v1 = vadd.f32 %v910_v62, %v1040_v21  ;;  %v926_v2 = vpop.f32.mrb[14].mxu1  ;;  %v442_v3 = vpop.f32.mrb[15].mxu0 }
 0x101   : > { %v548_v4 = vmax.f32 %v512_v59, 0.0  ;;  %v530_v5 = vmax.f32 %v440_v60, 0.0  ;;  %v515_v6 = vadd.f32 %v926_v2, %v1040_v21  ;;  %v443_v7 = vadd.f32 %v1040_v21, %v442_v3  ;;  %v506_v8 = vpop.f32.mrb[15].mxu1 }
 0x102   : > { %v858_v9 = vpack.c.bf16 %v532_v63, %v532_v63  ;;  %v546_v10 = vmax.f32 %v504_v0, 0.0  ;;  %v533_v11 = vmax.f32 %v451_v1, 0.0  ;;  %v507_v12 = vadd.f32 %v1040_v21, %v506_v8 }
 0x103   : > { %v874_v13 = vpack.c.bf16 %v548_v4, %v548_v4  ;;  %v856_v14 = vpack.c.bf16 %v530_v5, %v530_v5  ;;  %v549_v15 = vmax.f32 %v515_v6, 0.0  ;;  %v531_v16 = vmax.f32 %v443_v7, 0.0 }
 0x104   : > { %693 = vst.msk [vmem:[%s1052_s25 + $0x38] sm:$0xf] %vm678_vm3, %v858_v9  ;;  %v872_v17 = vpack.c.bf16 %v546_v10, %v546_v10  ;;  %v859_v18 = vpack.c.bf16 %v533_v11, %v533_v11  ;;  %v547_v19 = vmax.f32 %v507_v12, 0.0 }
 0x105   : > { %709 = vst.msk [vmem:[%s1052_s25 + $0x78] sm:$0xf] %vm678_vm3, %v874_v13  ;;  %691 = vst.msk [vmem:[%s1052_s25 + $0x30] sm:$0xf] %vm678_vm3, %v856_v14  ;;  %v875_v20 = vpack.c.bf16 %v549_v15, %v549_v15  ;;  %v857_v22 = vpack.c.bf16 %v531_v16, %v531_v16 }
 0x106   : > { %707 = vst.msk [vmem:[%s1052_s25 + $0x70] sm:$0xf] %vm678_vm3, %v872_v17  ;;  %694 = vst.msk [vmem:[%s1052_s25 + $0x3c] sm:$0xf] %vm678_vm3, %v859_v18  ;;  %v873_v21 = vpack.c.bf16 %v547_v19, %v547_v19 }
 0x107   : > { %710 = vst.msk [vmem:[%s1052_s25 + $0x7c] sm:$0xf] %vm678_vm3, %v875_v20  ;;  %692 = vst.msk [vmem:[%s1052_s25 + $0x34] sm:$0xf] %vm678_vm3, %v857_v22 }
 0x108   : > { %708 = vst.msk [vmem:[%s1052_s25 + $0x74] sm:$0xf] %vm678_vm3, %v873_v21 }
 0x109 PF: > { %s13_s12 = sadd.s32 1, %s961_s12  }
 0x10a   : > { %p10_p4 = scmp.ge.s32.totalorder %s13_s12, 4  }
 0x10c   :  { %12 = sbr.rel (!%p10_p4) target bundleno = 1 (0x1), region = 62 }

// kernel: resnet_forward.4
= control target key start
LH: loop header
LB: loop body
LE: loop exit
PB: predicated region body
PF: predicated region fallthrough
CT: control target
= control target key end

     0   :  { %s7322_s30 = smov 0   ;;  %s9566_s0 = inlined_call_operand.vmem [shape: bf16[128,64], index: 0, kind: input, shape index: {}]   ;;  %s9567_s1 = inlined_call_operand.vmem [shape: bf16[9,64,64], index: 1, kind: input, shape index: {}]   ;;  %s9568_s2 = inlined_call_operand.vmem [shape: f32[1,64], index: 2, kind: input, shape index: {}]   ;;  %s9569_s3 = inlined_call_operand.vmem [shape: bf16[9,64,64], index: 3, kind: input, shape index: {}]   ;;  %s9570_s4 = inlined_call_operand.vmem [shape: f32[1,64], index: 4, kind: input, shape index: {}]   ;;  %s9571_s5 = inlined_call_operand.vmem [shape: bf16[9,64,64], index: 5, kind: input, shape index: {}]   ;;  %s9572_s6 = inlined_call_operand.vmem [shape: f32[1,64], index: 6, kind: input, shape index: {}]   ;;  %s9573_s7 = inlined_call_operand.vmem [shape: bf16[9,64,64], index: 7, kind: input, shape index: {}]   ;;  %s9574_s8 = inlined_call_operand.vmem [shape: f32[1,64], index: 8, kind: input, shape index: {}]   ;;  %s9575_s9 = inlined_call_operand.vmem [shape: bf16[128,64], index: 9, kind: output, shape index: {}]  }
   0x1 LB: > { %s5398_s10 = sadd.s32 4294967295, %s7269_s30   ;;  %p5402_p0 = scmp.ge.s32.totalorder %s7269_s30, 1  ;;  %s7269_s30 = sphi %s7322_s30, %s19_s30  }
   0x2   : > { %p288_p1 = scmp.lt.s32.totalorder %s7269_s30, 3 }
   0x4   : > { %p289_p2 = pnand %p5402_p0, %p288_p1 }
   0x6   : > { %292 = sbr.rel (%p289_p2) target bundleno = 1473 (0x5c1), region = 56 }
   0xd   : > { %v7112_v0 = vld [vmem:[%s9567_s1 + $0x20] sm:$0xff]   ;;  %s5403_s13 = sshll.u32 %s5398_s10, 3  ;;  %v7113_v1 = vld [vmem:[%s9567_s1 + $0x28] sm:$0xff]   ;;  %v7114_v2 = vld [vmem:[%s9567_s1 + $0x30] sm:$0xff]   ;;  %v337_v3 = vlaneseq  ;;  %vm548_vm0 = vcmask 523264   ;;  %v9578_v38 = vmov 0.0  }
   0xe   : > { %p325_p3 = scmp.lt.s32.totalorder %s5403_s13, 15  ;;  %6271 = vmatprep.subr.bf16.mxu0 %v7112_v0  ;;  %v7115_v7 = vld [vmem:[%s9567_s1 + $0x38] sm:$0xff]   ;;  %v7117_v19 = vld [vmem:[%s9567_s1] sm:$0xff]   ;;  %v7118_v29 = vld [vmem:[%s9567_s1 + $0x8] sm:$0xff]  }
   0xf   : > { %6272 = vmatpush3.bf16.msra.mxu0 %v7112_v0  ;;  %v7367_v10 = vshrl.u32 %v337_v3, 7  ;;  %v7122_v52 = vld [vmem:[%s9567_s1 + $0x10] sm:$0xff]   ;;  %v7123_v60 = vld [vmem:[%s9567_s1 + $0x18] sm:$0xff]  }
  0x10   : > { %s9872_s13 = smov (!%p325_p3, %s5403_s13), 15  ;;  %6273 = vmatprep.subr.bf16.mxu0 %v7113_v1 }
  0x11   : > { %s5404_s18 = sshll.u32 %s9872_s13, 2  ;;  %9667 = vst [vmem:[#allocation4_spill] sm:$0xff] %v7367_v10  ;;  %vm474_vm1 = vcmp.lt.s32.totalorder %v7367_v10, 1  ;;  %v7408_v25 = vadd.s32 8, %v7367_v10  ;;  %v346_v28 = vand.u32 7, %v7367_v10  ;;  %v7425_v34 = vadd.s32 16, %v7367_v10 }
  0x12   : > { %s7347_s21 = scalar_lea.vmem %s9566_s0, %s5404_s18  ;;  %v7428_v35 = vadd.s32 24, %v7367_v10  ;;  %v7431_v36 = vadd.s32 32, %v7367_v10  ;;  %v7462_v47 = vadd.s32 40, %v7367_v10  ;;  %vm735_vm8 = vcmp.lt.s32.totalorder %v7367_v10, 7  ;;  %s9540_s26 = scalar_lea.vmem %s9575_s9, %s5404_s18 }
  0x13   : > { %6274 = vmatpush3.bf16.msra.mxu0 %v7113_v1  ;;  %v7350_v4 = vld [vmem:[%s7347_s21] sm:$0xf]  ;;  %v7353_v5 = vld [vmem:[%s7347_s21 + $0x1c] sm:$0xf]  ;;  %v7356_v6 = vld [vmem:[%s7347_s21 + $0x4] sm:$0xf] }
  0x14   : > { %6275 = vmatprep.subr.bf16.mxu0 %v7114_v2  ;;  %v7362_v8 = vunpack.c.l.bf16 %v7350_v4  ;;  %v7365_v9 = vunpack.c.l.bf16 %v7353_v5  ;;  %v7370_v11 = vld [vmem:[%s7347_s21 + $0x8] sm:$0xf]  ;;  %v7373_v12 = vunpack.c.l.bf16 %v7356_v6  ;;  %v7379_v14 = vld [vmem:[%s7347_s21 + $0xc] sm:$0xf]  ;;  %v7382_v15 = vld [vmem:[%s7347_s21 + $0x10] sm:$0xf] }
  0x15   : > { %v7376_v13 = vunpack.c.l.bf16 %v7370_v11  ;;  %v7385_v16 = vld [vmem:[%s7347_s21 + $0x18] sm:$0xf]  ;;  %v7391_v18 = vcombine.low %v7356_v6, %v7370_v11  ;;  %v7397_v20 = vunpack.c.l.bf16 %v7379_v14  ;;  %v7400_v21 = vunpack.c.l.bf16 %v7382_v15  ;;  %v7434_v37 = vld [vmem:[%s7347_s21 + $0x14] sm:$0xf] }
  0x16   : > { %9665 = vst [vmem:[#allocation2_spill] sm:$0xff] %v7362_v8  ;;  %9666 = vst [vmem:[#allocation3_spill] sm:$0xff] %v7365_v9  ;;  %v503_v17 = vmul.f32 0.0, %v7365_v9  ;;  %v467_v23 = vrot.slane %v7373_v12, 7  ;;  %v7405_v24 = vunpack.c.l.bf16 %v7385_v16  ;;  %v7413_v27 = vcombine.low %v7379_v14, %v7382_v15 }
  0x17   : > { %9668 = vst [vmem:[#allocation5_spill] sm:$0xff] %v7373_v12  ;;  %9669 = vst [vmem:[#allocation6_spill] sm:$0xff] %v7376_v13  ;;  %6276 = vmatpush3.bf16.msra.mxu0 %v7114_v2  ;;  %v468_v26 = vrot.slane %v7376_v13, 7  ;;  %v347_v30 = vand.u32 7, %v7408_v25  ;;  %v466_v31 = vrot.slane %v7362_v8, 7  ;;  %v473_v33 = vrot.slane %v7365_v9, 7 }
  0x18   : > { %9670 = vst [vmem:[#allocation7_spill] sm:$0xff] %v7391_v18  ;;  %9671 = vst [vmem:[#allocation8_spill] sm:$0xff] %v7397_v20  ;;  %6277 = vmatprep.subr.bf16.mxu0 %v7115_v7  ;;  %v511_v22 = vpack.c.bf16 %v7362_v8, %v503_v17  ;;  %v472_v32 = vrot.slane %v7405_v24, 7  ;;  %vm386_vm2 = vcmp.ge.s32.totalorder %v346_v28, 1  ;;  %v348_v44 = vand.u32 7, %v7425_v34  ;;  %v7126_v34 = vld [vmem:[%s9567_s1 + $0x50] sm:$0xff]  }
  0x19   : > { %9672 = vst [vmem:[#allocation9_spill] sm:$0xff] %v7400_v21  ;;  %9673 = vst [vmem:[#allocation10_spill] sm:$0xff] %v7405_v24  ;;  %vm387_vm3 = vcmp.ge.s32.totalorder %v347_v30, 1  ;;  %v7437_v39 = vsel %vm386_vm2, 1.0, %v9578_v38  ;;  %v7453_v43 = vsel %vm474_vm1, %v473_v33, %v466_v31  ;;  %v9580_v46 = vand.u32 7, %v7428_v35 }
  0x1a   : > { %9674 = vst [vmem:[#allocation11_spill] sm:$0xff] %v7413_v27  ;;  %6279 = vmatprep.mubr.msk.bf16.mxu0 %vm548_vm0, %v511_v22  ;;  %9675 = vst [vmem:[#allocation12_spill] sm:$0xff] %v7437_v39  ;;  %v7443_v40 = vsel %vm474_vm1, %v472_v32, %v473_v33  ;;  %v7446_v41 = vsel %vm387_vm3, 1.0, %v9578_v38  ;;  %v7449_v42 = vmul.f32 0.0, %v7437_v39  ;;  %v9577_v48 = vand.u32 7, %v7431_v36 }
  0x1b   : > { %6278 = vmatpush3.bf16.msra.mxu0 %v7115_v7  ;;  %v484_v45 = vmul.f32 %v7453_v43, %v7446_v41  ;;  %vm388_vm4 = vcmp.ge.s32.totalorder %v348_v44, 1  ;;  %v469_v50 = vrot.slane %v7397_v20, 7  ;;  %v470_v51 = vrot.slane %v7400_v21, 7 }
  0x1c   : > { %6287 = vmatprep.subr.bf16.mxu0 %v7117_v19  ;;  %9676 = vst [vmem:[#allocation13_spill] sm:$0xff] %v7449_v42  ;;  %v483_v49 = vmul.f32 %v7443_v40, %v7449_v42  ;;  %vm389_vm5 = vcmp.ge.s32.totalorder %v9580_v46, 1  ;;  %v9576_v53 = vand.u32 7, %v7462_v47  ;;  %v7480_v54 = vunpack.c.l.bf16 %v7434_v37 }
  0x1d   : > { %v7484_v55 = vcombine.low %v7434_v37, %v7385_v16  ;;  %v7487_v56 = vsel %vm388_vm4, 1.0, %v9578_v38  ;;  %vm390_vm6 = vcmp.ge.s32.totalorder %v9577_v48, 1  ;;  %v7493_v57 = vsel %vm474_vm1, %v467_v23, %v468_v26 }
  0x1e   : > { %6280 = vmatmul.mubr.msk.bf16.vlgmr.msra.gmra.mrb[0].mxu0 %vm548_vm0, %v7391_v18  ;;  %9677 = vst [vmem:[#allocation14_spill] sm:$0xff] %v7480_v54  ;;  %9679 = vst [vmem:[#allocation16_spill] sm:$0xff] %v7487_v56  ;;  %v7497_v58 = vsel %vm474_vm1, %v466_v31, %v467_v23  ;;  %v7500_v59 = vsel %vm389_vm5, 1.0, %v9578_v38  ;;  %vm391_vm7 = vcmp.ge.s32.totalorder %v9576_v53, 1  ;;  %v491_v61 = vpack.c.bf16 %v484_v45, %v483_v49 }
  0x1f   : > { %6288 = vmatpush3.bf16.msra.mxu0 %v7117_v19  ;;  %6283 = vmatprep.mubr.msk.bf16.mxu0 %vm548_vm0, %v7413_v27  ;;  %9678 = vst [vmem:[#allocation15_spill] sm:$0xff] %v7484_v55  ;;  %9680 = vst [vmem:[#allocation17_spill] sm:$0xff] %v7500_v59  ;;  %v7510_v62 = vsel %vm474_vm1, %v469_v50, %v470_v51  ;;  %v7514_v63 = vsel %vm474_vm1, %v468_v26, %v469_v50  ;;  %v7517_v0 = vsel %vm390_vm6, 1.0, %v9578_v38 }
  0x20   : > { %6289 = vmatprep.subr.bf16.mxu0 %v7118_v29  ;;  %v7520_v1 = vsel %vm391_vm7, 1.0, %v9578_v38  ;;  %v7524_v2 = vmul.f32 %v7514_v63, %v7487_v56  ;;  %v7528_v3 = vmul.f32 %v7510_v62, %v7500_v59  ;;  %v485_v7 = vmul.f32 %v7497_v58, %v7487_v56 }
  0x21   : > { %v486_v17 = vmul.f32 %v7493_v57, %v7500_v59  ;;  %v7535_v19 = vadd.s32 48, %v7367_v10  ;;  %v7538_v22 = vadd.s32 56, %v7367_v10  ;;  %v471_v25 = vrot.slane %v7480_v54, 7 }
  0x22   : > { %vm402_vm9 = vcmp.lt.s32.totalorder %v346_v28, 7  ;;  %vm7545_vm10 = vcmp.lt.s32.totalorder %v347_v30, 7  ;;  %v488_v31 = vmul.f32 %v7510_v62, %v7520_v1  ;;  %v7124_v28 = vld [vmem:[%s9567_s1 + $0x40] sm:$0xff]   ;;  %v727_v49 = vrot.slane %v7362_v8, 1 }
  0x23   : > { %6290 = vmatpush3.bf16.msra.mxu0 %v7118_v29  ;;  %v487_v29 = vmul.f32 %v7514_v63, %v7517_v0  ;;  %v352_v33 = vand.u32 7, %v7535_v19  ;;  %v353_v45 = vand.u32 7, %v7538_v22  ;;  %v7560_v30 = vsel %vm402_vm9, 1.0, %v9578_v38 }
  0x24   : > { %6291 = vmatprep.subr.bf16.mxu0 %v7122_v52  ;;  %v728_v50 = vrot.slane %v7373_v12, 1  ;;  %v7574_v23 = vsel %vm7545_vm10, 1.0, %v9578_v38  ;;  %v7577_v53 = vmul.f32 0.0, %v7560_v30  ;;  %v7587_v48 = vsel %vm474_vm1, %v470_v51, %v471_v25 }
  0x25   : > { %vm392_vm11 = vcmp.ge.s32.totalorder %v352_v33, 1  ;;  %vm393_vm12 = vcmp.ge.s32.totalorder %v353_v45, 1  ;;  %v730_v46 = vrot.slane %v7397_v20, 1  ;;  %vm404_vm13 = vcmp.lt.s32.totalorder %v348_v44, 7 }
  0x26   : > { %6284 = vmatmul.mubr.msk.bf16.gmra.mrb[4].mxu0 %vm548_vm0, %v7484_v55  ;;  %v7566_v19 = vsel %vm392_vm11, 1.0, %v9578_v38  ;;  %v7569_v22 = vsel %vm393_vm12, 1.0, %v9578_v38  ;;  %9684 = vst [vmem:[#allocation19_spill] sm:$0xff] %v7577_v53  ;;  %v7591_v26 = vsel %vm735_vm8, %v727_v49, %v728_v50  ;;  %v729_v38 = vrot.slane %v7376_v13, 1 }
  0x27   : > { %6292 = vmatpush3.bf16.msra.mxu0 %v7122_v52  ;;  %6295 = vmatprep.mubr.msk.bf16.mxu0 %vm548_vm0, %v491_v61  ;;  %v492_v52 = vpack.c.bf16 %v486_v17, %v485_v7  ;;  %v9581_v61 = vrot.slane %v7365_v9, 1  ;;  %9683 = vst [vmem:[#allocation18_spill] sm:$0xff] %v7569_v22  ;;  %v493_v7 = vpack.c.bf16 %v488_v31, %v487_v29  ;;  %v9686_v44 = vand.u32 7, %v7431_v36 }
  0x28   : > { %6293 = vmatprep.subr.bf16.mxu0 %v7123_v60  ;;  %v7583_v17 = vsel %vm474_vm1, %v471_v25, %v472_v32  ;;  %v489_v51 = vmul.f32 %v7587_v48, %v7566_v19  ;;  %v745_v29 = vmul.f32 %v7591_v26, %v7574_v23  ;;  %v7622_v12 = vsel %vm735_vm8, %v729_v38, %v730_v46 }
  0x29   : > { %v7602_v32 = vsel %vm735_vm8, %v9581_v61, %v727_v49  ;;  %v490_v25 = vmul.f32 %v7583_v17, %v7569_v22  ;;  %v9685_v49 = vand.u32 7, %v7428_v35  ;;  %v732_v61 = vrot.slane %v7480_v54, 1 }
  0x2a   : > { %v744_v31 = vmul.f32 %v7602_v32, %v7577_v53  ;;  %vm406_vm15 = vcmp.lt.s32.totalorder %v9686_v44, 7  ;;  %v7631_v35 = vsel %vm735_vm8, %v728_v50, %v729_v38  ;;  %vm408_vm3 = vcmp.lt.s32.totalorder %v352_v33, 7 }
  0x2b   : > { %6294 = vmatpush3.bf16.msra.mxu0 %v7123_v60  ;;  %v7125_v60 = vld [vmem:[%s9567_s1 + $0x48] sm:$0xff]   ;;  %vm405_vm14 = vcmp.lt.s32.totalorder %v9685_v49, 7  ;;  %v9689_v49 = vand.u32 7, %v7462_v47  ;;  %v7127_v47 = vld [vmem:[%s9567_s1 + $0x58] sm:$0xff]   ;;  %vm409_vm4 = vcmp.lt.s32.totalorder %v353_v45, 7  ;;  %v9695_v20 = vrot.slane %v7365_v9, 1 }
  0x2c   : > { %6303 = vmatprep.subr.bf16.mxu0 %v7124_v28  ;;  %v752_v50 = vpack.c.bf16 %v745_v29, %v744_v31  ;;  %v733_v31 = vrot.slane %v7405_v24, 1  ;;  %v7682_v29 = vmul.f32 0.0, %v7569_v22  ;;  %v7705_v53 = vmul.f32 %v7493_v57, %v7446_v41 }
  0x2d   : > { %vm407_vm2 = vcmp.lt.s32.totalorder %v9689_v49, 7  ;;  %v876_v55 = vmul.f32 %v7493_v57, %v7487_v56  ;;  %v877_v8 = vmul.f32 %v7514_v63, %v7500_v59  ;;  %v7133_v63 = vld [vmem:[%s9567_s1 + $0x88] sm:$0xff]  }
  0x2e   : > { %6296 = vmatmul.mubr.msk.bf16.vlgmr.msra.gmra.mrb[0].mxu0 %vm548_vm0, %v492_v52  ;;  %v731_v52 = vrot.slane %v7400_v21, 1  ;;  %v494_v21 = vpack.c.bf16 %v490_v25, %v489_v51  ;;  %9693 = vst [vmem:[#allocation24_spill] sm:$0xff] %v7682_v29  ;;  %v7701_v24 = vsel %vm735_vm8, %v733_v31, %v9695_v20  ;;  %v7717_v42 = vsel %vm735_vm8, %v732_v61, %v733_v31 }
  0x2f   : > { %6304 = vmatpush3.bf16.msra.mxu0 %v7124_v28  ;;  %6299 = vmatprep.mubr.msk.bf16.mxu0 %vm548_vm0, %v493_v7  ;;  %v9687_v28 = vmov 0.0   ;;  %v7721_v20 = vmul.f32 %v7443_v40, %v7566_v19  ;;  %v883_v57 = vpack.c.bf16 %v877_v8, %v876_v55  ;;  %v7135_v55 = vld [vmem:[%s9567_s1 + $0x98] sm:$0xff]  }
  0x30   : > { %6305 = vmatprep.subr.bf16.mxu0 %v7125_v60  ;;  %v7634_v7 = vsel %vm404_vm13, 1.0, %v9687_v28  ;;  %v7640_v54 = vsel %vm735_vm8, %v730_v46, %v731_v52  ;;  %v7643_v13 = vsel %vm405_vm14, 1.0, %v9687_v28  ;;  %v7647_v36 = vsel %vm735_vm8, %v731_v52, %v732_v61 }
  0x31   : > { %9688 = vst [vmem:[#allocation20_spill] sm:$0xff] %v7634_v7  ;;  %9690 = vst [vmem:[#allocation21_spill] sm:$0xff] %v7643_v13  ;;  %v7651_v38 = vmul.f32 %v7640_v54, %v7634_v7  ;;  %v7658_v46 = vmul.f32 %v7647_v36, %v7643_v13  ;;  %v7661_v51 = vsel %vm406_vm15, 1.0, %v9687_v28  ;;  %v7664_v25 = vsel %vm407_vm2, 1.0, %v9687_v28 }
  0x32   : > { %v746_v52 = vmul.f32 %v7631_v35, %v7634_v7  ;;  %v748_v44 = vmul.f32 %v7640_v54, %v7661_v51  ;;  %v749_v49 = vmul.f32 %v7647_v36, %v7664_v25  ;;  %v7688_v45 = vsel %vm408_vm3, 1.0, %v9687_v28 }
  0x33   : > { %9691 = vst [vmem:[#allocation22_spill] sm:$0xff] %v7651_v38  ;;  %6306 = vmatpush3.bf16.msra.mxu0 %v7125_v60  ;;  %9692 = vst [vmem:[#allocation23_spill] sm:$0xff] %v7658_v46  ;;  %v747_v60 = vmul.f32 %v7622_v12, %v7643_v13  ;;  %v7725_v38 = vmul.f32 %v7453_v43, %v7682_v29  ;;  %v7129_v46 = vld [vmem:[%s9567_s1 + $0x68] sm:$0xff]   ;;  %v7744_v29 = vmul.f32 %v7622_v12, %v7574_v23 }
  0x34   : > { %6307 = vmatprep.subr.bf16.mxu0 %v7126_v34  ;;  %v7752_v61 = vmul.f32 %v7701_v24, %v7664_v25  ;;  %v750_v31 = vmul.f32 %v7717_v42, %v7688_v45  ;;  %v7767_v9 = vmul.f32 %v7602_v32, %v7688_v45 }
  0x35   : > { %v753_v33 = vpack.c.bf16 %v747_v60, %v746_v52  ;;  %v7709_v52 = vmul.f32 %v7587_v48, %v7517_v0  ;;  %v754_v60 = vpack.c.bf16 %v749_v49, %v748_v44  ;;  %v7738_v44 = vmul.f32 %v7631_v35, %v7560_v30 }
  0x36   : > { %6300 = vmatmul.mubr.msk.bf16.gmra.mrb[4].mxu0 %vm548_vm0, %v494_v21  ;;  %v7128_v21 = vld [vmem:[%s9567_s1 + $0x60] sm:$0xff]  }
  0x37   : > { %6308 = vmatpush3.bf16.msra.mxu0 %v7126_v34  ;;  %6311 = vmatprep.mubr.msk.bf16.mxu0 %vm548_vm0, %v752_v50  ;;  %v7691_v34 = vsel %vm409_vm4, 1.0, %v9687_v28  ;;  %v7695_v50 = vmul.f32 %v7497_v58, %v7437_v39  ;;  %v7713_v28 = vmul.f32 %v7583_v17, %v7520_v1 }
  0x38   : > { %6309 = vmatprep.subr.bf16.mxu0 %v7127_v47  ;;  %9694 = vst [vmem:[#allocation25_spill] sm:$0xff] %v7691_v34  ;;  %v751_v49 = vmul.f32 %v7701_v24, %v7691_v34  ;;  %v7763_v10 = vmul.f32 0.0, %v7691_v34 }
  0x3a   : > { %9696 = vst [vmem:[#allocation26_spill] sm:$0xff] %v7763_v10  ;;  %v7778_v27 = vmul.f32 %v7591_v26, %v7763_v10  ;;  %v755_v18 = vpack.c.bf16 %v751_v49, %v750_v31  ;;  %v7132_v31 = vld [vmem:[%s9567_s1 + $0x80] sm:$0xff]   ;;  %v5475_v49 = vcombine.low %v7370_v11, %v7379_v14  ;;  %v1142_v11 = vmul.f32 %v7591_v26, %v7560_v30 }
  0x3b   : > { %6310 = vmatpush3.bf16.msra.mxu0 %v7127_v47  ;;  %v874_v47 = vmul.f32 %v7453_v43, %v7437_v39  ;;  %v7748_v43 = vmul.f32 %v7717_v42, %v7661_v51  ;;  %v7130_v39 = vld [vmem:[%s9567_s1 + $0x70] sm:$0xff]   ;;  %v1143_v14 = vmul.f32 %v7631_v35, %v7574_v23  ;;  %v9697_v26 = vcombine.low %v7385_v16, %v7353_v5  ;;  %v7143_v35 = vld [vmem:[%s9567_s1 + $0xc0] sm:$0xff]   ;;  %v7144_v5 = vld [vmem:[%s9567_s1 + $0xc8] sm:$0xff]  }
  0x3c   : > { %6319 = vmatprep.subr.bf16.mxu0 %v7128_v21 }
  0x3e   : > { %6312 = vmatmul.mubr.msk.bf16.vlgmr.msra.gmra.mrb[0].mxu0 %vm548_vm0, %v753_v33  ;;  %v875_v33 = vmul.f32 %v7497_v58, %v7446_v41 }
  0x3f   : > { %6320 = vmatpush3.bf16.msra.mxu0 %v7128_v21  ;;  %6315 = vmatprep.mubr.msk.bf16.mxu0 %vm548_vm0, %v754_v60  ;;  %v7131_v21 = vld [vmem:[%s9567_s1 + $0x78] sm:$0xff]   ;;  %v1543_v60 = vpack.c.bf16 %v7778_v27, %v7767_v9  ;;  %v7951_v27 = vld [vmem:[%s9569_s3] sm:$0xff]  }
  0x40   : > { %6321 = vmatprep.subr.bf16.mxu0 %v7129_v46  ;;  %v882_v58 = vpack.c.bf16 %v875_v33, %v874_v47  ;;  %v879_v47 = vmul.f32 %v7587_v48, %v7520_v1  ;;  %v7134_v48 = vld [vmem:[%s9567_s1 + $0x90] sm:$0xff]   ;;  %v7138_v33 = vld [vmem:[%s9567_s1 + $0xa8] sm:$0xff]   ;;  %v7158_v9 = vld [vmem:[%s9569_s3 + $0x38] sm:$0xff]  }
  0x43   : > { %6322 = vmatpush3.bf16.msra.mxu0 %v7129_v46  ;;  %v878_v46 = vmul.f32 %v7510_v62, %v7517_v0  ;;  %v881_v62 = vmul.f32 %v7443_v40, %v7569_v22  ;;  %v7137_v40 = vld [vmem:[%s9567_s1 + $0xa0] sm:$0xff]  }
  0x44   : > { %6323 = vmatprep.subr.bf16.mxu0 %v7130_v39 }
  0x46   : > { %6316 = vmatmul.mubr.msk.bf16.gmra.mrb[4].mxu0 %vm548_vm0, %v755_v18  ;;  %v884_v18 = vpack.c.bf16 %v879_v47, %v878_v46  ;;  %v1148_v46 = vmul.f32 %v7701_v24, %v7688_v45  ;;  %v7147_v24 = vld [vmem:[%s9567_s1 + $0xe0] sm:$0xff]  }
  0x47   : > { %6324 = vmatpush3.bf16.msra.mxu0 %v7130_v39  ;;  %6327 = vmatprep.mubr.msk.bf16.mxu0 %vm548_vm0, %v882_v58  ;;  %v880_v39 = vmul.f32 %v7583_v17, %v7566_v19  ;;  %v5474_v17 = vcombine.low %v7350_v4, %v7356_v6  ;;  %v5476_v4 = vcombine.low %v7382_v15, %v7434_v37  ;;  %v7141_v6 = vld [vmem:[%s9567_s1 + $0xb0] sm:$0xff]   ;;  %v7142_v15 = vld [vmem:[%s9567_s1 + $0xb8] sm:$0xff]  }
  0x48   : > { %6325 = vmatprep.subr.bf16.mxu0 %v7131_v21  ;;  %v1150_v37 = vpack.c.bf16 %v1143_v14, %v1142_v11  ;;  %v1145_v58 = vmul.f32 %v7640_v54, %v7643_v13  ;;  %v9711_v11 = vpack.c.bf16 %v7752_v61, %v7748_v43  ;;  %v7157_v61 = vld [vmem:[%s9569_s3 + $0x30] sm:$0xff]   ;;  %v5553_v43 = vld [vmem:[%s9568_s2] ss:$0 sm:$0xff] }
  0x49   : > { %v885_v8 = vpack.c.bf16 %v881_v62, %v880_v39  ;;  %v7149_v39 = vld [vmem:[%s9567_s1 + $0xf0] sm:$0xff]   ;;  %v9703_v62 = vld [vmem:[#allocation11_spill] sm:$0xff] }
  0x4b   : > { %6326 = vmatpush3.bf16.msra.mxu0 %v7131_v21  ;;  %v1144_v21 = vmul.f32 %v7622_v12, %v7634_v7  ;;  %v1147_v12 = vmul.f32 %v7717_v42, %v7664_v25  ;;  %v7145_v42 = vld [vmem:[%s9567_s1 + $0xd0] sm:$0xff]  }
  0x4c   : > { %6335 = vmatprep.subr.bf16.mxu0 %v7132_v31 }
  0x4d   : > { %v1151_v54 = vpack.c.bf16 %v1145_v58, %v1144_v21 }
  0x4e   : > { %6328 = vmatmul.mubr.msk.bf16.vlgmr.msra.gmra.mrb[0].mxu0 %vm548_vm0, %v883_v57  ;;  %v7146_v57 = vld [vmem:[%s9567_s1 + $0xd8] sm:$0xff]  }
  0x4f   : > { %6336 = vmatpush3.bf16.msra.mxu0 %v7132_v31  ;;  %6331 = vmatprep.mubr.msk.bf16.mxu0 %vm548_vm0, %v884_v18  ;;  %v1146_v31 = vmul.f32 %v7647_v36, %v7661_v51  ;;  %v1149_v36 = vmul.f32 %v7602_v32, %v7691_v34  ;;  %v9698_v32 = vpack.c.bf16 %v7705_v53, %v7695_v50  ;;  %v7150_v50 = vld [vmem:[%s9567_s1 + $0xf8] sm:$0xff]  }
  0x50   : > { %6337 = vmatprep.subr.bf16.mxu0 %v7133_v63  ;;  %v9699_v18 = vpack.c.bf16 %v7528_v3, %v7524_v2  ;;  %v9700_v53 = vpack.c.bf16 %v7713_v28, %v7709_v52  ;;  %v9701_v2 = vpack.c.bf16 %v7725_v38, %v7721_v20  ;;  %v9702_v3 = vld [vmem:[#allocation7_spill] sm:$0xff]  ;;  %v7151_v52 = vld [vmem:[%s9567_s1 + $0x100] sm:$0xff]  }
  0x51   : > { %v1152_v16 = vpack.c.bf16 %v1147_v12, %v1146_v31  ;;  %v1153_v47 = vpack.c.bf16 %v1149_v36, %v1148_v46  ;;  %v7152_v28 = vld [vmem:[%s9567_s1 + $0x108] sm:$0xff]   ;;  %v9704_v38 = vld [vmem:[#allocation2_spill] sm:$0xff] }
  0x52   : > { %v1409_v20 = vmul.f32 0.0, %v9704_v38 }
  0x53   : > { %6338 = vmatpush3.bf16.msra.mxu0 %v7133_v63  ;;  %v7148_v63 = vld [vmem:[%s9567_s1 + $0xe8] sm:$0xff]  }
  0x54   : > { %6339 = vmatprep.subr.bf16.mxu0 %v7134_v48 }
  0x56   : > { %6332 = vmatmul.mubr.msk.bf16.gmra.mrb[4].mxu0 %vm548_vm0, %v885_v8  ;;  %v7153_v8 = vld [vmem:[%s9567_s1 + $0x110] sm:$0xff]  }
  0x57   : > { %6340 = vmatpush3.bf16.msra.mxu0 %v7134_v48  ;;  %6343 = vmatprep.mubr.msk.bf16.mxu0 %vm548_vm0, %v5474_v17  ;;  %v9705_v48 = vld [vmem:[#allocation15_spill] sm:$0xff] }
  0x58   : > { %6341 = vmatprep.subr.bf16.mxu0 %v7135_v55 }
  0x5b   : > { %6342 = vmatpush3.bf16.msra.mxu0 %v7135_v55  ;;  %v9706_v55 = vld [vmem:[#allocation3_spill] sm:$0xff] }
  0x5c   : > { %6351 = vmatprep.subr.bf16.mxu0 %v7137_v40  ;;  %v1413_v17 = vpack.c.bf16 %v1409_v20, %v9706_v55 }
  0x5e   : > { %6344 = vmatmul.mubr.msk.bf16.vlgmr.msra.gmra.mrb[0].mxu0 %vm548_vm0, %v5475_v49  ;;  %v9707_v49 = vpack.c.bf16 %v7744_v29, %v7738_v44  ;;  %v7155_v29 = vld [vmem:[%s9569_s3 + $0x20] sm:$0xff]   ;;  %v7156_v44 = vld [vmem:[%s9569_s3 + $0x28] sm:$0xff]  }
  0x5f   : > { %6352 = vmatpush3.bf16.msra.mxu0 %v7137_v40  ;;  %6347 = vmatprep.mubr.msk.bf16.mxu0 %vm548_vm0, %v5476_v4  ;;  %v7154_v40 = vld [vmem:[%s9567_s1 + $0x118] sm:$0xff]   ;;  %v9709_v4 = vld [vmem:[#allocation22_spill] sm:$0xff] }
  0x60   : > { %6353 = vmatprep.subr.bf16.mxu0 %v7138_v33  ;;  %6415 = vmatprep.subr.bf16.mxu1 %v7155_v29 }
  0x61   : > { %6416 = vmatpush3.bf16.msra.mxu1 %v7155_v29 }
  0x62   : > { %6417 = vmatprep.subr.bf16.mxu1 %v7156_v44 }
  0x63   : > { %6354 = vmatpush3.bf16.msra.mxu0 %v7138_v33  ;;  %v9708_v33 = vld [vmem:[#allocation23_spill] sm:$0xff] }
  0x64   : > { %6355 = vmatprep.subr.bf16.mxu0 %v7141_v6 }
  0x65   : > { %6418 = vmatpush3.bf16.msra.mxu1 %v7156_v44 }
  0x66   : > { %6348 = vmatmul.mubr.msk.bf16.gmra.mrb[4].mxu0 %vm548_vm0, %v9697_v26  ;;  %6419 = vmatprep.subr.bf16.mxu1 %v7157_v61 }
  0x67   : > { %6356 = vmatpush3.bf16.msra.mxu0 %v7141_v6  ;;  %6359 = vmatprep.mubr.msk.bf16.mxu0 %vm548_vm0, %v1150_v37  ;;  %v9710_v6 = vpack.c.bf16 %v9708_v33, %v9709_v4 }
  0x68   : > { %6357 = vmatprep.subr.bf16.mxu0 %v7142_v15 }
  0x69   : > { %6420 = vmatpush3.bf16.msra.mxu1 %v7157_v61 }
  0x6a   : > { %6421 = vmatprep.subr.bf16.mxu1 %v7158_v9 }
  0x6b   : > { %6358 = vmatpush3.bf16.msra.mxu0 %v7142_v15 }
  0x6c   : > { %6367 = vmatprep.subr.bf16.mxu0 %v7143_v35 }
  0x6d   : > { %6422 = vmatpush3.bf16.msra.mxu1 %v7158_v9 }
  0x6e   : > { %6360 = vmatmul.mubr.msk.bf16.vlgmr.msra.gmra.mrb[0].mxu0 %vm548_vm0, %v1151_v54  ;;  %6431 = vmatprep.subr.bf16.mxu1 %v7951_v27 }
  0x6f   : > { %6368 = vmatpush3.bf16.msra.mxu0 %v7143_v35  ;;  %6363 = vmatprep.mubr.msk.bf16.mxu0 %vm548_vm0, %v1152_v16 }
  0x70   : > { %6369 = vmatprep.subr.bf16.mxu0 %v7144_v5 }
  0x73   : > { %6370 = vmatpush3.bf16.msra.mxu0 %v7144_v5 }
  0x74   : > { %6371 = vmatprep.subr.bf16.mxu0 %v7145_v42 }
  0x76   : > { %6364 = vmatmul.mubr.msk.bf16.gmra.mrb[4].mxu0 %vm548_vm0, %v1153_v47 }
  0x77   : > { %6372 = vmatpush3.bf16.msra.mxu0 %v7145_v42  ;;  %6375 = vmatprep.mubr.msk.bf16.mxu0 %vm548_vm0, %v9698_v32 }
  0x78   : > { %6373 = vmatprep.subr.bf16.mxu0 %v7146_v57 }
  0x7b   : > { %6374 = vmatpush3.bf16.msra.mxu0 %v7146_v57 }
  0x7c   : > { %6383 = vmatprep.subr.bf16.mxu0 %v7147_v24 }
  0x7e   : > { %6376 = vmatmul.mubr.msk.bf16.vlgmr.msra.gmra.mrb[0].mxu0 %vm548_vm0, %v9699_v18 }
  0x7f   : > { %6384 = vmatpush3.bf16.msra.mxu0 %v7147_v24  ;;  %6379 = vmatprep.mubr.msk.bf16.mxu0 %vm548_vm0, %v9700_v53 }
  0x80   : > { %6385 = vmatprep.subr.bf16.mxu0 %v7148_v63 }
  0x83   : > { %6386 = vmatpush3.bf16.msra.mxu0 %v7148_v63 }
  0x84   : > { %6387 = vmatprep.subr.bf16.mxu0 %v7149_v39 }
  0x86   : > { %6380 = vmatmul.mubr.msk.bf16.gmra.mrb[4].mxu0 %vm548_vm0, %v9701_v2 }
  0x87   : > { %6388 = vmatpush3.bf16.msra.mxu0 %v7149_v39  ;;  %6391 = vmatprep.mubr.msk.bf16.mxu0 %vm548_vm0, %v9702_v3  ;;  %v9722_v39 = vld [vmem:[#allocation13_spill] sm:$0xff] }
  0x88   : > { %6389 = vmatprep.subr.bf16.mxu0 %v7150_v50 }
  0x8b   : > { %6390 = vmatpush3.bf16.msra.mxu0 %v7150_v50 }
  0x8c   : > { %6399 = vmatprep.subr.bf16.mxu0 %v7151_v52 }
  0x8e   : > { %6392 = vmatmul.mubr.msk.bf16.vlgmr.msra.gmra.mrb[0].mxu0 %vm548_vm0, %v9703_v62 }
  0x8f   : > { %6400 = vmatpush3.bf16.msra.mxu0 %v7151_v52  ;;  %6395 = vmatprep.mubr.msk.bf16.mxu0 %vm548_vm0, %v9705_v48 }
  0x90   : > { %6401 = vmatprep.subr.bf16.mxu0 %v7152_v28 }
  0x93   : > { %6402 = vmatpush3.bf16.msra.mxu0 %v7152_v28 }
  0x94   : > { %6403 = vmatprep.subr.bf16.mxu0 %v7153_v8 }
  0x96   : > { %6396 = vmatmul.mubr.msk.bf16.gmra.mrb[4].mxu0 %vm548_vm0, %v1413_v17 }
  0x97   : > { %6404 = vmatpush3.bf16.msra.mxu0 %v7153_v8  ;;  %6407 = vmatprep.mubr.msk.bf16.mxu0 %vm548_vm0, %v9707_v49 }
  0x98   : > { %6405 = vmatprep.subr.bf16.mxu0 %v7154_v40 }
  0x9b   : > { %6406 = vmatpush3.bf16.msra.mxu0 %v7154_v40 }
  0x9e   : > { %6408 = vmatmul.mubr.msk.bf16.vlgmr.msra.gmra.mrb[0].mxu0 %vm548_vm0, %v9710_v6 }
  0x9f   : > { %6411 = vmatprep.mubr.msk.bf16.mxu0 %vm548_vm0, %v9711_v11 }
  0xa6   : > { %6412 = vmatmul.mubr.msk.bf16.gmra.mrb[4].mxu0 %vm548_vm0, %v1543_v60 }
 0x171   : > { %v6409_v60 = vpop.f32.mrb[0].mxu0 }
 0x172   : > { %v1671_v14 = vadd.f32 %v6409_v60, %v5553_v43  ;;  %v1623_v15 = vpop.f32.mrb[1].mxu0 }
 0x173   : > { %v1669_v37 = vadd.f32 %v5553_v43, %v1623_v15  ;;  %v6410_v21 = vpop.f32.mrb[2].mxu0 }
 0x174   : > { %v7957_v58 = vmax.f32 %v1671_v14, 0.0  ;;  %v1672_v26 = vadd.f32 %v6410_v21, %v5553_v43  ;;  %v1626_v35 = vpop.f32.mrb[3].mxu0 }
 0x175   : > { %v7959_v31 = vmax.f32 %v1669_v37, 0.0  ;;  %v1670_v12 = vadd.f32 %v5553_v43, %v1626_v35 }
 0x176   : > { %9712 = vst [vmem:[#allocation7_spill] sm:$0xff] %v7957_v58  ;;  %v7961_v54 = vmax.f32 %v1672_v26, 0.0  ;;  %v1687_v5 = vrot.slane %v7957_v58, 7  ;;  %v1946_v16 = vrot.slane %v7957_v58, 1 }
 0x177   : > { %v7965_v46 = vmax.f32 %v1670_v12, 0.0  ;;  %v1685_v36 = vrot.slane %v7959_v31, 7  ;;  %v1944_v28 = vrot.slane %v7959_v31, 1 }
 0x178   : > { %9713 = vst [vmem:[#allocation11_spill] sm:$0xff] %v7961_v54  ;;  %v1688_v42 = vrot.slane %v7961_v54, 7  ;;  %v9607_v47 = vrot.slane %v7961_v54, 1 }
 0x179   : > { %v1686_v24 = vrot.slane %v7965_v46, 7  ;;  %v1945_v32 = vrot.slane %v7965_v46, 1  ;;  %v6413_v63 = vpop.f32.mrb[4].mxu0  ;;  %v7976_v18 = vpack.c.bf16 %v7957_v58, %v7965_v46  ;;  %v7162_v58 = vld [vmem:[%s9569_s3 + $0x18] sm:$0xff]  }
 0x17a   : > { %v7984_v50 = vsel %vm735_vm8, %v1946_v16, %v9607_v47  ;;  %v1675_v2 = vadd.f32 %v6413_v63, %v5553_v43  ;;  %v1639_v3 = vpop.f32.mrb[5].mxu0  ;;  %v1697_v52 = vsel %vm474_vm1, %v1687_v5, %v1688_v42 }
 0x17b   : > { %9714 = vst [vmem:[#allocation15_spill] sm:$0xff] %v7976_v18  ;;  %v7991_v62 = vmul.f32 %v7984_v50, %v7643_v13  ;;  %v7995_v20 = vsel %vm474_vm1, %v1686_v24, %v1687_v5  ;;  %v7999_v48 = vsel %vm474_vm1, %v1685_v36, %v1686_v24  ;;  %v6414_v8 = vpop.f32.mrb[6].mxu0  ;;  %v8011_v49 = vsel %vm735_vm8, %v1945_v32, %v1946_v16 }
 0x17c   : > { %v8003_v17 = vmul.f32 %v7999_v48, %v7487_v56  ;;  %v8007_v40 = vmul.f32 %v7995_v20, %v7500_v59  ;;  %v8015_v33 = vmul.f32 %v7995_v20, %v7487_v56  ;;  %v1642_v4 = vpop.f32.mrb[7].mxu0  ;;  %v8019_v6 = vmul.f32 %v7984_v50, %v7634_v7 }
 0x17d   : > { %v8021_v11 = vmax.f32 %v1675_v2, 0.0  ;;  %v1673_v29 = vadd.f32 %v5553_v43, %v1639_v3  ;;  %v1676_v44 = vadd.f32 %v6414_v8, %v5553_v43  ;;  %v8025_v61 = vmul.f32 %v8011_v49, %v7634_v7 }
 0x17e   : > { %9716 = vst [vmem:[#allocation23_spill] sm:$0xff] %v8019_v6  ;;  %v1674_v9 = vadd.f32 %v5553_v43, %v1642_v4  ;;  %v8030_v14 = vmul.f32 %v1697_v52, %v7500_v59  ;;  %v8038_v26 = vmul.f32 %v1697_v52, %v7517_v0  ;;  %v8045_v12 = vmul.f32 %v1697_v52, %v7487_v56  ;;  %v7160_v56 = vld [vmem:[%s9569_s3 + $0x8] sm:$0xff]  }
 0x17f   : > { %9717 = vst [vmem:[#allocation22_spill] sm:$0xff] %v8021_v11  ;;  %v1691_v15 = vrot.slane %v8021_v11, 7  ;;  %v8033_v37 = vmax.f32 %v1673_v29, 0.0  ;;  %v8035_v21 = vmax.f32 %v1676_v44, 0.0  ;;  %v8049_v5 = vsel %vm735_vm8, %v1944_v28, %v1945_v32 }
 0x180   : > { %v8040_v35 = vmax.f32 %v1674_v9, 0.0  ;;  %9719 = vst [vmem:[#allocation28_spill] sm:$0xff] %v8045_v12  ;;  %v8221_v53 = vmul.f32 %v8011_v49, %v7574_v23  ;;  %v8238_v6 = vmul.f32 0.0, %v7959_v31 }
 0x181   : > { %9718 = vst [vmem:[#allocation27_spill] sm:$0xff] %v8033_v37  ;;  %v1689_v16 = vrot.slane %v8033_v37, 7  ;;  %v1948_v24 = vrot.slane %v8033_v37, 1  ;;  %v1692_v63 = vrot.slane %v8035_v21, 7  ;;  %v1951_v2 = vrot.slane %v8035_v21, 1 }
 0x182   : > { %v1690_v3 = vrot.slane %v8040_v35, 7  ;;  %v1949_v8 = vrot.slane %v8040_v35, 1  ;;  %v1721_v4 = vmul.f32 0.0, %v8035_v21  ;;  %v8060_v52 = vpack.c.bf16 %v8033_v37, %v7961_v54 }
 0x183   : > { %v8064_v32 = vpack.c.bf16 %v8021_v11, %v8040_v35  ;;  %v8068_v29 = vsel %vm474_vm1, %v1691_v15, %v1692_v63  ;;  %v8072_v44 = vsel %vm474_vm1, %v1692_v63, %v1685_v36  ;;  %v1696_v9 = vsel %vm474_vm1, %v1688_v42, %v1689_v16 }
 0x184   : > { %9720 = vst [vmem:[#allocation29_spill] sm:$0xff] %v8060_v52  ;;  %v1729_v57 = vpack.c.bf16 %v7959_v31, %v1721_v4  ;;  %v1701_v43 = vmul.f32 %v8068_v29, %v9722_v39  ;;  %v1702_v60 = vmul.f32 %v8072_v44, %v7446_v41  ;;  %v8082_v47 = vmul.f32 %v1696_v9, %v7520_v1 }
 0x185   : > { %9721 = vst [vmem:[#allocation30_spill] sm:$0xff] %v8064_v32  ;;  %v8088_v36 = vmul.f32 %v1696_v9, %v7500_v59  ;;  %v8092_v42 = vsel %vm474_vm1, %v1690_v3, %v1691_v15  ;;  %v8096_v63 = vsel %vm474_vm1, %v1689_v16, %v1690_v3  ;;  %v8100_v4 = vsel %vm735_vm8, %v1951_v2, %v1944_v28  ;;  %v9724_v16 = vld [vmem:[#allocation19_spill] sm:$0xff] }
 0x186   : > { %6423 = vmatprep.mubr.msk.bf16.mxu1 %vm548_vm0, %v1729_v57  ;;  %v1709_v39 = vpack.c.bf16 %v1702_v60, %v1701_v43  ;;  %v8107_v59 = vmul.f32 %v8096_v63, %v7566_v19  ;;  %v8111_v15 = vmul.f32 %v8092_v42, %v7569_v22  ;;  %v8119_v57 = vmul.f32 %v8100_v4, %v9724_v16  ;;  %v7161_v43 = vld [vmem:[%s9569_s3 + $0x10] sm:$0xff]  }
 0x187   : > { %9723 = vst [vmem:[#allocation31_spill] sm:$0xff] %v8088_v36  ;;  %6424 = vmatmul.mubr.msk.bf16.vlgmr.msra.gmra.mrb[0].mxu1 %vm548_vm0, %v7976_v18  ;;  %v8123_v60 = vmul.f32 %v8049_v5, %v7574_v23  ;;  %v1950_v3 = vrot.slane %v8021_v11, 1  ;;  %v1954_v55 = vsel %vm735_vm8, %v1948_v24, %v1949_v8  ;;  %v9725_v16 = vrot.slane %v7961_v54, 1 }
 0x188   : > { %6427 = vmatprep.mubr.msk.bf16.mxu1 %vm548_vm0, %v8060_v52  ;;  %6432 = vmatpush3.bf16.msra.mxu1 %v7951_v27  ;;  %v8148_v28 = vmul.f32 %v1954_v55, %v7664_v25  ;;  %v8197_v36 = vmul.f32 %v8092_v42, %v7566_v19  ;;  %v8279_v37 = vmul.f32 %v8011_v49, %v7560_v30  ;;  %v7164_v49 = vld [vmem:[%s9569_s3 + $0x48] sm:$0xff]  }
 0x189   : > { %v1955_v38 = vsel %vm735_vm8, %v9725_v16, %v1948_v24  ;;  %6433 = vmatprep.subr.bf16.mxu1 %v7160_v56  ;;  %v8157_v24 = vmul.f32 %v1954_v55, %v7643_v13  ;;  %v1952_v16 = vsel %vm735_vm8, %v1950_v3, %v1951_v2  ;;  %v1953_v52 = vsel %vm735_vm8, %v1949_v8, %v1950_v3  ;;  %v9729_v2 = vld [vmem:[#allocation12_spill] sm:$0xff] }
 0x18a   : > { %v8145_v27 = vmul.f32 %v1955_v38, %v7661_v51  ;;  %v8151_v18 = vmul.f32 %v1955_v38, %v7643_v13  ;;  %v8154_v12 = vmul.f32 %v1955_v38, %v7634_v7  ;;  %v8168_v54 = vmul.f32 %v1953_v52, %v7688_v45 }
 0x18b   : > { %9728 = vst [vmem:[#allocation34_spill] sm:$0xff] %v8157_v24  ;;  %v8171_v38 = vmul.f32 %v1952_v16, %v7691_v34  ;;  %v8177_v7 = vmul.f32 %v8072_v44, %v9729_v2  ;;  %v8181_v8 = vmul.f32 %v7999_v48, %v7446_v41  ;;  %v8184_v3 = vmul.f32 %v1696_v9, %v7517_v0 }
 0x18c   : > { %9726 = vst [vmem:[#allocation32_spill] sm:$0xff] %v8151_v18  ;;  %9727 = vst [vmem:[#allocation33_spill] sm:$0xff] %v8154_v12  ;;  %6434 = vmatpush3.bf16.msra.mxu1 %v7160_v56  ;;  %v8193_v13 = vmul.f32 %v8096_v63, %v7520_v1  ;;  %v8201_v9 = vmul.f32 %v8068_v29, %v7569_v22  ;;  %v8211_v24 = vmul.f32 %v8049_v5, %v7560_v30 }
 0x18d   : > { %6435 = vmatprep.subr.bf16.mxu1 %v7161_v43  ;;  %v8224_v12 = vmul.f32 %v1954_v55, %v7661_v51  ;;  %v8228_v56 = vmul.f32 %v1953_v52, %v7664_v25  ;;  %v8235_v22 = vmul.f32 %v8100_v4, %v7691_v34  ;;  %v7163_v55 = vld [vmem:[%s9569_s3 + $0x40] sm:$0xff]   ;;  %v8251_v18 = vmul.f32 %v7995_v20, %v7446_v41 }
 0x18e   : > { %v8255_v34 = vmul.f32 %v8096_v63, %v7517_v0  ;;  %v8288_v20 = vmul.f32 %v1953_v52, %v7661_v51  ;;  %v8300_v11 = vmul.f32 %v8100_v4, %v7688_v45  ;;  %v9732_v4 = vpack.c.bf16 %v8082_v47, %v8038_v26  ;;  %v7167_v26 = vld [vmem:[%s9569_s3 + $0x60] sm:$0xff]  }
 0x18f   : > { %6428 = vmatmul.mubr.msk.bf16.gmra.mrb[4].mxu1 %vm548_vm0, %v8064_v32  ;;  %v8231_v32 = vmul.f32 %v1952_v16, %v7688_v45  ;;  %v9734_v47 = vpack.c.bf16 %v8123_v60, %v8119_v57  ;;  %v7169_v57 = vld [vmem:[%s9569_s3 + $0x70] sm:$0xff]   ;;  %v7170_v60 = vld [vmem:[%s9569_s3 + $0x78] sm:$0xff]  }
 0x190   : > { %6436 = vmatpush3.bf16.msra.mxu1 %v7161_v43  ;;  %6439 = vmatprep.mubr.msk.bf16.mxu1 %vm548_vm0, %v1709_v39  ;;  %v8247_v43 = vmul.f32 %v7999_v48, %v9729_v2  ;;  %v8263_v39 = vmul.f32 %v8092_v42, %v7520_v1  ;;  %v8267_v48 = vmul.f32 %v8068_v29, %v7566_v19  ;;  %v9730_v2 = vld [vmem:[#allocation24_spill] sm:$0xff] }
 0x191   : > { %6437 = vmatprep.subr.bf16.mxu1 %v7162_v58  ;;  %v8273_v63 = vmul.f32 %v8072_v44, %v9730_v2  ;;  %v8285_v29 = vmul.f32 %v7984_v50, %v7574_v23  ;;  %v8291_v44 = vmul.f32 %v1952_v16, %v7664_v25  ;;  %v8304_v50 = vmul.f32 %v8049_v5, %v7763_v10  ;;  %v7165_v5 = vld [vmem:[%s9569_s3 + $0x50] sm:$0xff]  }
 0x192   : > { %v9731_v42 = vpack.c.bf16 %v8007_v40, %v8003_v17  ;;  %v7166_v17 = vld [vmem:[%s9569_s3 + $0x58] sm:$0xff]   ;;  %v9733_v40 = vpack.c.bf16 %v8111_v15, %v8107_v59  ;;  %v9735_v59 = vpack.c.bf16 %v7991_v62, %v8025_v61  ;;  %v9736_v15 = vpack.c.bf16 %v8148_v28, %v8145_v27  ;;  %v7171_v28 = vld [vmem:[%s9569_s3 + $0x80] sm:$0xff]   ;;  %v7172_v27 = vld [vmem:[%s9569_s3 + $0x88] sm:$0xff]  }
 0x193   : > { %v2740_v52 = vpack.c.bf16 %v8285_v29, %v8279_v37  ;;  %v2742_v16 = vpack.c.bf16 %v8291_v44, %v8288_v20  ;;  %v9737_v62 = vpack.c.bf16 %v8171_v38, %v8168_v54  ;;  %v9738_v61 = vpack.c.bf16 %v8181_v8, %v8177_v7  ;;  %v7173_v38 = vld [vmem:[%s9569_s3 + $0x90] sm:$0xff]   ;;  %v7174_v8 = vld [vmem:[%s9569_s3 + $0x98] sm:$0xff]   ;;  %v7192_v37 = vld [vmem:[%s9571_s5 + $0x28] sm:$0xff]  }
 0x194   : > { %6438 = vmatpush3.bf16.msra.mxu1 %v7162_v58  ;;  %v2743_v58 = vpack.c.bf16 %v8304_v50, %v8300_v11  ;;  %v9739_v54 = vpack.c.bf16 %v8030_v14, %v8015_v33  ;;  %v9740_v7 = vpack.c.bf16 %v8193_v13, %v8184_v3  ;;  %v9741_v33 = vpack.c.bf16 %v8201_v9, %v8197_v36  ;;  %v7175_v14 = vld [vmem:[%s9569_s3 + $0xa0] sm:$0xff]   ;;  %v7176_v3 = vld [vmem:[%s9569_s3 + $0xa8] sm:$0xff]   ;;  %v7194_v11 = vld [vmem:[%s9571_s5 + $0x38] sm:$0xff]  }
 0x195   : > { %6447 = vmatprep.subr.bf16.mxu1 %v7163_v55  ;;  %v9742_v13 = vpack.c.bf16 %v7965_v46, %v7959_v31  ;;  %v9743_v36 = vld [vmem:[#allocation11_spill] sm:$0xff]  ;;  %v7195_v20 = vld [vmem:[%s9571_s5] sm:$0xff]  }
 0x196   : > { %v9744_v9 = vld [vmem:[#allocation7_spill] sm:$0xff]  ;;  %v5690_v44 = vld [vmem:[%s9570_s4] ss:$0 sm:$0xff] }
 0x197   : > { %6440 = vmatmul.mubr.msk.bf16.vlgmr.msra.gmra.mrb[0].mxu1 %vm548_vm0, %v9731_v42  ;;  %v9745_v42 = vpack.c.bf16 %v9743_v36, %v9744_v9  ;;  %v9746_v31 = vld [vmem:[#allocation27_spill] sm:$0xff]  ;;  %v9770_v9 = vld [vmem:[#allocation6_spill] sm:$0xff] }
 0x198   : > { %6443 = vmatprep.mubr.msk.bf16.mxu1 %vm548_vm0, %v9732_v4  ;;  %6448 = vmatpush3.bf16.msra.mxu1 %v7163_v55  ;;  %v7168_v55 = vld [vmem:[%s9569_s3 + $0x68] sm:$0xff]   ;;  %v9747_v46 = vpack.c.bf16 %v8040_v35, %v9746_v31  ;;  %v7178_v4 = vld [vmem:[%s9569_s3 + $0xb8] sm:$0xff]   ;;  %v9750_v35 = vpack.c.bf16 %v8221_v53, %v8211_v24  ;;  %v9754_v53 = vpack.c.bf16 %v8228_v56, %v8224_v12  ;;  %v7181_v24 = vld [vmem:[%s9569_s3 + $0xd0] sm:$0xff]  }
 0x199   : > { %6449 = vmatprep.subr.bf16.mxu1 %v7164_v49  ;;  %v9756_v12 = vpack.c.bf16 %v8251_v18, %v8247_v43  ;;  %v7183_v56 = vld [vmem:[%s9569_s3 + $0xe0] sm:$0xff]   ;;  %v9760_v18 = vpack.c.bf16 %v8263_v39, %v8255_v34  ;;  %v7185_v43 = vld [vmem:[%s9569_s3 + $0xf0] sm:$0xff]   ;;  %v9762_v34 = vld [vmem:[#allocation15_spill] sm:$0xff] }
 0x19a   : > { %v7187_v39 = vld [vmem:[%s9569_s3 + $0x100] sm:$0xff]  }
 0x19c   : > { %6450 = vmatpush3.bf16.msra.mxu1 %v7164_v49  ;;  %v7177_v49 = vld [vmem:[%s9569_s3 + $0xb0] sm:$0xff]  }
 0x19d   : > { %6451 = vmatprep.subr.bf16.mxu1 %v7165_v5 }
 0x19f   : > { %6444 = vmatmul.mubr.msk.bf16.gmra.mrb[4].mxu1 %vm548_vm0, %v9733_v40  ;;  %v7179_v40 = vld [vmem:[%s9569_s3 + $0xc0] sm:$0xff]  }
 0x1a0   : > { %6452 = vmatpush3.bf16.msra.mxu1 %v7165_v5  ;;  %6455 = vmatprep.mubr.msk.bf16.mxu1 %vm548_vm0, %v9734_v47  ;;  %v9748_v5 = vld [vmem:[#allocation22_spill] sm:$0xff]  ;;  %v7180_v47 = vld [vmem:[%s9569_s3 + $0xc8] sm:$0xff]  }
 0x1a1   : > { %6453 = vmatprep.subr.bf16.mxu1 %v7166_v17 }
 0x1a4   : > { %6454 = vmatpush3.bf16.msra.mxu1 %v7166_v17  ;;  %v9749_v17 = vpack.c.bf16 %v8035_v21, %v9748_v5 }
 0x1a5   : > { %6463 = vmatprep.subr.bf16.mxu1 %v7167_v26 }
 0x1a7   : > { %6456 = vmatmul.mubr.msk.bf16.vlgmr.msra.gmra.mrb[0].mxu1 %vm548_vm0, %v9735_v59 }
 0x1a8   : > { %6459 = vmatprep.mubr.msk.bf16.mxu1 %vm548_vm0, %v9736_v15  ;;  %6464 = vmatpush3.bf16.msra.mxu1 %v7167_v26  ;;  %v9751_v26 = vld [vmem:[#allocation32_spill] sm:$0xff]  ;;  %v7182_v15 = vld [vmem:[%s9569_s3 + $0xd8] sm:$0xff]  }
 0x1a9   : > { %6465 = vmatprep.subr.bf16.mxu1 %v7168_v55 }
 0x1ac   : > { %6466 = vmatpush3.bf16.msra.mxu1 %v7168_v55  ;;  %v9752_v55 = vld [vmem:[#allocation23_spill] sm:$0xff] }
 0x1ad   : > { %6467 = vmatprep.subr.bf16.mxu1 %v7169_v57  ;;  %v9753_v59 = vpack.c.bf16 %v9751_v26, %v9752_v55  ;;  %v9773_v26 = vld [vmem:[#allocation2_spill] sm:$0xff] }
 0x1af   : > { %6460 = vmatmul.mubr.msk.bf16.gmra.mrb[4].mxu1 %vm548_vm0, %v9737_v62 }
 0x1b0   : > { %6468 = vmatpush3.bf16.msra.mxu1 %v7169_v57  ;;  %6471 = vmatprep.mubr.msk.bf16.mxu1 %vm548_vm0, %v9738_v61  ;;  %v9755_v57 = vpack.c.bf16 %v8235_v22, %v8231_v32  ;;  %v9757_v22 = vld [vmem:[#allocation31_spill] sm:$0xff]  ;;  %v9758_v32 = vld [vmem:[#allocation28_spill] sm:$0xff]  ;;  %v7186_v61 = vld [vmem:[%s9569_s3 + $0xf8] sm:$0xff]  }
 0x1b1   : > { %6469 = vmatprep.subr.bf16.mxu1 %v7170_v60  ;;  %v9759_v62 = vpack.c.bf16 %v9757_v22, %v9758_v32  ;;  %v9777_v32 = vld [vmem:[#allocation3_spill] sm:$0xff] }
 0x1b4   : > { %6470 = vmatpush3.bf16.msra.mxu1 %v7170_v60  ;;  %v7184_v60 = vld [vmem:[%s9569_s3 + $0xe8] sm:$0xff]  }
 0x1b5   : > { %6479 = vmatprep.subr.bf16.mxu1 %v7171_v28 }
 0x1b7   : > { %6472 = vmatmul.mubr.msk.bf16.vlgmr.msra.gmra.mrb[0].mxu1 %vm548_vm0, %v9739_v54  ;;  %v9763_v54 = vld [vmem:[#allocation29_spill] sm:$0xff] }
 0x1b8   : > { %6475 = vmatprep.mubr.msk.bf16.mxu1 %vm548_vm0, %v9740_v7  ;;  %6480 = vmatpush3.bf16.msra.mxu1 %v7171_v28  ;;  %v9761_v28 = vpack.c.bf16 %v8273_v63, %v8267_v48  ;;  %v9764_v48 = vld [vmem:[#allocation30_spill] sm:$0xff]  ;;  %v7189_v63 = vld [vmem:[%s9569_s3 + $0x110] sm:$0xff]   ;;  %v7190_v7 = vld [vmem:[%s9569_s3 + $0x118] sm:$0xff]  }
 0x1b9   : > { %6481 = vmatprep.subr.bf16.mxu1 %v7172_v27 }
 0x1bc   : > { %6482 = vmatpush3.bf16.msra.mxu1 %v7172_v27  ;;  %v7188_v27 = vld [vmem:[%s9569_s3 + $0x108] sm:$0xff]  }
 0x1bd   : > { %6483 = vmatprep.subr.bf16.mxu1 %v7173_v38 }
 0x1bf   : > { %6476 = vmatmul.mubr.msk.bf16.gmra.mrb[4].mxu1 %vm548_vm0, %v9741_v33  ;;  %v9767_v33 = vld [vmem:[#allocation33_spill] sm:$0xff] }
 0x1c0   : > { %6484 = vmatpush3.bf16.msra.mxu1 %v7173_v38  ;;  %6487 = vmatprep.mubr.msk.bf16.mxu1 %vm548_vm0, %v9742_v13  ;;  %v9765_v38 = vpack.c.bf16 %v8238_v6, %v8035_v21  ;;  %v7191_v6 = vld [vmem:[%s9571_s5 + $0x20] sm:$0xff]   ;;  %v7193_v21 = vld [vmem:[%s9571_s5 + $0x30] sm:$0xff]  }
 0x1c1   : > { %6485 = vmatprep.subr.bf16.mxu1 %v7174_v8  ;;  %6559 = vmatprep.subr.bf16.mxu0 %v7191_v6 }
 0x1c2   : > { %6560 = vmatpush3.bf16.msra.mxu0 %v7191_v6 }
 0x1c3   : > { %6561 = vmatprep.subr.bf16.mxu0 %v7192_v37 }
 0x1c4   : > { %6486 = vmatpush3.bf16.msra.mxu1 %v7174_v8  ;;  %v9766_v8 = vld [vmem:[#allocation34_spill] sm:$0xff] }
 0x1c5   : > { %6495 = vmatprep.subr.bf16.mxu1 %v7175_v14  ;;  %v9768_v13 = vpack.c.bf16 %v9766_v8, %v9767_v33 }
 0x1c6   : > { %6562 = vmatpush3.bf16.msra.mxu0 %v7192_v37 }
 0x1c7   : > { %6488 = vmatmul.mubr.msk.bf16.vlgmr.msra.gmra.mrb[0].mxu1 %vm548_vm0, %v9745_v42  ;;  %6563 = vmatprep.subr.bf16.mxu0 %v7193_v21 }
 0x1c8   : > { %6491 = vmatprep.mubr.msk.bf16.mxu1 %vm548_vm0, %v9747_v46  ;;  %6496 = vmatpush3.bf16.msra.mxu1 %v7175_v14 }
 0x1c9   : > { %6497 = vmatprep.subr.bf16.mxu1 %v7176_v3 }
 0x1ca   : > { %6564 = vmatpush3.bf16.msra.mxu0 %v7193_v21 }
 0x1cb   : > { %6565 = vmatprep.subr.bf16.mxu0 %v7194_v11 }
 0x1cc   : > { %6498 = vmatpush3.bf16.msra.mxu1 %v7176_v3  ;;  %v9769_v3 = vld [vmem:[#allocation8_spill] sm:$0xff] }
 0x1cd   : > { %6499 = vmatprep.subr.bf16.mxu1 %v7177_v49 }
 0x1ce   : > { %6566 = vmatpush3.bf16.msra.mxu0 %v7194_v11 }
 0x1cf   : > { %6492 = vmatmul.mubr.msk.bf16.gmra.mrb[4].mxu1 %vm548_vm0, %v9749_v17  ;;  %6575 = vmatprep.subr.bf16.mxu0 %v7195_v20 }
 0x1d0   : > { %6500 = vmatpush3.bf16.msra.mxu1 %v7177_v49  ;;  %6503 = vmatprep.mubr.msk.bf16.mxu1 %vm548_vm0, %v9750_v35 }
 0x1d1   : > { %6501 = vmatprep.subr.bf16.mxu1 %v7178_v4 }
 0x1d4   : > { %6502 = vmatpush3.bf16.msra.mxu1 %v7178_v4 }
 0x1d5   : > { %6511 = vmatprep.subr.bf16.mxu1 %v7179_v40 }
 0x1d7   : > { %6504 = vmatmul.mubr.msk.bf16.vlgmr.msra.gmra.mrb[0].mxu1 %vm548_vm0, %v9753_v59 }
 0x1d8   : > { %6507 = vmatprep.mubr.msk.bf16.mxu1 %vm548_vm0, %v9754_v53  ;;  %6512 = vmatpush3.bf16.msra.mxu1 %v7179_v40 }
 0x1d9   : > { %6513 = vmatprep.subr.bf16.mxu1 %v7180_v47 }
 0x1dc   : > { %6514 = vmatpush3.bf16.msra.mxu1 %v7180_v47 }
 0x1dd   : > { %6515 = vmatprep.subr.bf16.mxu1 %v7181_v24 }
 0x1df   : > { %6508 = vmatmul.mubr.msk.bf16.gmra.mrb[4].mxu1 %vm548_vm0, %v9755_v57  ;;  %v9775_v57 = vld [vmem:[#allocation10_spill] sm:$0xff] }
 0x1e0   : > { %6516 = vmatpush3.bf16.msra.mxu1 %v7181_v24  ;;  %6519 = vmatprep.mubr.msk.bf16.mxu1 %vm548_vm0, %v9756_v12  ;;  %v9774_v24 = vld [vmem:[#allocation5_spill] sm:$0xff] }
 0x1e1   : > { %6517 = vmatprep.subr.bf16.mxu1 %v7182_v15 }
 0x1e4   : > { %6518 = vmatpush3.bf16.msra.mxu1 %v7182_v15 }
 0x1e5   : > { %6527 = vmatprep.subr.bf16.mxu1 %v7183_v56 }
 0x1e7   : > { %6520 = vmatmul.mubr.msk.bf16.vlgmr.msra.gmra.mrb[0].mxu1 %vm548_vm0, %v9759_v62 }
 0x1e8   : > { %6523 = vmatprep.mubr.msk.bf16.mxu1 %vm548_vm0, %v9760_v18  ;;  %6528 = vmatpush3.bf16.msra.mxu1 %v7183_v56  ;;  %v9776_v56 = vld [vmem:[#allocation9_spill] sm:$0xff] }
 0x1e9   : > { %6529 = vmatprep.subr.bf16.mxu1 %v7184_v60 }
 0x1ec   : > { %6530 = vmatpush3.bf16.msra.mxu1 %v7184_v60 }
 0x1ed   : > { %6531 = vmatprep.subr.bf16.mxu1 %v7185_v43 }
 0x1ef   : > { %6524 = vmatmul.mubr.msk.bf16.gmra.mrb[4].mxu1 %vm548_vm0, %v9761_v28 }
 0x1f0   : > { %6532 = vmatpush3.bf16.msra.mxu1 %v7185_v43  ;;  %6535 = vmatprep.mubr.msk.bf16.mxu1 %vm548_vm0, %v9762_v34 }
 0x1f1   : > { %6533 = vmatprep.subr.bf16.mxu1 %v7186_v61 }
 0x1f4   : > { %6534 = vmatpush3.bf16.msra.mxu1 %v7186_v61  ;;  %v9779_v61 = vld [vmem:[#allocation14_spill] sm:$0xff] }
 0x1f5   : > { %6543 = vmatprep.subr.bf16.mxu1 %v7187_v39 }
 0x1f7   : > { %6536 = vmatmul.mubr.msk.bf16.vlgmr.msra.gmra.mrb[0].mxu1 %vm548_vm0, %v9763_v54 }
 0x1f8   : > { %6539 = vmatprep.mubr.msk.bf16.mxu1 %vm548_vm0, %v9764_v48  ;;  %6544 = vmatpush3.bf16.msra.mxu1 %v7187_v39 }
 0x1f9   : > { %6545 = vmatprep.subr.bf16.mxu1 %v7188_v27 }
 0x1fc   : > { %6546 = vmatpush3.bf16.msra.mxu1 %v7188_v27 }
 0x1fd   : > { %6547 = vmatprep.subr.bf16.mxu1 %v7189_v63 }
 0x1ff   : > { %6540 = vmatmul.mubr.msk.bf16.gmra.mrb[4].mxu1 %vm548_vm0, %v9765_v38 }
 0x200   : > { %6548 = vmatpush3.bf16.msra.mxu1 %v7189_v63  ;;  %6551 = vmatprep.mubr.msk.bf16.mxu1 %vm548_vm0, %v2740_v52 }
 0x201   : > { %6549 = vmatprep.subr.bf16.mxu1 %v7190_v7 }
 0x204   : > { %6550 = vmatpush3.bf16.msra.mxu1 %v7190_v7 }
 0x207   : > { %6552 = vmatmul.mubr.msk.bf16.vlgmr.msra.gmra.mrb[0].mxu1 %vm548_vm0, %v9768_v13 }
 0x208   : > { %6555 = vmatprep.mubr.msk.bf16.mxu1 %vm548_vm0, %v2742_v16 }
 0x20f   : > { %6556 = vmatmul.mubr.msk.bf16.gmra.mrb[4].mxu1 %vm548_vm0, %v2743_v58 }
 0x2da   : > { %v6553_v29 = vpop.f32.mrb[0].mxu1 }
 0x2db   : > { %v2823_v58 = vpop.f32.mrb[1].mxu1  ;;  %v2871_v52 = vadd.f32 %v6553_v29, %v5690_v44 }
 0x2dc   : > { %v6554_v50 = vpop.f32.mrb[2].mxu1  ;;  %v2869_v31 = vadd.f32 %v5690_v44, %v2823_v58 }
 0x2dd   : > { %v2872_v16 = vadd.f32 %v6554_v50, %v5690_v44  ;;  %v2826_v14 = vpop.f32.mrb[3].mxu1  ;;  %v2879_v42 = vadd.f32 %v2871_v52, %v9770_v9 }
 0x2de   : > { %v2870_v46 = vadd.f32 %v5690_v44, %v2826_v14  ;;  %v2877_v55 = vadd.f32 %v2869_v31, %v9773_v26 }
 0x2df   : > { %v2880_v36 = vadd.f32 %v2872_v16, %v9769_v3  ;;  %v8530_v47 = vmax.f32 %v2879_v42, 0.0  ;;  %v9787_v16 = vld [vmem:[#allocation16_spill] sm:$0xff]  ;;  %v9788_v3 = vld [vmem:[#allocation17_spill] sm:$0xff] }
 0x2e0   : > { %v2878_v15 = vadd.f32 %v2870_v46, %v9774_v24  ;;  %v8541_v34 = vmax.f32 %v2877_v55, 0.0 }
 0x2e1   : > { %v8528_v17 = vmax.f32 %v2880_v36, 0.0  ;;  %9772 = vst [vmem:[#allocation7_spill] sm:$0xff] %v8530_v47  ;;  %v2895_v27 = vrot.slane %v8530_v47, 7 }
 0x2e2   : > { %v6557_v49 = vpop.f32.mrb[4].mxu1  ;;  %9780 = vst [vmem:[#allocation22_spill] sm:$0xff] %v8541_v34  ;;  %v8546_v54 = vmax.f32 %v2878_v15, 0.0  ;;  %v2893_v58 = vrot.slane %v8541_v34, 7  ;;  %v9792_v15 = vld [vmem:[#allocation21_spill] sm:$0xff] }
 0x2e3   : > { %v2875_v4 = vadd.f32 %v6557_v49, %v5690_v44  ;;  %v2839_v5 = vpop.f32.mrb[5].mxu1  ;;  %9771 = vst [vmem:[#allocation11_spill] sm:$0xff] %v8528_v17  ;;  %v2896_v18 = vrot.slane %v8528_v17, 7  ;;  %v3155_v31 = vrot.slane %v8528_v17, 1 }
 0x2e4   : > { %v2873_v35 = vadd.f32 %v5690_v44, %v2839_v5  ;;  %v6558_v40 = vpop.f32.mrb[6].mxu1  ;;  %9782 = vst [vmem:[#allocation23_spill] sm:$0xff] %v8546_v54  ;;  %v8566_v21 = vpack.c.bf16 %v8530_v47, %v8546_v54  ;;  %v2894_v46 = vrot.slane %v8546_v54, 7  ;;  %v9789_v5 = vld [vmem:[#allocation13_spill] sm:$0xff] }
 0x2e5   : > { %v2876_v59 = vadd.f32 %v6558_v40, %v5690_v44  ;;  %v2842_v53 = vpop.f32.mrb[7].mxu1  ;;  %v2883_v12 = vadd.f32 %v2875_v4, %v9775_v57  ;;  %v8561_v6 = vsel %vm474_vm1, %v2895_v27, %v2896_v18  ;;  %v7197_v4 = vld [vmem:[%s9571_s5 + $0x10] sm:$0xff]  }
 0x2e6   : > { %v2881_v60 = vadd.f32 %v2873_v35, %v9776_v56  ;;  %v2874_v22 = vadd.f32 %v5690_v44, %v2842_v53  ;;  %v7196_v44 = vld [vmem:[%s9571_s5 + $0x8] sm:$0xff]   ;;  %v8582_v14 = vmul.f32 %v8561_v6, %v9787_v16  ;;  %v8621_v55 = vsel %vm474_vm1, %v2894_v46, %v2895_v27  ;;  %v9790_v53 = vld [vmem:[#allocation20_spill] sm:$0xff] }
 0x2e7   : > { %v2884_v62 = vadd.f32 %v2876_v59, %v9777_v32  ;;  %v8548_v48 = vmax.f32 %v2883_v12, 0.0  ;;  %v8625_v59 = vsel %vm474_vm1, %v2893_v58, %v2894_v46  ;;  %v2913_v46 = vmul.f32 %v8561_v6, %v7517_v0 }
 0x2e8   : > { %v8538_v43 = vmax.f32 %v2881_v60, 0.0  ;;  %v2882_v28 = vadd.f32 %v2874_v22, %v9779_v61  ;;  %v7198_v60 = vld [vmem:[%s9571_s5 + $0x18] sm:$0xff]   ;;  %v3153_v22 = vrot.slane %v8546_v54, 1  ;;  %v2911_v61 = vmul.f32 %v8625_v59, %v9787_v16 }
 0x2e9   : > { %v8543_v39 = vmax.f32 %v2884_v62, 0.0  ;;  %9783 = vst [vmem:[#allocation31_spill] sm:$0xff] %v8548_v48  ;;  %v2899_v11 = vrot.slane %v8548_v48, 7 }
 0x2ea   : > { %9778 = vst [vmem:[#allocation27_spill] sm:$0xff] %v8538_v43  ;;  %v2897_v63 = vrot.slane %v8538_v43, 7  ;;  %v8551_v7 = vmax.f32 %v2882_v28, 0.0  ;;  %v3156_v29 = vrot.slane %v8538_v43, 1  ;;  %v8578_v52 = vpack.c.bf16 %v8538_v43, %v8528_v17 }
 0x2eb   : > { %9781 = vst [vmem:[#allocation32_spill] sm:$0xff] %v8543_v39  ;;  %v2929_v38 = vmul.f32 0.0, %v8543_v39  ;;  %v2900_v8 = vrot.slane %v8543_v39, 7  ;;  %v2912_v28 = vmul.f32 %v8621_v55, %v9788_v3  ;;  %v3159_v27 = vrot.slane %v8543_v39, 1 }
 0x2ec   : > { %9784 = vst [vmem:[#allocation28_spill] sm:$0xff] %v8551_v7  ;;  %v8557_v13 = vsel %vm474_vm1, %v2896_v18, %v2897_v63  ;;  %v3157_v50 = vrot.slane %v8551_v7, 1  ;;  %9786 = vst [vmem:[#allocation15_spill] sm:$0xff] %v8578_v52  ;;  %v2898_v12 = vrot.slane %v8551_v7, 7  ;;  %v8638_v56 = vpack.c.bf16 %v8548_v48, %v8551_v7 }
 0x2ed   : > { %v2937_v37 = vpack.c.bf16 %v8541_v34, %v2929_v38  ;;  %v8586_v36 = vmul.f32 %v8557_v13, %v9788_v3  ;;  %v8592_v9 = vsel %vm474_vm1, %v2899_v11, %v2900_v8  ;;  %v8596_v42 = vsel %vm474_vm1, %v2900_v8, %v2893_v58  ;;  %v7199_v8 = vld [vmem:[%s9571_s5 + $0x40] sm:$0xff]  }
 0x2ee   : > { %v2909_v35 = vmul.f32 %v8592_v9, %v9789_v5  ;;  %v2910_v40 = vmul.f32 %v8596_v42, %v7446_v41  ;;  %v8613_v26 = vsel %vm735_vm8, %v3156_v29, %v3157_v50  ;;  %9794 = vst [vmem:[#allocation34_spill] sm:$0xff] %v8638_v56  ;;  %v3154_v18 = vrot.slane %v8530_v47, 1 }
 0x2ef   : > { %6567 = vmatprep.mubr.msk.bf16.mxu0 %vm548_vm0, %v2937_v37  ;;  %v8633_v57 = vmul.f32 %v8613_v26, %v9792_v15  ;;  %v8664_v37 = vsel %vm474_vm1, %v2898_v12, %v2899_v11  ;;  %v2918_v11 = vpack.c.bf16 %v2912_v28, %v2911_v61  ;;  %v8723_v62 = vmul.f32 %v8596_v42, %v9730_v2  ;;  %v9798_v2 = vld [vmem:[#allocation18_spill] sm:$0xff] }
 0x2f0   : > { %6568 = vmatmul.mubr.msk.bf16.vlgmr.msra.gmra.mrb[8].mxu0 %vm548_vm0, %v8566_v21  ;;  %v2917_v32 = vpack.c.bf16 %v2910_v40, %v2909_v35  ;;  %v8657_v38 = vsel %vm735_vm8, %v3154_v18, %v3155_v31  ;;  %v8673_v58 = vsel %vm735_vm8, %v3153_v22, %v3154_v18  ;;  %v8706_v28 = vmul.f32 %v8664_v37, %v7520_v1 }
 0x2f1   : > { %6571 = vmatprep.mubr.msk.bf16.mxu0 %vm548_vm0, %v8578_v52  ;;  %6576 = vmatpush3.bf16.msra.mxu0 %v7195_v20  ;;  %v8617_v20 = vsel %vm735_vm8, %v3155_v31, %v3156_v29  ;;  %9793 = vst [vmem:[#allocation30_spill] sm:$0xff] %v8633_v57  ;;  %v8668_v29 = vsel %vm474_vm1, %v2897_v63, %v2898_v12  ;;  %v3158_v31 = vrot.slane %v8548_v48, 1  ;;  %v9795_v63 = vld [vmem:[#allocation12_spill] sm:$0xff] }
 0x2f2   : > { %6577 = vmatprep.subr.bf16.mxu0 %v7196_v44  ;;  %v8629_v24 = vmul.f32 %v8617_v20, %v9790_v53  ;;  %v8686_v40 = vmul.f32 %v8625_v59, %v9795_v63  ;;  %v8690_v12 = vmul.f32 %v8621_v55, %v7446_v41  ;;  %v8702_v61 = vmul.f32 %v8668_v29, %v7517_v0  ;;  %v7201_v57 = vld [vmem:[%s9571_s5 + $0x50] sm:$0xff]  }
 0x2f3   : > { %v8698_v18 = vsel %vm735_vm8, %v3157_v50, %v3158_v31  ;;  %v8729_v33 = vmul.f32 %v8673_v58, %v7560_v30  ;;  %v2915_v5 = vmul.f32 %v8668_v29, %v7566_v19 }
 0x2f4   : > { %9791 = vst [vmem:[#allocation29_spill] sm:$0xff] %v8629_v24  ;;  %v8740_v50 = vmul.f32 %v8698_v18, %v7661_v51  ;;  %v2916_v24 = vmul.f32 %v8664_v37, %v9798_v2 }
 0x2f5   : > { %6578 = vmatpush3.bf16.msra.mxu0 %v7196_v44  ;;  %v3152_v44 = vrot.slane %v8541_v34, 1  ;;  %9796 = vst [vmem:[#allocation33_spill] sm:$0xff] %v8729_v33 }
 0x2f6   : > { %6579 = vmatprep.subr.bf16.mxu0 %v7197_v4 }
 0x2f7   : > { %v8682_v35 = vsel %vm735_vm8, %v3159_v27, %v3152_v44 }
 0x2f8   : > { %6572 = vmatmul.mubr.msk.bf16.gmra.mrb[12].mxu0 %vm548_vm0, %v8638_v56  ;;  %v7202_v56 = vld [vmem:[%s9571_s5 + $0x58] sm:$0xff]  }
 0x2f9   : > { %6580 = vmatpush3.bf16.msra.mxu0 %v7197_v4  ;;  %6583 = vmatprep.mubr.msk.bf16.mxu0 %vm548_vm0, %v2917_v32  ;;  %v2914_v4 = vmul.f32 %v8557_v13, %v7520_v1  ;;  %v8694_v32 = vsel %vm735_vm8, %v3158_v31, %v3159_v27  ;;  %v8713_v27 = vsel %vm735_vm8, %v3152_v44, %v3153_v22 }
 0x2fa   : > { %6581 = vmatprep.subr.bf16.mxu0 %v7198_v60  ;;  %v8719_v31 = vmul.f32 %v8592_v9, %v7566_v19  ;;  %v8733_v22 = vmul.f32 %v8657_v38, %v7574_v23  ;;  %v8755_v44 = vmul.f32 %v8713_v27, %v7763_v10  ;;  %v3169_v33 = vmul.f32 %v8713_v27, %v7574_v23 }
 0x2fb   : > { %v2919_v49 = vpack.c.bf16 %v2914_v4, %v2913_v46  ;;  %v8744_v46 = vmul.f32 %v8694_v32, %v7664_v25  ;;  %v8748_v4 = vmul.f32 %v8682_v35, %v7688_v45  ;;  %v3170_v10 = vmul.f32 %v8673_v58, %v9790_v53 }
 0x2fc   : > { %9797 = vst [vmem:[#allocation8_spill] sm:$0xff] %v8733_v22  ;;  %v2920_v22 = vpack.c.bf16 %v2916_v24, %v2915_v5  ;;  %v7203_v5 = vld [vmem:[%s9571_s5 + $0x60] sm:$0xff]   ;;  %v3173_v24 = vmul.f32 %v8613_v26, %v7664_v25 }
 0x2fd   : > { %6582 = vmatpush3.bf16.msra.mxu0 %v7198_v60  ;;  %v7200_v60 = vld [vmem:[%s9571_s5 + $0x48] sm:$0xff]  }
 0x2fe   : > { %6591 = vmatprep.subr.bf16.mxu0 %v7199_v8 }
 0x300   : > { %6584 = vmatmul.mubr.msk.bf16.vlgmr.msra.gmra.mrb[8].mxu0 %vm548_vm0, %v2918_v11 }
 0x301   : > { %6587 = vmatprep.mubr.msk.bf16.mxu0 %vm548_vm0, %v2919_v49  ;;  %6592 = vmatpush3.bf16.msra.mxu0 %v7199_v8  ;;  %v9799_v8 = vld [vmem:[#allocation19_spill] sm:$0xff] }
 0x302   : > { %6593 = vmatprep.subr.bf16.mxu0 %v7200_v60  ;;  %v3168_v11 = vmul.f32 %v8682_v35, %v9799_v8 }
 0x304   : > { %v3176_v52 = vpack.c.bf16 %v3169_v33, %v3168_v11  ;;  %v3172_v33 = vmul.f32 %v8617_v20, %v7661_v51  ;;  %v3174_v11 = vmul.f32 %v8698_v18, %v7688_v45 }
 0x305   : > { %6594 = vmatpush3.bf16.msra.mxu0 %v7200_v60  ;;  %v3171_v60 = vmul.f32 %v8657_v38, %v9792_v15 }
 0x306   : > { %6595 = vmatprep.subr.bf16.mxu0 %v7201_v57 }
 0x308   : > { %6588 = vmatmul.mubr.msk.bf16.gmra.mrb[12].mxu0 %vm548_vm0, %v2920_v22  ;;  %v3178_v22 = vpack.c.bf16 %v3173_v24, %v3172_v33  ;;  %v3299_v24 = vmul.f32 %v8625_v59, %v7446_v41  ;;  %v7207_v59 = vld [vmem:[%s9571_s5 + $0x80] sm:$0xff]  }
 0x309   : > { %6596 = vmatpush3.bf16.msra.mxu0 %v7201_v57  ;;  %6599 = vmatprep.mubr.msk.bf16.mxu0 %vm548_vm0, %v3176_v52  ;;  %v3177_v57 = vpack.c.bf16 %v3171_v60, %v3170_v10  ;;  %v7204_v52 = vld [vmem:[%s9571_s5 + $0x68] sm:$0xff]   ;;  %v7205_v10 = vld [vmem:[%s9571_s5 + $0x70] sm:$0xff]   ;;  %v3298_v60 = vmul.f32 %v8596_v42, %v9795_v63  ;;  %v3301_v42 = vmul.f32 %v8561_v6, %v9788_v3 }
 0x30a   : > { %6597 = vmatprep.subr.bf16.mxu0 %v7202_v56  ;;  %v3304_v6 = vmul.f32 %v8664_v37, %v7566_v19  ;;  %v3429_v37 = vpack.c.bf16 %v8528_v17, %v8530_v47 }
 0x30d   : > { %6598 = vmatpush3.bf16.msra.mxu0 %v7202_v56  ;;  %v9800_v56 = vld [vmem:[#allocation25_spill] sm:$0xff] }
 0x30e   : > { %6607 = vmatprep.subr.bf16.mxu0 %v7203_v5  ;;  %v3175_v49 = vmul.f32 %v8694_v32, %v9800_v56 }
 0x310   : > { %6600 = vmatmul.mubr.msk.bf16.vlgmr.msra.gmra.mrb[8].mxu0 %vm548_vm0, %v3177_v57  ;;  %v3179_v33 = vpack.c.bf16 %v3175_v49, %v3174_v11  ;;  %v3306_v57 = vpack.c.bf16 %v3299_v24, %v3298_v60  ;;  %v3303_v49 = vmul.f32 %v8668_v29, %v7520_v1  ;;  %v3305_v29 = vmul.f32 %v8592_v9, %v9798_v2  ;;  %v7210_v24 = vld [vmem:[%s9571_s5 + $0x98] sm:$0xff]   ;;  %v7211_v9 = vld [vmem:[%s9571_s5 + $0xa0] sm:$0xff]  }
 0x311   : > { %6603 = vmatprep.mubr.msk.bf16.mxu0 %vm548_vm0, %v3178_v22  ;;  %6608 = vmatpush3.bf16.msra.mxu0 %v7203_v5  ;;  %v7206_v5 = vld [vmem:[%s9571_s5 + $0x78] sm:$0xff]   ;;  %v3300_v22 = vmul.f32 %v8621_v55, %v9787_v16  ;;  %v7208_v55 = vld [vmem:[%s9571_s5 + $0x88] sm:$0xff]  }
 0x312   : > { %6609 = vmatprep.subr.bf16.mxu0 %v7204_v52  ;;  %v3309_v60 = vpack.c.bf16 %v3305_v29, %v3304_v6  ;;  %v3552_v6 = vmul.f32 %v8657_v38, %v9790_v53  ;;  %v3557_v38 = vmul.f32 %v8682_v35, %v9800_v56  ;;  %v7219_v35 = vld [vmem:[%s9571_s5 + $0xe0] sm:$0xff]  }
 0x313   : > { %v3307_v11 = vpack.c.bf16 %v3301_v42, %v3300_v22  ;;  %v7213_v22 = vld [vmem:[%s9571_s5 + $0xb0] sm:$0xff]   ;;  %v3550_v42 = vmul.f32 %v8713_v27, %v7560_v30  ;;  %v3553_v27 = vmul.f32 %v8617_v20, %v9792_v15  ;;  %v7216_v20 = vld [vmem:[%s9571_s5 + $0xc8] sm:$0xff]  }
 0x315   : > { %6610 = vmatpush3.bf16.msra.mxu0 %v7204_v52  ;;  %v3302_v52 = vmul.f32 %v8557_v13, %v7517_v0  ;;  %v7209_v13 = vld [vmem:[%s9571_s5 + $0x90] sm:$0xff]   ;;  %v3559_v29 = vpack.c.bf16 %v3553_v27, %v3552_v6  ;;  %v9813_v27 = vpack.c.bf16 %v8744_v46, %v8740_v50  ;;  %v8972_v46 = vld [vmem:[%s9573_s7] sm:$0xff]  }
 0x316   : > { %6611 = vmatprep.subr.bf16.mxu0 %v7205_v10  ;;  %v7229_v50 = vld [vmem:[%s9573_s7 + $0x30] sm:$0xff]  }
 0x318   : > { %6604 = vmatmul.mubr.msk.bf16.gmra.mrb[12].mxu0 %vm548_vm0, %v3179_v33  ;;  %v3428_v33 = vpack.c.bf16 %v8546_v54, %v8541_v34 }
 0x319   : > { %6612 = vmatpush3.bf16.msra.mxu0 %v7205_v10  ;;  %6615 = vmatprep.mubr.msk.bf16.mxu0 %vm548_vm0, %v3306_v57  ;;  %v3308_v10 = vpack.c.bf16 %v3303_v49, %v3302_v52  ;;  %v3430_v57 = vpack.c.bf16 %v8551_v7, %v8538_v43  ;;  %v3431_v49 = vpack.c.bf16 %v8543_v39, %v8548_v48  ;;  %v7214_v52 = vld [vmem:[%s9571_s5 + $0xb8] sm:$0xff]  }
 0x31a   : > { %6613 = vmatprep.subr.bf16.mxu0 %v7206_v5  ;;  %v9824_v43 = vld [vmem:[#allocation13_spill] sm:$0xff] }
 0x31d   : > { %6614 = vmatpush3.bf16.msra.mxu0 %v7206_v5  ;;  %v7212_v5 = vld [vmem:[%s9571_s5 + $0xa8] sm:$0xff]  }
 0x31e   : > { %6623 = vmatprep.subr.bf16.mxu0 %v7207_v59 }
 0x320   : > { %6616 = vmatmul.mubr.msk.bf16.vlgmr.msra.gmra.mrb[8].mxu0 %vm548_vm0, %v3307_v11 }
 0x321   : > { %6619 = vmatprep.mubr.msk.bf16.mxu0 %vm548_vm0, %v3308_v10  ;;  %6624 = vmatpush3.bf16.msra.mxu0 %v7207_v59  ;;  %v3551_v59 = vmul.f32 %v8673_v58, %v7574_v23  ;;  %v7215_v58 = vld [vmem:[%s9571_s5 + $0xc0] sm:$0xff]   ;;  %v3555_v10 = vmul.f32 %v8698_v18, %v7664_v25  ;;  %v7217_v18 = vld [vmem:[%s9571_s5 + $0xd0] sm:$0xff]  }
 0x322   : > { %6625 = vmatprep.subr.bf16.mxu0 %v7208_v55 }
 0x323   : > { %v3558_v11 = vpack.c.bf16 %v3551_v59, %v3550_v42  ;;  %v9808_v42 = vld [vmem:[#allocation33_spill] sm:$0xff] }
 0x325   : > { %6626 = vmatpush3.bf16.msra.mxu0 %v7208_v55  ;;  %v3554_v55 = vmul.f32 %v8613_v26, %v7661_v51  ;;  %v3556_v26 = vmul.f32 %v8694_v32, %v7688_v45  ;;  %v9801_v32 = vpack.c.bf16 %v8690_v12, %v8686_v40  ;;  %v9803_v40 = vpack.c.bf16 %v8706_v28, %v8702_v61  ;;  %v7221_v12 = vld [vmem:[%s9571_s5 + $0xf0] sm:$0xff]   ;;  %v7224_v61 = vld [vmem:[%s9571_s5 + $0x108] sm:$0xff]  }
 0x326   : > { %6627 = vmatprep.subr.bf16.mxu0 %v7209_v13  ;;  %v9805_v28 = vld [vmem:[#allocation15_spill] sm:$0xff] }
 0x328   : > { %6620 = vmatmul.mubr.msk.bf16.gmra.mrb[12].mxu0 %vm548_vm0, %v3309_v60  ;;  %v3561_v60 = vpack.c.bf16 %v3557_v38, %v3556_v26 }
 0x329   : > { %6628 = vmatpush3.bf16.msra.mxu0 %v7209_v13  ;;  %6631 = vmatprep.mubr.msk.bf16.mxu0 %vm548_vm0, %v3428_v33  ;;  %v3560_v13 = vpack.c.bf16 %v3555_v10, %v3554_v55  ;;  %v7220_v33 = vld [vmem:[%s9571_s5 + $0xe8] sm:$0xff]   ;;  %v7227_v55 = vld [vmem:[%s9573_s7 + $0x20] sm:$0xff]  }
 0x32a   : > { %6629 = vmatprep.subr.bf16.mxu0 %v7210_v24  ;;  %6703 = vmatprep.subr.bf16.mxu1 %v7227_v55  ;;  %v7228_v10 = vld [vmem:[%s9573_s7 + $0x28] sm:$0xff]  }
 0x32b   : > { %6704 = vmatpush3.bf16.msra.mxu1 %v7227_v55 }
 0x32c   : > { %6705 = vmatprep.subr.bf16.mxu1 %v7228_v10 }
 0x32d   : > { %6630 = vmatpush3.bf16.msra.mxu0 %v7210_v24  ;;  %v7218_v24 = vld [vmem:[%s9571_s5 + $0xd8] sm:$0xff]  }
 0x32e   : > { %6639 = vmatprep.subr.bf16.mxu0 %v7211_v9 }
 0x32f   : > { %6706 = vmatpush3.bf16.msra.mxu1 %v7228_v10 }
 0x330   : > { %6632 = vmatmul.mubr.msk.bf16.vlgmr.msra.gmra.mrb[8].mxu0 %vm548_vm0, %v3429_v37  ;;  %v7222_v37 = vld [vmem:[%s9571_s5 + $0xf8] sm:$0xff]   ;;  %6707 = vmatprep.subr.bf16.mxu1 %v7229_v50 }
 0x331   : > { %6635 = vmatprep.mubr.msk.bf16.mxu0 %vm548_vm0, %v3430_v57  ;;  %6640 = vmatpush3.bf16.msra.mxu0 %v7211_v9  ;;  %v9802_v9 = vpack.c.bf16 %v8586_v36, %v8582_v14  ;;  %v9804_v14 = vpack.c.bf16 %v8723_v62, %v8719_v31  ;;  %v7223_v36 = vld [vmem:[%s9571_s5 + $0x100] sm:$0xff]   ;;  %v3817_v31 = vmul.f32 0.0, %v8541_v34  ;;  %v7226_v57 = vld [vmem:[%s9571_s5 + $0x118] sm:$0xff]   ;;  %v7232_v34 = vld [vmem:[%s9573_s7 + $0x8] sm:$0xff]  }
 0x332   : > { %6641 = vmatprep.subr.bf16.mxu0 %v7212_v5  ;;  %v9806_v62 = vld [vmem:[#allocation34_spill] sm:$0xff] }
 0x333   : > { %6708 = vmatpush3.bf16.msra.mxu1 %v7229_v50 }
 0x335   : > { %6642 = vmatpush3.bf16.msra.mxu0 %v7212_v5  ;;  %v3821_v5 = vpack.c.bf16 %v3817_v31, %v8543_v39 }
 0x336   : > { %6643 = vmatprep.subr.bf16.mxu0 %v7213_v22 }
 0x338   : > { %6636 = vmatmul.mubr.msk.bf16.gmra.mrb[12].mxu0 %vm548_vm0, %v3431_v49  ;;  %v9810_v49 = vld [vmem:[#allocation30_spill] sm:$0xff] }
 0x339   : > { %6644 = vmatpush3.bf16.msra.mxu0 %v7213_v22  ;;  %6647 = vmatprep.mubr.msk.bf16.mxu0 %vm548_vm0, %v3558_v11  ;;  %v9807_v22 = vld [vmem:[#allocation8_spill] sm:$0xff] }
 0x33a   : > { %6645 = vmatprep.subr.bf16.mxu0 %v7214_v52  ;;  %v9809_v59 = vpack.c.bf16 %v9807_v22, %v9808_v42 }
 0x33d   : > { %6646 = vmatpush3.bf16.msra.mxu0 %v7214_v52  ;;  %v9811_v52 = vld [vmem:[#allocation29_spill] sm:$0xff] }
 0x33e   : > { %6655 = vmatprep.subr.bf16.mxu0 %v7215_v58  ;;  %v9812_v11 = vpack.c.bf16 %v9810_v49, %v9811_v52 }
 0x340   : > { %6648 = vmatmul.mubr.msk.bf16.vlgmr.msra.gmra.mrb[8].mxu0 %vm548_vm0, %v3559_v29 }
 0x341   : > { %6651 = vmatprep.mubr.msk.bf16.mxu0 %vm548_vm0, %v3560_v13  ;;  %6656 = vmatpush3.bf16.msra.mxu0 %v7215_v58  ;;  %v9814_v58 = vpack.c.bf16 %v8755_v44, %v8748_v4  ;;  %v7230_v44 = vld [vmem:[%s9573_s7 + $0x38] sm:$0xff]   ;;  %v5827_v4 = vld [vmem:[%s9572_s6] ss:$0 sm:$0xff] }
 0x342   : > { %6657 = vmatprep.subr.bf16.mxu0 %v7216_v20  ;;  %6709 = vmatprep.subr.bf16.mxu1 %v7230_v44 }
 0x343   : > { %6710 = vmatpush3.bf16.msra.mxu1 %v7230_v44 }
 0x344   : > { %6719 = vmatprep.subr.bf16.mxu1 %v8972_v46 }
 0x345   : > { %6658 = vmatpush3.bf16.msra.mxu0 %v7216_v20 }
 0x346   : > { %6659 = vmatprep.subr.bf16.mxu0 %v7217_v18 }
 0x348   : > { %6652 = vmatmul.mubr.msk.bf16.gmra.mrb[12].mxu0 %vm548_vm0, %v3561_v60 }
 0x349   : > { %6660 = vmatpush3.bf16.msra.mxu0 %v7217_v18  ;;  %6663 = vmatprep.mubr.msk.bf16.mxu0 %vm548_vm0, %v9801_v32 }
 0x34a   : > { %6661 = vmatprep.subr.bf16.mxu0 %v7218_v24 }
 0x34d   : > { %6662 = vmatpush3.bf16.msra.mxu0 %v7218_v24 }
 0x34e   : > { %6671 = vmatprep.subr.bf16.mxu0 %v7219_v35 }
 0x350   : > { %6664 = vmatmul.mubr.msk.bf16.vlgmr.msra.gmra.mrb[8].mxu0 %vm548_vm0, %v9802_v9 }
 0x351   : > { %6667 = vmatprep.mubr.msk.bf16.mxu0 %vm548_vm0, %v9803_v40  ;;  %6672 = vmatpush3.bf16.msra.mxu0 %v7219_v35 }
 0x352   : > { %6673 = vmatprep.subr.bf16.mxu0 %v7220_v33 }
 0x355   : > { %6674 = vmatpush3.bf16.msra.mxu0 %v7220_v33 }
 0x356   : > { %6675 = vmatprep.subr.bf16.mxu0 %v7221_v12 }
 0x358   : > { %6668 = vmatmul.mubr.msk.bf16.gmra.mrb[12].mxu0 %vm548_vm0, %v9804_v14 }
 0x359   : > { %6676 = vmatpush3.bf16.msra.mxu0 %v7221_v12  ;;  %6679 = vmatprep.mubr.msk.bf16.mxu0 %vm548_vm0, %v8566_v21  ;;  %v7225_v21 = vld [vmem:[%s9571_s5 + $0x110] sm:$0xff]  }
 0x35a   : > { %6677 = vmatprep.subr.bf16.mxu0 %v7222_v37 }
 0x35d   : > { %6678 = vmatpush3.bf16.msra.mxu0 %v7222_v37 }
 0x35e   : > { %6687 = vmatprep.subr.bf16.mxu0 %v7223_v36 }
 0x360   : > { %6680 = vmatmul.mubr.msk.bf16.vlgmr.msra.gmra.mrb[8].mxu0 %vm548_vm0, %v9805_v28 }
 0x361   : > { %6683 = vmatprep.mubr.msk.bf16.mxu0 %vm548_vm0, %v9806_v62  ;;  %6688 = vmatpush3.bf16.msra.mxu0 %v7223_v36 }
 0x362   : > { %6689 = vmatprep.subr.bf16.mxu0 %v7224_v61 }
 0x365   : > { %6690 = vmatpush3.bf16.msra.mxu0 %v7224_v61 }
 0x366   : > { %6691 = vmatprep.subr.bf16.mxu0 %v7225_v21 }
 0x368   : > { %6684 = vmatmul.mubr.msk.bf16.gmra.mrb[12].mxu0 %vm548_vm0, %v3821_v5 }
 0x369   : > { %6692 = vmatpush3.bf16.msra.mxu0 %v7225_v21  ;;  %6695 = vmatprep.mubr.msk.bf16.mxu0 %vm548_vm0, %v9809_v59 }
 0x36a   : > { %6693 = vmatprep.subr.bf16.mxu0 %v7226_v57 }
 0x36d   : > { %6694 = vmatpush3.bf16.msra.mxu0 %v7226_v57 }
 0x370   : > { %6696 = vmatmul.mubr.msk.bf16.vlgmr.msra.gmra.mrb[8].mxu0 %vm548_vm0, %v9812_v11 }
 0x371   : > { %6699 = vmatprep.mubr.msk.bf16.mxu0 %vm548_vm0, %v9813_v27 }
 0x378   : > { %6700 = vmatmul.mubr.msk.bf16.gmra.mrb[12].mxu0 %vm548_vm0, %v9814_v58 }
 0x443   : > { %v6697_v6 = vpop.f32.mrb[8].mxu0 }
 0x444   : > { %v4079_v29 = vadd.f32 %v6697_v6, %v5827_v4  ;;  %v4031_v20 = vpop.f32.mrb[9].mxu0 }
 0x445   : > { %v4077_v13 = vadd.f32 %v5827_v4, %v4031_v20  ;;  %v6698_v26 = vpop.f32.mrb[10].mxu0 }
 0x446   : > { %v8978_v38 = vmax.f32 %v4079_v29, 0.0  ;;  %v4080_v18 = vadd.f32 %v6698_v26, %v5827_v4  ;;  %v4034_v60 = vpop.f32.mrb[11].mxu0 }
 0x447   : > { %v8980_v24 = vmax.f32 %v4077_v13, 0.0  ;;  %v4078_v32 = vadd.f32 %v5827_v4, %v4034_v60 }
 0x448   : > { %9815 = vst [vmem:[#allocation6_spill] sm:$0xff] %v8978_v38  ;;  %v8982_v35 = vmax.f32 %v4080_v18, 0.0  ;;  %v4095_v33 = vrot.slane %v8978_v38, 7  ;;  %v4354_v9 = vrot.slane %v8978_v38, 1 }
 0x449   : > { %v8986_v40 = vmax.f32 %v4078_v32, 0.0  ;;  %v4093_v12 = vrot.slane %v8980_v24, 7  ;;  %v4352_v49 = vrot.slane %v8980_v24, 1 }
 0x44a   : > { %9816 = vst [vmem:[#allocation2_spill] sm:$0xff] %v8982_v35  ;;  %v4096_v37 = vrot.slane %v8982_v35, 7  ;;  %v9644_v14 = vrot.slane %v8982_v35, 1 }
 0x44b   : > { %v4094_v61 = vrot.slane %v8986_v40, 7  ;;  %v8996_v28 = vpack.c.bf16 %v8978_v38, %v8986_v40  ;;  %v4353_v62 = vrot.slane %v8986_v40, 1  ;;  %v6701_v21 = vpop.f32.mrb[12].mxu0 }
 0x44c   : > { %v9005_v57 = vsel %vm735_vm8, %v4354_v9, %v9644_v14  ;;  %v4083_v22 = vadd.f32 %v6701_v21, %v5827_v4  ;;  %v4047_v42 = vpop.f32.mrb[13].mxu0  ;;  %v4105_v59 = vsel %vm474_vm1, %v4095_v33, %v4096_v37 }
 0x44d   : > { %9817 = vst [vmem:[#allocation5_spill] sm:$0xff] %v8996_v28  ;;  %v9012_v52 = vmul.f32 %v9005_v57, %v9792_v15  ;;  %v9016_v11 = vsel %vm474_vm1, %v4094_v61, %v4095_v33  ;;  %v9020_v27 = vsel %vm474_vm1, %v4093_v12, %v4094_v61  ;;  %v6702_v58 = vpop.f32.mrb[14].mxu0  ;;  %v9032_v50 = vsel %vm735_vm8, %v4353_v62, %v4354_v9 }
 0x44e   : > { %v9024_v55 = vmul.f32 %v9020_v27, %v9787_v16  ;;  %v9028_v10 = vmul.f32 %v9016_v11, %v9788_v3  ;;  %v9036_v44 = vmul.f32 %v9016_v11, %v9787_v16  ;;  %v4050_v6 = vpop.f32.mrb[15].mxu0  ;;  %v9040_v29 = vmul.f32 %v9005_v57, %v9790_v53 }
 0x44f   : > { %v9042_v20 = vmax.f32 %v4083_v22, 0.0  ;;  %v4081_v13 = vadd.f32 %v5827_v4, %v4047_v42  ;;  %v4084_v26 = vadd.f32 %v6702_v58, %v5827_v4  ;;  %v9046_v18 = vmul.f32 %v9032_v50, %v9790_v53 }
 0x450   : > { %9819 = vst [vmem:[#allocation10_spill] sm:$0xff] %v9040_v29  ;;  %v4082_v60 = vadd.f32 %v5827_v4, %v4050_v6  ;;  %v9051_v33 = vmul.f32 %v4105_v59, %v9788_v3  ;;  %v9059_v22 = vmul.f32 %v4105_v59, %v7517_v0  ;;  %v9066_v58 = vmul.f32 %v4105_v59, %v9787_v16 }
 0x451   : > { %9820 = vst [vmem:[#allocation9_spill] sm:$0xff] %v9042_v20  ;;  %v4099_v9 = vrot.slane %v9042_v20, 7  ;;  %v9054_v61 = vmax.f32 %v4081_v13, 0.0  ;;  %v9056_v21 = vmax.f32 %v4084_v26, 0.0  ;;  %v9070_v6 = vsel %vm735_vm8, %v4352_v49, %v4353_v62 }
 0x452   : > { %v9061_v42 = vmax.f32 %v4082_v60, 0.0  ;;  %9821 = vst [vmem:[#allocation3_spill] sm:$0xff] %v9066_v58  ;;  %v9242_v38 = vmul.f32 %v9032_v50, %v7574_v23  ;;  %v9272_v29 = vmul.f32 %v9016_v11, %v7446_v41  ;;  %v9830_v11 = vld [vmem:[#allocation24_spill] sm:$0xff] }
 0x453   : > { %v4097_v13 = vrot.slane %v9054_v61, 7  ;;  %v4356_v26 = vrot.slane %v9054_v61, 1  ;;  %v4100_v36 = vrot.slane %v9056_v21, 7  ;;  %v4359_v31 = vrot.slane %v9056_v21, 1 }
 0x454   : > { %v4098_v60 = vrot.slane %v9061_v42, 7  ;;  %v4357_v32 = vrot.slane %v9061_v42, 1  ;;  %v4129_v4 = vmul.f32 0.0, %v9056_v21  ;;  %v9081_v16 = vpack.c.bf16 %v9054_v61, %v8982_v35 }
 0x455   : > { %v9085_v62 = vpack.c.bf16 %v9042_v20, %v9061_v42  ;;  %v9089_v59 = vsel %vm474_vm1, %v4099_v9, %v4100_v36  ;;  %v9093_v14 = vsel %vm474_vm1, %v4100_v36, %v4093_v12  ;;  %v4104_v7 = vsel %vm474_vm1, %v4096_v37, %v4097_v13 }
 0x456   : > { %9822 = vst [vmem:[#allocation14_spill] sm:$0xff] %v9081_v16  ;;  %v4137_v39 = vpack.c.bf16 %v8980_v24, %v4129_v4  ;;  %v4109_v48 = vmul.f32 %v9089_v59, %v9824_v43  ;;  %v4110_v54 = vmul.f32 %v9093_v14, %v7446_v41  ;;  %v9103_v17 = vmul.f32 %v4104_v7, %v7520_v1 }
 0x457   : > { %9823 = vst [vmem:[#allocation16_spill] sm:$0xff] %v9085_v62  ;;  %v9109_v12 = vmul.f32 %v4104_v7, %v9788_v3  ;;  %v9113_v37 = vsel %vm474_vm1, %v4098_v60, %v4099_v9  ;;  %v9117_v43 = vsel %vm474_vm1, %v4097_v13, %v4098_v60  ;;  %v9121_v36 = vsel %vm735_vm8, %v4359_v31, %v4352_v49 }
 0x458   : > { %6711 = vmatprep.mubr.msk.bf16.mxu1 %vm548_vm0, %v4137_v39  ;;  %v4117_v4 = vpack.c.bf16 %v4110_v54, %v4109_v48  ;;  %v9128_v3 = vmul.f32 %v9117_v43, %v7566_v19  ;;  %v9132_v9 = vmul.f32 %v9113_v37, %v9798_v2  ;;  %v9140_v39 = vmul.f32 %v9121_v36, %v9799_v8  ;;  %v7233_v48 = vld [vmem:[%s9573_s7 + $0x10] sm:$0xff]  }
 0x459   : > { %9825 = vst [vmem:[#allocation17_spill] sm:$0xff] %v9109_v12  ;;  %6712 = vmatmul.mubr.msk.bf16.vlgmr.msra.gmra.mrb[8].mxu1 %vm548_vm0, %v8996_v28  ;;  %v9144_v54 = vmul.f32 %v9070_v6, %v7574_v23  ;;  %v4358_v13 = vrot.slane %v9042_v20, 1  ;;  %v4362_v8 = vsel %vm735_vm8, %v4356_v26, %v4357_v32  ;;  %v9826_v49 = vrot.slane %v8982_v35, 1 }
 0x45a   : > { %6715 = vmatprep.mubr.msk.bf16.mxu1 %vm548_vm0, %v9081_v16  ;;  %6720 = vmatpush3.bf16.msra.mxu1 %v8972_v46  ;;  %v9169_v60 = vmul.f32 %v4362_v8, %v7664_v25  ;;  %v9205_v5 = vmul.f32 %v4104_v7, %v7517_v0  ;;  %v9222_v7 = vmul.f32 %v9089_v59, %v9798_v2 }
 0x45b   : > { %v4363_v47 = vsel %vm735_vm8, %v9826_v49, %v4356_v26  ;;  %6721 = vmatprep.subr.bf16.mxu1 %v7232_v34  ;;  %v9178_v26 = vmul.f32 %v4362_v8, %v9792_v15  ;;  %v4360_v49 = vsel %vm735_vm8, %v4358_v13, %v4359_v31  ;;  %v4361_v16 = vsel %vm735_vm8, %v4357_v32, %v4358_v13  ;;  %v7234_v32 = vld [vmem:[%s9573_s7 + $0x18] sm:$0xff]  }
 0x45c   : > { %v9166_v46 = vmul.f32 %v4363_v47, %v7661_v51  ;;  %v9172_v28 = vmul.f32 %v4363_v47, %v9792_v15  ;;  %v9175_v58 = vmul.f32 %v4363_v47, %v9790_v53  ;;  %v9189_v35 = vmul.f32 %v4361_v16, %v7688_v45 }
 0x45d   : > { %9829 = vst [vmem:[#allocation12_spill] sm:$0xff] %v9178_v26  ;;  %v9192_v47 = vmul.f32 %v4360_v49, %v9800_v56  ;;  %v9198_v15 = vmul.f32 %v9093_v14, %v9795_v63  ;;  %v9202_v31 = vmul.f32 %v9020_v27, %v7446_v41  ;;  %v9214_v13 = vmul.f32 %v9117_v43, %v7520_v1 }
 0x45e   : > { %9827 = vst [vmem:[#allocation20_spill] sm:$0xff] %v9172_v28  ;;  %9828 = vst [vmem:[#allocation21_spill] sm:$0xff] %v9175_v58  ;;  %6722 = vmatpush3.bf16.msra.mxu1 %v7232_v34  ;;  %v9218_v53 = vmul.f32 %v9113_v37, %v7566_v19  ;;  %v9232_v58 = vmul.f32 %v9070_v6, %v7560_v30  ;;  %v9245_v12 = vmul.f32 %v4362_v8, %v7661_v51 }
 0x45f   : > { %6723 = vmatprep.subr.bf16.mxu1 %v7233_v48  ;;  %v9249_v34 = vmul.f32 %v4361_v16, %v7664_v25  ;;  %v9256_v2 = vmul.f32 %v9121_v36, %v9800_v56  ;;  %v9259_v26 = vmul.f32 0.0, %v8980_v24  ;;  %v9268_v8 = vmul.f32 %v9020_v27, %v9795_v63 }
 0x460   : > { %v9276_v56 = vmul.f32 %v9117_v43, %v7517_v0  ;;  %v9288_v63 = vmul.f32 %v9089_v59, %v7566_v19  ;;  %v9294_v0 = vmul.f32 %v9093_v14, %v9830_v11  ;;  %v9300_v43 = vmul.f32 %v9032_v50, %v7560_v30  ;;  %v7236_v30 = vld [vmem:[%s9573_s7 + $0x48] sm:$0xff]   ;;  %v9848_v11 = vld [vmem:[#allocation9_spill] sm:$0xff] }
 0x461   : > { %6716 = vmatmul.mubr.msk.bf16.gmra.mrb[12].mxu1 %vm548_vm0, %v9085_v62  ;;  %v9252_v62 = vmul.f32 %v4360_v49, %v7688_v45  ;;  %v4760_v28 = vpack.c.bf16 %v9249_v34, %v9245_v12  ;;  %v4888_v41 = vpack.c.bf16 %v9272_v29, %v9268_v8  ;;  %v5021_v27 = vpack.c.bf16 %v9259_v26, %v9056_v21  ;;  %v7256_v12 = vld [vmem:[%s9573_s7 + $0xe8] sm:$0xff]   ;;  %v7257_v29 = vld [vmem:[%s9573_s7 + $0xf0] sm:$0xff]   ;;  %v7259_v8 = vld [vmem:[%s9573_s7 + $0x100] sm:$0xff]  }
 0x462   : > { %6724 = vmatpush3.bf16.msra.mxu1 %v7233_v48  ;;  %6727 = vmatprep.mubr.msk.bf16.mxu1 %vm548_vm0, %v4117_v4  ;;  %v7235_v48 = vld [vmem:[%s9573_s7 + $0x40] sm:$0xff]   ;;  %v9284_v4 = vmul.f32 %v9113_v37, %v7520_v1  ;;  %v9306_v19 = vmul.f32 %v9005_v57, %v7574_v23  ;;  %v9309_v59 = vmul.f32 %v4361_v16, %v7661_v51  ;;  %v9855_v34 = vld [vmem:[#allocation3_spill] sm:$0xff] }
 0x463   : > { %6725 = vmatprep.subr.bf16.mxu1 %v7234_v32  ;;  %v4761_v20 = vpack.c.bf16 %v9256_v2, %v9252_v62  ;;  %v9312_v14 = vmul.f32 %v4360_v49, %v7664_v25  ;;  %v4891_v50 = vpack.c.bf16 %v9294_v0, %v9288_v63  ;;  %v9321_v37 = vmul.f32 %v9121_v36, %v7688_v45  ;;  %v9831_v23 = vld [vmem:[#allocation26_spill] sm:$0xff]  ;;  %v7240_v36 = vld [vmem:[%s9573_s7 + $0x68] sm:$0xff]   ;;  %v9854_v62 = vld [vmem:[#allocation17_spill] sm:$0xff] }
 0x464   : > { %v4890_v1 = vpack.c.bf16 %v9284_v4, %v9276_v56  ;;  %v9325_v57 = vmul.f32 %v9070_v6, %v9831_v23  ;;  %v5148_v51 = vpack.c.bf16 %v9306_v19, %v9300_v43  ;;  %v9832_v16 = vpack.c.bf16 %v9028_v10, %v9024_v55  ;;  %v7237_v6 = vld [vmem:[%s9573_s7 + $0x50] sm:$0xff]   ;;  %v7238_v55 = vld [vmem:[%s9573_s7 + $0x58] sm:$0xff]   ;;  %v7252_v23 = vld [vmem:[%s9573_s7 + $0xc8] sm:$0xff]  }
 0x465   : > { %v5150_v25 = vpack.c.bf16 %v9312_v14, %v9309_v59  ;;  %v9833_v45 = vpack.c.bf16 %v9103_v17, %v9059_v22  ;;  %v9834_v10 = vpack.c.bf16 %v9132_v9, %v9128_v3  ;;  %v9835_v17 = vpack.c.bf16 %v9144_v54, %v9140_v39  ;;  %v7239_v22 = vld [vmem:[%s9573_s7 + $0x60] sm:$0xff]   ;;  %v7241_v39 = vld [vmem:[%s9573_s7 + $0x70] sm:$0xff]   ;;  %v7242_v54 = vld [vmem:[%s9573_s7 + $0x78] sm:$0xff]  }
 0x466   : > { %6726 = vmatpush3.bf16.msra.mxu1 %v7234_v32  ;;  %v5151_v49 = vpack.c.bf16 %v9325_v57, %v9321_v37  ;;  %v9836_v3 = vpack.c.bf16 %v9012_v52, %v9046_v18  ;;  %v9837_v9 = vpack.c.bf16 %v9169_v60, %v9166_v46  ;;  %v9838_v52 = vpack.c.bf16 %v9192_v47, %v9189_v35  ;;  %v7243_v60 = vld [vmem:[%s9573_s7 + $0x80] sm:$0xff]   ;;  %v7244_v46 = vld [vmem:[%s9573_s7 + $0x88] sm:$0xff]   ;;  %v7258_v2 = vld [vmem:[%s9573_s7 + $0xf8] sm:$0xff]  }
 0x467   : > { %6735 = vmatprep.subr.bf16.mxu1 %v7235_v48  ;;  %v9839_v18 = vpack.c.bf16 %v9202_v31, %v9198_v15  ;;  %v9840_v35 = vpack.c.bf16 %v9051_v33, %v9036_v44  ;;  %v9841_v47 = vpack.c.bf16 %v9214_v13, %v9205_v5  ;;  %v7245_v15 = vld [vmem:[%s9573_s7 + $0x90] sm:$0xff]   ;;  %v7246_v31 = vld [vmem:[%s9573_s7 + $0x98] sm:$0xff]   ;;  %v9842_v44 = vpack.c.bf16 %v9222_v7, %v9218_v53  ;;  %v7247_v5 = vld [vmem:[%s9573_s7 + $0xa0] sm:$0xff]  }
 0x468   : > { %v9843_v33 = vpack.c.bf16 %v8986_v40, %v8980_v24  ;;  %v7248_v32 = vld [vmem:[%s9573_s7 + $0xa8] sm:$0xff]   ;;  %v9844_v53 = vld [vmem:[#allocation2_spill] sm:$0xff]  ;;  %v9847_v24 = vpack.c.bf16 %v9061_v42, %v9054_v61  ;;  %v7249_v40 = vld [vmem:[%s9573_s7 + $0xb0] sm:$0xff]   ;;  %v9850_v61 = vpack.c.bf16 %v9242_v38, %v9232_v58 }
 0x469   : > { %6728 = vmatmul.mubr.msk.bf16.vlgmr.msra.gmra.mrb[8].mxu1 %vm548_vm0, %v9832_v16  ;;  %v9845_v13 = vld [vmem:[#allocation6_spill] sm:$0xff]  ;;  %v9851_v16 = vld [vmem:[#allocation20_spill] sm:$0xff]  ;;  %v7254_v58 = vld [vmem:[%s9573_s7 + $0xd8] sm:$0xff]  }
 0x46a   : > { %6731 = vmatprep.mubr.msk.bf16.mxu1 %vm548_vm0, %v9833_v45  ;;  %6736 = vmatpush3.bf16.msra.mxu1 %v7235_v48  ;;  %v9846_v7 = vpack.c.bf16 %v9844_v53, %v9845_v13  ;;  %v7250_v48 = vld [vmem:[%s9573_s7 + $0xb8] sm:$0xff]   ;;  %v7251_v42 = vld [vmem:[%s9573_s7 + $0xc0] sm:$0xff]   ;;  %v7253_v38 = vld [vmem:[%s9573_s7 + $0xd0] sm:$0xff]  }
 0x46b   : > { %6737 = vmatprep.subr.bf16.mxu1 %v7236_v30  ;;  %v9852_v45 = vld [vmem:[#allocation10_spill] sm:$0xff]  ;;  %v9857_v4 = vld [vmem:[#allocation5_spill] sm:$0xff]  ;;  %v7260_v56 = vld [vmem:[%s9573_s7 + $0x108] sm:$0xff]  }
 0x46c   : > { %v9859_v63 = vld [vmem:[#allocation16_spill] sm:$0xff]  ;;  %v9865_v37 = vld [vmem:[#allocation11_spill] sm:$0xff] }
 0x46d   : > { %v7261_v0 = vld [vmem:[%s9573_s7 + $0x110] sm:$0xff]  }
 0x46e   : > { %6738 = vmatpush3.bf16.msra.mxu1 %v7236_v30  ;;  %v9849_v30 = vpack.c.bf16 %v9056_v21, %v9848_v11  ;;  %v5964_v21 = vld [vmem:[%s9574_s8] ss:$0 sm:$0xff] }
 0x46f   : > { %6739 = vmatprep.subr.bf16.mxu1 %v7237_v6 }
 0x471   : > { %6732 = vmatmul.mubr.msk.bf16.gmra.mrb[12].mxu1 %vm548_vm0, %v9834_v10 }
 0x472   : > { %6740 = vmatpush3.bf16.msra.mxu1 %v7237_v6  ;;  %6743 = vmatprep.mubr.msk.bf16.mxu1 %vm548_vm0, %v9835_v17  ;;  %v9853_v6 = vpack.c.bf16 %v9851_v16, %v9852_v45  ;;  %v9863_v17 = vld [vmem:[#allocation7_spill] sm:$0xff] }
 0x473   : > { %6741 = vmatprep.subr.bf16.mxu1 %v7238_v55 }
 0x476   : > { %6742 = vmatpush3.bf16.msra.mxu1 %v7238_v55  ;;  %v9861_v55 = vld [vmem:[#allocation21_spill] sm:$0xff] }
 0x477   : > { %6751 = vmatprep.subr.bf16.mxu1 %v7239_v22 }
 0x479   : > { %6744 = vmatmul.mubr.msk.bf16.vlgmr.msra.gmra.mrb[8].mxu1 %vm548_vm0, %v9836_v3 }
 0x47a   : > { %6747 = vmatprep.mubr.msk.bf16.mxu1 %vm548_vm0, %v9837_v9  ;;  %6752 = vmatpush3.bf16.msra.mxu1 %v7239_v22 }
 0x47b   : > { %6753 = vmatprep.subr.bf16.mxu1 %v7240_v36 }
 0x47e   : > { %6754 = vmatpush3.bf16.msra.mxu1 %v7240_v36  ;;  %v9864_v36 = vld [vmem:[#allocation22_spill] sm:$0xff] }
 0x47f   : > { %6755 = vmatprep.subr.bf16.mxu1 %v7241_v39 }
 0x481   : > { %6748 = vmatmul.mubr.msk.bf16.gmra.mrb[12].mxu1 %vm548_vm0, %v9838_v52 }
 0x482   : > { %6756 = vmatpush3.bf16.msra.mxu1 %v7241_v39  ;;  %6759 = vmatprep.mubr.msk.bf16.mxu1 %vm548_vm0, %v9839_v18  ;;  %v9866_v39 = vld [vmem:[#allocation23_spill] sm:$0xff] }
 0x483   : > { %6757 = vmatprep.subr.bf16.mxu1 %v7242_v54 }
 0x486   : > { %6758 = vmatpush3.bf16.msra.mxu1 %v7242_v54 }
 0x487   : > { %6767 = vmatprep.subr.bf16.mxu1 %v7243_v60 }
 0x489   : > { %6760 = vmatmul.mubr.msk.bf16.vlgmr.msra.gmra.mrb[8].mxu1 %vm548_vm0, %v9840_v35 }
 0x48a   : > { %6763 = vmatprep.mubr.msk.bf16.mxu1 %vm548_vm0, %v9841_v47  ;;  %6768 = vmatpush3.bf16.msra.mxu1 %v7243_v60 }
 0x48b   : > { %6769 = vmatprep.subr.bf16.mxu1 %v7244_v46 }
 0x48e   : > { %6770 = vmatpush3.bf16.msra.mxu1 %v7244_v46 }
 0x48f   : > { %6771 = vmatprep.subr.bf16.mxu1 %v7245_v15 }
 0x491   : > { %6764 = vmatmul.mubr.msk.bf16.gmra.mrb[12].mxu1 %vm548_vm0, %v9842_v44 }
 0x492   : > { %6772 = vmatpush3.bf16.msra.mxu1 %v7245_v15  ;;  %6775 = vmatprep.mubr.msk.bf16.mxu1 %vm548_vm0, %v9843_v33 }
 0x493   : > { %6773 = vmatprep.subr.bf16.mxu1 %v7246_v31 }
 0x496   : > { %6774 = vmatpush3.bf16.msra.mxu1 %v7246_v31 }
 0x497   : > { %6783 = vmatprep.subr.bf16.mxu1 %v7247_v5 }
 0x499   : > { %6776 = vmatmul.mubr.msk.bf16.vlgmr.msra.gmra.mrb[8].mxu1 %vm548_vm0, %v9846_v7 }
 0x49a   : > { %6779 = vmatprep.mubr.msk.bf16.mxu1 %vm548_vm0, %v9847_v24  ;;  %6784 = vmatpush3.bf16.msra.mxu1 %v7247_v5  ;;  %v9868_v24 = vld [vmem:[#allocation27_spill] sm:$0xff] }
 0x49b   : > { %6785 = vmatprep.subr.bf16.mxu1 %v7248_v32 }
 0x49e   : > { %6786 = vmatpush3.bf16.msra.mxu1 %v7248_v32  ;;  %v9867_v32 = vld [vmem:[#allocation31_spill] sm:$0xff] }
 0x49f   : > { %6787 = vmatprep.subr.bf16.mxu1 %v7249_v40 }
 0x4a1   : > { %6780 = vmatmul.mubr.msk.bf16.gmra.mrb[12].mxu1 %vm548_vm0, %v9849_v30  ;;  %v9869_v30 = vld [vmem:[#allocation32_spill] sm:$0xff] }
 0x4a2   : > { %6788 = vmatpush3.bf16.msra.mxu1 %v7249_v40  ;;  %6791 = vmatprep.mubr.msk.bf16.mxu1 %vm548_vm0, %v9850_v61 }
 0x4a3   : > { %6789 = vmatprep.subr.bf16.mxu1 %v7250_v48 }
 0x4a6   : > { %6790 = vmatpush3.bf16.msra.mxu1 %v7250_v48 }
 0x4a7   : > { %6799 = vmatprep.subr.bf16.mxu1 %v7251_v42 }
 0x4a9   : > { %6792 = vmatmul.mubr.msk.bf16.vlgmr.msra.gmra.mrb[8].mxu1 %vm548_vm0, %v9853_v6 }
 0x4aa   : > { %6795 = vmatprep.mubr.msk.bf16.mxu1 %vm548_vm0, %v4760_v28  ;;  %6800 = vmatpush3.bf16.msra.mxu1 %v7251_v42  ;;  %v7255_v28 = vld [vmem:[%s9573_s7 + $0xe0] sm:$0xff]  }
 0x4ab   : > { %6801 = vmatprep.subr.bf16.mxu1 %v7252_v23 }
 0x4ae   : > { %6802 = vmatpush3.bf16.msra.mxu1 %v7252_v23  ;;  %v9870_v23 = vld [vmem:[#allocation28_spill] sm:$0xff] }
 0x4af   : > { %6803 = vmatprep.subr.bf16.mxu1 %v7253_v38 }
 0x4b1   : > { %6796 = vmatmul.mubr.msk.bf16.gmra.mrb[12].mxu1 %vm548_vm0, %v4761_v20  ;;  %v9856_v20 = vpack.c.bf16 %v9854_v62, %v9855_v34 }
 0x4b2   : > { %6804 = vmatpush3.bf16.msra.mxu1 %v7253_v38  ;;  %6807 = vmatprep.mubr.msk.bf16.mxu1 %vm548_vm0, %v4888_v41  ;;  %v9858_v41 = vld [vmem:[#allocation14_spill] sm:$0xff] }
 0x4b3   : > { %6805 = vmatprep.subr.bf16.mxu1 %v7254_v58 }
 0x4b6   : > { %6806 = vmatpush3.bf16.msra.mxu1 %v7254_v58 }
 0x4b7   : > { %6815 = vmatprep.subr.bf16.mxu1 %v7255_v28 }
 0x4b9   : > { %6808 = vmatmul.mubr.msk.bf16.vlgmr.msra.gmra.mrb[8].mxu1 %vm548_vm0, %v9856_v20 }
 0x4ba   : > { %6811 = vmatprep.mubr.msk.bf16.mxu1 %vm548_vm0, %v4890_v1  ;;  %6816 = vmatpush3.bf16.msra.mxu1 %v7255_v28  ;;  %v7262_v1 = vld [vmem:[%s9573_s7 + $0x118] sm:$0xff]  }
 0x4bb   : > { %6817 = vmatprep.subr.bf16.mxu1 %v7256_v12 }
 0x4be   : > { %6818 = vmatpush3.bf16.msra.mxu1 %v7256_v12 }
 0x4bf   : > { %6819 = vmatprep.subr.bf16.mxu1 %v7257_v29 }
 0x4c1   : > { %6812 = vmatmul.mubr.msk.bf16.gmra.mrb[12].mxu1 %vm548_vm0, %v4891_v50  ;;  %v9860_v50 = vld [vmem:[#allocation12_spill] sm:$0xff] }
 0x4c2   : > { %6820 = vmatpush3.bf16.msra.mxu1 %v7257_v29  ;;  %6823 = vmatprep.mubr.msk.bf16.mxu1 %vm548_vm0, %v9857_v4  ;;  %v9862_v10 = vpack.c.bf16 %v9860_v50, %v9861_v55 }
 0x4c3   : > { %6821 = vmatprep.subr.bf16.mxu1 %v7258_v2 }
 0x4c6   : > { %6822 = vmatpush3.bf16.msra.mxu1 %v7258_v2 }
 0x4c7   : > { %6831 = vmatprep.subr.bf16.mxu1 %v7259_v8 }
 0x4c9   : > { %6824 = vmatmul.mubr.msk.bf16.vlgmr.msra.gmra.mrb[8].mxu1 %vm548_vm0, %v9858_v41 }
 0x4ca   : > { %6827 = vmatprep.mubr.msk.bf16.mxu1 %vm548_vm0, %v9859_v63  ;;  %6832 = vmatpush3.bf16.msra.mxu1 %v7259_v8 }
 0x4cb   : > { %6833 = vmatprep.subr.bf16.mxu1 %v7260_v56 }
 0x4ce   : > { %6834 = vmatpush3.bf16.msra.mxu1 %v7260_v56 }
 0x4cf   : > { %6835 = vmatprep.subr.bf16.mxu1 %v7261_v0 }
 0x4d1   : > { %6828 = vmatmul.mubr.msk.bf16.gmra.mrb[12].mxu1 %vm548_vm0, %v5021_v27 }
 0x4d2   : > { %6836 = vmatpush3.bf16.msra.mxu1 %v7261_v0  ;;  %6839 = vmatprep.mubr.msk.bf16.mxu1 %vm548_vm0, %v5148_v51 }
 0x4d3   : > { %6837 = vmatprep.subr.bf16.mxu1 %v7262_v1 }
 0x4d6   : > { %6838 = vmatpush3.bf16.msra.mxu1 %v7262_v1 }
 0x4d9   : > { %6840 = vmatmul.mubr.msk.bf16.vlgmr.msra.gmra.mrb[8].mxu1 %vm548_vm0, %v9862_v10 }
 0x4da   : > { %6843 = vmatprep.mubr.msk.bf16.mxu1 %vm548_vm0, %v5150_v25 }
 0x4e1   : > { %6844 = vmatmul.mubr.msk.bf16.gmra.mrb[12].mxu1 %vm548_vm0, %v5151_v49  ;;  %vm5333_vm0 = vcmask 519168  }
 0x5ac   : > { %v6841_v26 = vpop.f32.mrb[8].mxu1 }
 0x5ad   : > { %v5279_v27 = vadd.f32 %v6841_v26, %v5964_v21  ;;  %v5231_v43 = vpop.f32.mrb[9].mxu1 }
 0x5ae   : > { %v5277_v19 = vadd.f32 %v5964_v21, %v5231_v43  ;;  %v6842_v51 = vpop.f32.mrb[10].mxu1 }
 0x5af   : > { %v5287_v22 = vadd.f32 %v5279_v27, %v9863_v17  ;;  %v5280_v59 = vadd.f32 %v6842_v51, %v5964_v21  ;;  %v5234_v14 = vpop.f32.mrb[11].mxu1 }
 0x5b0   : > { %v5285_v25 = vadd.f32 %v5277_v19, %v9864_v36  ;;  %v5278_v3 = vadd.f32 %v5964_v21, %v5234_v14 }
 0x5b1   : > { %v5295_v9 = vmax.f32 %v5287_v22, 0.0  ;;  %v5288_v57 = vadd.f32 %v5280_v59, %v9865_v37 }
 0x5b2   : > { %v5293_v49 = vmax.f32 %v5285_v25, 0.0  ;;  %v5286_v54 = vadd.f32 %v5278_v3, %v9866_v39 }
 0x5b3   : > { %v5977_v52 = vpack.c.bf16 %v5295_v9, %v5295_v9  ;;  %v5296_v18 = vmax.f32 %v5288_v57, 0.0 }
 0x5b4   : > { %v5975_v60 = vpack.c.bf16 %v5293_v49, %v5293_v49  ;;  %v5294_v46 = vmax.f32 %v5286_v54, 0.0  ;;  %v6845_v35 = vpop.f32.mrb[12].mxu1 }
 0x5b5   : > { %5336 = vst.msk [vmem:[%s9540_s26 + $0x8] sm:$0xf] %vm5333_vm0, %v5977_v52  ;;  %v5978_v47 = vpack.c.bf16 %v5296_v18, %v5296_v18  ;;  %v5283_v15 = vadd.f32 %v6845_v35, %v5964_v21  ;;  %v5247_v31 = vpop.f32.mrb[13].mxu1 }
 0x5b6   : > { %5334 = vst.msk [vmem:[%s9540_s26] sm:$0xf] %vm5333_vm0, %v5975_v60  ;;  %v5976_v44 = vpack.c.bf16 %v5294_v46, %v5294_v46  ;;  %v5281_v33 = vadd.f32 %v5964_v21, %v5247_v31  ;;  %v6846_v5 = vpop.f32.mrb[14].mxu1 }
 0x5b7   : > { %5337 = vst.msk [vmem:[%s9540_s26 + $0xc] sm:$0xf] %vm5333_vm0, %v5978_v47  ;;  %v5291_v53 = vadd.f32 %v5283_v15, %v9867_v32  ;;  %v5284_v13 = vadd.f32 %v6846_v5, %v5964_v21  ;;  %v5250_v7 = vpop.f32.mrb[15].mxu1 }
 0x5b8   : > { %5335 = vst.msk [vmem:[%s9540_s26 + $0x4] sm:$0xf] %vm5333_vm0, %v5976_v44  ;;  %v5289_v40 = vadd.f32 %v5281_v33, %v9868_v24  ;;  %v5282_v48 = vadd.f32 %v5964_v21, %v5250_v7 }
 0x5b9   : > { %v5299_v11 = vmax.f32 %v5291_v53, 0.0  ;;  %v5292_v61 = vadd.f32 %v5284_v13, %v9869_v30 }
 0x5ba   : > { %v5297_v42 = vmax.f32 %v5289_v40, 0.0  ;;  %v5290_v16 = vadd.f32 %v5282_v48, %v9870_v23 }
 0x5bb   : > { %v5981_v45 = vpack.c.bf16 %v5299_v11, %v5299_v11  ;;  %v5300_v6 = vmax.f32 %v5292_v61, 0.0 }
 0x5bc   : > { %v5979_v38 = vpack.c.bf16 %v5297_v42, %v5297_v42  ;;  %v5298_v58 = vmax.f32 %v5290_v16, 0.0 }
 0x5bd   : > { %5340 = vst.msk [vmem:[%s9540_s26 + $0x18] sm:$0xf] %vm5333_vm0, %v5981_v45  ;;  %v5982_v28 = vpack.c.bf16 %v5300_v6, %v5300_v6 }
 0x5be   : > { %5338 = vst.msk [vmem:[%s9540_s26 + $0x10] sm:$0xf] %vm5333_vm0, %v5979_v38  ;;  %v5980_v12 = vpack.c.bf16 %v5298_v58, %v5298_v58 }
 0x5bf   : > { %5341 = vst.msk [vmem:[%s9540_s26 + $0x1c] sm:$0xf] %vm5333_vm0, %v5982_v28 }
 0x5c0   : > { %5339 = vst.msk [vmem:[%s9540_s26 + $0x14] sm:$0xf] %vm5333_vm0, %v5980_v12 }
 0x5c1 PF: > { %s19_s30 = sadd.s32 1, %s7269_s30  }
 0x5c2   : > { %p16_p4 = scmp.ge.s32.totalorder %s19_s30, 4  }
 0x5c4   :  { %18 = sbr.rel (!%p16_p4) target bundleno = 1 (0x1), region = 118 }

// kernel: resnet_forward.5
= control target key start
LH: loop header
LB: loop body
LE: loop exit
PB: predicated region body
PF: predicated region fallthrough
CT: control target
= control target key end

     0   :  { %s6714_s29 = smov 0   ;;  %s8279_s0 = inlined_call_operand.vmem [shape: bf16[32,64], index: 0, kind: input, shape index: {}]   ;;  %s8280_s1 = inlined_call_operand.vmem [shape: bf16[32,64], index: 1, kind: input, shape index: {}]   ;;  %s8281_s2 = inlined_call_operand.vmem [shape: bf16[32,64], index: 2, kind: input, shape index: {}]   ;;  %s8282_s3 = inlined_call_operand.vmem [shape: bf16[32,64], index: 3, kind: input, shape index: {}]   ;;  %s8283_s4 = inlined_call_operand.vmem [shape: bf16[9,64,128], index: 4, kind: input, shape index: {}]   ;;  %s8284_s5 = inlined_call_operand.vmem [shape: f32[1,128], index: 5, kind: input, shape index: {}]   ;;  %s8285_s6 = inlined_call_operand.vmem [shape: bf16[64,128], index: 6, kind: input, shape index: {}]   ;;  %s8286_s7 = inlined_call_operand.vmem [shape: f32[1,128], index: 7, kind: input, shape index: {}]   ;;  %s8287_s8 = inlined_call_operand.vmem [shape: bf16[9,128,128], index: 8, kind: input, shape index: {}]   ;;  %s8288_s9 = inlined_call_operand.vmem [shape: f32[1,128], index: 9, kind: input, shape index: {}]   ;;  %s8289_s10 = inlined_call_operand.vmem [shape: bf16[9,128,128], index: 10, kind: input, shape index: {}]   ;;  %s8290_s11 = inlined_call_operand.vmem [shape: f32[1,128], index: 11, kind: input, shape index: {}]   ;;  %s8291_s12 = inlined_call_operand.vmem [shape: bf16[9,128,128], index: 12, kind: input, shape index: {}]   ;;  %s8292_s13 = inlined_call_operand.vmem [shape: f32[1,128], index: 13, kind: input, shape index: {}]   ;;  %s8293_s14 = inlined_call_operand.vmem [shape: bf16[32,128], index: 14, kind: output, shape index: {}]  }
   0x1 LB: > { %s4614_s30 = sadd.s32 4294967295, %s6635_s29   ;;  %p4618_p0 = scmp.ge.s32.totalorder %s6635_s29, 1  ;;  %s6635_s29 = sphi %s6714_s29, %s24_s29  }
   0x2   : > { %p446_p1 = scmp.lt.s32.totalorder %s6635_s29, 3 }
   0x4   : > { %p447_p2 = pnand %p4618_p0, %p446_p1 }
   0x5   : > { %v6366_v0 = vld [vmem:[%s8283_s4 + $0x20] sm:$0xff] (!%p447_p2)   ;;  %v538_v1 = vlaneseq (!%p447_p2)  ;;  %v6637_v2 = vmov (!%p447_p2), 0.0   ;;  %v6367_v3 = vld [vmem:[%s8283_s4 + $0x28] sm:$0xff] (!%p447_p2)   ;;  %vm6638_vm0 = vmmov (!%p447_p2), 0   ;;  %s4619_s19 = sshll.u32 (!%p447_p2), %s4614_s30, 1  ;;  %v6368_v6 = vld [vmem:[%s8283_s4 + $0x30] sm:$0xff] (!%p447_p2)  }
   0x6   : > { %450 = sbr.rel (%p447_p2) target bundleno = 1638 (0x666), region = 76  ;;  %5656 = vmatprep.subr.bf16.mxu1 (!%p447_p2), %v6637_v2  ;;  %5680 = vmatprep.subr.bf16.mxu0 (!%p447_p2), %v6637_v2  ;;  %p508_p3 = scmp.lt.s32.totalorder (!%p447_p2), %s4619_s19, 3  ;;  %v6370_v5 = vld [vmem:[%s8283_s4 + $0x40] sm:$0xff] (!%p447_p2)   ;;  %v6372_v7 = vld [vmem:[%s8283_s4 + $0x48] sm:$0xff] (!%p447_p2)   ;;  %v6369_v8 = vld [vmem:[%s8283_s4 + $0x38] sm:$0xff] (!%p447_p2)   ;;  %vm638_vm3 = vcmask (!%p447_p2), 523264  }
   0x7   : > { %5657 = vmatpush3.bf16.msra.mxu1 (!%p447_p2), %v6366_v0  ;;  %5664 = vmatprep.mubr.msk.bf16.mxu1 (!%p447_p2), %vm6638_vm0, %v6637_v2  ;;  %v6735_v4 = vshrl.u32 (!%p447_p2), %v538_v1, 7  ;;  %v6374_v13 = vld [vmem:[%s8283_s4 + $0x50] sm:$0xff] (!%p447_p2)   ;;  %v6376_v22 = vld [vmem:[%s8283_s4 + $0x58] sm:$0xff] (!%p447_p2)   ;;  %v6371_v25 = vld [vmem:[%s8283_s4] sm:$0xff] (!%p447_p2)  }
   0x8   : > { %5658 = vmatprep.subr.bf16.mxu1 (!%p447_p2), %v6637_v2  ;;  %5688 = vmatprep.mubr.msk.bf16.mxu0 (!%p447_p2), %vm6638_vm0, %v6637_v2  ;;  %v6373_v30 = vld [vmem:[%s8283_s4 + $0x8] sm:$0xff] (!%p447_p2)   ;;  %v6378_v38 = vld [vmem:[%s8283_s4 + $0x80] sm:$0xff] (!%p447_p2)   ;;  %v6375_v39 = vld [vmem:[%s8283_s4 + $0x10] sm:$0xff] (!%p447_p2)  }
   0x9   : > { %vm543_vm1 = vcmp.ge.s32.totalorder (!%p447_p2), %v6735_v4, 4  ;;  %5681 = vmatpush3.bf16.msra.mxu0 (!%p447_p2), %v6370_v5  ;;  %vm599_vm2 = vcmp.lt.s32.totalorder (!%p447_p2), %v6735_v4, 4  ;;  %v541_v14 = vand.u32 (!%p447_p2), 3, %v6735_v4  ;;  %v6777_v17 = vadd.s32 (!%p447_p2), 8, %v6735_v4  ;;  %v6380_v46 = vld [vmem:[%s8283_s4 + $0x88] sm:$0xff] (!%p447_p2)   ;;  %v6377_v47 = vld [vmem:[%s8283_s4 + $0x18] sm:$0xff] (!%p447_p2)  }
   0xa   : > { %5682 = vmatprep.subr.bf16.mxu0 (!%p447_p2), %v6637_v2  ;;  %v6761_v10 = vsel (!%p447_p2), %vm543_vm1, 1.0, %v6637_v2  ;;  %vm583_vm6 = vcmp.lt.s32.totalorder (!%p447_p2), %v6735_v4, 5  ;;  %v6382_v50 = vld [vmem:[%s8283_s4 + $0x90] sm:$0xff] (!%p447_p2)   ;;  %v6379_v51 = vld [vmem:[%s8283_s4 + $0x60] sm:$0xff] (!%p447_p2)   ;;  %v6381_v54 = vld [vmem:[%s8283_s4 + $0x68] sm:$0xff] (!%p447_p2)   ;;  %vm839_vm7 = vcmp.lt.s32.totalorder (!%p447_p2), %v6735_v4, 1 }
   0xb   : > { %5659 = vmatpush3.bf16.msra.mxu1 (!%p447_p2), %v6367_v3  ;;  %vm551_vm4 = vcmp.ge.s32.totalorder (!%p447_p2), %v541_v14, 1  ;;  %v542_v27 = vand.u32 (!%p447_p2), 3, %v6777_v17  ;;  %v6384_v55 = vld [vmem:[%s8283_s4 + $0x98] sm:$0xff] (!%p447_p2)   ;;  %v6383_v58 = vld [vmem:[%s8283_s4 + $0x70] sm:$0xff] (!%p447_p2)   ;;  %v6387_v61 = vld [vmem:[%s8283_s4 + $0xc0] sm:$0xff] (!%p447_p2)   ;;  %vm555_vm8 = vcmp.lt.s32.totalorder (!%p447_p2), %v541_v14, 3 }
   0xc   : > { %5660 = vmatprep.subr.bf16.mxu1 (!%p447_p2), %v6637_v2  ;;  %v6810_v31 = vsel (!%p447_p2), %vm551_vm4, 1.0, %v6637_v2  ;;  %v6389_v1 = vld [vmem:[%s8283_s4 + $0xc8] sm:$0xff] (!%p447_p2)   ;;  %v6385_v3 = vld [vmem:[%s8283_s4 + $0x78] sm:$0xff] (!%p447_p2)   ;;  %vm548_vm9 = vcmp.lt.s32.totalorder (!%p447_p2), %v6777_v17, 12  ;;  %vm1664_vm11 = vcmp.lt.s32.totalorder (!%p447_p2), %v6735_v4, 3  ;;  %vm2004_vm12 = vcmp.lt.s32.totalorder (!%p447_p2), %v6735_v4, 7 }
   0xd   : > { %s8295_s19 = smov (!%p508_p3, %s4619_s19), 3  ;;  %5683 = vmatpush3.bf16.msra.mxu0 %v6372_v7  ;;  %vm552_vm5 = vcmp.ge.s32.totalorder %v542_v27, 1  ;;  %v6832_v37 = vmul.f32 %v6810_v31, %v6761_v10  ;;  %v6391_v7 = vld [vmem:[%s8283_s4 + $0xd0] sm:$0xff]   ;;  %vm556_vm10 = vcmp.lt.s32.totalorder %v542_v27, 3  ;;  %v6572_v4 = vld [vmem:[%s8291_s12 + $0x88] sm:$0xff]  }
   0xe   : > { %s6745_s24 = sshll.u32 %s8295_s19, 2  ;;  %5684 = vmatprep.subr.bf16.mxu0 %v6637_v2  ;;  %v6841_v40 = vsel %vm552_vm5, 1.0, %v6637_v2  ;;  %v7075_v14 = vsel %vm556_vm10, 1.0, %v6637_v2 }
   0xf   : > { %s523_s30 = scalar_lea.vmem %s8281_s2, %s6745_s24  ;;  %5661 = vmatpush3.bf16.msra.mxu1 %v6368_v6  ;;  %s529_s19 = scalar_lea.vmem %s8282_s3, %s6745_s24 }
  0x10   : > { %v6758_v9 = vld [vmem:[%s523_s30] sm:$0xff]   ;;  %5662 = vmatprep.subr.bf16.mxu1 %v6637_v2  ;;  %s511_s16 = scalar_lea.vmem %s8279_s0, %s6745_s24  ;;  %s517_s23 = scalar_lea.vmem %s8280_s1, %s6745_s24 }
  0x11   : > { %v575_v11 = vunpack.c.l.bf16 %v6758_v9  ;;  %v576_v12 = vunpack.c.h.bf16 %v6758_v9  ;;  %v6779_v18 = vld [vmem:[%s529_s19] sm:$0xff]   ;;  %5685 = vmatpush3.bf16.msra.mxu0 %v6374_v13 }
  0x12   : > { %v6791_v23 = vunpack.c.l.bf16 %v6779_v18  ;;  %v6794_v24 = vunpack.c.h.bf16 %v6779_v18  ;;  %5686 = vmatprep.subr.bf16.mxu0 %v6637_v2  ;;  %v6865_v48 = vld [vmem:[%s517_s23] sm:$0xff]   ;;  %s535_s23 = scalar_lea.vmem %s8293_s14, %s6745_s24 }
  0x13   : > { %v597_v15 = vrot.slane %v575_v11, 4  ;;  %v598_v16 = vrot.slane %v576_v12, 4  ;;  %5663 = vmatpush3.bf16.msra.mxu1 %v6369_v8  ;;  %v571_v52 = vunpack.c.l.bf16 %v6865_v48  ;;  %v572_v53 = vunpack.c.h.bf16 %v6865_v48  ;;  %v6897_v59 = vld [vmem:[%s511_s16] sm:$0xff]  }
  0x14   : > { %5668 = vmatprep.subr.bf16.mxu1 %v6637_v2  ;;  %v751_v28 = vrot.slane %v6791_v23, 4  ;;  %v752_v29 = vrot.slane %v6794_v24, 4  ;;  %v581_v32 = vrot.slane %v6791_v23, 3  ;;  %v582_v33 = vrot.slane %v6794_v24, 3  ;;  %v6388_v8 = vld [vmem:[%s8283_s4 + $0xa0] sm:$0xff]  }
  0x15   : > { %v600_v19 = vsel %vm599_vm2, %v597_v15, %v598_v16  ;;  %v601_v20 = vsel %vm599_vm2, %v598_v16, %v597_v15  ;;  %5687 = vmatpush3.bf16.msra.mxu0 %v6376_v22  ;;  %v837_v56 = vrot.slane %v571_v52, 7  ;;  %v838_v57 = vrot.slane %v572_v53, 7  ;;  %v6393_v15 = vld [vmem:[%s8283_s4 + $0xd8] sm:$0xff]   ;;  %v6390_v16 = vld [vmem:[%s8283_s4 + $0xa8] sm:$0xff]   ;;  %v6392_v22 = vld [vmem:[%s8283_s4 + $0xb0] sm:$0xff]  }
  0x16   : > { %v602_v21 = vmul.f32 %v601_v20, %v6761_v10  ;;  %5704 = vmatprep.subr.bf16.mxu0 %v6637_v2  ;;  %v753_v34 = vsel %vm599_vm2, %v751_v28, %v752_v29  ;;  %v754_v35 = vsel %vm599_vm2, %v752_v29, %v751_v28  ;;  %v584_v41 = vsel %vm583_vm6, %v581_v32, %v582_v33  ;;  %v6397_v28 = vld [vmem:[%s8283_s4 + $0xe0] sm:$0xff]   ;;  %v6402_v29 = vld [vmem:[%s8283_s4 + $0x118] sm:$0xff]  }
  0x17   : > { %v755_v36 = vmul.f32 %v754_v35, %v6761_v10  ;;  %v585_v42 = vsel %vm583_vm6, %v582_v33, %v581_v32  ;;  %v587_v45 = vmul.f32 %v584_v41, %v6841_v40  ;;  %v1092_v60 = vrot.slane %v6791_v23, 7  ;;  %v6401_v32 = vld [vmem:[%s8283_s4 + $0xf0] sm:$0xff]   ;;  %v6403_v33 = vld [vmem:[%s8283_s4 + $0xf8] sm:$0xff]  }
  0x18   : > { %v604_v26 = vpack.c.bf16 %v600_v19, %v602_v21  ;;  %v586_v44 = vmul.f32 %v585_v42, %v6832_v37  ;;  %v1093_v62 = vrot.slane %v6794_v24, 7  ;;  %v840_v63 = vsel %vm839_vm7, %v837_v56, %v838_v57  ;;  %v6396_v21 = vld [vmem:[%s8283_s4 + $0x100] sm:$0xff]   ;;  %v6398_v24 = vld [vmem:[%s8283_s4 + $0x108] sm:$0xff]   ;;  %v6408_v35 = vld [vmem:[%s8285_s6 + $0x10] sm:$0xff]  }
  0x19   : > { %v757_v43 = vpack.c.bf16 %v753_v34, %v755_v36  ;;  %v841_v0 = vsel %vm839_vm7, %v838_v57, %v837_v56  ;;  %v843_v6 = vmul.f32 %v840_v63, %v6841_v40  ;;  %v6406_v34 = vld [vmem:[%s8285_s6] sm:$0xff]   ;;  %v6413_v41 = vld [vmem:[%s8287_s8 + $0x58] sm:$0xff]  }
  0x1a   : > { %5665 = vmatmul.mubr.msk.bf16.vlgmr.msra.gmra.mrb[0].mxu1 %vm638_vm3, %v604_v26  ;;  %v588_v49 = vpack.c.bf16 %v587_v45, %v586_v44  ;;  %v842_v5 = vmul.f32 %v841_v0, %v6810_v31  ;;  %v1094_v12 = vsel %vm839_vm7, %v1092_v60, %v1093_v62  ;;  %v1095_v13 = vsel %vm839_vm7, %v1093_v62, %v1092_v60  ;;  %v6400_v26 = vld [vmem:[%s8283_s4 + $0x110] sm:$0xff]   ;;  %v6410_v36 = vld [vmem:[%s8287_s8 + $0x40] sm:$0xff]   ;;  %v6417_v45 = vld [vmem:[%s8287_s8 + $0x78] sm:$0xff]  }
  0x1b   : > { %5669 = vmatpush3.bf16.msra.mxu1 %v6371_v25  ;;  %5676 = vmatprep.mubr.msk.bf16.mxu1 %vm6638_vm0, %v6637_v2  ;;  %v1096_v19 = vmul.f32 %v1095_v13, %v6810_v31  ;;  %v1097_v20 = vmul.f32 %v1094_v12, %v6841_v40  ;;  %v6394_v25 = vld [vmem:[%s8283_s4 + $0xb8] sm:$0xff]   ;;  %v6414_v42 = vld [vmem:[%s8287_s8 + $0x60] sm:$0xff]   ;;  %v6416_v44 = vld [vmem:[%s8287_s8 + $0x70] sm:$0xff]  }
  0x1c   : > { %5670 = vmatprep.subr.bf16.mxu1 %v6637_v2  ;;  %5689 = vmatmul.mubr.msk.bf16.vlgmr.msra.gmra.mrb[0].mxu0 %vm638_vm3, %v757_v43  ;;  %v844_v11 = vpack.c.bf16 %v843_v6, %v842_v5  ;;  %v6415_v43 = vld [vmem:[%s8287_s8 + $0x68] sm:$0xff]  }
  0x1d   : > { %5705 = vmatpush3.bf16.msra.mxu0 %v6378_v38  ;;  %5712 = vmatprep.mubr.msk.bf16.mxu0 %vm6638_vm0, %v6637_v2  ;;  %v1098_v23 = vpack.c.bf16 %v1097_v20, %v1096_v19  ;;  %v6411_v38 = vld [vmem:[%s8287_s8 + $0x48] sm:$0xff]  }
  0x1e   : > { %5706 = vmatprep.subr.bf16.mxu0 %v6637_v2 }
  0x1f   : > { %5671 = vmatpush3.bf16.msra.mxu1 %v6373_v30  ;;  %v6399_v30 = vld [vmem:[%s8283_s4 + $0xe8] sm:$0xff]  }
  0x20   : > { %5672 = vmatprep.subr.bf16.mxu1 %v6637_v2 }
  0x21   : > { %5707 = vmatpush3.bf16.msra.mxu0 %v6380_v46 }
  0x22   : > { %5708 = vmatprep.subr.bf16.mxu0 %v6637_v2 }
  0x23   : > { %5673 = vmatpush3.bf16.msra.mxu1 %v6375_v39  ;;  %v6412_v39 = vld [vmem:[%s8287_s8 + $0x50] sm:$0xff]  }
  0x24   : > { %5674 = vmatprep.subr.bf16.mxu1 %v6637_v2 }
  0x25   : > { %5709 = vmatpush3.bf16.msra.mxu0 %v6382_v50 }
  0x26   : > { %5710 = vmatprep.subr.bf16.mxu0 %v6637_v2 }
  0x27   : > { %5675 = vmatpush3.bf16.msra.mxu1 %v6377_v47 }
  0x28   : > { %5692 = vmatprep.subr.bf16.mxu1 %v6637_v2 }
  0x29   : > { %5711 = vmatpush3.bf16.msra.mxu0 %v6384_v55 }
  0x2a   : > { %5677 = vmatmul.mubr.msk.bf16.vlgmr.msra.gmra.mrb[4].mxu1 %vm638_vm3, %v588_v49  ;;  %5728 = vmatprep.subr.bf16.mxu0 %v6637_v2 }
  0x2b   : > { %5693 = vmatpush3.bf16.msra.mxu1 %v6379_v51  ;;  %5700 = vmatprep.mubr.msk.bf16.mxu1 %vm6638_vm0, %v6637_v2 }
  0x2c   : > { %5694 = vmatprep.subr.bf16.mxu1 %v6637_v2  ;;  %5713 = vmatmul.mubr.msk.bf16.vlgmr.msra.gmra.mrb[4].mxu0 %vm638_vm3, %v6897_v59 }
  0x2d   : > { %5729 = vmatpush3.bf16.msra.mxu0 %v6387_v61  ;;  %5736 = vmatprep.mubr.msk.bf16.mxu0 %vm6638_vm0, %v6637_v2 }
  0x2e   : > { %5730 = vmatprep.subr.bf16.mxu0 %v6637_v2 }
  0x2f   : > { %5695 = vmatpush3.bf16.msra.mxu1 %v6381_v54 }
  0x30   : > { %5696 = vmatprep.subr.bf16.mxu1 %v6637_v2 }
  0x31   : > { %5731 = vmatpush3.bf16.msra.mxu0 %v6389_v1 }
  0x32   : > { %5732 = vmatprep.subr.bf16.mxu0 %v6637_v2 }
  0x33   : > { %5697 = vmatpush3.bf16.msra.mxu1 %v6383_v58 }
  0x34   : > { %5698 = vmatprep.subr.bf16.mxu1 %v6637_v2 }
  0x35   : > { %5733 = vmatpush3.bf16.msra.mxu0 %v6391_v7 }
  0x36   : > { %5734 = vmatprep.subr.bf16.mxu0 %v6637_v2 }
  0x37   : > { %5699 = vmatpush3.bf16.msra.mxu1 %v6385_v3 }
  0x38   : > { %5716 = vmatprep.subr.bf16.mxu1 %v6637_v2 }
  0x39   : > { %5735 = vmatpush3.bf16.msra.mxu0 %v6393_v15 }
  0x3a   : > { %5701 = vmatmul.mubr.msk.bf16.vlgmr.msra.gmra.mrb[8].mxu1 %vm638_vm3, %v844_v11  ;;  %5752 = vmatprep.subr.bf16.mxu0 %v6637_v2 }
  0x3b   : > { %5717 = vmatpush3.bf16.msra.mxu1 %v6388_v8  ;;  %5724 = vmatprep.mubr.msk.bf16.mxu1 %vm6638_vm0, %v6637_v2 }
  0x3c   : > { %5718 = vmatprep.subr.bf16.mxu1 %v6637_v2  ;;  %5737 = vmatmul.mubr.msk.bf16.vlgmr.msra.gmra.mrb[8].mxu0 %vm638_vm3, %v1098_v23 }
  0x3d   : > { %5753 = vmatpush3.bf16.msra.mxu0 %v6396_v21  ;;  %5760 = vmatprep.mubr.msk.bf16.mxu0 %vm6638_vm0, %v6637_v2 }
  0x3e   : > { %5754 = vmatprep.subr.bf16.mxu0 %v6637_v2 }
  0x3f   : > { %5719 = vmatpush3.bf16.msra.mxu1 %v6390_v16 }
  0x40   : > { %5720 = vmatprep.subr.bf16.mxu1 %v6637_v2 }
  0x41   : > { %5755 = vmatpush3.bf16.msra.mxu0 %v6398_v24 }
  0x42   : > { %5756 = vmatprep.subr.bf16.mxu0 %v6637_v2 }
  0x43   : > { %5721 = vmatpush3.bf16.msra.mxu1 %v6392_v22 }
  0x44   : > { %5722 = vmatprep.subr.bf16.mxu1 %v6637_v2 }
  0x45   : > { %5757 = vmatpush3.bf16.msra.mxu0 %v6400_v26 }
  0x46   : > { %5758 = vmatprep.subr.bf16.mxu0 %v6637_v2 }
  0x47   : > { %5723 = vmatpush3.bf16.msra.mxu1 %v6394_v25 }
  0x48   : > { %5740 = vmatprep.subr.bf16.mxu1 %v6637_v2 }
  0x49   : > { %5759 = vmatpush3.bf16.msra.mxu0 %v6402_v29 }
  0x4a   : > { %5725 = vmatmul.mubr.msk.bf16.vlgmr.msra.gmra.mrb[12].mxu1 %vm638_vm3, %v6865_v48  ;;  %5956 = vmatprep.subr.bf16.mxu0 %v6637_v2 }
  0x4b   : > { %5741 = vmatpush3.bf16.msra.mxu1 %v6397_v28  ;;  %5748 = vmatprep.mubr.msk.bf16.mxu1 %vm6638_vm0, %v6637_v2 }
  0x4c   : > { %5742 = vmatprep.subr.bf16.mxu1 %v6637_v2  ;;  %5761 = vmatmul.mubr.msk.bf16.vlgmr.msra.gmra.mrb[12].mxu0 %vm638_vm3, %v6779_v18  ;;  %v6407_v18 = vld [vmem:[%s8285_s6 + $0x8] sm:$0xff]  }
  0x4d   : > { %5972 = vmatprep.mubr.msk.bf16.mxu0 %vm6638_vm0, %v6637_v2 }
  0x4f   : > { %5743 = vmatpush3.bf16.msra.mxu1 %v6399_v30 }
  0x50   : > { %5744 = vmatprep.subr.bf16.mxu1 %v6637_v2 }
  0x53   : > { %5745 = vmatpush3.bf16.msra.mxu1 %v6401_v32 }
  0x54   : > { %5746 = vmatprep.subr.bf16.mxu1 %v6637_v2 }
  0x57   : > { %5747 = vmatpush3.bf16.msra.mxu1 %v6403_v33 }
  0x58   : > { %5764 = vmatprep.subr.bf16.mxu1 %v6637_v2 }
  0x5a   : > { %5749 = vmatmul.mubr.msk.bf16.vlgmr.msra.gmra.mrb[16].mxu1 %vm638_vm3, %v6758_v9  ;;  %v6409_v9 = vld [vmem:[%s8285_s6 + $0x18] sm:$0xff]  }
  0x5b   : > { %5772 = vmatprep.mubr.msk.bf16.mxu1 %vm6638_vm0, %v6637_v2  ;;  %5765 = vmatpush3.bf16.msra.mxu1 %v6406_v34 }
  0x5c   : > { %5766 = vmatprep.subr.bf16.mxu1 %v6637_v2 }
  0x5f   : > { %5767 = vmatpush3.bf16.msra.mxu1 %v6407_v18 }
  0x60   : > { %5768 = vmatprep.subr.bf16.mxu1 %v6637_v2 }
  0x63   : > { %5769 = vmatpush3.bf16.msra.mxu1 %v6408_v35 }
  0x64   : > { %5770 = vmatprep.subr.bf16.mxu1 %v6637_v2 }
  0x67   : > { %5771 = vmatpush3.bf16.msra.mxu1 %v6409_v9 }
  0x68   : > { %5776 = vmatprep.subr.bf16.mxu1 %v6637_v2 }
  0x6a   : > { %5773 = vmatmul.mubr.msk.bf16.vlgmr.msra.gmra.mrb[20].mxu1 %vm638_vm3, %v6897_v59 }
  0x6b   : > { %5777 = vmatpush3.bf16.msra.mxu1 %v6410_v36  ;;  %5792 = vmatprep.mubr.msk.bf16.mxu1 %vm6638_vm0, %v6637_v2  ;;  %v4742_v36 = vld [vmem:[%s8284_s5] ss:$0 sm:$0xff] }
  0x6c   : > { %5778 = vmatprep.subr.bf16.mxu1 %v6637_v2 }
  0x6f   : > { %5779 = vmatpush3.bf16.msra.mxu1 %v6411_v38 }
  0x70   : > { %5780 = vmatprep.subr.bf16.mxu1 %v6637_v2 }
  0x73   : > { %5781 = vmatpush3.bf16.msra.mxu1 %v6412_v39 }
  0x74   : > { %5782 = vmatprep.subr.bf16.mxu1 %v6637_v2 }
  0x77   : > { %5783 = vmatpush3.bf16.msra.mxu1 %v6413_v41 }
  0x78   : > { %5784 = vmatprep.subr.bf16.mxu1 %v6637_v2 }
  0x7b   : > { %5785 = vmatpush3.bf16.msra.mxu1 %v6414_v42 }
  0x7c   : > { %5786 = vmatprep.subr.bf16.mxu1 %v6637_v2 }
  0x7f   : > { %5787 = vmatpush3.bf16.msra.mxu1 %v6415_v43 }
  0x80   : > { %5788 = vmatprep.subr.bf16.mxu1 %v6637_v2 }
  0x83   : > { %5789 = vmatpush3.bf16.msra.mxu1 %v6416_v44 }
  0x84   : > { %5790 = vmatprep.subr.bf16.mxu1 %v6637_v2 }
  0x87   : > { %5791 = vmatpush3.bf16.msra.mxu1 %v6417_v45  ;;  %v7067_v45 = vsel %vm555_vm8, 1.0, %v6637_v2 }
  0x88   : > { %5796 = vmatprep.subr.bf16.mxu1 %v6637_v2 }
  0xed   : > { %v676_v46 = vpop.f32.mrb[0].mxu1 }
  0xee   : > { %v5666_v47 = vpop.f32.mrb[1].mxu1 }
  0xef   : > { %v679_v48 = vpop.f32.mrb[2].mxu1  ;;  %v828_v50 = vpop.f32.mrb[0].mxu0 }
  0xf0   : > { %v5667_v49 = vpop.f32.mrb[3].mxu1  ;;  %v5690_v51 = vpop.f32.mrb[1].mxu0 }
  0xf1   : > { %v831_v52 = vpop.f32.mrb[2].mxu0  ;;  %v7079_v49 = vmul.f32 %v7067_v45, %v6761_v10 }
  0xf2   : > { %v5691_v53 = vpop.f32.mrb[3].mxu0 }
  0xfd   : > { %v744_v54 = vpop.f32.mrb[4].mxu1 }
  0xfe   : > { %v745_v55 = vadd.f32 %v744_v54, %v676_v46  ;;  %v5678_v56 = vpop.f32.mrb[5].mxu1  ;;  %v7070_v46 = vsel %vm548_vm9, 1.0, %v6637_v2 }
  0xff   : > { %v747_v57 = vpop.f32.mrb[6].mxu1  ;;  %v999_v62 = vpop.f32.mrb[4].mxu0  ;;  %v7087_v27 = vmul.f32 %v6841_v40, %v7070_v46  ;;  %v7094_v53 = vmul.f32 %v7075_v14, %v7070_v46 }
 0x100   : > { %v835_v58 = vadd.f32 %v828_v50, %v745_v55  ;;  %v748_v59 = vadd.f32 %v747_v57, %v679_v48  ;;  %v5679_v60 = vpop.f32.mrb[7].mxu1  ;;  %v5714_v63 = vpop.f32.mrb[5].mxu0 }
 0x101   : > { %v1002_v0 = vpop.f32.mrb[6].mxu0 }
 0x102   : > { %v836_v61 = vadd.f32 %v831_v52, %v748_v59  ;;  %v5715_v1 = vpop.f32.mrb[7].mxu0 }
 0x10d   : > { %v915_v3 = vpop.f32.mrb[8].mxu1 }
 0x10e   : > { %v922_v5 = vadd.f32 %v915_v3, %v835_v58  ;;  %v5702_v6 = vpop.f32.mrb[9].mxu1 }
 0x10f   : > { %v918_v7 = vpop.f32.mrb[10].mxu1  ;;  %v1169_v15 = vpop.f32.mrb[8].mxu0 }
 0x110   : > { %v1006_v8 = vadd.f32 %v999_v62, %v922_v5  ;;  %v923_v11 = vadd.f32 %v918_v7, %v836_v61  ;;  %v5703_v12 = vpop.f32.mrb[11].mxu1  ;;  %v5738_v16 = vpop.f32.mrb[9].mxu0 }
 0x111   : > { %v1172_v19 = vpop.f32.mrb[10].mxu0 }
 0x112   : > { %v1007_v13 = vadd.f32 %v1002_v0, %v923_v11  ;;  %v5739_v20 = vpop.f32.mrb[11].mxu0 }
 0x11d   : > { %v1083_v21 = vpop.f32.mrb[12].mxu1 }
 0x11e   : > { %v1090_v22 = vadd.f32 %v1083_v21, %v1006_v8  ;;  %v5726_v23 = vpop.f32.mrb[13].mxu1  ;;  %v6418_v8 = vld [vmem:[%s8287_s8] sm:$0xff]  }
 0x11f   : > { %v1086_v24 = vpop.f32.mrb[14].mxu1  ;;  %v1337_v30 = vpop.f32.mrb[12].mxu0 }
 0x120   : > { %v1176_v25 = vadd.f32 %v1169_v15, %v1090_v22  ;;  %v1091_v26 = vadd.f32 %v1086_v24, %v1007_v13  ;;  %v5727_v28 = vpop.f32.mrb[15].mxu1  ;;  %v5762_v32 = vpop.f32.mrb[13].mxu0 }
 0x121   : > { %v1340_v33 = vpop.f32.mrb[14].mxu0  ;;  %v6419_v32 = vld [vmem:[%s8287_s8 + $0x8] sm:$0xff]  }
 0x122   : > { %v1177_v29 = vadd.f32 %v1172_v19, %v1091_v26  ;;  %v5763_v34 = vpop.f32.mrb[15].mxu0 }
 0x12d   : > { %v1253_v18 = vpop.f32.mrb[16].mxu1 }
 0x12e   : > { %v1260_v35 = vadd.f32 %v1253_v18, %v1176_v25  ;;  %v5750_v9 = vpop.f32.mrb[17].mxu1 }
 0x12f   : > { %v1256_v38 = vpop.f32.mrb[18].mxu1 }
 0x130   : > { %v1344_v39 = vadd.f32 %v1337_v30, %v1260_v35  ;;  %v1261_v41 = vadd.f32 %v1256_v38, %v1177_v29  ;;  %v5751_v42 = vpop.f32.mrb[19].mxu1 }
 0x131   : > { %v6421_v42 = vld [vmem:[%s8287_s8 + $0x18] sm:$0xff]  }
 0x132   : > { %v1353_v43 = vadd.f32 %v4742_v36, %v1344_v39  ;;  %v1345_v44 = vadd.f32 %v1340_v33, %v1261_v41  ;;  %v6420_v41 = vld [vmem:[%s8287_s8 + $0x10] sm:$0xff]  }
 0x134   : > { %v7072_v47 = vmax.f32 %v1353_v43, 0.0  ;;  %v1354_v48 = vadd.f32 %v4742_v36, %v1345_v44  ;;  %v6422_v43 = vld [vmem:[%s8287_s8 + $0x20] sm:$0xff]   ;;  %v6423_v44 = vld [vmem:[%s8287_s8 + $0x28] sm:$0xff]  }
 0x136   : > { %v7081_v17 = vmax.f32 %v1354_v48, 0.0  ;;  %v1460_v50 = vrot.slane %v7072_v47, 4  ;;  %v1437_v51 = vrot.slane %v7072_v47, 3  ;;  %v1662_v52 = vrot.slane %v7072_v47, 5  ;;  %v6424_v48 = vld [vmem:[%s8287_s8 + $0x30] sm:$0xff]  }
 0x137   : > { %v1778_v58 = vrot.slane %v7072_v47, 7  ;;  %v2002_v60 = vrot.slane %v7072_v47, 1 }
 0x138   : > { %v1461_v54 = vrot.slane %v7081_v17, 4  ;;  %v1438_v55 = vrot.slane %v7081_v17, 3  ;;  %v1663_v56 = vrot.slane %v7081_v17, 5  ;;  %v1779_v57 = vrot.slane %v7081_v17, 7 }
 0x139   : > { %v1893_v59 = vpack.c.bf16 %v7081_v17, %v7072_v47  ;;  %v2003_v61 = vrot.slane %v7081_v17, 1  ;;  %v6483_v47 = vld [vmem:[%s8289_s10 + $0x48] sm:$0xff]   ;;  %v6452_v17 = vld [vmem:[%s8287_s8 + $0x150] sm:$0xff]  }
 0x13a   : > { %v7107_v62 = vsel %vm599_vm2, %v1460_v50, %v1461_v54  ;;  %v1463_v63 = vsel %vm599_vm2, %v1461_v54, %v1460_v50  ;;  %v1439_v0 = vsel %vm583_vm6, %v1437_v51, %v1438_v55  ;;  %v1440_v1 = vsel %vm583_vm6, %v1438_v55, %v1437_v51  ;;  %v6425_v50 = vld [vmem:[%s8287_s8 + $0x38] sm:$0xff]   ;;  %v6426_v51 = vld [vmem:[%s8287_s8 + $0x80] sm:$0xff]   ;;  %v6428_v54 = vld [vmem:[%s8287_s8 + $0x90] sm:$0xff]  }
 0x13b   : > { %v1464_v3 = vmul.f32 %v1463_v63, %v6761_v10  ;;  %v1441_v5 = vmul.f32 %v1440_v1, %v6832_v37  ;;  %v1442_v6 = vmul.f32 %v1439_v0, %v6841_v40  ;;  %v1665_v7 = vsel %vm1664_vm11, %v1662_v52, %v1663_v56  ;;  %v6429_v55 = vld [vmem:[%s8287_s8 + $0x98] sm:$0xff]  }
 0x13c   : > { %v1666_v11 = vsel %vm1664_vm11, %v1663_v56, %v1662_v52  ;;  %v7126_v12 = vmul.f32 %v1665_v7, %v7075_v14  ;;  %v1780_v13 = vsel %vm839_vm7, %v1778_v58, %v1779_v57  ;;  %v1781_v15 = vsel %vm839_vm7, %v1779_v57, %v1778_v58  ;;  %v6427_v52 = vld [vmem:[%s8287_s8 + $0x88] sm:$0xff]   ;;  %v6430_v56 = vld [vmem:[%s8287_s8 + $0xa0] sm:$0xff]   ;;  %v6432_v58 = vld [vmem:[%s8287_s8 + $0xb0] sm:$0xff]  }
 0x13d   : > { %v1466_v16 = vpack.c.bf16 %v7107_v62, %v1464_v3  ;;  %v1443_v19 = vpack.c.bf16 %v1442_v6, %v1441_v5  ;;  %v7134_v20 = vmul.f32 %v1666_v11, %v7079_v49  ;;  %v7137_v21 = vmul.f32 %v1781_v15, %v6810_v31  ;;  %v6431_v57 = vld [vmem:[%s8287_s8 + $0xa8] sm:$0xff]   ;;  %v6438_v3 = vld [vmem:[%s8287_s8 + $0xe0] sm:$0xff]   ;;  %v6440_v6 = vld [vmem:[%s8287_s8 + $0xf0] sm:$0xff]  }
 0x13e   : > { %v7140_v22 = vmul.f32 %v1780_v13, %v6841_v40  ;;  %v2005_v23 = vsel %vm2004_vm12, %v2002_v60, %v2003_v61  ;;  %v2006_v24 = vsel %vm2004_vm12, %v2003_v61, %v2002_v60  ;;  %v7147_v25 = vmul.f32 %v1439_v0, %v6810_v31  ;;  %v6433_v60 = vld [vmem:[%s8287_s8 + $0xb8] sm:$0xff]   ;;  %v6434_v61 = vld [vmem:[%s8287_s8 + $0xc0] sm:$0xff]   ;;  %v6436_v0 = vld [vmem:[%s8287_s8 + $0xd0] sm:$0xff]  }
 0x13f   : > { %5793 = vmatmul.mubr.bf16.vlgmr.msra.gmra.mrb[20].mxu1 %v1466_v16  ;;  %v1669_v26 = vpack.c.bf16 %v7126_v12, %v7134_v20  ;;  %v7152_v28 = vmul.f32 %v2005_v23, %v7067_v45  ;;  %v7155_v29 = vmul.f32 %v2006_v24, %v7075_v14  ;;  %v7158_v30 = vmul.f32 %v1440_v1, %v7087_v27  ;;  %v6437_v1 = vld [vmem:[%s8287_s8 + $0xd8] sm:$0xff]   ;;  %v6439_v5 = vld [vmem:[%s8287_s8 + $0xe8] sm:$0xff]   ;;  %v6444_v12 = vld [vmem:[%s8287_s8 + $0x110] sm:$0xff]  }
 0x140   : > { %5797 = vmatpush3.bf16.msra.mxu1 %v6418_v8  ;;  %5812 = vmatprep.mubr.msk.bf16.mxu1 %vm6638_vm0, %v6637_v2  ;;  %v1784_v33 = vpack.c.bf16 %v7140_v22, %v7137_v21  ;;  %v7168_v34 = vmul.f32 %v1463_v63, %v7070_v46  ;;  %v7171_v18 = vmul.f32 %v1665_v7, %v7067_v45  ;;  %v6435_v63 = vld [vmem:[%s8287_s8 + $0xc8] sm:$0xff]   ;;  %v6441_v7 = vld [vmem:[%s8287_s8 + $0xf8] sm:$0xff]   ;;  %v6442_v8 = vld [vmem:[%s8287_s8 + $0x100] sm:$0xff]  }
 0x141   : > { %5798 = vmatprep.subr.bf16.mxu1 %v6637_v2  ;;  %v2009_v35 = vpack.c.bf16 %v7155_v29, %v7152_v28  ;;  %v2120_v9 = vpack.c.bf16 %v7158_v30, %v7147_v25  ;;  %v7179_v36 = vmul.f32 %v1666_v11, %v7094_v53  ;;  %v6443_v11 = vld [vmem:[%s8287_s8 + $0x108] sm:$0xff]   ;;  %v6445_v13 = vld [vmem:[%s8287_s8 + $0x118] sm:$0xff]   ;;  %v6446_v15 = vld [vmem:[%s8287_s8 + $0x120] sm:$0xff]  }
 0x142   : > { %v2231_v38 = vpack.c.bf16 %v7168_v34, %v7107_v62  ;;  %v6447_v16 = vld [vmem:[%s8287_s8 + $0x128] sm:$0xff]   ;;  %v6449_v20 = vld [vmem:[%s8287_s8 + $0x138] sm:$0xff]   ;;  %v6450_v21 = vld [vmem:[%s8287_s8 + $0x140] sm:$0xff]  }
 0x143   : > { %v2342_v39 = vpack.c.bf16 %v7179_v36, %v7171_v18  ;;  %v6482_v22 = vld [vmem:[%s8289_s10 + $0x40] sm:$0xff]   ;;  %v6451_v23 = vld [vmem:[%s8287_s8 + $0x148] sm:$0xff]   ;;  %v6453_v24 = vld [vmem:[%s8287_s8 + $0x158] sm:$0xff]  }
 0x144   : > { %5799 = vmatpush3.bf16.msra.mxu1 %v6419_v32  ;;  %5957 = vmatpush3.bf16.msra.mxu0 %v6482_v22  ;;  %v6454_v32 = vld [vmem:[%s8287_s8 + $0x160] sm:$0xff]   ;;  %v6461_v28 = vld [vmem:[%s8287_s8 + $0x198] sm:$0xff]   ;;  %v6488_v18 = vld [vmem:[%s8289_s10 + $0x70] sm:$0xff]  }
 0x145   : > { %5800 = vmatprep.subr.bf16.mxu1 %v6637_v2  ;;  %5958 = vmatprep.subr.bf16.mxu0 %v6637_v2  ;;  %v6462_v29 = vld [vmem:[%s8287_s8 + $0x1a0] sm:$0xff]   ;;  %v6469_v25 = vld [vmem:[%s8287_s8 + $0x1d8] sm:$0xff]  }
 0x146   : > { %v6470_v30 = vld [vmem:[%s8287_s8 + $0x1e0] sm:$0xff]   ;;  %v6477_v62 = vld [vmem:[%s8287_s8 + $0x218] sm:$0xff]  }
 0x147   : > { %v6478_v34 = vld [vmem:[%s8287_s8 + $0x220] sm:$0xff]   ;;  %v6489_v36 = vld [vmem:[%s8289_s10 + $0x78] sm:$0xff]  }
 0x148   : > { %5801 = vmatpush3.bf16.msra.mxu1 %v6420_v41  ;;  %5959 = vmatpush3.bf16.msra.mxu0 %v6483_v47  ;;  %v6456_v41 = vld [vmem:[%s8287_s8 + $0x170] sm:$0xff]  }
 0x149   : > { %5802 = vmatprep.subr.bf16.mxu1 %v6637_v2  ;;  %5960 = vmatprep.subr.bf16.mxu0 %v6637_v2 }
 0x14c   : > { %5803 = vmatpush3.bf16.msra.mxu1 %v6421_v42  ;;  %v6457_v42 = vld [vmem:[%s8287_s8 + $0x178] sm:$0xff]  }
 0x14d   : > { %5804 = vmatprep.subr.bf16.mxu1 %v6637_v2 }
 0x150   : > { %5805 = vmatpush3.bf16.msra.mxu1 %v6422_v43  ;;  %v6458_v43 = vld [vmem:[%s8287_s8 + $0x180] sm:$0xff]  }
 0x151   : > { %5806 = vmatprep.subr.bf16.mxu1 %v6637_v2 }
 0x154   : > { %5807 = vmatpush3.bf16.msra.mxu1 %v6423_v44  ;;  %v6459_v44 = vld [vmem:[%s8287_s8 + $0x188] sm:$0xff]  }
 0x155   : > { %5808 = vmatprep.subr.bf16.mxu1 %v6637_v2 }
 0x158   : > { %5809 = vmatpush3.bf16.msra.mxu1 %v6424_v48  ;;  %v6460_v48 = vld [vmem:[%s8287_s8 + $0x190] sm:$0xff]  }
 0x159   : > { %5810 = vmatprep.subr.bf16.mxu1 %v6637_v2 }
 0x15c   : > { %5811 = vmatpush3.bf16.msra.mxu1 %v6425_v50  ;;  %v6464_v50 = vld [vmem:[%s8287_s8 + $0x1b0] sm:$0xff]  }
 0x15d   : > { %5816 = vmatprep.subr.bf16.mxu1 %v6637_v2 }
 0x15f   : > { %5813 = vmatmul.mubr.bf16.vlgmr.msra.gmra.mrb[20].mxu1 %v1443_v19  ;;  %v6448_v19 = vld [vmem:[%s8287_s8 + $0x130] sm:$0xff]  }
 0x160   : > { %5817 = vmatpush3.bf16.msra.mxu1 %v6426_v51  ;;  %5832 = vmatprep.mubr.msk.bf16.mxu1 %vm6638_vm0, %v6637_v2  ;;  %v6465_v51 = vld [vmem:[%s8287_s8 + $0x1b8] sm:$0xff]  }
 0x161   : > { %5818 = vmatprep.subr.bf16.mxu1 %v6637_v2 }
 0x164   : > { %5819 = vmatpush3.bf16.msra.mxu1 %v6427_v52  ;;  %v6466_v52 = vld [vmem:[%s8287_s8 + $0x1c0] sm:$0xff]  }
 0x165   : > { %5820 = vmatprep.subr.bf16.mxu1 %v6637_v2 }
 0x168   : > { %5821 = vmatpush3.bf16.msra.mxu1 %v6428_v54  ;;  %v6467_v54 = vld [vmem:[%s8287_s8 + $0x1c8] sm:$0xff]  }
 0x169   : > { %5822 = vmatprep.subr.bf16.mxu1 %v6637_v2 }
 0x16c   : > { %5823 = vmatpush3.bf16.msra.mxu1 %v6429_v55  ;;  %v6468_v55 = vld [vmem:[%s8287_s8 + $0x1d0] sm:$0xff]  }
 0x16d   : > { %5824 = vmatprep.subr.bf16.mxu1 %v6637_v2 }
 0x170   : > { %5825 = vmatpush3.bf16.msra.mxu1 %v6430_v56  ;;  %v6472_v56 = vld [vmem:[%s8287_s8 + $0x1f0] sm:$0xff]  }
 0x171   : > { %5826 = vmatprep.subr.bf16.mxu1 %v6637_v2 }
 0x174   : > { %5827 = vmatpush3.bf16.msra.mxu1 %v6431_v57  ;;  %v6473_v57 = vld [vmem:[%s8287_s8 + $0x1f8] sm:$0xff]  }
 0x175   : > { %5828 = vmatprep.subr.bf16.mxu1 %v6637_v2 }
 0x178   : > { %5829 = vmatpush3.bf16.msra.mxu1 %v6432_v58  ;;  %v6474_v58 = vld [vmem:[%s8287_s8 + $0x200] sm:$0xff]  }
 0x179   : > { %5830 = vmatprep.subr.bf16.mxu1 %v6637_v2 }
 0x17c   : > { %5831 = vmatpush3.bf16.msra.mxu1 %v6433_v60  ;;  %v6475_v60 = vld [vmem:[%s8287_s8 + $0x208] sm:$0xff]  }
 0x17d   : > { %5836 = vmatprep.subr.bf16.mxu1 %v6637_v2 }
 0x17f   : > { %5833 = vmatmul.mubr.bf16.vlgmr.msra.gmra.mrb[20].mxu1 %v1669_v26  ;;  %v6485_v26 = vld [vmem:[%s8289_s10 + $0x58] sm:$0xff]  }
 0x180   : > { %5837 = vmatpush3.bf16.msra.mxu1 %v6434_v61  ;;  %5852 = vmatprep.mubr.msk.bf16.mxu1 %vm6638_vm0, %v6637_v2  ;;  %v6476_v61 = vld [vmem:[%s8287_s8 + $0x210] sm:$0xff]  }
 0x181   : > { %5838 = vmatprep.subr.bf16.mxu1 %v6637_v2 }
 0x184   : > { %5839 = vmatpush3.bf16.msra.mxu1 %v6435_v63  ;;  %v6480_v63 = vld [vmem:[%s8287_s8 + $0x230] sm:$0xff]  }
 0x185   : > { %5840 = vmatprep.subr.bf16.mxu1 %v6637_v2 }
 0x188   : > { %5841 = vmatpush3.bf16.msra.mxu1 %v6436_v0  ;;  %v6481_v0 = vld [vmem:[%s8287_s8 + $0x238] sm:$0xff]  }
 0x189   : > { %5842 = vmatprep.subr.bf16.mxu1 %v6637_v2 }
 0x18c   : > { %5843 = vmatpush3.bf16.msra.mxu1 %v6437_v1  ;;  %v6486_v1 = vld [vmem:[%s8289_s10 + $0x60] sm:$0xff]  }
 0x18d   : > { %5844 = vmatprep.subr.bf16.mxu1 %v6637_v2 }
 0x190   : > { %5845 = vmatpush3.bf16.msra.mxu1 %v6438_v3  ;;  %v6487_v3 = vld [vmem:[%s8289_s10 + $0x68] sm:$0xff]  }
 0x191   : > { %5846 = vmatprep.subr.bf16.mxu1 %v6637_v2 }
 0x194   : > { %5847 = vmatpush3.bf16.msra.mxu1 %v6439_v5 }
 0x195   : > { %5848 = vmatprep.subr.bf16.mxu1 %v6637_v2 }
 0x198   : > { %5849 = vmatpush3.bf16.msra.mxu1 %v6440_v6  ;;  %v4949_v6 = vld [vmem:[%s8288_s9] ss:$0 sm:$0xff] }
 0x199   : > { %5850 = vmatprep.subr.bf16.mxu1 %v6637_v2 }
 0x19c   : > { %5851 = vmatpush3.bf16.msra.mxu1 %v6441_v7 }
 0x19d   : > { %5856 = vmatprep.subr.bf16.mxu1 %v6637_v2 }
 0x19f   : > { %5853 = vmatmul.mubr.bf16.vlgmr.msra.gmra.mrb[20].mxu1 %v1784_v33  ;;  %v6455_v33 = vld [vmem:[%s8287_s8 + $0x168] sm:$0xff]  }
 0x1a0   : > { %5857 = vmatpush3.bf16.msra.mxu1 %v6442_v8  ;;  %5872 = vmatprep.mubr.msk.bf16.mxu1 %vm6638_vm0, %v6637_v2 }
 0x1a1   : > { %5858 = vmatprep.subr.bf16.mxu1 %v6637_v2 }
 0x1a4   : > { %5859 = vmatpush3.bf16.msra.mxu1 %v6443_v11 }
 0x1a5   : > { %5860 = vmatprep.subr.bf16.mxu1 %v6637_v2 }
 0x1a8   : > { %5861 = vmatpush3.bf16.msra.mxu1 %v6444_v12 }
 0x1a9   : > { %5862 = vmatprep.subr.bf16.mxu1 %v6637_v2 }
 0x1ac   : > { %5863 = vmatpush3.bf16.msra.mxu1 %v6445_v13 }
 0x1ad   : > { %5864 = vmatprep.subr.bf16.mxu1 %v6637_v2 }
 0x1b0   : > { %5865 = vmatpush3.bf16.msra.mxu1 %v6446_v15 }
 0x1b1   : > { %5866 = vmatprep.subr.bf16.mxu1 %v6637_v2 }
 0x1b4   : > { %5867 = vmatpush3.bf16.msra.mxu1 %v6447_v16 }
 0x1b5   : > { %5868 = vmatprep.subr.bf16.mxu1 %v6637_v2 }
 0x1b8   : > { %5869 = vmatpush3.bf16.msra.mxu1 %v6448_v19 }
 0x1b9   : > { %5870 = vmatprep.subr.bf16.mxu1 %v6637_v2 }
 0x1bc   : > { %5871 = vmatpush3.bf16.msra.mxu1 %v6449_v20 }
 0x1bd   : > { %5876 = vmatprep.subr.bf16.mxu1 %v6637_v2 }
 0x1bf   : > { %5873 = vmatmul.mubr.bf16.vlgmr.msra.gmra.mrb[20].mxu1 %v1893_v59  ;;  %v6484_v59 = vld [vmem:[%s8289_s10 + $0x50] sm:$0xff]  }
 0x1c0   : > { %5877 = vmatpush3.bf16.msra.mxu1 %v6450_v21  ;;  %5892 = vmatprep.mubr.msk.bf16.mxu1 %vm6638_vm0, %v6637_v2 }
 0x1c1   : > { %5878 = vmatprep.subr.bf16.mxu1 %v6637_v2  ;;  %5961 = vmatpush3.bf16.msra.mxu0 %v6484_v59 }
 0x1c2   : > { %5962 = vmatprep.subr.bf16.mxu0 %v6637_v2 }
 0x1c4   : > { %5879 = vmatpush3.bf16.msra.mxu1 %v6451_v23 }
 0x1c5   : > { %5880 = vmatprep.subr.bf16.mxu1 %v6637_v2  ;;  %5963 = vmatpush3.bf16.msra.mxu0 %v6485_v26 }
 0x1c6   : > { %5964 = vmatprep.subr.bf16.mxu0 %v6637_v2 }
 0x1c8   : > { %5881 = vmatpush3.bf16.msra.mxu1 %v6452_v17 }
 0x1c9   : > { %5882 = vmatprep.subr.bf16.mxu1 %v6637_v2  ;;  %5965 = vmatpush3.bf16.msra.mxu0 %v6486_v1  ;;  %v6501_v1 = vld [vmem:[%s8289_s10 + $0x98] sm:$0xff]  }
 0x1ca   : > { %5966 = vmatprep.subr.bf16.mxu0 %v6637_v2 }
 0x1cc   : > { %5883 = vmatpush3.bf16.msra.mxu1 %v6453_v24 }
 0x1cd   : > { %5884 = vmatprep.subr.bf16.mxu1 %v6637_v2  ;;  %5967 = vmatpush3.bf16.msra.mxu0 %v6487_v3  ;;  %v6502_v3 = vld [vmem:[%s8289_s10 + $0xa0] sm:$0xff]  }
 0x1ce   : > { %5968 = vmatprep.subr.bf16.mxu0 %v6637_v2 }
 0x1d0   : > { %5885 = vmatpush3.bf16.msra.mxu1 %v6454_v32 }
 0x1d1   : > { %5886 = vmatprep.subr.bf16.mxu1 %v6637_v2  ;;  %5969 = vmatpush3.bf16.msra.mxu0 %v6488_v18  ;;  %v6503_v18 = vld [vmem:[%s8289_s10 + $0xa8] sm:$0xff]  }
 0x1d2   : > { %5970 = vmatprep.subr.bf16.mxu0 %v6637_v2 }
 0x1d4   : > { %5887 = vmatpush3.bf16.msra.mxu1 %v6455_v33 }
 0x1d5   : > { %5888 = vmatprep.subr.bf16.mxu1 %v6637_v2  ;;  %5971 = vmatpush3.bf16.msra.mxu0 %v6489_v36  ;;  %v6504_v36 = vld [vmem:[%s8289_s10 + $0xb0] sm:$0xff]  }
 0x1d6   : > { %5976 = vmatprep.subr.bf16.mxu0 %v6637_v2 }
 0x1d8   : > { %5889 = vmatpush3.bf16.msra.mxu1 %v6456_v41  ;;  %v6490_v41 = vld [vmem:[%s8289_s10] sm:$0xff]  }
 0x1d9   : > { %5890 = vmatprep.subr.bf16.mxu1 %v6637_v2 }
 0x1dc   : > { %5891 = vmatpush3.bf16.msra.mxu1 %v6457_v42 }
 0x1dd   : > { %5896 = vmatprep.subr.bf16.mxu1 %v6637_v2 }
 0x1df   : > { %5893 = vmatmul.mubr.bf16.vlgmr.msra.gmra.mrb[20].mxu1 %v2009_v35  ;;  %v6463_v35 = vld [vmem:[%s8287_s8 + $0x1a8] sm:$0xff]  }
 0x1e0   : > { %5897 = vmatpush3.bf16.msra.mxu1 %v6458_v43  ;;  %5912 = vmatprep.mubr.msk.bf16.mxu1 %vm6638_vm0, %v6637_v2 }
 0x1e1   : > { %5898 = vmatprep.subr.bf16.mxu1 %v6637_v2 }
 0x1e4   : > { %5899 = vmatpush3.bf16.msra.mxu1 %v6459_v44 }
 0x1e5   : > { %5900 = vmatprep.subr.bf16.mxu1 %v6637_v2 }
 0x1e8   : > { %5901 = vmatpush3.bf16.msra.mxu1 %v6460_v48 }
 0x1e9   : > { %5902 = vmatprep.subr.bf16.mxu1 %v6637_v2 }
 0x1ec   : > { %5903 = vmatpush3.bf16.msra.mxu1 %v6461_v28 }
 0x1ed   : > { %5904 = vmatprep.subr.bf16.mxu1 %v6637_v2 }
 0x1f0   : > { %5905 = vmatpush3.bf16.msra.mxu1 %v6462_v29 }
 0x1f1   : > { %5906 = vmatprep.subr.bf16.mxu1 %v6637_v2 }
 0x1f4   : > { %5907 = vmatpush3.bf16.msra.mxu1 %v6463_v35  ;;  %v6491_v35 = vld [vmem:[%s8289_s10 + $0x8] sm:$0xff]  }
 0x1f5   : > { %5908 = vmatprep.subr.bf16.mxu1 %v6637_v2 }
 0x1f8   : > { %5909 = vmatpush3.bf16.msra.mxu1 %v6464_v50 }
 0x1f9   : > { %5910 = vmatprep.subr.bf16.mxu1 %v6637_v2 }
 0x1fc   : > { %5911 = vmatpush3.bf16.msra.mxu1 %v6465_v51 }
 0x1fd   : > { %5916 = vmatprep.subr.bf16.mxu1 %v6637_v2 }
 0x1ff   : > { %5913 = vmatmul.mubr.bf16.vlgmr.msra.gmra.mrb[20].mxu1 %v2120_v9  ;;  %v6471_v9 = vld [vmem:[%s8287_s8 + $0x1e8] sm:$0xff]  }
 0x200   : > { %5917 = vmatpush3.bf16.msra.mxu1 %v6466_v52  ;;  %5932 = vmatprep.mubr.msk.bf16.mxu1 %vm6638_vm0, %v6637_v2 }
 0x201   : > { %5918 = vmatprep.subr.bf16.mxu1 %v6637_v2 }
 0x204   : > { %5919 = vmatpush3.bf16.msra.mxu1 %v6467_v54 }
 0x205   : > { %5920 = vmatprep.subr.bf16.mxu1 %v6637_v2 }
 0x208   : > { %5921 = vmatpush3.bf16.msra.mxu1 %v6468_v55 }
 0x209   : > { %5922 = vmatprep.subr.bf16.mxu1 %v6637_v2 }
 0x20c   : > { %5923 = vmatpush3.bf16.msra.mxu1 %v6469_v25 }
 0x20d   : > { %5924 = vmatprep.subr.bf16.mxu1 %v6637_v2 }
 0x210   : > { %5925 = vmatpush3.bf16.msra.mxu1 %v6470_v30  ;;  %v6492_v30 = vld [vmem:[%s8289_s10 + $0x10] sm:$0xff]  }
 0x211   : > { %5926 = vmatprep.subr.bf16.mxu1 %v6637_v2 }
 0x214   : > { %5927 = vmatpush3.bf16.msra.mxu1 %v6471_v9  ;;  %v6493_v9 = vld [vmem:[%s8289_s10 + $0x18] sm:$0xff]  }
 0x215   : > { %5928 = vmatprep.subr.bf16.mxu1 %v6637_v2 }
 0x218   : > { %5929 = vmatpush3.bf16.msra.mxu1 %v6472_v56  ;;  %v6494_v56 = vld [vmem:[%s8289_s10 + $0x20] sm:$0xff]  }
 0x219   : > { %5930 = vmatprep.subr.bf16.mxu1 %v6637_v2 }
 0x21c   : > { %5931 = vmatpush3.bf16.msra.mxu1 %v6473_v57  ;;  %v6495_v57 = vld [vmem:[%s8289_s10 + $0x28] sm:$0xff]  }
 0x21d   : > { %5936 = vmatprep.subr.bf16.mxu1 %v6637_v2 }
 0x21f   : > { %5933 = vmatmul.mubr.bf16.vlgmr.msra.gmra.mrb[20].mxu1 %v2231_v38  ;;  %v6479_v38 = vld [vmem:[%s8287_s8 + $0x228] sm:$0xff]  }
 0x220   : > { %5937 = vmatpush3.bf16.msra.mxu1 %v6474_v58  ;;  %5952 = vmatprep.mubr.msk.bf16.mxu1 %vm6638_vm0, %v6637_v2  ;;  %v6496_v58 = vld [vmem:[%s8289_s10 + $0x30] sm:$0xff]  }
 0x221   : > { %5938 = vmatprep.subr.bf16.mxu1 %v6637_v2 }
 0x224   : > { %5939 = vmatpush3.bf16.msra.mxu1 %v6475_v60  ;;  %v6497_v60 = vld [vmem:[%s8289_s10 + $0x38] sm:$0xff]  }
 0x225   : > { %5940 = vmatprep.subr.bf16.mxu1 %v6637_v2 }
 0x228   : > { %5941 = vmatpush3.bf16.msra.mxu1 %v6476_v61 }
 0x229   : > { %5942 = vmatprep.subr.bf16.mxu1 %v6637_v2 }
 0x22c   : > { %5943 = vmatpush3.bf16.msra.mxu1 %v6477_v62 }
 0x22d   : > { %5944 = vmatprep.subr.bf16.mxu1 %v6637_v2 }
 0x230   : > { %5945 = vmatpush3.bf16.msra.mxu1 %v6478_v34  ;;  %v6498_v34 = vld [vmem:[%s8289_s10 + $0x80] sm:$0xff]  }
 0x231   : > { %5946 = vmatprep.subr.bf16.mxu1 %v6637_v2 }
 0x234   : > { %5947 = vmatpush3.bf16.msra.mxu1 %v6479_v38 }
 0x235   : > { %5948 = vmatprep.subr.bf16.mxu1 %v6637_v2 }
 0x238   : > { %5949 = vmatpush3.bf16.msra.mxu1 %v6480_v63  ;;  %v6499_v63 = vld [vmem:[%s8289_s10 + $0x88] sm:$0xff]  }
 0x239   : > { %5950 = vmatprep.subr.bf16.mxu1 %v6637_v2 }
 0x23c   : > { %5951 = vmatpush3.bf16.msra.mxu1 %v6481_v0  ;;  %v6500_v0 = vld [vmem:[%s8289_s10 + $0x90] sm:$0xff]  }
 0x23d   : > { %6156 = vmatprep.subr.bf16.mxu1 %v6637_v2 }
 0x23f   : > { %5953 = vmatmul.mubr.bf16.vlgmr.msra.gmra.mrb[20].mxu1 %v2342_v39  ;;  %v4743_v39 = vld [vmem:[%s8286_s7] ss:$0 sm:$0xff] }
 0x240   : > { %6172 = vmatprep.mubr.msk.bf16.mxu1 %vm6638_vm0, %v6637_v2 }
 0x312   : > { %v2442_v5 = vpop.f32.mrb[20].mxu1 }
 0x313   : > { %v6316_v7 = vadd.f32 %v4743_v39, %v2442_v5  ;;  %v5954_v8 = vpop.f32.mrb[21].mxu1 }
 0x314   : > { %v2445_v11 = vpop.f32.mrb[22].mxu1 }
 0x315   : > { %v6317_v12 = vadd.f32 %v6316_v7, %v4949_v6  ;;  %v6318_v13 = vadd.f32 %v4743_v39, %v2445_v11  ;;  %v5955_v15 = vpop.f32.mrb[23].mxu1  ;;  %v6505_v39 = vld [vmem:[%s8289_s10 + $0xb8] sm:$0xff]   ;;  %v6506_v7 = vld [vmem:[%s8289_s10 + $0xc0] sm:$0xff]   ;;  %v6507_v11 = vld [vmem:[%s8289_s10 + $0xc8] sm:$0xff]  }
 0x316   : > { %v6510_v15 = vld [vmem:[%s8289_s10 + $0xe0] sm:$0xff]  }
 0x317   : > { %v7506_v16 = vmax.f32 %v6317_v12, 0.0  ;;  %v6319_v19 = vadd.f32 %v6318_v13, %v4949_v6  ;;  %v6508_v12 = vld [vmem:[%s8289_s10 + $0xd0] sm:$0xff]   ;;  %v6509_v13 = vld [vmem:[%s8289_s10 + $0xd8] sm:$0xff]  }
 0x319   : > { %v7508_v20 = vmax.f32 %v6319_v19, 0.0  ;;  %v2487_v21 = vrot.slane %v7506_v16, 4  ;;  %v2464_v47 = vrot.slane %v7506_v16, 3  ;;  %v2689_v32 = vrot.slane %v7506_v16, 5  ;;  %v6511_v19 = vld [vmem:[%s8289_s10 + $0xe8] sm:$0xff]  }
 0x31b   : > { %v2488_v22 = vrot.slane %v7508_v20, 4  ;;  %v2465_v23 = vrot.slane %v7508_v20, 3  ;;  %v2690_v17 = vrot.slane %v7508_v20, 5 }
 0x31d   : > { %v2490_v59 = vsel %vm599_vm2, %v2488_v22, %v2487_v21  ;;  %v2466_v26 = vsel %vm583_vm6, %v2464_v47, %v2465_v23  ;;  %v7523_v33 = vsel %vm599_vm2, %v2487_v21, %v2488_v22  ;;  %v2467_v42 = vsel %vm583_vm6, %v2465_v23, %v2464_v47  ;;  %v6512_v22 = vld [vmem:[%s8289_s10 + $0xf0] sm:$0xff]  }
 0x31e   : > { %v2491_v24 = vmul.f32 %v2490_v59, %v6761_v10  ;;  %v7533_v44 = vsel %vm1664_vm11, %v2689_v32, %v2690_v17  ;;  %v2692_v48 = vsel %vm1664_vm11, %v2690_v17, %v2689_v32  ;;  %v7538_v28 = vmul.f32 %v2466_v26, %v6810_v31  ;;  %v6514_v32 = vld [vmem:[%s8289_s10 + $0x100] sm:$0xff]  }
 0x31f   : > { %v7541_v29 = vmul.f32 %v2467_v42, %v7087_v27  ;;  %v7549_v50 = vmul.f32 %v2490_v59, %v7070_v46  ;;  %v7553_v51 = vmul.f32 %v7533_v44, %v7067_v45  ;;  %v7559_v54 = vmul.f32 %v2692_v48, %v7094_v53  ;;  %v6513_v59 = vld [vmem:[%s8289_s10 + $0xf8] sm:$0xff]  }
 0x320   : > { %v2493_v43 = vpack.c.bf16 %v7523_v33, %v2491_v24  ;;  %v2468_v61 = vmul.f32 %v2467_v42, %v6832_v37  ;;  %v2469_v62 = vmul.f32 %v2466_v26, %v6841_v40  ;;  %v2693_v5 = vmul.f32 %v2692_v48, %v7079_v49  ;;  %v6515_v42 = vld [vmem:[%s8289_s10 + $0x108] sm:$0xff]   ;;  %v6518_v48 = vld [vmem:[%s8289_s10 + $0x120] sm:$0xff]  }
 0x321   : > { %v3145_v52 = vpack.c.bf16 %v7541_v29, %v7538_v28  ;;  %v3256_v55 = vpack.c.bf16 %v7549_v50, %v7523_v33  ;;  %v3367_v25 = vpack.c.bf16 %v7559_v54, %v7553_v51  ;;  %v2694_v6 = vmul.f32 %v7533_v44, %v7075_v14  ;;  %v6517_v44 = vld [vmem:[%s8289_s10 + $0x118] sm:$0xff]   ;;  %v6542_v29 = vld [vmem:[%s8289_s10 + $0x1e0] sm:$0xff]  }
 0x322   : > { %5973 = vmatmul.mubr.bf16.vlgmr.msra.gmra.mrb[16].mxu0 %v2493_v43  ;;  %v2470_v38 = vpack.c.bf16 %v2469_v62, %v2468_v61  ;;  %v2805_v21 = vrot.slane %v7508_v20, 7  ;;  %v2804_v23 = vrot.slane %v7506_v16, 7  ;;  %v6516_v43 = vld [vmem:[%s8289_s10 + $0x110] sm:$0xff]   ;;  %v6525_v61 = vld [vmem:[%s8289_s10 + $0x158] sm:$0xff]   ;;  %v6526_v62 = vld [vmem:[%s8289_s10 + $0x160] sm:$0xff]  }
 0x323   : > { %5977 = vmatpush3.bf16.msra.mxu0 %v6490_v41  ;;  %5992 = vmatprep.mubr.msk.bf16.mxu0 %vm6638_vm0, %v6637_v2  ;;  %v2695_v8 = vpack.c.bf16 %v2694_v6, %v2693_v5  ;;  %v6530_v5 = vld [vmem:[%s8289_s10 + $0x180] sm:$0xff]   ;;  %v6541_v28 = vld [vmem:[%s8289_s10 + $0x1d8] sm:$0xff]  }
 0x324   : > { %5978 = vmatprep.subr.bf16.mxu0 %v6637_v2  ;;  %v2806_v47 = vsel %vm839_vm7, %v2804_v23, %v2805_v21  ;;  %v2807_v17 = vsel %vm839_vm7, %v2805_v21, %v2804_v23  ;;  %v6538_v21 = vld [vmem:[%s8289_s10 + $0x1c0] sm:$0xff]   ;;  %v6540_v23 = vld [vmem:[%s8289_s10 + $0x1d0] sm:$0xff]   ;;  %v6549_v33 = vld [vmem:[%s8289_s10 + $0x218] sm:$0xff]  }
 0x325   : > { %v2808_v24 = vmul.f32 %v2807_v17, %v6810_v31  ;;  %v2809_v26 = vmul.f32 %v2806_v47, %v6841_v40  ;;  %v6550_v50 = vld [vmem:[%s8289_s10 + $0x220] sm:$0xff]  }
 0x326   : > { %v6554_v51 = vld [vmem:[%s8291_s12 + $0x40] sm:$0xff]  }
 0x327   : > { %5979 = vmatpush3.bf16.msra.mxu0 %v6491_v35  ;;  %v2810_v41 = vpack.c.bf16 %v2809_v26, %v2808_v24  ;;  %v6519_v35 = vld [vmem:[%s8289_s10 + $0x128] sm:$0xff]   ;;  %v6544_v24 = vld [vmem:[%s8289_s10 + $0x1f0] sm:$0xff]   ;;  %v6555_v54 = vld [vmem:[%s8291_s12] sm:$0xff]  }
 0x328   : > { %5980 = vmatprep.subr.bf16.mxu0 %v6637_v2  ;;  %6157 = vmatpush3.bf16.msra.mxu1 %v6555_v54 }
 0x329   : > { %6158 = vmatprep.subr.bf16.mxu1 %v6637_v2 }
 0x32b   : > { %5981 = vmatpush3.bf16.msra.mxu0 %v6492_v30  ;;  %v6520_v30 = vld [vmem:[%s8289_s10 + $0x130] sm:$0xff]  }
 0x32c   : > { %5982 = vmatprep.subr.bf16.mxu0 %v6637_v2 }
 0x32f   : > { %5983 = vmatpush3.bf16.msra.mxu0 %v6493_v9  ;;  %v6521_v9 = vld [vmem:[%s8289_s10 + $0x138] sm:$0xff]  }
 0x330   : > { %5984 = vmatprep.subr.bf16.mxu0 %v6637_v2 }
 0x333   : > { %5985 = vmatpush3.bf16.msra.mxu0 %v6494_v56  ;;  %v6522_v56 = vld [vmem:[%s8289_s10 + $0x140] sm:$0xff]  }
 0x334   : > { %5986 = vmatprep.subr.bf16.mxu0 %v6637_v2 }
 0x337   : > { %5987 = vmatpush3.bf16.msra.mxu0 %v6495_v57  ;;  %v2919_v57 = vpack.c.bf16 %v7508_v20, %v7506_v16 }
 0x338   : > { %5988 = vmatprep.subr.bf16.mxu0 %v6637_v2 }
 0x33b   : > { %5989 = vmatpush3.bf16.msra.mxu0 %v6496_v58  ;;  %v6523_v58 = vld [vmem:[%s8289_s10 + $0x148] sm:$0xff]  }
 0x33c   : > { %5990 = vmatprep.subr.bf16.mxu0 %v6637_v2 }
 0x33f   : > { %5991 = vmatpush3.bf16.msra.mxu0 %v6497_v60  ;;  %v6524_v60 = vld [vmem:[%s8289_s10 + $0x150] sm:$0xff]  }
 0x340   : > { %5996 = vmatprep.subr.bf16.mxu0 %v6637_v2 }
 0x342   : > { %5993 = vmatmul.mubr.bf16.vlgmr.msra.gmra.mrb[20].mxu0 %v2470_v38  ;;  %v3029_v38 = vrot.slane %v7508_v20, 1 }
 0x343   : > { %5997 = vmatpush3.bf16.msra.mxu0 %v6498_v34  ;;  %6012 = vmatprep.mubr.msk.bf16.mxu0 %vm6638_vm0, %v6637_v2  ;;  %v6527_v34 = vld [vmem:[%s8289_s10 + $0x168] sm:$0xff]  }
 0x344   : > { %5998 = vmatprep.subr.bf16.mxu0 %v6637_v2 }
 0x347   : > { %5999 = vmatpush3.bf16.msra.mxu0 %v6499_v63  ;;  %v6528_v63 = vld [vmem:[%s8289_s10 + $0x170] sm:$0xff]  }
 0x348   : > { %6000 = vmatprep.subr.bf16.mxu0 %v6637_v2 }
 0x34b   : > { %6001 = vmatpush3.bf16.msra.mxu0 %v6500_v0  ;;  %v3028_v0 = vrot.slane %v7506_v16, 1 }
 0x34c   : > { %6002 = vmatprep.subr.bf16.mxu0 %v6637_v2 }
 0x34f   : > { %6003 = vmatpush3.bf16.msra.mxu0 %v6501_v1  ;;  %v3030_v1 = vsel %vm2004_vm12, %v3028_v0, %v3029_v38 }
 0x350   : > { %6004 = vmatprep.subr.bf16.mxu0 %v6637_v2 }
 0x353   : > { %6005 = vmatpush3.bf16.msra.mxu0 %v6502_v3  ;;  %v3031_v3 = vsel %vm2004_vm12, %v3029_v38, %v3028_v0 }
 0x354   : > { %6006 = vmatprep.subr.bf16.mxu0 %v6637_v2 }
 0x357   : > { %6007 = vmatpush3.bf16.msra.mxu0 %v6503_v18  ;;  %v6529_v18 = vld [vmem:[%s8289_s10 + $0x178] sm:$0xff]  }
 0x358   : > { %6008 = vmatprep.subr.bf16.mxu0 %v6637_v2 }
 0x35b   : > { %6009 = vmatpush3.bf16.msra.mxu0 %v6504_v36  ;;  %v3032_v36 = vmul.f32 %v3030_v1, %v7067_v45 }
 0x35c   : > { %6010 = vmatprep.subr.bf16.mxu0 %v6637_v2 }
 0x35f   : > { %6011 = vmatpush3.bf16.msra.mxu0 %v6505_v39  ;;  %v3033_v39 = vmul.f32 %v3031_v3, %v7075_v14 }
 0x360   : > { %6016 = vmatprep.subr.bf16.mxu0 %v6637_v2 }
 0x361   : > { %v3034_v6 = vpack.c.bf16 %v3033_v39, %v3032_v36 }
 0x362   : > { %6013 = vmatmul.mubr.bf16.vlgmr.msra.gmra.mrb[24].mxu0 %v2695_v8  ;;  %v6532_v8 = vld [vmem:[%s8289_s10 + $0x190] sm:$0xff]  }
 0x363   : > { %6017 = vmatpush3.bf16.msra.mxu0 %v6506_v7  ;;  %6032 = vmatprep.mubr.msk.bf16.mxu0 %vm6638_vm0, %v6637_v2  ;;  %v6531_v7 = vld [vmem:[%s8289_s10 + $0x188] sm:$0xff]  }
 0x364   : > { %6018 = vmatprep.subr.bf16.mxu0 %v6637_v2 }
 0x367   : > { %6019 = vmatpush3.bf16.msra.mxu0 %v6507_v11  ;;  %v6533_v11 = vld [vmem:[%s8289_s10 + $0x198] sm:$0xff]  }
 0x368   : > { %6020 = vmatprep.subr.bf16.mxu0 %v6637_v2 }
 0x36b   : > { %6021 = vmatpush3.bf16.msra.mxu0 %v6508_v12  ;;  %v6534_v12 = vld [vmem:[%s8289_s10 + $0x1a0] sm:$0xff]  }
 0x36c   : > { %6022 = vmatprep.subr.bf16.mxu0 %v6637_v2 }
 0x36f   : > { %6023 = vmatpush3.bf16.msra.mxu0 %v6509_v13  ;;  %v6535_v13 = vld [vmem:[%s8289_s10 + $0x1a8] sm:$0xff]  }
 0x370   : > { %6024 = vmatprep.subr.bf16.mxu0 %v6637_v2 }
 0x373   : > { %6025 = vmatpush3.bf16.msra.mxu0 %v6510_v15  ;;  %v6536_v15 = vld [vmem:[%s8289_s10 + $0x1b0] sm:$0xff]  }
 0x374   : > { %6026 = vmatprep.subr.bf16.mxu0 %v6637_v2 }
 0x377   : > { %6027 = vmatpush3.bf16.msra.mxu0 %v6511_v19  ;;  %v6537_v19 = vld [vmem:[%s8289_s10 + $0x1b8] sm:$0xff]  }
 0x378   : > { %6028 = vmatprep.subr.bf16.mxu0 %v6637_v2 }
 0x37b   : > { %6029 = vmatpush3.bf16.msra.mxu0 %v6512_v22  ;;  %v6539_v22 = vld [vmem:[%s8289_s10 + $0x1c8] sm:$0xff]  }
 0x37c   : > { %6030 = vmatprep.subr.bf16.mxu0 %v6637_v2 }
 0x37f   : > { %6031 = vmatpush3.bf16.msra.mxu0 %v6513_v59 }
 0x380   : > { %6036 = vmatprep.subr.bf16.mxu0 %v6637_v2 }
 0x382   : > { %6033 = vmatmul.mubr.bf16.vlgmr.msra.gmra.mrb[28].mxu0 %v2810_v41  ;;  %v6546_v41 = vld [vmem:[%s8289_s10 + $0x200] sm:$0xff]  }
 0x383   : > { %6037 = vmatpush3.bf16.msra.mxu0 %v6514_v32  ;;  %6052 = vmatprep.mubr.msk.bf16.mxu0 %vm6638_vm0, %v6637_v2  ;;  %v6545_v32 = vld [vmem:[%s8289_s10 + $0x1f8] sm:$0xff]  }
 0x384   : > { %6038 = vmatprep.subr.bf16.mxu0 %v6637_v2 }
 0x387   : > { %6039 = vmatpush3.bf16.msra.mxu0 %v6515_v42  ;;  %v6547_v42 = vld [vmem:[%s8289_s10 + $0x208] sm:$0xff]  }
 0x388   : > { %6040 = vmatprep.subr.bf16.mxu0 %v6637_v2 }
 0x38b   : > { %6041 = vmatpush3.bf16.msra.mxu0 %v6516_v43  ;;  %v6548_v43 = vld [vmem:[%s8289_s10 + $0x210] sm:$0xff]  }
 0x38c   : > { %6042 = vmatprep.subr.bf16.mxu0 %v6637_v2 }
 0x38f   : > { %6043 = vmatpush3.bf16.msra.mxu0 %v6517_v44 }
 0x390   : > { %6044 = vmatprep.subr.bf16.mxu0 %v6637_v2 }
 0x393   : > { %6045 = vmatpush3.bf16.msra.mxu0 %v6518_v48 }
 0x394   : > { %6046 = vmatprep.subr.bf16.mxu0 %v6637_v2 }
 0x397   : > { %6047 = vmatpush3.bf16.msra.mxu0 %v6519_v35 }
 0x398   : > { %6048 = vmatprep.subr.bf16.mxu0 %v6637_v2 }
 0x39b   : > { %6049 = vmatpush3.bf16.msra.mxu0 %v6520_v30 }
 0x39c   : > { %6050 = vmatprep.subr.bf16.mxu0 %v6637_v2 }
 0x39f   : > { %6051 = vmatpush3.bf16.msra.mxu0 %v6521_v9  ;;  %v6552_v9 = vld [vmem:[%s8289_s10 + $0x230] sm:$0xff]  }
 0x3a0   : > { %6056 = vmatprep.subr.bf16.mxu0 %v6637_v2 }
 0x3a2   : > { %6053 = vmatmul.mubr.bf16.vlgmr.msra.gmra.mrb[32].mxu0 %v2919_v57 }
 0x3a3   : > { %6057 = vmatpush3.bf16.msra.mxu0 %v6522_v56  ;;  %6072 = vmatprep.mubr.msk.bf16.mxu0 %vm6638_vm0, %v6637_v2 }
 0x3a4   : > { %6058 = vmatprep.subr.bf16.mxu0 %v6637_v2 }
 0x3a7   : > { %6059 = vmatpush3.bf16.msra.mxu0 %v6523_v58  ;;  %v6553_v58 = vld [vmem:[%s8289_s10 + $0x238] sm:$0xff]  }
 0x3a8   : > { %6060 = vmatprep.subr.bf16.mxu0 %v6637_v2 }
 0x3ab   : > { %6061 = vmatpush3.bf16.msra.mxu0 %v6524_v60 }
 0x3ac   : > { %6062 = vmatprep.subr.bf16.mxu0 %v6637_v2 }
 0x3af   : > { %6063 = vmatpush3.bf16.msra.mxu0 %v6525_v61 }
 0x3b0   : > { %6064 = vmatprep.subr.bf16.mxu0 %v6637_v2 }
 0x3b3   : > { %6065 = vmatpush3.bf16.msra.mxu0 %v6526_v62 }
 0x3b4   : > { %6066 = vmatprep.subr.bf16.mxu0 %v6637_v2 }
 0x3b7   : > { %6067 = vmatpush3.bf16.msra.mxu0 %v6527_v34 }
 0x3b8   : > { %6068 = vmatprep.subr.bf16.mxu0 %v6637_v2 }
 0x3bb   : > { %6069 = vmatpush3.bf16.msra.mxu0 %v6528_v63 }
 0x3bc   : > { %6070 = vmatprep.subr.bf16.mxu0 %v6637_v2 }
 0x3bf   : > { %6071 = vmatpush3.bf16.msra.mxu0 %v6529_v18 }
 0x3c0   : > { %6076 = vmatprep.subr.bf16.mxu0 %v6637_v2 }
 0x3c2   : > { %6073 = vmatmul.mubr.bf16.vlgmr.msra.gmra.mrb[36].mxu0 %v3034_v6  ;;  %v6558_v6 = vld [vmem:[%s8291_s12 + $0x50] sm:$0xff]  }
 0x3c3   : > { %6077 = vmatpush3.bf16.msra.mxu0 %v6530_v5  ;;  %6092 = vmatprep.mubr.msk.bf16.mxu0 %vm6638_vm0, %v6637_v2  ;;  %v6557_v5 = vld [vmem:[%s8291_s12 + $0x8] sm:$0xff]  }
 0x3c4   : > { %6078 = vmatprep.subr.bf16.mxu0 %v6637_v2  ;;  %6159 = vmatpush3.bf16.msra.mxu1 %v6557_v5 }
 0x3c5   : > { %6160 = vmatprep.subr.bf16.mxu1 %v6637_v2 }
 0x3c7   : > { %6079 = vmatpush3.bf16.msra.mxu0 %v6531_v7  ;;  %v6559_v7 = vld [vmem:[%s8291_s12 + $0x10] sm:$0xff]  }
 0x3c8   : > { %6080 = vmatprep.subr.bf16.mxu0 %v6637_v2  ;;  %6161 = vmatpush3.bf16.msra.mxu1 %v6559_v7 }
 0x3c9   : > { %6162 = vmatprep.subr.bf16.mxu1 %v6637_v2 }
 0x3cb   : > { %6081 = vmatpush3.bf16.msra.mxu0 %v6532_v8  ;;  %v6560_v8 = vld [vmem:[%s8291_s12 + $0x58] sm:$0xff]  }
 0x3cc   : > { %6082 = vmatprep.subr.bf16.mxu0 %v6637_v2 }
 0x3cf   : > { %6083 = vmatpush3.bf16.msra.mxu0 %v6533_v11  ;;  %v6561_v11 = vld [vmem:[%s8291_s12 + $0x18] sm:$0xff]  }
 0x3d0   : > { %6084 = vmatprep.subr.bf16.mxu0 %v6637_v2  ;;  %6163 = vmatpush3.bf16.msra.mxu1 %v6561_v11 }
 0x3d1   : > { %6164 = vmatprep.subr.bf16.mxu1 %v6637_v2 }
 0x3d3   : > { %6085 = vmatpush3.bf16.msra.mxu0 %v6534_v12 }
 0x3d4   : > { %6086 = vmatprep.subr.bf16.mxu0 %v6637_v2 }
 0x3d7   : > { %6087 = vmatpush3.bf16.msra.mxu0 %v6535_v13 }
 0x3d8   : > { %6088 = vmatprep.subr.bf16.mxu0 %v6637_v2 }
 0x3db   : > { %6089 = vmatpush3.bf16.msra.mxu0 %v6536_v15 }
 0x3dc   : > { %6090 = vmatprep.subr.bf16.mxu0 %v6637_v2 }
 0x3df   : > { %6091 = vmatpush3.bf16.msra.mxu0 %v6537_v19 }
 0x3e0   : > { %6096 = vmatprep.subr.bf16.mxu0 %v6637_v2 }
 0x3e2   : > { %6093 = vmatmul.mubr.bf16.vlgmr.msra.gmra.mrb[40].mxu0 %v3145_v52  ;;  %v6543_v52 = vld [vmem:[%s8289_s10 + $0x1e8] sm:$0xff]  }
 0x3e3   : > { %6097 = vmatpush3.bf16.msra.mxu0 %v6538_v21  ;;  %6112 = vmatprep.mubr.msk.bf16.mxu0 %vm6638_vm0, %v6637_v2 }
 0x3e4   : > { %6098 = vmatprep.subr.bf16.mxu0 %v6637_v2 }
 0x3e7   : > { %6099 = vmatpush3.bf16.msra.mxu0 %v6539_v22 }
 0x3e8   : > { %6100 = vmatprep.subr.bf16.mxu0 %v6637_v2 }
 0x3eb   : > { %6101 = vmatpush3.bf16.msra.mxu0 %v6540_v23  ;;  %v6562_v23 = vld [vmem:[%s8291_s12 + $0x60] sm:$0xff]  }
 0x3ec   : > { %6102 = vmatprep.subr.bf16.mxu0 %v6637_v2 }
 0x3ef   : > { %6103 = vmatpush3.bf16.msra.mxu0 %v6541_v28  ;;  %v6563_v28 = vld [vmem:[%s8291_s12 + $0x20] sm:$0xff]  }
 0x3f0   : > { %6104 = vmatprep.subr.bf16.mxu0 %v6637_v2  ;;  %6165 = vmatpush3.bf16.msra.mxu1 %v6563_v28 }
 0x3f1   : > { %6166 = vmatprep.subr.bf16.mxu1 %v6637_v2 }
 0x3f3   : > { %6105 = vmatpush3.bf16.msra.mxu0 %v6542_v29  ;;  %v6564_v29 = vld [vmem:[%s8291_s12 + $0x68] sm:$0xff]  }
 0x3f4   : > { %6106 = vmatprep.subr.bf16.mxu0 %v6637_v2 }
 0x3f5   : > { %v2593_v47 = vpop.f32.mrb[16].mxu0 }
 0x3f6   : > { %v5974_v17 = vpop.f32.mrb[17].mxu0 }
 0x3f7   : > { %6107 = vmatpush3.bf16.msra.mxu0 %v6543_v52  ;;  %v2596_v59 = vpop.f32.mrb[18].mxu0  ;;  %v6565_v52 = vld [vmem:[%s8291_s12 + $0x28] sm:$0xff]   ;;  %v6567_v17 = vld [vmem:[%s8291_s12 + $0x30] sm:$0xff]  }
 0x3f8   : > { %v5975_v26 = vpop.f32.mrb[19].mxu0  ;;  %6108 = vmatprep.subr.bf16.mxu0 %v6637_v2  ;;  %6167 = vmatpush3.bf16.msra.mxu1 %v6565_v52 }
 0x3f9   : > { %6168 = vmatprep.subr.bf16.mxu1 %v6637_v2 }
 0x3fb   : > { %6109 = vmatpush3.bf16.msra.mxu0 %v6544_v24  ;;  %v6569_v24 = vld [vmem:[%s8291_s12 + $0x38] sm:$0xff]  }
 0x3fc   : > { %6110 = vmatprep.subr.bf16.mxu0 %v6637_v2  ;;  %6169 = vmatpush3.bf16.msra.mxu1 %v6567_v17 }
 0x3fd   : > { %6170 = vmatprep.subr.bf16.mxu1 %v6637_v2 }
 0x3ff   : > { %6111 = vmatpush3.bf16.msra.mxu0 %v6545_v32 }
 0x400   : > { %6116 = vmatprep.subr.bf16.mxu0 %v6637_v2  ;;  %6171 = vmatpush3.bf16.msra.mxu1 %v6569_v24  ;;  %v6571_v24 = vld [vmem:[%s8291_s12 + $0xc0] sm:$0xff]  }
 0x401   : > { %6196 = vmatprep.subr.bf16.mxu1 %v6637_v2 }
 0x402   : > { %6113 = vmatmul.mubr.bf16.vlgmr.msra.gmra.mrb[44].mxu0 %v3256_v55  ;;  %v6551_v55 = vld [vmem:[%s8289_s10 + $0x228] sm:$0xff]  }
 0x403   : > { %6117 = vmatpush3.bf16.msra.mxu0 %v6546_v41  ;;  %6132 = vmatprep.mubr.msk.bf16.mxu0 %vm6638_vm0, %v6637_v2 }
 0x404   : > { %6118 = vmatprep.subr.bf16.mxu0 %v6637_v2 }
 0x407   : > { %6119 = vmatpush3.bf16.msra.mxu0 %v6547_v42 }
 0x408   : > { %6120 = vmatprep.subr.bf16.mxu0 %v6637_v2 }
 0x40b   : > { %6121 = vmatpush3.bf16.msra.mxu0 %v6548_v43 }
 0x40c   : > { %6122 = vmatprep.subr.bf16.mxu0 %v6637_v2 }
 0x40f   : > { %6123 = vmatpush3.bf16.msra.mxu0 %v6549_v33 }
 0x410   : > { %6124 = vmatprep.subr.bf16.mxu0 %v6637_v2 }
 0x413   : > { %6125 = vmatpush3.bf16.msra.mxu0 %v6550_v50 }
 0x414   : > { %6126 = vmatprep.subr.bf16.mxu0 %v6637_v2 }
 0x415   : > { %v2682_v44 = vpop.f32.mrb[20].mxu0 }
 0x416   : > { %v2683_v48 = vadd.f32 %v2682_v44, %v2593_v47  ;;  %v5994_v35 = vpop.f32.mrb[21].mxu0  ;;  %v6566_v47 = vld [vmem:[%s8291_s12 + $0x70] sm:$0xff]  }
 0x417   : > { %v2685_v30 = vpop.f32.mrb[22].mxu0  ;;  %6127 = vmatpush3.bf16.msra.mxu0 %v6551_v55 }
 0x418   : > { %v2686_v56 = vadd.f32 %v2685_v30, %v2596_v59  ;;  %v5995_v57 = vpop.f32.mrb[23].mxu0  ;;  %6128 = vmatprep.subr.bf16.mxu0 %v6637_v2  ;;  %v6568_v59 = vld [vmem:[%s8291_s12 + $0x78] sm:$0xff]  }
 0x41b   : > { %6129 = vmatpush3.bf16.msra.mxu0 %v6552_v9 }
 0x41c   : > { %6130 = vmatprep.subr.bf16.mxu0 %v6637_v2 }
 0x41f   : > { %6131 = vmatpush3.bf16.msra.mxu0 %v6553_v58 }
 0x420   : > { %6136 = vmatprep.subr.bf16.mxu0 %v6637_v2 }
 0x422   : > { %6133 = vmatmul.mubr.bf16.vlgmr.msra.gmra.mrb[48].mxu0 %v3367_v25  ;;  %v6556_v25 = vld [vmem:[%s8291_s12 + $0x48] sm:$0xff]  }
 0x423   : > { %6152 = vmatprep.mubr.msk.bf16.mxu0 %vm6638_vm0, %v6637_v2  ;;  %6137 = vmatpush3.bf16.msra.mxu0 %v6554_v51 }
 0x424   : > { %6138 = vmatprep.subr.bf16.mxu0 %v6637_v2 }
 0x427   : > { %6139 = vmatpush3.bf16.msra.mxu0 %v6556_v25 }
 0x428   : > { %6140 = vmatprep.subr.bf16.mxu0 %v6637_v2 }
 0x42b   : > { %6141 = vmatpush3.bf16.msra.mxu0 %v6558_v6 }
 0x42c   : > { %6142 = vmatprep.subr.bf16.mxu0 %v6637_v2 }
 0x42f   : > { %6143 = vmatpush3.bf16.msra.mxu0 %v6560_v8 }
 0x430   : > { %6144 = vmatprep.subr.bf16.mxu0 %v6637_v2 }
 0x433   : > { %6145 = vmatpush3.bf16.msra.mxu0 %v6562_v23 }
 0x434   : > { %6146 = vmatprep.subr.bf16.mxu0 %v6637_v2 }
 0x435   : > { %v2795_v60 = vpop.f32.mrb[24].mxu0 }
 0x436   : > { %v2802_v61 = vadd.f32 %v2795_v60, %v2683_v48  ;;  %v6014_v62 = vpop.f32.mrb[25].mxu0 }
 0x437   : > { %v2798_v34 = vpop.f32.mrb[26].mxu0  ;;  %6147 = vmatpush3.bf16.msra.mxu0 %v6564_v29 }
 0x438   : > { %v2803_v38 = vadd.f32 %v2798_v34, %v2686_v56  ;;  %v6015_v63 = vpop.f32.mrb[27].mxu0  ;;  %6148 = vmatprep.subr.bf16.mxu0 %v6637_v2  ;;  %v5150_v34 = vld [vmem:[%s8290_s11] ss:$0 sm:$0xff] }
 0x43b   : > { %6149 = vmatpush3.bf16.msra.mxu0 %v6566_v47 }
 0x43c   : > { %6150 = vmatprep.subr.bf16.mxu0 %v6637_v2 }
 0x43f   : > { %6151 = vmatpush3.bf16.msra.mxu0 %v6568_v59  ;;  %v6570_v59 = vld [vmem:[%s8291_s12 + $0x80] sm:$0xff]  }
 0x440   : > { %6176 = vmatprep.subr.bf16.mxu0 %v6637_v2 }
 0x455   : > { %v2910_v0 = vpop.f32.mrb[28].mxu0 }
 0x456   : > { %v2917_v1 = vadd.f32 %v2910_v0, %v2802_v61  ;;  %v6034_v3 = vpop.f32.mrb[29].mxu0 }
 0x457   : > { %v2913_v18 = vpop.f32.mrb[30].mxu0 }
 0x458   : > { %v2918_v36 = vadd.f32 %v2913_v18, %v2803_v38  ;;  %v6035_v39 = vpop.f32.mrb[31].mxu0 }
 0x475   : > { %v3019_v12 = vpop.f32.mrb[32].mxu0 }
 0x476   : > { %v3026_v13 = vadd.f32 %v3019_v12, %v2917_v1  ;;  %v6054_v15 = vpop.f32.mrb[33].mxu0 }
 0x477   : > { %v3022_v19 = vpop.f32.mrb[34].mxu0 }
 0x478   : > { %v3027_v21 = vadd.f32 %v3022_v19, %v2918_v36  ;;  %v6055_v22 = vpop.f32.mrb[35].mxu0 }
 0x495   : > { %v3134_v26 = vpop.f32.mrb[36].mxu0 }
 0x496   : > { %v3141_v32 = vadd.f32 %v3134_v26, %v3026_v13  ;;  %v6074_v41 = vpop.f32.mrb[37].mxu0 }
 0x497   : > { %v3137_v42 = vpop.f32.mrb[38].mxu0 }
 0x498   : > { %v3142_v43 = vadd.f32 %v3137_v42, %v3027_v21  ;;  %v6075_v33 = vpop.f32.mrb[39].mxu0 }
 0x4b5   : > { %v3245_v50 = vpop.f32.mrb[40].mxu0 }
 0x4b6   : > { %v3252_v55 = vadd.f32 %v3245_v50, %v3141_v32  ;;  %v6094_v44 = vpop.f32.mrb[41].mxu0 }
 0x4b7   : > { %v3248_v48 = vpop.f32.mrb[42].mxu0 }
 0x4b8   : > { %v3253_v35 = vadd.f32 %v3248_v48, %v3142_v43  ;;  %v6095_v30 = vpop.f32.mrb[43].mxu0 }
 0x4d5   : > { %v3356_v9 = vpop.f32.mrb[44].mxu0 }
 0x4d6   : > { %v3363_v56 = vadd.f32 %v3356_v9, %v3252_v55  ;;  %v6114_v57 = vpop.f32.mrb[45].mxu0 }
 0x4d7   : > { %v3359_v58 = vpop.f32.mrb[46].mxu0 }
 0x4d8   : > { %v3364_v60 = vadd.f32 %v3359_v58, %v3253_v35  ;;  %v6115_v61 = vpop.f32.mrb[47].mxu0 }
 0x4d9   : > { %v6576_v61 = vld [vmem:[%s8291_s12 + $0x98] sm:$0xff]  }
 0x4f5   : > { %v3467_v62 = vpop.f32.mrb[48].mxu0 }
 0x4f6   : > { %v3474_v38 = vadd.f32 %v3467_v62, %v3363_v56  ;;  %v6134_v63 = vpop.f32.mrb[49].mxu0  ;;  %v6577_v62 = vld [vmem:[%s8291_s12 + $0xd8] sm:$0xff]  }
 0x4f7   : > { %v3470_v0 = vpop.f32.mrb[50].mxu0  ;;  %v6580_v63 = vld [vmem:[%s8291_s12 + $0xa8] sm:$0xff]  }
 0x4f8   : > { %v3483_v1 = vadd.f32 %v5150_v34, %v3474_v38  ;;  %v3475_v3 = vadd.f32 %v3470_v0, %v3364_v60  ;;  %v6135_v18 = vpop.f32.mrb[51].mxu0  ;;  %v6579_v38 = vld [vmem:[%s8291_s12 + $0xe0] sm:$0xff]   ;;  %v6581_v0 = vld [vmem:[%s8291_s12 + $0xe8] sm:$0xff]  }
 0x4f9   : > { %v6584_v18 = vld [vmem:[%s8291_s12 + $0xb8] sm:$0xff]  }
 0x4fa   : > { %v7929_v36 = vmax.f32 %v3483_v1, 0.0  ;;  %v3484_v39 = vadd.f32 %v5150_v34, %v3475_v3  ;;  %v6578_v34 = vld [vmem:[%s8291_s12 + $0xa0] sm:$0xff]   ;;  %v6582_v1 = vld [vmem:[%s8291_s12 + $0xb0] sm:$0xff]  }
 0x4fb   : > { %v6583_v3 = vld [vmem:[%s8291_s12 + $0xf0] sm:$0xff]  }
 0x4fc   : > { %v7931_v51 = vmax.f32 %v3484_v39, 0.0  ;;  %v3510_v54 = vrot.slane %v7929_v36, 4  ;;  %v3487_v25 = vrot.slane %v7929_v36, 3  ;;  %v3712_v5 = vrot.slane %v7929_v36, 5  ;;  %v6585_v39 = vld [vmem:[%s8291_s12 + $0xf8] sm:$0xff]  }
 0x4fd   : > { %v3827_v12 = vrot.slane %v7929_v36, 7  ;;  %v4051_v15 = vrot.slane %v7929_v36, 1 }
 0x4fe   : > { %v3511_v6 = vrot.slane %v7931_v51, 4  ;;  %v3488_v7 = vrot.slane %v7931_v51, 3  ;;  %v3713_v8 = vrot.slane %v7931_v51, 5  ;;  %v3828_v11 = vrot.slane %v7931_v51, 7 }
 0x4ff   : > { %v3942_v13 = vpack.c.bf16 %v7931_v51, %v7929_v36  ;;  %v4052_v19 = vrot.slane %v7931_v51, 1  ;;  %v6606_v36 = vld [vmem:[%s8291_s12 + $0x190] sm:$0xff]  }
 0x500   : > { %v7947_v21 = vsel %vm599_vm2, %v3510_v54, %v3511_v6  ;;  %v3513_v22 = vsel %vm599_vm2, %v3511_v6, %v3510_v54  ;;  %v3489_v23 = vsel %vm583_vm6, %v3487_v25, %v3488_v7  ;;  %v3490_v28 = vsel %vm583_vm6, %v3488_v7, %v3487_v25  ;;  %v6586_v54 = vld [vmem:[%s8291_s12 + $0x100] sm:$0xff]   ;;  %v6589_v6 = vld [vmem:[%s8291_s12 + $0x148] sm:$0xff]   ;;  %v6590_v7 = vld [vmem:[%s8291_s12 + $0x110] sm:$0xff]  }
 0x501   : > { %v3514_v29 = vmul.f32 %v3513_v22, %v6761_v10  ;;  %v3491_v52 = vmul.f32 %v3490_v28, %v6832_v37  ;;  %v3492_v47 = vmul.f32 %v3489_v23, %v6841_v40  ;;  %v3714_v17 = vsel %vm1664_vm11, %v3712_v5, %v3713_v8  ;;  %v6587_v25 = vld [vmem:[%s8291_s12 + $0x140] sm:$0xff]   ;;  %v6607_v51 = vld [vmem:[%s8291_s12 + $0x1d0] sm:$0xff]  }
 0x502   : > { %v3715_v26 = vsel %vm1664_vm11, %v3713_v8, %v3712_v5  ;;  %v7969_v10 = vmul.f32 %v3714_v17, %v7075_v14  ;;  %v3829_v37 = vsel %vm839_vm7, %v3827_v12, %v3828_v11  ;;  %v3830_v32 = vsel %vm839_vm7, %v3828_v11, %v3827_v12  ;;  %v6588_v5 = vld [vmem:[%s8291_s12 + $0x108] sm:$0xff]   ;;  %v6591_v8 = vld [vmem:[%s8291_s12 + $0x150] sm:$0xff]   ;;  %v6592_v11 = vld [vmem:[%s8291_s12 + $0x118] sm:$0xff]  }
 0x503   : > { %v3516_v41 = vpack.c.bf16 %v7947_v21, %v3514_v29  ;;  %v3493_v42 = vpack.c.bf16 %v3492_v47, %v3491_v52  ;;  %v7977_v43 = vmul.f32 %v3715_v26, %v7079_v49  ;;  %v7980_v33 = vmul.f32 %v3830_v32, %v6810_v31  ;;  %v6593_v12 = vld [vmem:[%s8291_s12 + $0x158] sm:$0xff]   ;;  %v6599_v29 = vld [vmem:[%s8291_s12 + $0x170] sm:$0xff]   ;;  %v6611_v32 = vld [vmem:[%s8291_s12 + $0x1e0] sm:$0xff]  }
 0x504   : > { %v7983_v50 = vmul.f32 %v3829_v37, %v6841_v40  ;;  %v4053_v55 = vsel %vm2004_vm12, %v4051_v15, %v4052_v19  ;;  %v4054_v44 = vsel %vm2004_vm12, %v4052_v19, %v4051_v15  ;;  %v7990_v48 = vmul.f32 %v3489_v23, %v6810_v31  ;;  %v6573_v31 = vld [vmem:[%s8291_s12 + $0xc8] sm:$0xff]   ;;  %v6594_v15 = vld [vmem:[%s8291_s12 + $0x120] sm:$0xff]   ;;  %v6600_v52 = vld [vmem:[%s8291_s12 + $0x138] sm:$0xff]  }
 0x505   : > { %6153 = vmatmul.mubr.bf16.vlgmr.msra.gmra.mrb[52].mxu0 %v3516_v41  ;;  %6173 = vmatmul.mubr.bf16.vlgmr.msra.gmra.mrb[24].mxu1 %v3493_v42  ;;  %v3718_v49 = vpack.c.bf16 %v7969_v10, %v7977_v43  ;;  %v7995_v35 = vmul.f32 %v4053_v55, %v7067_v45  ;;  %v7998_v40 = vmul.f32 %v4054_v44, %v7075_v14  ;;  %v6595_v19 = vld [vmem:[%s8291_s12 + $0x160] sm:$0xff]   ;;  %v6597_v23 = vld [vmem:[%s8291_s12 + $0x168] sm:$0xff]   ;;  %v6601_v47 = vld [vmem:[%s8291_s12 + $0x178] sm:$0xff]  }
 0x506   : > { %6177 = vmatpush3.bf16.msra.mxu0 %v6570_v59  ;;  %6197 = vmatpush3.bf16.msra.mxu1 %v6571_v24  ;;  %v3833_v30 = vpack.c.bf16 %v7983_v50, %v7980_v33  ;;  %v8009_v9 = vmul.f32 %v3490_v28, %v7087_v27  ;;  %v8012_v56 = vmul.f32 %v3513_v22, %v7070_v46  ;;  %v6596_v22 = vld [vmem:[%s8291_s12 + $0x128] sm:$0xff]   ;;  %v6598_v28 = vld [vmem:[%s8291_s12 + $0x130] sm:$0xff]   ;;  %v6603_v59 = vld [vmem:[%s8291_s12 + $0x1c0] sm:$0xff]  }
 0x507   : > { %6178 = vmatprep.subr.bf16.mxu0 %v6637_v2  ;;  %6198 = vmatprep.subr.bf16.mxu1 %v6637_v2  ;;  %v4057_v14 = vpack.c.bf16 %v7998_v40, %v7995_v35  ;;  %v8019_v57 = vmul.f32 %v3714_v17, %v7067_v45  ;;  %v8022_v58 = vmul.f32 %v3715_v26, %v7094_v53  ;;  %v6574_v45 = vld [vmem:[%s8291_s12 + $0x90] sm:$0xff]   ;;  %v6602_v17 = vld [vmem:[%s8291_s12 + $0x180] sm:$0xff]   ;;  %v6604_v24 = vld [vmem:[%s8291_s12 + $0x188] sm:$0xff]  }
 0x508   : > { %6192 = vmatprep.mubr.msk.bf16.mxu0 %vm6638_vm0, %v6637_v2  ;;  %6212 = vmatprep.mubr.msk.bf16.mxu1 %vm6638_vm0, %v6637_v2  ;;  %v4168_v46 = vpack.c.bf16 %v8009_v9, %v7990_v48  ;;  %v4279_v27 = vpack.c.bf16 %v8012_v56, %v7947_v21  ;;  %v6575_v53 = vld [vmem:[%s8291_s12 + $0xd0] sm:$0xff]   ;;  %v6605_v26 = vld [vmem:[%s8291_s12 + $0x1c8] sm:$0xff]   ;;  %v6609_v10 = vld [vmem:[%s8291_s12 + $0x1d8] sm:$0xff]  }
 0x509   : > { %v4390_v60 = vpack.c.bf16 %v8022_v58, %v8019_v57  ;;  %v6610_v37 = vld [vmem:[%s8291_s12 + $0x1a0] sm:$0xff]   ;;  %v6612_v41 = vld [vmem:[%s8291_s12 + $0x1a8] sm:$0xff]   ;;  %v6614_v43 = vld [vmem:[%s8291_s12 + $0x1b0] sm:$0xff]  }
 0x50a   : > { %6179 = vmatpush3.bf16.msra.mxu0 %v6572_v4  ;;  %6199 = vmatpush3.bf16.msra.mxu1 %v6573_v31  ;;  %v6613_v42 = vld [vmem:[%s8291_s12 + $0x1e8] sm:$0xff]   ;;  %v6615_v33 = vld [vmem:[%s8291_s12 + $0x1f0] sm:$0xff]   ;;  %v6616_v50 = vld [vmem:[%s8291_s12 + $0x1b8] sm:$0xff]  }
 0x50b   : > { %6180 = vmatprep.subr.bf16.mxu0 %v6637_v2  ;;  %6200 = vmatprep.subr.bf16.mxu1 %v6637_v2  ;;  %v6617_v55 = vld [vmem:[%s8291_s12 + $0x1f8] sm:$0xff]   ;;  %v6618_v44 = vld [vmem:[%s8291_s12 + $0x200] sm:$0xff]   ;;  %v6620_v48 = vld [vmem:[%s8291_s12 + $0x210] sm:$0xff]  }
 0x50c   : > { %v6621_v21 = vld [vmem:[%s8291_s12 + $0x218] sm:$0xff]   ;;  %v6622_v35 = vld [vmem:[%s8291_s12 + $0x220] sm:$0xff]   ;;  %v6623_v40 = vld [vmem:[%s8291_s12 + $0x228] sm:$0xff]  }
 0x50d   : > { %v6624_v4 = vld [vmem:[%s8291_s12 + $0x230] sm:$0xff]   ;;  %v6625_v31 = vld [vmem:[%s8291_s12 + $0x238] sm:$0xff]  }
 0x50e   : > { %6181 = vmatpush3.bf16.msra.mxu0 %v6574_v45  ;;  %6201 = vmatpush3.bf16.msra.mxu1 %v6575_v53 }
 0x50f   : > { %6182 = vmatprep.subr.bf16.mxu0 %v6637_v2  ;;  %6202 = vmatprep.subr.bf16.mxu1 %v6637_v2 }
 0x512   : > { %6183 = vmatpush3.bf16.msra.mxu0 %v6576_v61  ;;  %6203 = vmatpush3.bf16.msra.mxu1 %v6577_v62 }
 0x513   : > { %6184 = vmatprep.subr.bf16.mxu0 %v6637_v2  ;;  %6204 = vmatprep.subr.bf16.mxu1 %v6637_v2 }
 0x516   : > { %6185 = vmatpush3.bf16.msra.mxu0 %v6578_v34  ;;  %6205 = vmatpush3.bf16.msra.mxu1 %v6579_v38 }
 0x517   : > { %6186 = vmatprep.subr.bf16.mxu0 %v6637_v2  ;;  %6206 = vmatprep.subr.bf16.mxu1 %v6637_v2 }
 0x51a   : > { %6187 = vmatpush3.bf16.msra.mxu0 %v6580_v63  ;;  %6207 = vmatpush3.bf16.msra.mxu1 %v6581_v0 }
 0x51b   : > { %6188 = vmatprep.subr.bf16.mxu0 %v6637_v2  ;;  %6208 = vmatprep.subr.bf16.mxu1 %v6637_v2 }
 0x51e   : > { %6189 = vmatpush3.bf16.msra.mxu0 %v6582_v1  ;;  %6209 = vmatpush3.bf16.msra.mxu1 %v6583_v3 }
 0x51f   : > { %6190 = vmatprep.subr.bf16.mxu0 %v6637_v2  ;;  %6210 = vmatprep.subr.bf16.mxu1 %v6637_v2 }
 0x522   : > { %6191 = vmatpush3.bf16.msra.mxu0 %v6584_v18  ;;  %6211 = vmatpush3.bf16.msra.mxu1 %v6585_v39 }
 0x523   : > { %6216 = vmatprep.subr.bf16.mxu0 %v6637_v2  ;;  %6236 = vmatprep.subr.bf16.mxu1 %v6637_v2 }
 0x525   : > { %6193 = vmatmul.mubr.bf16.vlgmr.msra.gmra.mrb[56].mxu0 %v3718_v49  ;;  %6213 = vmatmul.mubr.bf16.vlgmr.msra.gmra.mrb[28].mxu1 %v3833_v30  ;;  %v6619_v49 = vld [vmem:[%s8291_s12 + $0x208] sm:$0xff]  }
 0x526   : > { %6217 = vmatpush3.bf16.msra.mxu0 %v6586_v54  ;;  %6237 = vmatpush3.bf16.msra.mxu1 %v6587_v25 }
 0x527   : > { %6218 = vmatprep.subr.bf16.mxu0 %v6637_v2  ;;  %6238 = vmatprep.subr.bf16.mxu1 %v6637_v2 }
 0x528   : > { %6232 = vmatprep.mubr.msk.bf16.mxu0 %vm6638_vm0, %v6637_v2  ;;  %6252 = vmatprep.mubr.msk.bf16.mxu1 %vm6638_vm0, %v6637_v2 }
 0x52a   : > { %6219 = vmatpush3.bf16.msra.mxu0 %v6588_v5  ;;  %6239 = vmatpush3.bf16.msra.mxu1 %v6589_v6 }
 0x52b   : > { %6220 = vmatprep.subr.bf16.mxu0 %v6637_v2  ;;  %6240 = vmatprep.subr.bf16.mxu1 %v6637_v2 }
 0x52e   : > { %6221 = vmatpush3.bf16.msra.mxu0 %v6590_v7  ;;  %6241 = vmatpush3.bf16.msra.mxu1 %v6591_v8 }
 0x52f   : > { %6222 = vmatprep.subr.bf16.mxu0 %v6637_v2  ;;  %6242 = vmatprep.subr.bf16.mxu1 %v6637_v2 }
 0x532   : > { %6223 = vmatpush3.bf16.msra.mxu0 %v6592_v11  ;;  %6243 = vmatpush3.bf16.msra.mxu1 %v6593_v12 }
 0x533   : > { %6224 = vmatprep.subr.bf16.mxu0 %v6637_v2  ;;  %6244 = vmatprep.subr.bf16.mxu1 %v6637_v2 }
 0x536   : > { %6225 = vmatpush3.bf16.msra.mxu0 %v6594_v15  ;;  %6245 = vmatpush3.bf16.msra.mxu1 %v6595_v19 }
 0x537   : > { %6226 = vmatprep.subr.bf16.mxu0 %v6637_v2  ;;  %6246 = vmatprep.subr.bf16.mxu1 %v6637_v2 }
 0x53a   : > { %6227 = vmatpush3.bf16.msra.mxu0 %v6596_v22  ;;  %6247 = vmatpush3.bf16.msra.mxu1 %v6597_v23 }
 0x53b   : > { %6228 = vmatprep.subr.bf16.mxu0 %v6637_v2  ;;  %6248 = vmatprep.subr.bf16.mxu1 %v6637_v2 }
 0x53e   : > { %6229 = vmatpush3.bf16.msra.mxu0 %v6598_v28  ;;  %6249 = vmatpush3.bf16.msra.mxu1 %v6599_v29 }
 0x53f   : > { %6230 = vmatprep.subr.bf16.mxu0 %v6637_v2  ;;  %6250 = vmatprep.subr.bf16.mxu1 %v6637_v2 }
 0x542   : > { %6231 = vmatpush3.bf16.msra.mxu0 %v6600_v52  ;;  %6251 = vmatpush3.bf16.msra.mxu1 %v6601_v47 }
 0x543   : > { %6256 = vmatprep.subr.bf16.mxu0 %v6637_v2  ;;  %6276 = vmatprep.subr.bf16.mxu1 %v6637_v2 }
 0x545   : > { %6233 = vmatmul.mubr.bf16.vlgmr.msra.gmra.mrb[60].mxu0 %v3942_v13  ;;  %6253 = vmatmul.mubr.bf16.vlgmr.msra.gmra.mrb[32].mxu1 %v4057_v14  ;;  %v6608_v13 = vld [vmem:[%s8291_s12 + $0x198] sm:$0xff]  }
 0x546   : > { %6257 = vmatpush3.bf16.msra.mxu0 %v6602_v17  ;;  %6277 = vmatpush3.bf16.msra.mxu1 %v6603_v59 }
 0x547   : > { %6258 = vmatprep.subr.bf16.mxu0 %v6637_v2  ;;  %6278 = vmatprep.subr.bf16.mxu1 %v6637_v2 }
 0x548   : > { %6272 = vmatprep.mubr.msk.bf16.mxu0 %vm6638_vm0, %v6637_v2  ;;  %6292 = vmatprep.mubr.msk.bf16.mxu1 %vm6638_vm0, %v6637_v2 }
 0x54a   : > { %6259 = vmatpush3.bf16.msra.mxu0 %v6604_v24  ;;  %6279 = vmatpush3.bf16.msra.mxu1 %v6605_v26 }
 0x54b   : > { %6260 = vmatprep.subr.bf16.mxu0 %v6637_v2  ;;  %6280 = vmatprep.subr.bf16.mxu1 %v6637_v2 }
 0x54e   : > { %6261 = vmatpush3.bf16.msra.mxu0 %v6606_v36  ;;  %6281 = vmatpush3.bf16.msra.mxu1 %v6607_v51 }
 0x54f   : > { %6262 = vmatprep.subr.bf16.mxu0 %v6637_v2  ;;  %6282 = vmatprep.subr.bf16.mxu1 %v6637_v2 }
 0x552   : > { %6263 = vmatpush3.bf16.msra.mxu0 %v6608_v13  ;;  %6283 = vmatpush3.bf16.msra.mxu1 %v6609_v10 }
 0x553   : > { %6264 = vmatprep.subr.bf16.mxu0 %v6637_v2  ;;  %6284 = vmatprep.subr.bf16.mxu1 %v6637_v2 }
 0x556   : > { %6265 = vmatpush3.bf16.msra.mxu0 %v6610_v37  ;;  %6285 = vmatpush3.bf16.msra.mxu1 %v6611_v32  ;;  %v5351_v32 = vld [vmem:[%s8292_s13] ss:$0 sm:$0xff] }
 0x557   : > { %6266 = vmatprep.subr.bf16.mxu0 %v6637_v2  ;;  %6286 = vmatprep.subr.bf16.mxu1 %v6637_v2 }
 0x55a   : > { %6267 = vmatpush3.bf16.msra.mxu0 %v6612_v41  ;;  %6287 = vmatpush3.bf16.msra.mxu1 %v6613_v42 }
 0x55b   : > { %6268 = vmatprep.subr.bf16.mxu0 %v6637_v2  ;;  %6288 = vmatprep.subr.bf16.mxu1 %v6637_v2 }
 0x55e   : > { %6269 = vmatpush3.bf16.msra.mxu0 %v6614_v43  ;;  %6289 = vmatpush3.bf16.msra.mxu1 %v6615_v33 }
 0x55f   : > { %6270 = vmatprep.subr.bf16.mxu0 %v6637_v2  ;;  %6290 = vmatprep.subr.bf16.mxu1 %v6637_v2 }
 0x562   : > { %6271 = vmatpush3.bf16.msra.mxu0 %v6616_v50  ;;  %6291 = vmatpush3.bf16.msra.mxu1 %v6617_v55 }
 0x563   : > { %6296 = vmatprep.subr.bf16.mxu0 %v6637_v2 }
 0x565   : > { %6273 = vmatmul.mubr.bf16.vlgmr.msra.gmra.mrb[64].mxu0 %v4168_v46  ;;  %6293 = vmatmul.mubr.bf16.vlgmr.msra.gmra.mrb[36].mxu1 %v4279_v27 }
 0x566   : > { %6297 = vmatpush3.bf16.msra.mxu0 %v6618_v44  ;;  %6312 = vmatprep.mubr.msk.bf16.mxu0 %vm6638_vm0, %v6637_v2 }
 0x567   : > { %6298 = vmatprep.subr.bf16.mxu0 %v6637_v2 }
 0x56a   : > { %6299 = vmatpush3.bf16.msra.mxu0 %v6619_v49 }
 0x56b   : > { %6300 = vmatprep.subr.bf16.mxu0 %v6637_v2 }
 0x56e   : > { %6301 = vmatpush3.bf16.msra.mxu0 %v6620_v48 }
 0x56f   : > { %6302 = vmatprep.subr.bf16.mxu0 %v6637_v2 }
 0x572   : > { %6303 = vmatpush3.bf16.msra.mxu0 %v6621_v21 }
 0x573   : > { %6304 = vmatprep.subr.bf16.mxu0 %v6637_v2 }
 0x576   : > { %6305 = vmatpush3.bf16.msra.mxu0 %v6622_v35 }
 0x577   : > { %6306 = vmatprep.subr.bf16.mxu0 %v6637_v2 }
 0x57a   : > { %6307 = vmatpush3.bf16.msra.mxu0 %v6623_v40 }
 0x57b   : > { %6308 = vmatprep.subr.bf16.mxu0 %v6637_v2 }
 0x57e   : > { %6309 = vmatpush3.bf16.msra.mxu0 %v6624_v4 }
 0x57f   : > { %6310 = vmatprep.subr.bf16.mxu0 %v6637_v2 }
 0x582   : > { %6311 = vmatpush3.bf16.msra.mxu0 %v6625_v31 }
 0x585   : > { %6313 = vmatmul.mubr.bf16.vlgmr.msra.gmra.mrb[68].mxu0 %v4390_v60 }
 0x5d8   : > { %v3616_v30 = vpop.f32.mrb[52].mxu0  ;;  %v3705_v9 = vpop.f32.mrb[24].mxu1 }
 0x5d9   : > { %v3706_v56 = vadd.f32 %v3705_v9, %v3616_v30  ;;  %v6154_v14 = vpop.f32.mrb[53].mxu0  ;;  %v6174_v46 = vpop.f32.mrb[25].mxu1 }
 0x5da   : > { %v3619_v27 = vpop.f32.mrb[54].mxu0  ;;  %v3708_v45 = vpop.f32.mrb[26].mxu1 }
 0x5db   : > { %v3709_v53 = vadd.f32 %v3708_v45, %v3619_v27  ;;  %v6155_v61 = vpop.f32.mrb[55].mxu0  ;;  %v6175_v62 = vpop.f32.mrb[27].mxu1 }
 0x5f8   : > { %v3818_v34 = vpop.f32.mrb[56].mxu0  ;;  %v3933_v38 = vpop.f32.mrb[28].mxu1 }
 0x5f9   : > { %v3825_v63 = vadd.f32 %v3818_v34, %v3706_v56  ;;  %v6194_v0 = vpop.f32.mrb[57].mxu0  ;;  %v6214_v2 = vpop.f32.mrb[29].mxu1 }
 0x5fa   : > { %v3821_v1 = vpop.f32.mrb[58].mxu0  ;;  %v3936_v3 = vpop.f32.mrb[30].mxu1 }
 0x5fb   : > { %v3940_v18 = vadd.f32 %v3933_v38, %v3825_v63  ;;  %v3826_v57 = vadd.f32 %v3821_v1, %v3709_v53  ;;  %v6195_v58 = vpop.f32.mrb[59].mxu0  ;;  %v6215_v60 = vpop.f32.mrb[31].mxu1 }
 0x5fd   : > { %v3941_v39 = vadd.f32 %v3936_v3, %v3826_v57 }
 0x618   : > { %v4042_v54 = vpop.f32.mrb[60].mxu0  ;;  %v4157_v25 = vpop.f32.mrb[32].mxu1 }
 0x619   : > { %v4049_v5 = vadd.f32 %v4042_v54, %v3940_v18  ;;  %v6234_v6 = vpop.f32.mrb[61].mxu0  ;;  %v6254_v7 = vpop.f32.mrb[33].mxu1 }
 0x61a   : > { %v4045_v8 = vpop.f32.mrb[62].mxu0  ;;  %v4160_v11 = vpop.f32.mrb[34].mxu1 }
 0x61b   : > { %v4164_v12 = vadd.f32 %v4157_v25, %v4049_v5  ;;  %v4050_v15 = vadd.f32 %v4045_v8, %v3941_v39  ;;  %v6235_v19 = vpop.f32.mrb[63].mxu0  ;;  %v6255_v22 = vpop.f32.mrb[35].mxu1 }
 0x61d   : > { %v4165_v23 = vadd.f32 %v4160_v11, %v4050_v15 }
 0x638   : > { %v4268_v28 = vpop.f32.mrb[64].mxu0  ;;  %v4379_v29 = vpop.f32.mrb[36].mxu1 }
 0x639   : > { %v4275_v52 = vadd.f32 %v4268_v28, %v4164_v12  ;;  %v6274_v47 = vpop.f32.mrb[65].mxu0  ;;  %v6294_v17 = vpop.f32.mrb[37].mxu1 }
 0x63a   : > { %v4271_v59 = vpop.f32.mrb[66].mxu0  ;;  %v4382_v24 = vpop.f32.mrb[38].mxu1 }
 0x63b   : > { %v4386_v26 = vadd.f32 %v4379_v29, %v4275_v52  ;;  %v4276_v36 = vadd.f32 %v4271_v59, %v4165_v23  ;;  %v6275_v51 = vpop.f32.mrb[67].mxu0  ;;  %v6295_v13 = vpop.f32.mrb[39].mxu1 }
 0x63d   : > { %v4387_v10 = vadd.f32 %v4382_v24, %v4276_v36 }
 0x658   : > { %v4490_v37 = vpop.f32.mrb[68].mxu0 }
 0x659   : > { %v4497_v41 = vadd.f32 %v4490_v37, %v4386_v26  ;;  %v6314_v42 = vpop.f32.mrb[69].mxu0 }
 0x65a   : > { %v4493_v43 = vpop.f32.mrb[70].mxu0 }
 0x65b   : > { %v4506_v33 = vadd.f32 %v5351_v32, %v4497_v41  ;;  %v4498_v50 = vadd.f32 %v4493_v43, %v4387_v10  ;;  %v6315_v55 = vpop.f32.mrb[71].mxu0 }
 0x65d   : > { %v4508_v44 = vadd.f32 %v4506_v33, %v7506_v16  ;;  %v4507_v49 = vadd.f32 %v5351_v32, %v4498_v50 }
 0x65f   : > { %v4509_v48 = vadd.f32 %v4507_v49, %v7508_v20  ;;  %v4510_v21 = vmax.f32 %v4508_v44, 0.0 }
 0x661   : > { %v4511_v35 = vmax.f32 %v4509_v48, 0.0 }
 0x663   : > { %v5361_v40 = vpack.c.bf16 %v4511_v35, %v4510_v21 }
 0x665   : > { %5362 = vst [vmem:[%s535_s23] sm:$0xff] %v5361_v40  }
 0x666 PF: > { %s24_s29 = sadd.s32 1, %s6635_s29  }
 0x667   : > { %p21_p4 = scmp.ge.s32.totalorder %s24_s29, 4  }
 0x669   :  { %23 = sbr.rel (!%p21_p4) target bundleno = 1 (0x1), region = 147 }

</bundles_post_ra>
